<compile_context>
chip_gen: v7x
topology: tpu7x:2x2x1
jax: 0.10.0
libtpu: 0.0.40
codegen_flags: <defaults>
</compile_context>

<pallas_src>
import functools

import jax
import jax.numpy as jnp
from jax.experimental import pallas as pl


# ----------------------------------------------------------------------------
# Pallas kernels
# ----------------------------------------------------------------------------
def _matmul_bias_act_kernel(x_ref, w_ref, b_ref, o_ref, *, act):
    # bf16 x bf16 matmul on the MXU, f32 accumulation, f32 epilogue.
    acc = jnp.dot(x_ref[...], w_ref[...], preferred_element_type=jnp.float32)
    acc = acc + b_ref[...]
    if act == "relu":
        acc = jnp.maximum(acc, 0.0)
    elif act == "sigmoid":
        acc = jax.nn.sigmoid(acc)          # exp + recip go to the EUP slot
    o_ref[...] = acc.astype(o_ref.dtype)


def _bottleneck_kernel(flat_ref, we_ref, be_ref, wmv_ref, bmv_ref, eps_ref,
                       wd_ref, bd_ref, w1_ref, b1_ref,
                       mu_ref, lv_ref, d1_ref, *, latent):
    # enc4: 4x4 valid conv on a 4x4 input == dense layer over the flattened
    # (kh, kw, ci) window (weight layout pre-transposed at init).
    feat = jnp.dot(flat_ref[...], we_ref[...],
                   preferred_element_type=jnp.float32) + be_ref[...]
    # mu / logvar via one matmul against the lane-dense [W_mu | W_logvar].
    h = jnp.dot(feat.astype(jnp.bfloat16), wmv_ref[...],
                preferred_element_type=jnp.float32) + bmv_ref[...]
    mu = h[:, :latent]
    logvar = h[:, latent:]
    # z = exp(logvar) * eps + mu   (matches the PyTorch forward exactly)
    z = jnp.exp(logvar) * eps_ref[...] + mu
    zd = jnp.dot(z.astype(jnp.bfloat16), wd_ref[...],
                 preferred_element_type=jnp.float32) + bd_ref[...]
    # dec1: ConvTranspose2d(latent, 256, k=4, s=1, p=0) on a 1x1 input is a
    # dense layer producing the (kh, kw, cout) == (4,4,256) slab; fused ReLU.
    d1 = jnp.dot(zd.astype(jnp.bfloat16), w1_ref[...],
                 preferred_element_type=jnp.float32) + b1_ref[...]
    d1 = jnp.maximum(d1, 0.0)
    mu_ref[...] = mu
    lv_ref[...] = logvar
    d1_ref[...] = d1.astype(d1_ref.dtype)


def _final_convT_kernel(w_ref, colsT_ref, b_ref, o_ref):
    # (1, K) @ (K, M): the single output channel lands lane-dense along M,
    # so the store is unmasked vst instead of per-row masked stores.
    acc = jnp.dot(w_ref[...], colsT_ref[...],
                  preferred_element_type=jnp.float32)
    o_ref[...] = jax.nn.sigmoid(acc + b_ref[...])


# ----------------------------------------------------------------------------
# Pallas wrappers (grid-less: every layer fits in VMEM as a single block)
# ----------------------------------------------------------------------------
def _full_spec(shape):
    return pl.BlockSpec(shape, lambda: (0,) * len(shape))


def matmul_bias_act(x, w, b, act="none", out_dtype=jnp.bfloat16):
    """(M,K) @ (K,N) + b with fused activation; full-array blocks, no grid."""
    if x.dtype != jnp.bfloat16:
        x = x.astype(jnp.bfloat16)
    M, K = x.shape
    Kw, N = w.shape
    assert K == Kw
    return pl.pallas_call(
        functools.partial(_matmul_bias_act_kernel, act=act),
        out_shape=jax.ShapeDtypeStruct((M, N), out_dtype),
        in_specs=[_full_spec((M, K)), _full_spec((K, N)), _full_spec((1, N))],
        out_specs=_full_spec((M, N)),
    )(x, w, b)


def bottleneck(flat, eps, params, latent):
    """Fused enc4 + mu/logvar + reparameterization + linear_dec + dec1(+ReLU)."""
    B, D = flat.shape
    we, be = params["enc4"]
    wmv, bmv = params["mu_logvar"]
    wd, bd = params["dec_lin"]
    w1, b1 = params["dec1"]
    n1 = w1.shape[1]                       # 4*4*256
    mu, logvar, d1 = pl.pallas_call(
        functools.partial(_bottleneck_kernel, latent=latent),
        out_shape=(
            jax.ShapeDtypeStruct((B, latent), jnp.float32),    # mu
            jax.ShapeDtypeStruct((B, latent), jnp.float32),    # logvar
            jax.ShapeDtypeStruct((B, n1), jnp.bfloat16),       # relu(dec1(z))
        ),
        in_specs=[
            _full_spec((B, D)), _full_spec(we.shape), _full_spec(be.shape),
            _full_spec(wmv.shape), _full_spec(bmv.shape),
            _full_spec((B, latent)),
            _full_spec(wd.shape), _full_spec(bd.shape),
            _full_spec(w1.shape), _full_spec(b1.shape),
        ],
        out_specs=(
            _full_spec((B, latent)), _full_spec((B, latent)),
            _full_spec((B, n1)),
        ),
    )(flat.astype(jnp.bfloat16), we, be, wmv, bmv,
      eps.astype(jnp.float32), wd, bd, w1, b1)
    return mu, logvar, d1


# ----------------------------------------------------------------------------
# Conv / ConvTranspose glue (NHWC patches in XLA, matmul in Pallas)
# ----------------------------------------------------------------------------
def _patches_matmul(x_nhwc, w_mat, b_row, *, k, strides, padding, lhs_dilation,
                    act, out_dtype):
    # Patch feature ordering is (c, kh, kw) — matches w.reshape(Cout, Cin*k*k).
    cols = jax.lax.conv_general_dilated_patches(
        x_nhwc,
        filter_shape=(k, k),
        window_strides=strides,
        padding=padding,
        lhs_dilation=lhs_dilation,
        dimension_numbers=("NHWC", "HWIO", "NHWC"),
    )
    B, Ho, Wo, Kc = cols.shape
    out = matmul_bias_act(cols.reshape(B * Ho * Wo, Kc), w_mat, b_row,
                          act=act, out_dtype=out_dtype)
    return out.reshape(B, Ho, Wo, -1)


def conv2d(x_nhwc, layer, *, k, stride, pad, act, out_dtype=jnp.bfloat16):
    """PyTorch Conv2d semantics on NHWC activations."""
    w_mat, b_row = layer
    return _patches_matmul(
        x_nhwc, w_mat, b_row, k=k, strides=(stride, stride),
        padding=((pad, pad), (pad, pad)), lhs_dilation=(1, 1),
        act=act, out_dtype=out_dtype)


def conv_transpose2d(x_nhwc, layer, *, k, stride, pad, opad, act,
                     out_dtype=jnp.bfloat16):
    """PyTorch ConvTranspose2d as input-dilated conv with a flipped kernel
    (flip/transpose already baked into the weight matrix at init)."""
    w_mat, b_row = layer
    lo = k - 1 - pad
    hi = k - 1 - pad + opad
    return _patches_matmul(
        x_nhwc, w_mat, b_row, k=k, strides=(1, 1),
        padding=((lo, hi), (lo, hi)), lhs_dilation=(stride, stride),
        act=act, out_dtype=out_dtype)


def final_conv_transpose(x_nhwc, layer):
    """Last ConvTranspose2d(64 -> 1, k=3, s=2, p=1, op=1) + Sigmoid, computed
    transposed so the 1-channel output is stored lane-dense."""
    w_row, b_sc = layer                                    # (1, K) bf16, (1, 1) f32
    cols = jax.lax.conv_general_dilated_patches(
        x_nhwc, filter_shape=(3, 3), window_strides=(1, 1),
        padding=((1, 2), (1, 2)), lhs_dilation=(2, 2),
        dimension_numbers=("NHWC", "HWIO", "NHWC"))
    B, Ho, Wo, K = cols.shape
    M = B * Ho * Wo
    colsT = cols.reshape(M, K).T                           # (K, M) — tiny XLA transpose
    out = pl.pallas_call(
        _final_convT_kernel,
        out_shape=jax.ShapeDtypeStruct((1, M), jnp.float32),
        in_specs=[_full_spec(w_row.shape), _full_spec((K, M)),
                  _full_spec(b_sc.shape)],
        out_specs=_full_spec((1, M)),
    )(w_row, colsT, b_sc)
    return out.reshape(B, 1, Ho, Wo)                       # already NCHW (C == 1)


# ----------------------------------------------------------------------------
# Parameters (PyTorch-like uniform(+-1/sqrt(fan)); matmul layouts precomputed)
# ----------------------------------------------------------------------------
def _uinit(key, shape, fan_in):
    bound = float(fan_in) ** -0.5
    return jax.random.uniform(key, shape, jnp.float32, -bound, bound)


def init_params(key, latent_dim):
    keys = iter(jax.random.split(key, 22))

    def conv_p(cin, cout, k):
        fan = cin * k * k
        w = _uinit(next(keys), (cout, cin, k, k), fan)
        b = _uinit(next(keys), (cout,), fan)
        # patch feature ordering (ci, kh, kw)
        w_mat = w.reshape(cout, cin * k * k).T.astype(jnp.bfloat16)       # (K, N)
        return w_mat, b.reshape(1, cout).astype(jnp.float32)

    def conv_hwcn_p(cin, cout, k):
        # enc4 consumed as a dense layer on a flattened NHWC window -> (kh,kw,ci)
        fan = cin * k * k
        w = _uinit(next(keys), (cout, cin, k, k), fan)
        b = _uinit(next(keys), (cout,), fan)
        w_mat = (w.transpose(2, 3, 1, 0)
                  .reshape(k * k * cin, cout).astype(jnp.bfloat16))       # (K, N)
        return w_mat, b.reshape(1, cout).astype(jnp.float32)

    def convT_p(cin, cout, k):
        fan = cout * k * k
        w = _uinit(next(keys), (cin, cout, k, k), fan)
        b = _uinit(next(keys), (cout,), fan)
        # flipped kernel + swapped channel axes -> equivalent stride-1 conv
        w_eq = jnp.flip(w, axis=(2, 3)).transpose(1, 0, 2, 3)             # (Cout,Cin,k,k)
        w_mat = w_eq.reshape(cout, cin * k * k).T.astype(jnp.bfloat16)    # (K, N)
        return w_mat, b.reshape(1, cout).astype(jnp.float32)

    def convT_1x1_p(cin, cout, k):
        # dec1 on a 1x1 input == dense layer producing the (kh, kw, cout) slab
        fan = cout * k * k
        w = _uinit(next(keys), (cin, cout, k, k), fan)
        b = _uinit(next(keys), (cout,), fan)
        w_mat = (w.transpose(0, 2, 3, 1)
                  .reshape(cin, k * k * cout).astype(jnp.bfloat16))       # (cin, k*k*cout)
        b_row = jnp.tile(b, k * k).reshape(1, k * k * cout).astype(jnp.float32)
        return w_mat, b_row

    def convT_rowvec_p(cin, cout, k):
        # dec4 (cout == 1): keep the weight as a (1, K) row so the kernel can
        # compute (1,K)@(K,M) and store a lane-dense (1, M) output.
        assert cout == 1
        fan = cout * k * k
        w = _uinit(next(keys), (cin, cout, k, k), fan)
        b = _uinit(next(keys), (cout,), fan)
        w_eq = jnp.flip(w, axis=(2, 3)).transpose(1, 0, 2, 3)             # (1,Cin,k,k)
        w_row = w_eq.reshape(1, cin * k * k).astype(jnp.bfloat16)         # (1, K)
        return w_row, b.reshape(1, 1).astype(jnp.float32)

    def lin_p(fin, fout):
        w = _uinit(next(keys), (fin, fout), fin)   # stored (in, out)
        b = _uinit(next(keys), (fout,), fin)
        return w, b

    w_mu, b_mu = lin_p(64, latent_dim)
    w_lv, b_lv = lin_p(64, latent_dim)
    w_dec, b_dec = lin_p(latent_dim, 64)

    return {
        "enc1": conv_p(1, 64, 3),
        "enc2": conv_p(64, 128, 3),
        "enc3": conv_p(128, 256, 3),
        "enc4": conv_hwcn_p(256, latent_dim, 4),
        "dec1": convT_1x1_p(latent_dim, 256, 4),
        "dec2": convT_p(256, 128, 3),
        "dec3": convT_p(128, 64, 3),
        "dec4": convT_rowvec_p(64, 1, 3),
        # fused latent head: [W_mu | W_logvar] -> one lane-dense (64, 2L) matmul
        "mu_logvar": (
            jnp.concatenate([w_mu, w_lv], axis=1).astype(jnp.bfloat16),
            jnp.concatenate([b_mu, b_lv], axis=0).reshape(1, 2 * latent_dim)
               .astype(jnp.float32),
        ),
        "dec_lin": (w_dec.astype(jnp.bfloat16),
                    b_dec.reshape(1, 64).astype(jnp.float32)),
    }


# ----------------------------------------------------------------------------
# Forward pass (mirrors VariationalAutoencoderCNN.forward)
# ----------------------------------------------------------------------------
def vae_forward(params, x, eps):
    B = x.shape[0]
    latent = eps.shape[1]

    # NCHW -> NHWC once; bf16 activations end-to-end.
    h = jnp.transpose(x, (0, 2, 3, 1)).astype(jnp.bfloat16)             # (B,28,28,1)

    # encoder (first three convs)
    h = conv2d(h, params["enc1"], k=3, stride=2, pad=1, act="relu")     # (B,14,14,64)
    h = conv2d(h, params["enc2"], k=3, stride=2, pad=1, act="relu")     # (B,7,7,128)
    h = conv2d(h, params["enc3"], k=3, stride=2, pad=1, act="relu")     # (B,4,4,256)

    # fused bottleneck: enc4, mu, logvar, z = exp(logvar)*eps + mu,
    # linear_dec, dec1 (+ReLU) — one pallas_call.
    flat = h.reshape(B, -1)                                             # (B, 4*4*256)
    mu, logvar, d1 = bottleneck(flat, eps, params, latent)

    # decoder (NHWC)
    h = d1.reshape(B, 4, 4, 256)                                        # relu(dec1(z))
    h = conv_transpose2d(h, params["dec2"], k=3, stride=2, pad=1, opad=0,
                         act="relu")                                    # (B,7,7,128)
    h = conv_transpose2d(h, params["dec3"], k=3, stride=2, pad=1, opad=1,
                         act="relu")                                    # (B,14,14,64)
    x_hat = final_conv_transpose(h, params["dec4"])                     # (B,1,28,28) f32
    return x_hat, mu, logvar


# ----------------------------------------------------------------------------
if __name__ == "__main__":
    latent_dim = 64  # forward requires encoder flat dim (= latent_dim) == 64 for linear_mu
    assert latent_dim == 64

    key = jax.random.PRNGKey(0)
    k_params, k_x, k_eps = jax.random.split(key, 3)

    params = init_params(k_params, latent_dim)
    x = jax.random.uniform(k_x, (2, 1, 28, 28), jnp.float32)
    # eps ~ torch.rand_like(mu) -> uniform [0, 1)
    eps = jax.random.uniform(k_eps, (2, latent_dim), jnp.float32)

    fwd = jax.jit(vae_forward)
    x_hat, mu, logvar = fwd(params, x, eps)
    jax.block_until_ready((x_hat, mu, logvar))

    assert x_hat.shape == (2, 1, 28, 28)
    assert mu.shape == (2, latent_dim)
    assert logvar.shape == (2, latent_dim)
    assert bool(jnp.all(jnp.isfinite(x_hat)))
    assert bool(jnp.all((x_hat >= 0.0) & (x_hat <= 1.0)))
    assert bool(jnp.all(jnp.isfinite(mu))) and bool(jnp.all(jnp.isfinite(logvar)))
    print("KERNEL_OK")
</pallas_src>

<mosaic_0001>
module attributes {stable_mosaic.version = 11 : i64} {
  func.func @_matmul_bias_act_kernel(%arg0: memref<392x9xbf16, #tpu.memory_space<vmem>>, %arg1: memref<9x64xbf16, #tpu.memory_space<vmem>>, %arg2: memref<1x64xf32, #tpu.memory_space<vmem>>, %arg3: memref<392x64xbf16, #tpu.memory_space<vmem>>) attributes {dimension_semantics = [], scalar_prefetch = 0 : i64, scratch_operands = 0 : i64, tpu.core_type = #tpu.core_type<tc>} {
    %c0 = arith.constant 0 : index
    %c0_0 = arith.constant 0 : index
    %0 = vector.load %arg0[%c0, %c0_0] : memref<392x9xbf16, #tpu.memory_space<vmem>>, vector<392x9xbf16>
    %c0_1 = arith.constant 0 : index
    %c0_2 = arith.constant 0 : index
    %1 = vector.load %arg1[%c0_1, %c0_2] : memref<9x64xbf16, #tpu.memory_space<vmem>>, vector<9x64xbf16>
    %cst = arith.constant dense<0.000000e+00> : vector<392x64xf32>
    %2 = tpu.matmul %0, %1, %cst {dimension_numbers = #tpu.dot_dimension_numbers<[1], [0], [0], [1], [0, 0, 1, 1], [], []>} : vector<392x9xbf16>, vector<9x64xbf16>, vector<392x64xf32> -> vector<392x64xf32>
    %c0_3 = arith.constant 0 : index
    %c0_4 = arith.constant 0 : index
    %3 = vector.load %arg2[%c0_3, %c0_4] : memref<1x64xf32, #tpu.memory_space<vmem>>, vector<1x64xf32>
    %4 = vector.broadcast %3 : vector<1x64xf32> to vector<392x64xf32>
    %5 = arith.addf %2, %4 : vector<392x64xf32>
    %cst_5 = arith.constant 0.000000e+00 : f32
    %6 = vector.broadcast %cst_5 : f32 to vector<392x64xf32>
    %7 = arith.maximumf %5, %6 : vector<392x64xf32>
    %8 = arith.truncf %7 : vector<392x64xf32> to vector<392x64xbf16>
    %c0_6 = arith.constant 0 : index
    %c0_7 = arith.constant 0 : index
    %9 = vector.load %arg3[%c0_6, %c0_7] : memref<392x64xbf16, #tpu.memory_space<vmem>>, vector<392x64xbf16>
    tpu.vector_store %arg3[%c0_6, %c0_7], %8 {strides = array<i32>} : memref<392x64xbf16, #tpu.memory_space<vmem>>, vector<392x64xbf16>,
    return
  }
}

module attributes {stable_mosaic.version = 11 : i64} {
  func.func @_matmul_bias_act_kernel(%arg0: memref<98x576xbf16, #tpu.memory_space<vmem>>, %arg1: memref<576x128xbf16, #tpu.memory_space<vmem>>, %arg2: memref<1x128xf32, #tpu.memory_space<vmem>>, %arg3: memref<98x128xbf16, #tpu.memory_space<vmem>>) attributes {dimension_semantics = [], scalar_prefetch = 0 : i64, scratch_operands = 0 : i64, tpu.core_type = #tpu.core_type<tc>} {
    %c0 = arith.constant 0 : index
    %c0_0 = arith.constant 0 : index
    %0 = vector.load %arg0[%c0, %c0_0] : memref<98x576xbf16, #tpu.memory_space<vmem>>, vector<98x576xbf16>
    %c0_1 = arith.constant 0 : index
    %c0_2 = arith.constant 0 : index
    %1 = vector.load %arg1[%c0_1, %c0_2] : memref<576x128xbf16, #tpu.memory_space<vmem>>, vector<576x128xbf16>
    %cst = arith.constant dense<0.000000e+00> : vector<98x128xf32>
    %2 = tpu.matmul %0, %1, %cst {dimension_numbers = #tpu.dot_dimension_numbers<[1], [0], [0], [1], [0, 0, 1, 1], [], []>} : vector<98x576xbf16>, vector<576x128xbf16>, vector<98x128xf32> -> vector<98x128xf32>
    %c0_3 = arith.constant 0 : index
    %c0_4 = arith.constant 0 : index
    %3 = vector.load %arg2[%c0_3, %c0_4] : memref<1x128xf32, #tpu.memory_space<vmem>>, vector<1x128xf32>
    %4 = vector.broadcast %3 : vector<1x128xf32> to vector<98x128xf32>
    %5 = arith.addf %2, %4 : vector<98x128xf32>
    %cst_5 = arith.constant 0.000000e+00 : f32
    %6 = vector.broadcast %cst_5 : f32 to vector<98x128xf32>
    %7 = arith.maximumf %5, %6 : vector<98x128xf32>
    %8 = arith.truncf %7 : vector<98x128xf32> to vector<98x128xbf16>
    %c0_6 = arith.constant 0 : index
    %c0_7 = arith.constant 0 : index
    %9 = vector.load %arg3[%c0_6, %c0_7] : memref<98x128xbf16, #tpu.memory_space<vmem>>, vector<98x128xbf16>
    tpu.vector_store %arg3[%c0_6, %c0_7], %8 {strides = array<i32>} : memref<98x128xbf16, #tpu.memory_space<vmem>>, vector<98x128xbf16>,
    return
  }
}

module attributes {stable_mosaic.version = 11 : i64} {
  func.func @_matmul_bias_act_kernel(%arg0: memref<32x1152xbf16, #tpu.memory_space<vmem>>, %arg1: memref<1152x256xbf16, #tpu.memory_space<vmem>>, %arg2: memref<1x256xf32, #tpu.memory_space<vmem>>, %arg3: memref<32x256xbf16, #tpu.memory_space<vmem>>) attributes {dimension_semantics = [], scalar_prefetch = 0 : i64, scratch_operands = 0 : i64, tpu.core_type = #tpu.core_type<tc>} {
    %c0 = arith.constant 0 : index
    %c0_0 = arith.constant 0 : index
    %0 = vector.load %arg0[%c0, %c0_0] : memref<32x1152xbf16, #tpu.memory_space<vmem>>, vector<32x1152xbf16>
    %c0_1 = arith.constant 0 : index
    %c0_2 = arith.constant 0 : index
    %1 = vector.load %arg1[%c0_1, %c0_2] : memref<1152x256xbf16, #tpu.memory_space<vmem>>, vector<1152x256xbf16>
    %cst = arith.constant dense<0.000000e+00> : vector<32x256xf32>
    %2 = tpu.matmul %0, %1, %cst {dimension_numbers = #tpu.dot_dimension_numbers<[1], [0], [0], [1], [0, 0, 1, 1], [], []>} : vector<32x1152xbf16>, vector<1152x256xbf16>, vector<32x256xf32> -> vector<32x256xf32>
    %c0_3 = arith.constant 0 : index
    %c0_4 = arith.constant 0 : index
    %3 = vector.load %arg2[%c0_3, %c0_4] : memref<1x256xf32, #tpu.memory_space<vmem>>, vector<1x256xf32>
    %4 = vector.broadcast %3 : vector<1x256xf32> to vector<32x256xf32>
    %5 = arith.addf %2, %4 : vector<32x256xf32>
    %cst_5 = arith.constant 0.000000e+00 : f32
    %6 = vector.broadcast %cst_5 : f32 to vector<32x256xf32>
    %7 = arith.maximumf %5, %6 : vector<32x256xf32>
    %8 = arith.truncf %7 : vector<32x256xf32> to vector<32x256xbf16>
    %c0_6 = arith.constant 0 : index
    %c0_7 = arith.constant 0 : index
    %9 = vector.load %arg3[%c0_6, %c0_7] : memref<32x256xbf16, #tpu.memory_space<vmem>>, vector<32x256xbf16>
    tpu.vector_store %arg3[%c0_6, %c0_7], %8 {strides = array<i32>} : memref<32x256xbf16, #tpu.memory_space<vmem>>, vector<32x256xbf16>,
    return
  }
}

module attributes {stable_mosaic.version = 11 : i64} {
  func.func @_bottleneck_kernel(%arg0: memref<2x4096xbf16, #tpu.memory_space<vmem>>, %arg1: memref<4096x64xbf16, #tpu.memory_space<vmem>>, %arg2: memref<1x64xf32, #tpu.memory_space<vmem>>, %arg3: memref<64x128xbf16, #tpu.memory_space<vmem>>, %arg4: memref<1x128xf32, #tpu.memory_space<vmem>>, %arg5: memref<2x64xf32, #tpu.memory_space<vmem>>, %arg6: memref<64x64xbf16, #tpu.memory_space<vmem>>, %arg7: memref<1x64xf32, #tpu.memory_space<vmem>>, %arg8: memref<64x4096xbf16, #tpu.memory_space<vmem>>, %arg9: memref<1x4096xf32, #tpu.memory_space<vmem>>, %arg10: memref<2x64xf32, #tpu.memory_space<vmem>>, %arg11: memref<2x64xf32, #tpu.memory_space<vmem>>, %arg12: memref<2x4096xbf16, #tpu.memory_space<vmem>>) attributes {dimension_semantics = [], scalar_prefetch = 0 : i64, scratch_operands = 0 : i64, tpu.core_type = #tpu.core_type<tc>} {
    %c0 = arith.constant 0 : index
    %c0_0 = arith.constant 0 : index
    %0 = vector.load %arg0[%c0, %c0_0] : memref<2x4096xbf16, #tpu.memory_space<vmem>>, vector<2x4096xbf16>
    %c0_1 = arith.constant 0 : index
    %c0_2 = arith.constant 0 : index
    %1 = vector.load %arg1[%c0_1, %c0_2] : memref<4096x64xbf16, #tpu.memory_space<vmem>>, vector<4096x64xbf16>
    %cst = arith.constant dense<0.000000e+00> : vector<2x64xf32>
    %2 = tpu.matmul %0, %1, %cst {dimension_numbers = #tpu.dot_dimension_numbers<[1], [0], [0], [1], [0, 0, 1, 1], [], []>} : vector<2x4096xbf16>, vector<4096x64xbf16>, vector<2x64xf32> -> vector<2x64xf32>
    %c0_3 = arith.constant 0 : index
    %c0_4 = arith.constant 0 : index
    %3 = vector.load %arg2[%c0_3, %c0_4] : memref<1x64xf32, #tpu.memory_space<vmem>>, vector<1x64xf32>
    %4 = vector.broadcast %3 : vector<1x64xf32> to vector<2x64xf32>
    %5 = arith.addf %2, %4 : vector<2x64xf32>
    %6 = arith.truncf %5 : vector<2x64xf32> to vector<2x64xbf16>
    %c0_5 = arith.constant 0 : index
    %c0_6 = arith.constant 0 : index
    %7 = vector.load %arg3[%c0_5, %c0_6] : memref<64x128xbf16, #tpu.memory_space<vmem>>, vector<64x128xbf16>
    %cst_7 = arith.constant dense<0.000000e+00> : vector<2x128xf32>
    %8 = tpu.matmul %6, %7, %cst_7 {dimension_numbers = #tpu.dot_dimension_numbers<[1], [0], [0], [1], [0, 0, 1, 1], [], []>} : vector<2x64xbf16>, vector<64x128xbf16>, vector<2x128xf32> -> vector<2x128xf32>
    %c0_8 = arith.constant 0 : index
    %c0_9 = arith.constant 0 : index
    %9 = vector.load %arg4[%c0_8, %c0_9] : memref<1x128xf32, #tpu.memory_space<vmem>>, vector<1x128xf32>
    %10 = vector.broadcast %9 : vector<1x128xf32> to vector<2x128xf32>
    %11 = arith.addf %8, %10 : vector<2x128xf32>
    %12 = vector.extract_strided_slice %11 {offsets = [0, 0], sizes = [2, 64], strides = [1, 1]} : vector<2x128xf32> to vector<2x64xf32>
    %13 = vector.extract_strided_slice %11 {offsets = [0, 64], sizes = [2, 64], strides = [1, 1]} : vector<2x128xf32> to vector<2x64xf32>
    %14 = math.exp %13 : vector<2x64xf32>
    %c0_10 = arith.constant 0 : index
    %c0_11 = arith.constant 0 : index
    %15 = vector.load %arg5[%c0_10, %c0_11] : memref<2x64xf32, #tpu.memory_space<vmem>>, vector<2x64xf32>
    %16 = arith.mulf %14, %15 : vector<2x64xf32>
    %17 = arith.addf %16, %12 : vector<2x64xf32>
    %18 = arith.truncf %17 : vector<2x64xf32> to vector<2x64xbf16>
    %c0_12 = arith.constant 0 : index
    %c0_13 = arith.constant 0 : index
    %19 = vector.load %arg6[%c0_12, %c0_13] : memref<64x64xbf16, #tpu.memory_space<vmem>>, vector<64x64xbf16>
    %cst_14 = arith.constant dense<0.000000e+00> : vector<2x64xf32>
    %20 = tpu.matmul %18, %19, %cst_14 {dimension_numbers = #tpu.dot_dimension_numbers<[1], [0], [0], [1], [0, 0, 1, 1], [], []>} : vector<2x64xbf16>, vector<64x64xbf16>, vector<2x64xf32> -> vector<2x64xf32>
    %c0_15 = arith.constant 0 : index
    %c0_16 = arith.constant 0 : index
    %21 = vector.load %arg7[%c0_15, %c0_16] : memref<1x64xf32, #tpu.memory_space<vmem>>, vector<1x64xf32>
    %22 = vector.broadcast %21 : vector<1x64xf32> to vector<2x64xf32>
    %23 = arith.addf %20, %22 : vector<2x64xf32>
    %24 = arith.truncf %23 : vector<2x64xf32> to vector<2x64xbf16>
    %c0_17 = arith.constant 0 : index
    %c0_18 = arith.constant 0 : index
    %25 = vector.load %arg8[%c0_17, %c0_18] : memref<64x4096xbf16, #tpu.memory_space<vmem>>, vector<64x4096xbf16>
    %cst_19 = arith.constant dense<0.000000e+00> : vector<2x4096xf32>
    %26 = tpu.matmul %24, %25, %cst_19 {dimension_numbers = #tpu.dot_dimension_numbers<[1], [0], [0], [1], [0, 0, 1, 1], [], []>} : vector<2x64xbf16>, vector<64x4096xbf16>, vector<2x4096xf32> -> vector<2x4096xf32>
    %c0_20 = arith.constant 0 : index
    %c0_21 = arith.constant 0 : index
    %27 = vector.load %arg9[%c0_20, %c0_21] : memref<1x4096xf32, #tpu.memory_space<vmem>>, vector<1x4096xf32>
    %28 = vector.broadcast %27 : vector<1x4096xf32> to vector<2x4096xf32>
    %29 = arith.addf %26, %28 : vector<2x4096xf32>
    %cst_22 = arith.constant 0.000000e+00 : f32
    %30 = vector.broadcast %cst_22 : f32 to vector<2x4096xf32>
    %31 = arith.maximumf %29, %30 : vector<2x4096xf32>
    %c0_23 = arith.constant 0 : index
    %c0_24 = arith.constant 0 : index
    %32 = vector.load %arg10[%c0_23, %c0_24] : memref<2x64xf32, #tpu.memory_space<vmem>>, vector<2x64xf32>
    tpu.vector_store %arg10[%c0_23, %c0_24], %12 {strides = array<i32>} : memref<2x64xf32, #tpu.memory_space<vmem>>, vector<2x64xf32>,
    %c0_25 = arith.constant 0 : index
    %c0_26 = arith.constant 0 : index
    %33 = vector.load %arg11[%c0_25, %c0_26] : memref<2x64xf32, #tpu.memory_space<vmem>>, vector<2x64xf32>
    tpu.vector_store %arg11[%c0_25, %c0_26], %13 {strides = array<i32>} : memref<2x64xf32, #tpu.memory_space<vmem>>, vector<2x64xf32>,
    %34 = arith.truncf %31 : vector<2x4096xf32> to vector<2x4096xbf16>
    %c0_27 = arith.constant 0 : index
    %c0_28 = arith.constant 0 : index
    %35 = vector.load %arg12[%c0_27, %c0_28] : memref<2x4096xbf16, #tpu.memory_space<vmem>>, vector<2x4096xbf16>
    tpu.vector_store %arg12[%c0_27, %c0_28], %34 {strides = array<i32>} : memref<2x4096xbf16, #tpu.memory_space<vmem>>, vector<2x4096xbf16>,
    return
  }
}

module attributes {stable_mosaic.version = 11 : i64} {
  func.func @_matmul_bias_act_kernel(%arg0: memref<98x2304xbf16, #tpu.memory_space<vmem>>, %arg1: memref<2304x128xbf16, #tpu.memory_space<vmem>>, %arg2: memref<1x128xf32, #tpu.memory_space<vmem>>, %arg3: memref<98x128xbf16, #tpu.memory_space<vmem>>) attributes {dimension_semantics = [], scalar_prefetch = 0 : i64, scratch_operands = 0 : i64, tpu.core_type = #tpu.core_type<tc>} {
    %c0 = arith.constant 0 : index
    %c0_0 = arith.constant 0 : index
    %0 = vector.load %arg0[%c0, %c0_0] : memref<98x2304xbf16, #tpu.memory_space<vmem>>, vector<98x2304xbf16>
    %c0_1 = arith.constant 0 : index
    %c0_2 = arith.constant 0 : index
    %1 = vector.load %arg1[%c0_1, %c0_2] : memref<2304x128xbf16, #tpu.memory_space<vmem>>, vector<2304x128xbf16>
    %cst = arith.constant dense<0.000000e+00> : vector<98x128xf32>
    %2 = tpu.matmul %0, %1, %cst {dimension_numbers = #tpu.dot_dimension_numbers<[1], [0], [0], [1], [0, 0, 1, 1], [], []>} : vector<98x2304xbf16>, vector<2304x128xbf16>, vector<98x128xf32> -> vector<98x128xf32>
    %c0_3 = arith.constant 0 : index
    %c0_4 = arith.constant 0 : index
    %3 = vector.load %arg2[%c0_3, %c0_4] : memref<1x128xf32, #tpu.memory_space<vmem>>, vector<1x128xf32>
    %4 = vector.broadcast %3 : vector<1x128xf32> to vector<98x128xf32>
    %5 = arith.addf %2, %4 : vector<98x128xf32>
    %cst_5 = arith.constant 0.000000e+00 : f32
    %6 = vector.broadcast %cst_5 : f32 to vector<98x128xf32>
    %7 = arith.maximumf %5, %6 : vector<98x128xf32>
    %8 = arith.truncf %7 : vector<98x128xf32> to vector<98x128xbf16>
    %c0_6 = arith.constant 0 : index
    %c0_7 = arith.constant 0 : index
    %9 = vector.load %arg3[%c0_6, %c0_7] : memref<98x128xbf16, #tpu.memory_space<vmem>>, vector<98x128xbf16>
    tpu.vector_store %arg3[%c0_6, %c0_7], %8 {strides = array<i32>} : memref<98x128xbf16, #tpu.memory_space<vmem>>, vector<98x128xbf16>,
    return
  }
}

module attributes {stable_mosaic.version = 11 : i64} {
  func.func @_matmul_bias_act_kernel(%arg0: memref<392x1152xbf16, #tpu.memory_space<vmem>>, %arg1: memref<1152x64xbf16, #tpu.memory_space<vmem>>, %arg2: memref<1x64xf32, #tpu.memory_space<vmem>>, %arg3: memref<392x64xbf16, #tpu.memory_space<vmem>>) attributes {dimension_semantics = [], scalar_prefetch = 0 : i64, scratch_operands = 0 : i64, tpu.core_type = #tpu.core_type<tc>} {
    %c0 = arith.constant 0 : index
    %c0_0 = arith.constant 0 : index
    %0 = vector.load %arg0[%c0, %c0_0] : memref<392x1152xbf16, #tpu.memory_space<vmem>>, vector<392x1152xbf16>
    %c0_1 = arith.constant 0 : index
    %c0_2 = arith.constant 0 : index
    %1 = vector.load %arg1[%c0_1, %c0_2] : memref<1152x64xbf16, #tpu.memory_space<vmem>>, vector<1152x64xbf16>
    %cst = arith.constant dense<0.000000e+00> : vector<392x64xf32>
    %2 = tpu.matmul %0, %1, %cst {dimension_numbers = #tpu.dot_dimension_numbers<[1], [0], [0], [1], [0, 0, 1, 1], [], []>} : vector<392x1152xbf16>, vector<1152x64xbf16>, vector<392x64xf32> -> vector<392x64xf32>
    %c0_3 = arith.constant 0 : index
    %c0_4 = arith.constant 0 : index
    %3 = vector.load %arg2[%c0_3, %c0_4] : memref<1x64xf32, #tpu.memory_space<vmem>>, vector<1x64xf32>
    %4 = vector.broadcast %3 : vector<1x64xf32> to vector<392x64xf32>
    %5 = arith.addf %2, %4 : vector<392x64xf32>
    %cst_5 = arith.constant 0.000000e+00 : f32
    %6 = vector.broadcast %cst_5 : f32 to vector<392x64xf32>
    %7 = arith.maximumf %5, %6 : vector<392x64xf32>
    %8 = arith.truncf %7 : vector<392x64xf32> to vector<392x64xbf16>
    %c0_6 = arith.constant 0 : index
    %c0_7 = arith.constant 0 : index
    %9 = vector.load %arg3[%c0_6, %c0_7] : memref<392x64xbf16, #tpu.memory_space<vmem>>, vector<392x64xbf16>
    tpu.vector_store %arg3[%c0_6, %c0_7], %8 {strides = array<i32>} : memref<392x64xbf16, #tpu.memory_space<vmem>>, vector<392x64xbf16>,
    return
  }
}

module attributes {stable_mosaic.version = 11 : i64} {
  func.func @_final_convT_kernel(%arg0: memref<1x576xbf16, #tpu.memory_space<vmem>>, %arg1: memref<576x1568xbf16, #tpu.memory_space<vmem>>, %arg2: memref<1x1xf32, #tpu.memory_space<vmem>>, %arg3: memref<1x1568xf32, #tpu.memory_space<vmem>>) attributes {dimension_semantics = [], scalar_prefetch = 0 : i64, scratch_operands = 0 : i64, tpu.core_type = #tpu.core_type<tc>} {
    %c0 = arith.constant 0 : index
    %c0_0 = arith.constant 0 : index
    %0 = vector.load %arg0[%c0, %c0_0] : memref<1x576xbf16, #tpu.memory_space<vmem>>, vector<1x576xbf16>
    %c0_1 = arith.constant 0 : index
    %c0_2 = arith.constant 0 : index
    %1 = vector.load %arg1[%c0_1, %c0_2] : memref<576x1568xbf16, #tpu.memory_space<vmem>>, vector<576x1568xbf16>
    %cst = arith.constant dense<0.000000e+00> : vector<1x1568xf32>
    %2 = tpu.matmul %0, %1, %cst {dimension_numbers = #tpu.dot_dimension_numbers<[1], [0], [0], [1], [0, 0, 1, 1], [], []>} : vector<1x576xbf16>, vector<576x1568xbf16>, vector<1x1568xf32> -> vector<1x1568xf32>
    %c0_3 = arith.constant 0 : index
    %c0_4 = arith.constant 0 : index
    %3 = vector.load %arg2[%c0_3, %c0_4] : memref<1x1xf32, #tpu.memory_space<vmem>>, vector<1x1xf32>
    %4 = vector.broadcast %3 : vector<1x1xf32> to vector<1x1568xf32>
    %5 = arith.addf %2, %4 : vector<1x1568xf32>
    %6 = arith.negf %5 : vector<1x1568xf32>
    %7 = math.exp %6 : vector<1x1568xf32>
    %cst_5 = arith.constant 1.000000e+00 : f32
    %8 = vector.broadcast %cst_5 : f32 to vector<1x1568xf32>
    %9 = arith.addf %8, %7 : vector<1x1568xf32>
    %10 = arith.divf %8, %9 : vector<1x1568xf32>
    %c0_6 = arith.constant 0 : index
    %c0_7 = arith.constant 0 : index
    %11 = vector.load %arg3[%c0_6, %c0_7] : memref<1x1568xf32, #tpu.memory_space<vmem>>, vector<1x1568xf32>
    tpu.vector_store %arg3[%c0_6, %c0_7], %10 {strides = array<i32>} : memref<1x1568xf32, #tpu.memory_space<vmem>>, vector<1x1568xf32>,
    return
  }
}

</mosaic_0001>

<bundles_post_ra>
// kernel: vae_forward.7
= control target key start
LH: loop header
LB: loop body
LE: loop exit
PB: predicated region body
PF: predicated region fallthrough
CT: control target
= control target key end

     0   :  { %vm277_vm0 = vcmask 1043456   ;;  %vm278_vm1 = vcmask 1044480   ;;  %v1125_v0 = vmov 0.0   ;;  %v1126_v2 = vmov 65535   ;;  %s1553_s1 = inlined_call_operand.vmem [shape: bf16[9,64], index: 1, kind: input, shape index: {}]   ;;  %s1554_s0 = inlined_call_operand.vmem [shape: bf16[392,9], index: 0, kind: input, shape index: {}]   ;;  %s1555_s2 = inlined_call_operand.vmem [shape: f32[1,64], index: 2, kind: input, shape index: {}]   ;;  %s1556_s3 = inlined_call_operand.vmem [shape: bf16[392,64], index: 3, kind: output, shape index: {}]  }
   0x1   :  { %992 = vmatprep.subr.bf16.mxu0 %v1125_v0  ;;  %v1099_v1 = vld [vmem:[%s1553_s1] sm:$0x1f]   ;;  %1094 = vmatprep.subr.bf16.mxu1 %v1125_v0  ;;  %v279_v3 = vsel %vm277_vm0, 4294967295, %v1126_v2  ;;  %vm1127_vm2 = vmmov 0   ;;  %v1101_v7 = vld [vmem:[%s1554_s0 + $0x68] sm:$0xff]   ;;  %vm201_vm3 = vcmask 72704  }
   0x2   :  { %v280_v4 = vsel %vm278_vm1, %v279_v3, 0  ;;  %994 = vmatprep.mubr.msk.bf16.mxu0 %vm1127_vm2, %v1125_v0  ;;  %v1100_v5 = vld [vmem:[%s1554_s0] sm:$0xff]   ;;  %1046 = vmatprep.mubr.msk.bf16.mxu1 %vm1127_vm2, %v1125_v0  ;;  %v1102_v8 = vld [vmem:[%s1554_s0 + $0x8] sm:$0xff]   ;;  %v1103_v9 = vld [vmem:[%s1554_s0 + $0x70] sm:$0xff]   ;;  %vm762_vm4 = vcmask 519168  }
   0x3   :  { %v282_v6 = vand.u32 %v1099_v1, %v280_v4  ;;  %v1104_v10 = vld [vmem:[%s1554_s0 + $0x10] sm:$0xff]   ;;  %v1105_v11 = vld [vmem:[%s1554_s0 + $0x78] sm:$0xff]   ;;  %v1107_v13 = vld [vmem:[%s1554_s0 + $0x80] sm:$0xff]  }
   0x4   :  { %v1106_v12 = vld [vmem:[%s1554_s0 + $0x18] sm:$0xff]   ;;  %v1108_v14 = vld [vmem:[%s1554_s0 + $0x20] sm:$0xff]   ;;  %v1109_v15 = vld [vmem:[%s1554_s0 + $0x88] sm:$0xff]  }
   0x5   :  { %993 = vmatpush3.bf16.msra.mxu0 %v282_v6  ;;  %1095 = vmatpush3.bf16.msra.mxu1 %v282_v6  ;;  %v1110_v16 = vld [vmem:[%s1554_s0 + $0x28] sm:$0xff]   ;;  %v1111_v17 = vld [vmem:[%s1554_s0 + $0x90] sm:$0xff]   ;;  %v1113_v19 = vld [vmem:[%s1554_s0 + $0x98] sm:$0xff]  }
   0x6   :  { %v1112_v18 = vld [vmem:[%s1554_s0 + $0x30] sm:$0xff]   ;;  %v1114_v20 = vld [vmem:[%s1554_s0 + $0x38] sm:$0xff]   ;;  %v1115_v21 = vld [vmem:[%s1554_s0 + $0xa0] sm:$0xff]  }
   0x7   :  { %v1116_v22 = vld [vmem:[%s1554_s0 + $0x40] sm:$0xff]   ;;  %v1117_v23 = vld [vmem:[%s1554_s0 + $0xa8] sm:$0xff]   ;;  %v1119_v25 = vld [vmem:[%s1554_s0 + $0xb0] sm:$0xff]  }
   0x8   :  { %995 = vmatmul.mubr.msk.bf16.vlgmr.msra.gmra.mrb[0].mxu0 %vm201_vm3, %v1100_v5  ;;  %1047 = vmatmul.mubr.msk.bf16.vlgmr.msra.gmra.mrb[0].mxu1 %vm201_vm3, %v1101_v7  ;;  %v1118_v24 = vld [vmem:[%s1554_s0 + $0x48] sm:$0xff]   ;;  %v1120_v26 = vld [vmem:[%s1554_s0 + $0x50] sm:$0xff]   ;;  %v1121_v27 = vld [vmem:[%s1554_s0 + $0xb8] sm:$0xff]  }
   0x9   :  { %998 = vmatprep.mubr.msk.bf16.mxu0 %vm1127_vm2, %v1125_v0  ;;  %1050 = vmatprep.mubr.msk.bf16.mxu1 %vm1127_vm2, %v1125_v0  ;;  %v1122_v28 = vld [vmem:[%s1554_s0 + $0x58] sm:$0xff]   ;;  %v1123_v29 = vld [vmem:[%s1554_s0 + $0xc0] ss:$0 sps:$4 sm:$0xff]  }
   0xa   :  { %v1124_v30 = vld [vmem:[%s1554_s0 + $0x60] sm:$0xff]  }
   0xb   :  { %v1306_v31 = vld [vmem:[%s1555_s2] ss:$0 sm:$0xff] }
  0x10   :  { %999 = vmatmul.mubr.msk.bf16.gmra.mrb[4].mxu0 %vm201_vm3, %v1102_v8  ;;  %1051 = vmatmul.mubr.msk.bf16.gmra.mrb[4].mxu1 %vm201_vm3, %v1103_v9 }
  0x11   :  { %1002 = vmatprep.mubr.msk.bf16.mxu0 %vm1127_vm2, %v1125_v0  ;;  %1054 = vmatprep.mubr.msk.bf16.mxu1 %vm1127_vm2, %v1125_v0 }
  0x18   :  { %1003 = vmatmul.mubr.msk.bf16.gmra.mrb[8].mxu0 %vm201_vm3, %v1104_v10  ;;  %1055 = vmatmul.mubr.msk.bf16.gmra.mrb[8].mxu1 %vm201_vm3, %v1105_v11 }
  0x19   :  { %1006 = vmatprep.mubr.msk.bf16.mxu0 %vm1127_vm2, %v1125_v0  ;;  %1058 = vmatprep.mubr.msk.bf16.mxu1 %vm1127_vm2, %v1125_v0 }
  0x20   :  { %1007 = vmatmul.mubr.msk.bf16.gmra.mrb[12].mxu0 %vm201_vm3, %v1106_v12  ;;  %1059 = vmatmul.mubr.msk.bf16.gmra.mrb[12].mxu1 %vm201_vm3, %v1107_v13 }
  0x21   :  { %1010 = vmatprep.mubr.msk.bf16.mxu0 %vm1127_vm2, %v1125_v0  ;;  %1062 = vmatprep.mubr.msk.bf16.mxu1 %vm1127_vm2, %v1125_v0 }
  0x28   :  { %1011 = vmatmul.mubr.msk.bf16.gmra.mrb[16].mxu0 %vm201_vm3, %v1108_v14  ;;  %1063 = vmatmul.mubr.msk.bf16.gmra.mrb[16].mxu1 %vm201_vm3, %v1109_v15 }
  0x29   :  { %1014 = vmatprep.mubr.msk.bf16.mxu0 %vm1127_vm2, %v1125_v0  ;;  %1066 = vmatprep.mubr.msk.bf16.mxu1 %vm1127_vm2, %v1125_v0 }
  0x30   :  { %1015 = vmatmul.mubr.msk.bf16.gmra.mrb[20].mxu0 %vm201_vm3, %v1110_v16  ;;  %1067 = vmatmul.mubr.msk.bf16.gmra.mrb[20].mxu1 %vm201_vm3, %v1111_v17 }
  0x31   :  { %1018 = vmatprep.mubr.msk.bf16.mxu0 %vm1127_vm2, %v1125_v0  ;;  %1070 = vmatprep.mubr.msk.bf16.mxu1 %vm1127_vm2, %v1125_v0 }
  0x38   :  { %1019 = vmatmul.mubr.msk.bf16.gmra.mrb[24].mxu0 %vm201_vm3, %v1112_v18  ;;  %1071 = vmatmul.mubr.msk.bf16.gmra.mrb[24].mxu1 %vm201_vm3, %v1113_v19 }
  0x39   :  { %1022 = vmatprep.mubr.msk.bf16.mxu0 %vm1127_vm2, %v1125_v0  ;;  %1074 = vmatprep.mubr.msk.bf16.mxu1 %vm1127_vm2, %v1125_v0 }
  0x40   :  { %1023 = vmatmul.mubr.msk.bf16.gmra.mrb[28].mxu0 %vm201_vm3, %v1114_v20  ;;  %1075 = vmatmul.mubr.msk.bf16.gmra.mrb[28].mxu1 %vm201_vm3, %v1115_v21 }
  0x41   :  { %1026 = vmatprep.mubr.msk.bf16.mxu0 %vm1127_vm2, %v1125_v0  ;;  %1078 = vmatprep.mubr.msk.bf16.mxu1 %vm1127_vm2, %v1125_v0 }
  0x48   :  { %1027 = vmatmul.mubr.msk.bf16.gmra.mrb[32].mxu0 %vm201_vm3, %v1116_v22  ;;  %1079 = vmatmul.mubr.msk.bf16.gmra.mrb[32].mxu1 %vm201_vm3, %v1117_v23 }
  0x49   :  { %1030 = vmatprep.mubr.msk.bf16.mxu0 %vm1127_vm2, %v1125_v0  ;;  %1082 = vmatprep.mubr.msk.bf16.mxu1 %vm1127_vm2, %v1125_v0 }
  0x50   :  { %1031 = vmatmul.mubr.msk.bf16.gmra.mrb[36].mxu0 %vm201_vm3, %v1118_v24  ;;  %1083 = vmatmul.mubr.msk.bf16.gmra.mrb[36].mxu1 %vm201_vm3, %v1119_v25 }
  0x51   :  { %1034 = vmatprep.mubr.msk.bf16.mxu0 %vm1127_vm2, %v1125_v0  ;;  %1086 = vmatprep.mubr.msk.bf16.mxu1 %vm1127_vm2, %v1125_v0 }
  0x58   :  { %1035 = vmatmul.mubr.msk.bf16.gmra.mrb[40].mxu0 %vm201_vm3, %v1120_v26  ;;  %1087 = vmatmul.mubr.msk.bf16.gmra.mrb[40].mxu1 %vm201_vm3, %v1121_v27 }
  0x59   :  { %1038 = vmatprep.mubr.msk.bf16.mxu0 %vm1127_vm2, %v1125_v0  ;;  %1090 = vmatprep.mubr.msk.bf16.mxu1 %vm1127_vm2, %v1125_v0 }
  0x60   :  { %1039 = vmatmul.mubr.msk.bf16.gmra.mrb[44].mxu0 %vm201_vm3, %v1122_v28  ;;  %1091 = vmatmul.mubr.msk.bf16.gmra.mrb[44].mxu1 %vm201_vm3, %v1123_v29 }
  0x61   :  { %1042 = vmatprep.mubr.msk.bf16.mxu0 %vm1127_vm2, %v1125_v0 }
  0x68   :  { %1043 = vmatmul.mubr.msk.bf16.gmra.mrb[48].mxu0 %vm201_vm3, %v1124_v30 }
  0xdb   :  { %v318_v32 = vpop.f32.mrb[0].mxu0  ;;  %v422_v33 = vpop.f32.mrb[0].mxu1 }
  0xdc   :  { %v319_v34 = vadd.f32 %v1306_v31, %v318_v32  ;;  %v996_v35 = vpop.f32.mrb[1].mxu0  ;;  %v423_v36 = vadd.f32 %v1306_v31, %v422_v33  ;;  %v1048_v37 = vpop.f32.mrb[1].mxu1 }
  0xdd   :  { %v321_v38 = vpop.f32.mrb[2].mxu0  ;;  %v425_v39 = vpop.f32.mrb[2].mxu1 }
  0xde   :  { %v516_v40 = vmax.f32 %v319_v34, 0.0  ;;  %v322_v41 = vadd.f32 %v1306_v31, %v321_v38  ;;  %v997_v42 = vpop.f32.mrb[3].mxu0  ;;  %v542_v43 = vmax.f32 %v423_v36, 0.0  ;;  %v426_v44 = vadd.f32 %v1306_v31, %v425_v39  ;;  %v1049_v45 = vpop.f32.mrb[3].mxu1 }
  0xe0   :  { %v917_v46 = vpack.c.bf16 %v516_v40, %v516_v40  ;;  %v517_v47 = vmax.f32 %v322_v41, 0.0  ;;  %v943_v48 = vpack.c.bf16 %v542_v43, %v542_v43  ;;  %v543_v49 = vmax.f32 %v426_v44, 0.0 }
  0xe2   :  { %763 = vst.msk [vmem:[%s1556_s3] sm:$0xf] %vm762_vm4, %v917_v46  ;;  %v918_v50 = vpack.c.bf16 %v517_v47, %v517_v47  ;;  %789 = vst.msk [vmem:[%s1556_s3 + $0x68] sm:$0xf] %vm762_vm4, %v943_v48  ;;  %v944_v51 = vpack.c.bf16 %v543_v49, %v543_v49 }
  0xe3   :  { %v326_v52 = vpop.f32.mrb[4].mxu0  ;;  %v430_v53 = vpop.f32.mrb[4].mxu1 }
  0xe4   :  { %764 = vst.msk [vmem:[%s1556_s3 + $0x4] sm:$0xf] %vm762_vm4, %v918_v50  ;;  %v327_v54 = vadd.f32 %v1306_v31, %v326_v52  ;;  %v1000_v55 = vpop.f32.mrb[5].mxu0  ;;  %790 = vst.msk [vmem:[%s1556_s3 + $0x6c] sm:$0xf] %vm762_vm4, %v944_v51  ;;  %v431_v56 = vadd.f32 %v1306_v31, %v430_v53  ;;  %v1052_v57 = vpop.f32.mrb[5].mxu1 }
  0xe5   :  { %v329_v58 = vpop.f32.mrb[6].mxu0  ;;  %v433_v59 = vpop.f32.mrb[6].mxu1 }
  0xe6   :  { %v518_v60 = vmax.f32 %v327_v54, 0.0  ;;  %v330_v61 = vadd.f32 %v1306_v31, %v329_v58  ;;  %v1001_v62 = vpop.f32.mrb[7].mxu0  ;;  %v544_v63 = vmax.f32 %v431_v56, 0.0  ;;  %v434_v0 = vadd.f32 %v1306_v31, %v433_v59  ;;  %v1053_v1 = vpop.f32.mrb[7].mxu1 }
  0xe8   :  { %v919_v2 = vpack.c.bf16 %v518_v60, %v518_v60  ;;  %v519_v3 = vmax.f32 %v330_v61, 0.0  ;;  %v945_v4 = vpack.c.bf16 %v544_v63, %v544_v63  ;;  %v545_v5 = vmax.f32 %v434_v0, 0.0 }
  0xea   :  { %765 = vst.msk [vmem:[%s1556_s3 + $0x8] sm:$0xf] %vm762_vm4, %v919_v2  ;;  %v920_v6 = vpack.c.bf16 %v519_v3, %v519_v3  ;;  %791 = vst.msk [vmem:[%s1556_s3 + $0x70] sm:$0xf] %vm762_vm4, %v945_v4  ;;  %v946_v7 = vpack.c.bf16 %v545_v5, %v545_v5 }
  0xeb   :  { %v334_v8 = vpop.f32.mrb[8].mxu0  ;;  %v438_v9 = vpop.f32.mrb[8].mxu1 }
  0xec   :  { %766 = vst.msk [vmem:[%s1556_s3 + $0xc] sm:$0xf] %vm762_vm4, %v920_v6  ;;  %v335_v10 = vadd.f32 %v1306_v31, %v334_v8  ;;  %v1004_v11 = vpop.f32.mrb[9].mxu0  ;;  %792 = vst.msk [vmem:[%s1556_s3 + $0x74] sm:$0xf] %vm762_vm4, %v946_v7  ;;  %v439_v12 = vadd.f32 %v1306_v31, %v438_v9  ;;  %v1056_v13 = vpop.f32.mrb[9].mxu1 }
  0xed   :  { %v337_v14 = vpop.f32.mrb[10].mxu0  ;;  %v441_v15 = vpop.f32.mrb[10].mxu1 }
  0xee   :  { %v520_v16 = vmax.f32 %v335_v10, 0.0  ;;  %v338_v17 = vadd.f32 %v1306_v31, %v337_v14  ;;  %v1005_v18 = vpop.f32.mrb[11].mxu0  ;;  %v546_v19 = vmax.f32 %v439_v12, 0.0  ;;  %v442_v20 = vadd.f32 %v1306_v31, %v441_v15  ;;  %v1057_v21 = vpop.f32.mrb[11].mxu1 }
  0xf0   :  { %v921_v22 = vpack.c.bf16 %v520_v16, %v520_v16  ;;  %v521_v23 = vmax.f32 %v338_v17, 0.0  ;;  %v947_v24 = vpack.c.bf16 %v546_v19, %v546_v19  ;;  %v547_v25 = vmax.f32 %v442_v20, 0.0 }
  0xf2   :  { %767 = vst.msk [vmem:[%s1556_s3 + $0x10] sm:$0xf] %vm762_vm4, %v921_v22  ;;  %v922_v26 = vpack.c.bf16 %v521_v23, %v521_v23  ;;  %793 = vst.msk [vmem:[%s1556_s3 + $0x78] sm:$0xf] %vm762_vm4, %v947_v24  ;;  %v948_v27 = vpack.c.bf16 %v547_v25, %v547_v25 }
  0xf3   :  { %v342_v28 = vpop.f32.mrb[12].mxu0  ;;  %v446_v29 = vpop.f32.mrb[12].mxu1 }
  0xf4   :  { %768 = vst.msk [vmem:[%s1556_s3 + $0x14] sm:$0xf] %vm762_vm4, %v922_v26  ;;  %v343_v30 = vadd.f32 %v1306_v31, %v342_v28  ;;  %v1008_v32 = vpop.f32.mrb[13].mxu0  ;;  %794 = vst.msk [vmem:[%s1556_s3 + $0x7c] sm:$0xf] %vm762_vm4, %v948_v27  ;;  %v447_v33 = vadd.f32 %v1306_v31, %v446_v29  ;;  %v1060_v34 = vpop.f32.mrb[13].mxu1 }
  0xf5   :  { %v345_v35 = vpop.f32.mrb[14].mxu0  ;;  %v449_v36 = vpop.f32.mrb[14].mxu1 }
  0xf6   :  { %v522_v37 = vmax.f32 %v343_v30, 0.0  ;;  %v346_v38 = vadd.f32 %v1306_v31, %v345_v35  ;;  %v1009_v39 = vpop.f32.mrb[15].mxu0  ;;  %v548_v40 = vmax.f32 %v447_v33, 0.0  ;;  %v450_v41 = vadd.f32 %v1306_v31, %v449_v36  ;;  %v1061_v42 = vpop.f32.mrb[15].mxu1 }
  0xf8   :  { %v923_v43 = vpack.c.bf16 %v522_v37, %v522_v37  ;;  %v523_v44 = vmax.f32 %v346_v38, 0.0  ;;  %v949_v45 = vpack.c.bf16 %v548_v40, %v548_v40  ;;  %v549_v46 = vmax.f32 %v450_v41, 0.0 }
  0xfa   :  { %769 = vst.msk [vmem:[%s1556_s3 + $0x18] sm:$0xf] %vm762_vm4, %v923_v43  ;;  %v924_v47 = vpack.c.bf16 %v523_v44, %v523_v44  ;;  %795 = vst.msk [vmem:[%s1556_s3 + $0x80] sm:$0xf] %vm762_vm4, %v949_v45  ;;  %v950_v48 = vpack.c.bf16 %v549_v46, %v549_v46 }
  0xfb   :  { %v350_v49 = vpop.f32.mrb[16].mxu0  ;;  %v454_v50 = vpop.f32.mrb[16].mxu1 }
  0xfc   :  { %770 = vst.msk [vmem:[%s1556_s3 + $0x1c] sm:$0xf] %vm762_vm4, %v924_v47  ;;  %v351_v51 = vadd.f32 %v1306_v31, %v350_v49  ;;  %v1012_v52 = vpop.f32.mrb[17].mxu0  ;;  %796 = vst.msk [vmem:[%s1556_s3 + $0x84] sm:$0xf] %vm762_vm4, %v950_v48  ;;  %v455_v53 = vadd.f32 %v1306_v31, %v454_v50  ;;  %v1064_v54 = vpop.f32.mrb[17].mxu1 }
  0xfd   :  { %v353_v55 = vpop.f32.mrb[18].mxu0  ;;  %v457_v56 = vpop.f32.mrb[18].mxu1 }
  0xfe   :  { %v524_v57 = vmax.f32 %v351_v51, 0.0  ;;  %v354_v58 = vadd.f32 %v1306_v31, %v353_v55  ;;  %v1013_v59 = vpop.f32.mrb[19].mxu0  ;;  %v550_v60 = vmax.f32 %v455_v53, 0.0  ;;  %v458_v61 = vadd.f32 %v1306_v31, %v457_v56  ;;  %v1065_v62 = vpop.f32.mrb[19].mxu1 }
 0x100   :  { %v925_v63 = vpack.c.bf16 %v524_v57, %v524_v57  ;;  %v525_v0 = vmax.f32 %v354_v58, 0.0  ;;  %v951_v1 = vpack.c.bf16 %v550_v60, %v550_v60  ;;  %v551_v2 = vmax.f32 %v458_v61, 0.0 }
 0x102   :  { %771 = vst.msk [vmem:[%s1556_s3 + $0x20] sm:$0xf] %vm762_vm4, %v925_v63  ;;  %v926_v3 = vpack.c.bf16 %v525_v0, %v525_v0  ;;  %797 = vst.msk [vmem:[%s1556_s3 + $0x88] sm:$0xf] %vm762_vm4, %v951_v1  ;;  %v952_v4 = vpack.c.bf16 %v551_v2, %v551_v2 }
 0x103   :  { %v358_v5 = vpop.f32.mrb[20].mxu0  ;;  %v462_v6 = vpop.f32.mrb[20].mxu1 }
 0x104   :  { %772 = vst.msk [vmem:[%s1556_s3 + $0x24] sm:$0xf] %vm762_vm4, %v926_v3  ;;  %v359_v7 = vadd.f32 %v1306_v31, %v358_v5  ;;  %v1016_v8 = vpop.f32.mrb[21].mxu0  ;;  %798 = vst.msk [vmem:[%s1556_s3 + $0x8c] sm:$0xf] %vm762_vm4, %v952_v4  ;;  %v463_v9 = vadd.f32 %v1306_v31, %v462_v6  ;;  %v1068_v10 = vpop.f32.mrb[21].mxu1 }
 0x105   :  { %v361_v11 = vpop.f32.mrb[22].mxu0  ;;  %v465_v12 = vpop.f32.mrb[22].mxu1 }
 0x106   :  { %v526_v13 = vmax.f32 %v359_v7, 0.0  ;;  %v362_v14 = vadd.f32 %v1306_v31, %v361_v11  ;;  %v1017_v15 = vpop.f32.mrb[23].mxu0  ;;  %v552_v16 = vmax.f32 %v463_v9, 0.0  ;;  %v466_v17 = vadd.f32 %v1306_v31, %v465_v12  ;;  %v1069_v18 = vpop.f32.mrb[23].mxu1 }
 0x108   :  { %v927_v19 = vpack.c.bf16 %v526_v13, %v526_v13  ;;  %v527_v20 = vmax.f32 %v362_v14, 0.0  ;;  %v953_v21 = vpack.c.bf16 %v552_v16, %v552_v16  ;;  %v553_v22 = vmax.f32 %v466_v17, 0.0 }
 0x10a   :  { %773 = vst.msk [vmem:[%s1556_s3 + $0x28] sm:$0xf] %vm762_vm4, %v927_v19  ;;  %v928_v23 = vpack.c.bf16 %v527_v20, %v527_v20  ;;  %799 = vst.msk [vmem:[%s1556_s3 + $0x90] sm:$0xf] %vm762_vm4, %v953_v21  ;;  %v954_v24 = vpack.c.bf16 %v553_v22, %v553_v22 }
 0x10b   :  { %v366_v25 = vpop.f32.mrb[24].mxu0  ;;  %v470_v26 = vpop.f32.mrb[24].mxu1 }
 0x10c   :  { %774 = vst.msk [vmem:[%s1556_s3 + $0x2c] sm:$0xf] %vm762_vm4, %v928_v23  ;;  %v367_v27 = vadd.f32 %v1306_v31, %v366_v25  ;;  %v1020_v28 = vpop.f32.mrb[25].mxu0  ;;  %800 = vst.msk [vmem:[%s1556_s3 + $0x94] sm:$0xf] %vm762_vm4, %v954_v24  ;;  %v471_v29 = vadd.f32 %v1306_v31, %v470_v26  ;;  %v1072_v30 = vpop.f32.mrb[25].mxu1 }
 0x10d   :  { %v369_v32 = vpop.f32.mrb[26].mxu0  ;;  %v473_v33 = vpop.f32.mrb[26].mxu1 }
 0x10e   :  { %v528_v34 = vmax.f32 %v367_v27, 0.0  ;;  %v370_v35 = vadd.f32 %v1306_v31, %v369_v32  ;;  %v1021_v36 = vpop.f32.mrb[27].mxu0  ;;  %v554_v37 = vmax.f32 %v471_v29, 0.0  ;;  %v474_v38 = vadd.f32 %v1306_v31, %v473_v33  ;;  %v1073_v39 = vpop.f32.mrb[27].mxu1 }
 0x110   :  { %v929_v40 = vpack.c.bf16 %v528_v34, %v528_v34  ;;  %v529_v41 = vmax.f32 %v370_v35, 0.0  ;;  %v955_v42 = vpack.c.bf16 %v554_v37, %v554_v37  ;;  %v555_v43 = vmax.f32 %v474_v38, 0.0 }
 0x112   :  { %775 = vst.msk [vmem:[%s1556_s3 + $0x30] sm:$0xf] %vm762_vm4, %v929_v40  ;;  %v930_v44 = vpack.c.bf16 %v529_v41, %v529_v41  ;;  %801 = vst.msk [vmem:[%s1556_s3 + $0x98] sm:$0xf] %vm762_vm4, %v955_v42  ;;  %v956_v45 = vpack.c.bf16 %v555_v43, %v555_v43 }
 0x113   :  { %v374_v46 = vpop.f32.mrb[28].mxu0  ;;  %v478_v47 = vpop.f32.mrb[28].mxu1 }
 0x114   :  { %776 = vst.msk [vmem:[%s1556_s3 + $0x34] sm:$0xf] %vm762_vm4, %v930_v44  ;;  %v375_v48 = vadd.f32 %v1306_v31, %v374_v46  ;;  %v1024_v49 = vpop.f32.mrb[29].mxu0  ;;  %802 = vst.msk [vmem:[%s1556_s3 + $0x9c] sm:$0xf] %vm762_vm4, %v956_v45  ;;  %v479_v50 = vadd.f32 %v1306_v31, %v478_v47  ;;  %v1076_v51 = vpop.f32.mrb[29].mxu1 }
 0x115   :  { %v377_v52 = vpop.f32.mrb[30].mxu0  ;;  %v481_v53 = vpop.f32.mrb[30].mxu1 }
 0x116   :  { %v530_v54 = vmax.f32 %v375_v48, 0.0  ;;  %v378_v55 = vadd.f32 %v1306_v31, %v377_v52  ;;  %v1025_v56 = vpop.f32.mrb[31].mxu0  ;;  %v556_v57 = vmax.f32 %v479_v50, 0.0  ;;  %v482_v58 = vadd.f32 %v1306_v31, %v481_v53  ;;  %v1077_v59 = vpop.f32.mrb[31].mxu1 }
 0x118   :  { %v931_v60 = vpack.c.bf16 %v530_v54, %v530_v54  ;;  %v531_v61 = vmax.f32 %v378_v55, 0.0  ;;  %v957_v62 = vpack.c.bf16 %v556_v57, %v556_v57  ;;  %v557_v63 = vmax.f32 %v482_v58, 0.0 }
 0x11a   :  { %777 = vst.msk [vmem:[%s1556_s3 + $0x38] sm:$0xf] %vm762_vm4, %v931_v60  ;;  %v932_v0 = vpack.c.bf16 %v531_v61, %v531_v61  ;;  %803 = vst.msk [vmem:[%s1556_s3 + $0xa0] sm:$0xf] %vm762_vm4, %v957_v62  ;;  %v958_v1 = vpack.c.bf16 %v557_v63, %v557_v63 }
 0x11b   :  { %v382_v2 = vpop.f32.mrb[32].mxu0  ;;  %v486_v3 = vpop.f32.mrb[32].mxu1 }
 0x11c   :  { %778 = vst.msk [vmem:[%s1556_s3 + $0x3c] sm:$0xf] %vm762_vm4, %v932_v0  ;;  %v383_v4 = vadd.f32 %v1306_v31, %v382_v2  ;;  %v1028_v5 = vpop.f32.mrb[33].mxu0  ;;  %804 = vst.msk [vmem:[%s1556_s3 + $0xa4] sm:$0xf] %vm762_vm4, %v958_v1  ;;  %v487_v6 = vadd.f32 %v1306_v31, %v486_v3  ;;  %v1080_v7 = vpop.f32.mrb[33].mxu1 }
 0x11d   :  { %v385_v8 = vpop.f32.mrb[34].mxu0  ;;  %v489_v9 = vpop.f32.mrb[34].mxu1 }
 0x11e   :  { %v532_v10 = vmax.f32 %v383_v4, 0.0  ;;  %v386_v11 = vadd.f32 %v1306_v31, %v385_v8  ;;  %v1029_v12 = vpop.f32.mrb[35].mxu0  ;;  %v558_v13 = vmax.f32 %v487_v6, 0.0  ;;  %v490_v14 = vadd.f32 %v1306_v31, %v489_v9  ;;  %v1081_v15 = vpop.f32.mrb[35].mxu1 }
 0x120   :  { %v933_v16 = vpack.c.bf16 %v532_v10, %v532_v10  ;;  %v533_v17 = vmax.f32 %v386_v11, 0.0  ;;  %v959_v18 = vpack.c.bf16 %v558_v13, %v558_v13  ;;  %v559_v19 = vmax.f32 %v490_v14, 0.0 }
 0x122   :  { %779 = vst.msk [vmem:[%s1556_s3 + $0x40] sm:$0xf] %vm762_vm4, %v933_v16  ;;  %v934_v20 = vpack.c.bf16 %v533_v17, %v533_v17  ;;  %805 = vst.msk [vmem:[%s1556_s3 + $0xa8] sm:$0xf] %vm762_vm4, %v959_v18  ;;  %v960_v21 = vpack.c.bf16 %v559_v19, %v559_v19 }
 0x123   :  { %v390_v22 = vpop.f32.mrb[36].mxu0  ;;  %v494_v23 = vpop.f32.mrb[36].mxu1 }
 0x124   :  { %780 = vst.msk [vmem:[%s1556_s3 + $0x44] sm:$0xf] %vm762_vm4, %v934_v20  ;;  %v391_v24 = vadd.f32 %v1306_v31, %v390_v22  ;;  %v1032_v25 = vpop.f32.mrb[37].mxu0  ;;  %806 = vst.msk [vmem:[%s1556_s3 + $0xac] sm:$0xf] %vm762_vm4, %v960_v21  ;;  %v495_v26 = vadd.f32 %v1306_v31, %v494_v23  ;;  %v1084_v27 = vpop.f32.mrb[37].mxu1 }
 0x125   :  { %v393_v28 = vpop.f32.mrb[38].mxu0  ;;  %v497_v29 = vpop.f32.mrb[38].mxu1 }
 0x126   :  { %v534_v30 = vmax.f32 %v391_v24, 0.0  ;;  %v394_v32 = vadd.f32 %v1306_v31, %v393_v28  ;;  %v1033_v33 = vpop.f32.mrb[39].mxu0  ;;  %v560_v34 = vmax.f32 %v495_v26, 0.0  ;;  %v498_v35 = vadd.f32 %v1306_v31, %v497_v29  ;;  %v1085_v36 = vpop.f32.mrb[39].mxu1 }
 0x128   :  { %v935_v37 = vpack.c.bf16 %v534_v30, %v534_v30  ;;  %v535_v38 = vmax.f32 %v394_v32, 0.0  ;;  %v961_v39 = vpack.c.bf16 %v560_v34, %v560_v34  ;;  %v561_v40 = vmax.f32 %v498_v35, 0.0 }
 0x12a   :  { %781 = vst.msk [vmem:[%s1556_s3 + $0x48] sm:$0xf] %vm762_vm4, %v935_v37  ;;  %v936_v41 = vpack.c.bf16 %v535_v38, %v535_v38  ;;  %807 = vst.msk [vmem:[%s1556_s3 + $0xb0] sm:$0xf] %vm762_vm4, %v961_v39  ;;  %v962_v42 = vpack.c.bf16 %v561_v40, %v561_v40 }
 0x12b   :  { %v398_v43 = vpop.f32.mrb[40].mxu0  ;;  %v502_v44 = vpop.f32.mrb[40].mxu1 }
 0x12c   :  { %782 = vst.msk [vmem:[%s1556_s3 + $0x4c] sm:$0xf] %vm762_vm4, %v936_v41  ;;  %v399_v45 = vadd.f32 %v1306_v31, %v398_v43  ;;  %v1036_v46 = vpop.f32.mrb[41].mxu0  ;;  %808 = vst.msk [vmem:[%s1556_s3 + $0xb4] sm:$0xf] %vm762_vm4, %v962_v42  ;;  %v503_v47 = vadd.f32 %v1306_v31, %v502_v44  ;;  %v1088_v48 = vpop.f32.mrb[41].mxu1 }
 0x12d   :  { %v401_v49 = vpop.f32.mrb[42].mxu0  ;;  %v505_v50 = vpop.f32.mrb[42].mxu1 }
 0x12e   :  { %v536_v51 = vmax.f32 %v399_v45, 0.0  ;;  %v402_v52 = vadd.f32 %v1306_v31, %v401_v49  ;;  %v1037_v53 = vpop.f32.mrb[43].mxu0  ;;  %v562_v54 = vmax.f32 %v503_v47, 0.0  ;;  %v506_v55 = vadd.f32 %v1306_v31, %v505_v50  ;;  %v1089_v56 = vpop.f32.mrb[43].mxu1 }
 0x130   :  { %v937_v57 = vpack.c.bf16 %v536_v51, %v536_v51  ;;  %v537_v58 = vmax.f32 %v402_v52, 0.0  ;;  %v963_v59 = vpack.c.bf16 %v562_v54, %v562_v54  ;;  %v563_v60 = vmax.f32 %v506_v55, 0.0 }
 0x132   :  { %783 = vst.msk [vmem:[%s1556_s3 + $0x50] sm:$0xf] %vm762_vm4, %v937_v57  ;;  %v938_v61 = vpack.c.bf16 %v537_v58, %v537_v58  ;;  %809 = vst.msk [vmem:[%s1556_s3 + $0xb8] sm:$0xf] %vm762_vm4, %v963_v59  ;;  %v964_v62 = vpack.c.bf16 %v563_v60, %v563_v60 }
 0x133   :  { %v406_v63 = vpop.f32.mrb[44].mxu0  ;;  %v510_v0 = vpop.f32.mrb[44].mxu1 }
 0x134   :  { %784 = vst.msk [vmem:[%s1556_s3 + $0x54] sm:$0xf] %vm762_vm4, %v938_v61  ;;  %v407_v1 = vadd.f32 %v1306_v31, %v406_v63  ;;  %v1040_v2 = vpop.f32.mrb[45].mxu0  ;;  %810 = vst.msk [vmem:[%s1556_s3 + $0xbc] sm:$0xf] %vm762_vm4, %v964_v62  ;;  %v511_v3 = vadd.f32 %v1306_v31, %v510_v0  ;;  %v1092_v4 = vpop.f32.mrb[45].mxu1 }
 0x135   :  { %v409_v5 = vpop.f32.mrb[46].mxu0  ;;  %v513_v6 = vpop.f32.mrb[46].mxu1 }
 0x136   :  { %v538_v7 = vmax.f32 %v407_v1, 0.0  ;;  %v410_v8 = vadd.f32 %v1306_v31, %v409_v5  ;;  %v1041_v9 = vpop.f32.mrb[47].mxu0  ;;  %v564_v10 = vmax.f32 %v511_v3, 0.0  ;;  %v1093_v11 = vpop.f32.mrb[47].mxu1 }
 0x138   :  { %v939_v12 = vpack.c.bf16 %v538_v7, %v538_v7  ;;  %v539_v13 = vmax.f32 %v410_v8, 0.0  ;;  %v965_v14 = vpack.c.bf16 %v564_v10, %v564_v10 }
 0x13a   :  { %785 = vst.msk [vmem:[%s1556_s3 + $0x58] sm:$0xf] %vm762_vm4, %v939_v12  ;;  %v940_v15 = vpack.c.bf16 %v539_v13, %v539_v13  ;;  %811 = vst.msk [vmem:[%s1556_s3 + $0xc0] sm:$0xf] %vm762_vm4, %v965_v14 }
 0x13b   :  { %v414_v16 = vpop.f32.mrb[48].mxu0 }
 0x13c   :  { %786 = vst.msk [vmem:[%s1556_s3 + $0x5c] sm:$0xf] %vm762_vm4, %v940_v15  ;;  %v415_v17 = vadd.f32 %v1306_v31, %v414_v16  ;;  %v1044_v18 = vpop.f32.mrb[49].mxu0 }
 0x13d   :  { %v417_v19 = vpop.f32.mrb[50].mxu0 }
 0x13e   :  { %v540_v20 = vmax.f32 %v415_v17, 0.0  ;;  %v418_v21 = vadd.f32 %v1306_v31, %v417_v19  ;;  %v1045_v22 = vpop.f32.mrb[51].mxu0 }
 0x140   :  { %v941_v23 = vpack.c.bf16 %v540_v20, %v540_v20  ;;  %v541_v24 = vmax.f32 %v418_v21, 0.0 }
 0x142   :  { %787 = vst.msk [vmem:[%s1556_s3 + $0x60] sm:$0xf] %vm762_vm4, %v941_v23  ;;  %v942_v25 = vpack.c.bf16 %v541_v24, %v541_v24 }
 0x144   :  { %788 = vst.msk [vmem:[%s1556_s3 + $0x64] sm:$0xf] %vm762_vm4, %v942_v25 }

// kernel: vae_forward.8
= control target key start
LH: loop header
LB: loop body
LE: loop exit
PB: predicated region body
PF: predicated region fallthrough
CT: control target
= control target key end

     0   :  { %v1281_v34 = vmov 0.0   ;;  %vm1282_vm0 = vmmov 0   ;;  %vm516_vm1 = vcmask 523264   ;;  %s1602_s1 = inlined_call_operand.vmem [shape: bf16[576,128], index: 1, kind: input, shape index: {}]   ;;  %s1603_s0 = inlined_call_operand.vmem [shape: bf16[98,576], index: 0, kind: input, shape index: {}]   ;;  %s1604_s2 = inlined_call_operand.vmem [shape: f32[1,128], index: 2, kind: input, shape index: {}]   ;;  %s1605_s3 = inlined_call_operand.vmem [shape: bf16[98,128], index: 3, kind: output, shape index: {}]  }
   0x1   :  { %v1198_v0 = vld [vmem:[%s1602_s1 + $0x40] sm:$0xff]   ;;  %v1202_v4 = vld [vmem:[%s1602_s1 + $0x48] sm:$0xff]   ;;  %v1206_v8 = vld [vmem:[%s1602_s1 + $0x50] sm:$0xff]  }
   0x2   :  { %v1199_v1 = vld [vmem:[%s1602_s1 + $0xc0] sm:$0xff]   ;;  %1025 = vmatprep.subr.bf16.mxu0 %v1198_v0  ;;  %v1203_v5 = vld [vmem:[%s1602_s1 + $0xc8] sm:$0xff]   ;;  %v1207_v9 = vld [vmem:[%s1602_s1 + $0xd0] sm:$0xff]  }
   0x3   :  { %v1200_v2 = vld [vmem:[%s1602_s1] sm:$0xff]   ;;  %1083 = vmatprep.subr.bf16.mxu1 %v1199_v1  ;;  %v1204_v6 = vld [vmem:[%s1602_s1 + $0x8] sm:$0xff]   ;;  %v1208_v10 = vld [vmem:[%s1602_s1 + $0x10] sm:$0xff]  }
   0x4   :  { %v1201_v3 = vld [vmem:[%s1602_s1 + $0x80] sm:$0xff]   ;;  %1026 = vmatpush3.bf16.msra.mxu0 %v1200_v2  ;;  %v1205_v7 = vld [vmem:[%s1602_s1 + $0x88] sm:$0xff]   ;;  %v1209_v11 = vld [vmem:[%s1602_s1 + $0x90] sm:$0xff]  }
   0x5   :  { %1084 = vmatpush3.bf16.msra.mxu1 %v1201_v3  ;;  %1027 = vmatprep.subr.bf16.mxu0 %v1202_v4  ;;  %v1210_v12 = vld [vmem:[%s1602_s1 + $0x58] sm:$0xff]   ;;  %v1214_v16 = vld [vmem:[%s1602_s1 + $0x60] sm:$0xff]   ;;  %v1218_v20 = vld [vmem:[%s1602_s1 + $0x68] sm:$0xff]  }
   0x6   :  { %1085 = vmatprep.subr.bf16.mxu1 %v1203_v5  ;;  %v1211_v13 = vld [vmem:[%s1602_s1 + $0xd8] sm:$0xff]   ;;  %v1215_v17 = vld [vmem:[%s1602_s1 + $0xe0] sm:$0xff]   ;;  %v1219_v21 = vld [vmem:[%s1602_s1 + $0xe8] sm:$0xff]  }
   0x7   :  { %v1212_v14 = vld [vmem:[%s1602_s1 + $0x18] sm:$0xff]   ;;  %v1216_v18 = vld [vmem:[%s1602_s1 + $0x20] sm:$0xff]   ;;  %v1220_v22 = vld [vmem:[%s1602_s1 + $0x28] sm:$0xff]  }
   0x8   :  { %1028 = vmatpush3.bf16.msra.mxu0 %v1204_v6  ;;  %v1213_v15 = vld [vmem:[%s1602_s1 + $0x98] sm:$0xff]   ;;  %v1217_v19 = vld [vmem:[%s1602_s1 + $0xa0] sm:$0xff]   ;;  %v1221_v23 = vld [vmem:[%s1602_s1 + $0xa8] sm:$0xff]  }
   0x9   :  { %1086 = vmatpush3.bf16.msra.mxu1 %v1205_v7  ;;  %1029 = vmatprep.subr.bf16.mxu0 %v1206_v8  ;;  %v1222_v24 = vld [vmem:[%s1602_s1 + $0x70] sm:$0xff]   ;;  %v1226_v28 = vld [vmem:[%s1602_s1 + $0x78] sm:$0xff]   ;;  %v1235_v36 = vld [vmem:[%s1603_s0 + $0xc] ss:$20 sps:$4 sm:$0xff]  }
   0xa   :  { %1087 = vmatprep.subr.bf16.mxu1 %v1207_v9  ;;  %v1223_v25 = vld [vmem:[%s1602_s1 + $0xf0] sm:$0xff]   ;;  %v1227_v29 = vld [vmem:[%s1602_s1 + $0xf8] sm:$0xff]   ;;  %v1236_v37 = vld [vmem:[%s1602_s1 + $0x100] sm:$0xff]   ;;  %658 = vmatprep.mubr.bf16.mxu1 %v1235_v36 }
   0xb   :  { %v1224_v26 = vld [vmem:[%s1602_s1 + $0x30] sm:$0xff]   ;;  %v1228_v30 = vld [vmem:[%s1602_s1 + $0x38] sm:$0xff]   ;;  %v1237_v38 = vld [vmem:[%s1603_s0 + $0x2c] ss:$20 sps:$4 sm:$0xff]  }
   0xc   :  { %1030 = vmatpush3.bf16.msra.mxu0 %v1208_v10  ;;  %v1225_v27 = vld [vmem:[%s1602_s1 + $0xb0] sm:$0xff]   ;;  %v1229_v31 = vld [vmem:[%s1602_s1 + $0xb8] sm:$0xff]   ;;  %v1247_v43 = vld [vmem:[%s1602_s1 + $0x108] sm:$0xff]  }
   0xd   :  { %1088 = vmatpush3.bf16.msra.mxu1 %v1209_v11  ;;  %1031 = vmatprep.subr.bf16.mxu0 %v1210_v12  ;;  %v1230_v32 = vld [vmem:[%s1603_s0] ss:$20 sps:$4 sm:$0xff]   ;;  %v1232_v33 = vld [vmem:[%s1603_s0 + $0x4] ss:$20 sps:$4 sm:$0xff]   ;;  %v1233_v35 = vld [vmem:[%s1603_s0 + $0x8] ss:$20 sps:$4 sm:$0xff]  }
   0xe   :  { %1089 = vmatprep.subr.bf16.mxu1 %v1211_v13  ;;  %570 = vmatprep.mubr.bf16.mxu0 %v1232_v33  ;;  %v1239_v39 = vld [vmem:[%s1603_s0 + $0x34] ss:$20 sps:$4 sm:$0xff]   ;;  %v1242_v41 = vld [vmem:[%s1603_s0 + $0x30] ss:$20 sps:$4 sm:$0xff]   ;;  %v1249_v47 = vld [vmem:[%s1603_s0 + $0x58] ss:$20 sps:$4 sm:$0xff]  }
   0xf   :  { %v1241_v40 = vld [vmem:[%s1603_s0 + $0x28] ss:$20 sps:$4 sm:$0xff]   ;;  %v1256_v45 = vld [vmem:[%s1602_s1 + $0x110] sm:$0xff]   ;;  %v1252_v49 = vld [vmem:[%s1603_s0 + $0x84] ss:$20 sps:$4 sm:$0xff]  }
  0x10   :  { %1032 = vmatpush3.bf16.msra.mxu0 %v1212_v14  ;;  %v1243_v42 = vld [vmem:[%s1603_s0 + $0x54] ss:$20 sps:$4 sm:$0xff]   ;;  %v1245_v44 = vld [vmem:[%s1603_s0 + $0x5c] ss:$20 sps:$4 sm:$0xff]   ;;  %v1254_v51 = vld [vmem:[%s1603_s0 + $0x78] ss:$20 sps:$4 sm:$0xff]  }
  0x11   :  { %1090 = vmatpush3.bf16.msra.mxu1 %v1213_v15  ;;  %1033 = vmatprep.subr.bf16.mxu0 %v1214_v16  ;;  %v1248_v46 = vld [vmem:[%s1603_s0 + $0x50] ss:$20 sps:$4 sm:$0xff]   ;;  %v1269_v50 = vld [vmem:[%s1602_s1 + $0x118] sm:$0xff]   ;;  %v1255_v52 = vld [vmem:[%s1603_s0 + $0x80] ss:$20 sps:$4 sm:$0xff]  }
  0x12   :  { %1091 = vmatprep.subr.bf16.mxu1 %v1215_v17  ;;  %v1250_v48 = vld [vmem:[%s1603_s0 + $0x7c] ss:$20 sps:$4 sm:$0xff]   ;;  %v1257_v53 = vld [vmem:[%s1603_s0 + $0xa4] ss:$20 sps:$4 sm:$0xff]   ;;  %v1259_v54 = vld [vmem:[%s1603_s0 + $0xac] ss:$20 sps:$4 sm:$0xff]  }
  0x13   :  { %v1261_v55 = vld [vmem:[%s1603_s0 + $0xa0] ss:$20 sps:$4 sm:$0xff]   ;;  %v1262_v56 = vld [vmem:[%s1603_s0 + $0xa8] ss:$20 sps:$4 sm:$0xff]   ;;  %v1268_v62 = vld [vmem:[%s1603_s0 + $0xd0] ss:$20 sps:$4 sm:$0xff]  }
  0x14   :  { %1034 = vmatpush3.bf16.msra.mxu0 %v1216_v18  ;;  %v1263_v57 = vld [vmem:[%s1603_s0 + $0xcc] ss:$20 sps:$4 sm:$0xff]   ;;  %v1265_v58 = vld [vmem:[%s1603_s0 + $0xd4] ss:$20 sps:$4 sm:$0xff]   ;;  %v52_v60 = vld [vmem:[%s1603_s0 + $0xf8] sm:$0x11] }
  0x15   :  { %1092 = vmatpush3.bf16.msra.mxu1 %v1217_v19  ;;  %1035 = vmatprep.subr.bf16.mxu0 %v1218_v20  ;;  %v51_v59 = vld [vmem:[%s1603_s0 + $0xf0] sm:$0x11]  ;;  %v1267_v61 = vld [vmem:[%s1603_s0 + $0xc8] ss:$20 sps:$4 sm:$0xff]   ;;  %v919_v0 = vcombine.high %v52_v60, %v52_v60  ;;  %v918_v2 = vcombine.low %v52_v60, %v52_v60  ;;  %v1276_v5 = vld [vmem:[%s1603_s0 + $0x38] ss:$20 sps:$4 sm:$0xff]  }
  0x16   :  { %1093 = vmatprep.subr.bf16.mxu1 %v1219_v21  ;;  %v917_v63 = vcombine.high %v51_v59, %v51_v59  ;;  %v916_v1 = vcombine.low %v51_v59, %v51_v59  ;;  %v1274_v3 = vld [vmem:[%s1603_s0 + $0x10] ss:$20 sps:$4 sm:$0xff]   ;;  %v1277_v6 = vld [vmem:[%s1603_s0 + $0xd8] ss:$20 sps:$4 sm:$0xff]   ;;  %v1278_v7 = vld [vmem:[%s1603_s0 + $0x60] ss:$20 sps:$4 sm:$0xff]  }
  0x17   :  { %v1275_v4 = vld [vmem:[%s1603_s0 + $0xb0] ss:$20 sps:$4 sm:$0xff]   ;;  %v1279_v8 = vld [vmem:[%s1603_s0 + $0x100] ss:$0 sps:$4 sm:$0x11]  }
  0x18   :  { %1036 = vmatpush3.bf16.msra.mxu0 %v1220_v22  ;;  %v1280_v9 = vld [vmem:[%s1603_s0 + $0x88] ss:$20 sps:$4 sm:$0xff]   ;;  %v1542_v11 = vld [vmem:[%s1604_s2] ss:$0 sm:$0xff] }
  0x19   :  { %1094 = vmatpush3.bf16.msra.mxu1 %v1221_v23  ;;  %1037 = vmatprep.subr.bf16.mxu0 %v1222_v24 }
  0x1a   :  { %1095 = vmatprep.subr.bf16.mxu1 %v1223_v25 }
  0x1c   :  { %1038 = vmatpush3.bf16.msra.mxu0 %v1224_v26 }
  0x1d   :  { %1096 = vmatpush3.bf16.msra.mxu1 %v1225_v27  ;;  %1039 = vmatprep.subr.bf16.mxu0 %v1226_v28 }
  0x1e   :  { %1097 = vmatprep.subr.bf16.mxu1 %v1227_v29 }
  0x20   :  { %1040 = vmatpush3.bf16.msra.mxu0 %v1228_v30 }
  0x21   :  { %1098 = vmatpush3.bf16.msra.mxu1 %v1229_v31  ;;  %1152 = vmatprep.subr.bf16.mxu0 %v1281_v34 }
  0x22   :  { %1188 = vmatprep.subr.bf16.mxu1 %v1281_v34 }
  0x23   :  { %571 = vmatmul.mubr.bf16.vlgmr.msra.gmra.mrb[0].mxu0 %v1230_v32 }
  0x24   :  { %659 = vmatmul.mubr.bf16.vlgmr.msra.gmra.mrb[0].mxu1 %v1233_v35  ;;  %1153 = vmatpush3.bf16.msra.mxu0 %v1236_v37 }
  0x25   :  { %578 = vmatprep.mubr.bf16.mxu0 %v1237_v38  ;;  %1192 = vmatpush3.bf16.msra.mxu1 %v1236_v37 }
  0x26   :  { %666 = vmatprep.mubr.bf16.mxu1 %v1239_v39  ;;  %1154 = vmatprep.subr.bf16.mxu0 %v1281_v34 }
  0x27   :  { %1189 = vmatprep.subr.bf16.mxu1 %v1281_v34 }
  0x28   :  { %1155 = vmatpush3.bf16.msra.mxu0 %v1247_v43 }
  0x29   :  { %1193 = vmatpush3.bf16.msra.mxu1 %v1247_v43  ;;  %1156 = vmatprep.subr.bf16.mxu0 %v1281_v34 }
  0x2a   :  { %1190 = vmatprep.subr.bf16.mxu1 %v1281_v34 }
  0x2b   :  { %579 = vmatmul.mubr.bf16.gmra.mrb[4].mxu0 %v1241_v40 }
  0x2c   :  { %667 = vmatmul.mubr.bf16.gmra.mrb[4].mxu1 %v1242_v41  ;;  %586 = vmatprep.mubr.bf16.mxu0 %v1243_v42 }
  0x2d   :  { %674 = vmatprep.mubr.bf16.mxu1 %v1245_v44  ;;  %1157 = vmatpush3.bf16.msra.mxu0 %v1256_v45 }
  0x2e   :  { %1194 = vmatpush3.bf16.msra.mxu1 %v1256_v45  ;;  %1158 = vmatprep.subr.bf16.mxu0 %v1281_v34 }
  0x2f   :  { %1191 = vmatprep.subr.bf16.mxu1 %v1281_v34 }
  0x31   :  { %1159 = vmatpush3.bf16.msra.mxu0 %v1269_v50 }
  0x32   :  { %1195 = vmatpush3.bf16.msra.mxu1 %v1269_v50 }
  0x33   :  { %587 = vmatmul.mubr.bf16.gmra.mrb[8].mxu0 %v1248_v46 }
  0x34   :  { %675 = vmatmul.mubr.bf16.gmra.mrb[8].mxu1 %v1249_v47  ;;  %594 = vmatprep.mubr.bf16.mxu0 %v1250_v48 }
  0x35   :  { %682 = vmatprep.mubr.bf16.mxu1 %v1252_v49 }
  0x3b   :  { %595 = vmatmul.mubr.bf16.gmra.mrb[12].mxu0 %v1254_v51 }
  0x3c   :  { %683 = vmatmul.mubr.bf16.gmra.mrb[12].mxu1 %v1255_v52  ;;  %602 = vmatprep.mubr.bf16.mxu0 %v1257_v53 }
  0x3d   :  { %690 = vmatprep.mubr.bf16.mxu1 %v1259_v54 }
  0x43   :  { %603 = vmatmul.mubr.bf16.gmra.mrb[16].mxu0 %v1261_v55 }
  0x44   :  { %691 = vmatmul.mubr.bf16.gmra.mrb[16].mxu1 %v1262_v56  ;;  %610 = vmatprep.mubr.bf16.mxu0 %v1263_v57 }
  0x45   :  { %698 = vmatprep.mubr.bf16.mxu1 %v1265_v58 }
  0x4b   :  { %611 = vmatmul.mubr.bf16.gmra.mrb[20].mxu0 %v1267_v61 }
  0x4c   :  { %699 = vmatmul.mubr.bf16.gmra.mrb[20].mxu1 %v1268_v62  ;;  %618 = vmatprep.mubr.bf16.mxu0 %v917_v63 }
  0x4d   :  { %706 = vmatprep.mubr.bf16.mxu1 %v919_v0 }
  0x53   :  { %619 = vmatmul.mubr.bf16.gmra.mrb[24].mxu0 %v916_v1 }
  0x54   :  { %707 = vmatmul.mubr.bf16.gmra.mrb[24].mxu1 %v918_v2  ;;  %1160 = vmatprep.mubr.msk.bf16.mxu0 %vm1282_vm0, %v1281_v34 }
  0x55   :  { %1176 = vmatprep.mubr.msk.bf16.mxu1 %vm1282_vm0, %v1281_v34 }
  0x5b   :  { %1161 = vmatmul.mubr.msk.bf16.vlgmr.msra.gmra.mrb[28].mxu0 %vm516_vm1, %v1274_v3 }
  0x5c   :  { %1177 = vmatmul.mubr.msk.bf16.vlgmr.msra.gmra.mrb[28].mxu1 %vm516_vm1, %v1275_v4  ;;  %1164 = vmatprep.mubr.msk.bf16.mxu0 %vm1282_vm0, %v1281_v34 }
  0x5d   :  { %1180 = vmatprep.mubr.msk.bf16.mxu1 %vm1282_vm0, %v1281_v34 }
  0x63   :  { %1165 = vmatmul.mubr.msk.bf16.gmra.mrb[32].mxu0 %vm516_vm1, %v1276_v5 }
  0x64   :  { %1181 = vmatmul.mubr.msk.bf16.gmra.mrb[32].mxu1 %vm516_vm1, %v1277_v6  ;;  %1168 = vmatprep.mubr.msk.bf16.mxu0 %vm1282_vm0, %v1281_v34 }
  0x65   :  { %1184 = vmatprep.mubr.msk.bf16.mxu1 %vm1282_vm0, %v1281_v34 }
  0x6b   :  { %1169 = vmatmul.mubr.msk.bf16.gmra.mrb[36].mxu0 %vm516_vm1, %v1278_v7 }
  0x6c   :  { %1185 = vmatmul.mubr.msk.bf16.gmra.mrb[36].mxu1 %vm516_vm1, %v1279_v8  ;;  %1172 = vmatprep.mubr.msk.bf16.mxu0 %vm1282_vm0, %v1281_v34 }
  0x73   :  { %1173 = vmatmul.mubr.msk.bf16.gmra.mrb[40].mxu0 %vm516_vm1, %v1280_v9 }
  0xf6   :  { %v1041_v10 = vpop.f32.mrb[0].mxu0 }
  0xf7   :  { %v1042_v12 = vpop.f32.mrb[1].mxu0  ;;  %v1099_v13 = vpop.f32.mrb[0].mxu1 }
  0xf8   :  { %v1043_v14 = vadd.f32 %v1042_v12, %v1041_v10  ;;  %v1044_v15 = vpop.f32.mrb[2].mxu0  ;;  %v1100_v16 = vpop.f32.mrb[1].mxu1 }
  0xf9   :  { %v1045_v17 = vpop.f32.mrb[3].mxu0  ;;  %v1101_v18 = vadd.f32 %v1100_v16, %v1099_v13  ;;  %v1102_v19 = vpop.f32.mrb[2].mxu1 }
  0xfa   :  { %v573_v20 = vadd.f32 %v1043_v14, %v1542_v11  ;;  %v1046_v21 = vadd.f32 %v1045_v17, %v1044_v15  ;;  %v1103_v22 = vpop.f32.mrb[3].mxu1 }
  0xfb   :  { %v1104_v23 = vadd.f32 %v1103_v22, %v1102_v19 }
  0xfc   :  { %v576_v24 = vadd.f32 %v1046_v21, %v1542_v11  ;;  %v1546_v25 = vadd.f32 %v1101_v18, %v573_v20 }
  0xfe   :  { %v1047_v26 = vpop.f32.mrb[4].mxu0  ;;  %v1548_v27 = vadd.f32 %v1104_v23, %v576_v24 }
  0xff   :  { %v1048_v28 = vpop.f32.mrb[5].mxu0  ;;  %v1105_v29 = vpop.f32.mrb[4].mxu1 }
 0x100   :  { %v1049_v30 = vadd.f32 %v1048_v28, %v1047_v26  ;;  %v1050_v31 = vpop.f32.mrb[6].mxu0  ;;  %v1106_v32 = vpop.f32.mrb[5].mxu1 }
 0x101   :  { %v1051_v33 = vpop.f32.mrb[7].mxu0  ;;  %v1107_v34 = vadd.f32 %v1106_v32, %v1105_v29  ;;  %v1108_v35 = vpop.f32.mrb[6].mxu1 }
 0x102   :  { %v581_v36 = vadd.f32 %v1049_v30, %v1542_v11  ;;  %v1052_v37 = vadd.f32 %v1051_v33, %v1050_v31  ;;  %v1109_v38 = vpop.f32.mrb[7].mxu1 }
 0x103   :  { %v1110_v39 = vadd.f32 %v1109_v38, %v1108_v35 }
 0x104   :  { %v584_v40 = vadd.f32 %v1052_v37, %v1542_v11  ;;  %v1552_v41 = vadd.f32 %v1107_v34, %v581_v36 }
 0x106   :  { %v1053_v42 = vpop.f32.mrb[8].mxu0  ;;  %v1554_v43 = vadd.f32 %v1110_v39, %v584_v40 }
 0x107   :  { %v1054_v44 = vpop.f32.mrb[9].mxu0  ;;  %v1111_v45 = vpop.f32.mrb[8].mxu1 }
 0x108   :  { %v1055_v46 = vadd.f32 %v1054_v44, %v1053_v42  ;;  %v1056_v47 = vpop.f32.mrb[10].mxu0  ;;  %v1112_v48 = vpop.f32.mrb[9].mxu1 }
 0x109   :  { %v1057_v49 = vpop.f32.mrb[11].mxu0  ;;  %v1113_v50 = vadd.f32 %v1112_v48, %v1111_v45  ;;  %v1114_v51 = vpop.f32.mrb[10].mxu1 }
 0x10a   :  { %v589_v52 = vadd.f32 %v1055_v46, %v1542_v11  ;;  %v1058_v53 = vadd.f32 %v1057_v49, %v1056_v47  ;;  %v1115_v54 = vpop.f32.mrb[11].mxu1 }
 0x10b   :  { %v1116_v55 = vadd.f32 %v1115_v54, %v1114_v51 }
 0x10c   :  { %v592_v56 = vadd.f32 %v1058_v53, %v1542_v11  ;;  %v1558_v57 = vadd.f32 %v1113_v50, %v589_v52 }
 0x10e   :  { %v1059_v58 = vpop.f32.mrb[12].mxu0  ;;  %v1560_v59 = vadd.f32 %v1116_v55, %v592_v56 }
 0x10f   :  { %v1060_v60 = vpop.f32.mrb[13].mxu0  ;;  %v1117_v61 = vpop.f32.mrb[12].mxu1 }
 0x110   :  { %v1061_v62 = vadd.f32 %v1060_v60, %v1059_v58  ;;  %v1062_v63 = vpop.f32.mrb[14].mxu0  ;;  %v1118_v0 = vpop.f32.mrb[13].mxu1 }
 0x111   :  { %v1063_v1 = vpop.f32.mrb[15].mxu0  ;;  %v1119_v2 = vadd.f32 %v1118_v0, %v1117_v61  ;;  %v1120_v3 = vpop.f32.mrb[14].mxu1 }
 0x112   :  { %v597_v4 = vadd.f32 %v1061_v62, %v1542_v11  ;;  %v1064_v5 = vadd.f32 %v1063_v1, %v1062_v63  ;;  %v1121_v6 = vpop.f32.mrb[15].mxu1 }
 0x113   :  { %v1122_v7 = vadd.f32 %v1121_v6, %v1120_v3 }
 0x114   :  { %v600_v8 = vadd.f32 %v1064_v5, %v1542_v11  ;;  %v1564_v9 = vadd.f32 %v1119_v2, %v597_v4 }
 0x116   :  { %v1065_v10 = vpop.f32.mrb[16].mxu0  ;;  %v1566_v12 = vadd.f32 %v1122_v7, %v600_v8 }
 0x117   :  { %v1066_v13 = vpop.f32.mrb[17].mxu0  ;;  %v1123_v14 = vpop.f32.mrb[16].mxu1 }
 0x118   :  { %v1067_v15 = vadd.f32 %v1066_v13, %v1065_v10  ;;  %v1068_v16 = vpop.f32.mrb[18].mxu0  ;;  %v1124_v17 = vpop.f32.mrb[17].mxu1 }
 0x119   :  { %v1069_v18 = vpop.f32.mrb[19].mxu0  ;;  %v1125_v19 = vadd.f32 %v1124_v17, %v1123_v14  ;;  %v1126_v20 = vpop.f32.mrb[18].mxu1 }
 0x11a   :  { %v605_v21 = vadd.f32 %v1067_v15, %v1542_v11  ;;  %v1070_v22 = vadd.f32 %v1069_v18, %v1068_v16  ;;  %v1127_v23 = vpop.f32.mrb[19].mxu1 }
 0x11b   :  { %v1128_v24 = vadd.f32 %v1127_v23, %v1126_v20 }
 0x11c   :  { %v608_v26 = vadd.f32 %v1070_v22, %v1542_v11  ;;  %v693_v28 = vadd.f32 %v1125_v19, %v605_v21 }
 0x11e   :  { %v1071_v29 = vpop.f32.mrb[20].mxu0  ;;  %v696_v30 = vadd.f32 %v1128_v24, %v608_v26 }
 0x11f   :  { %v1072_v31 = vpop.f32.mrb[21].mxu0  ;;  %v1129_v32 = vpop.f32.mrb[20].mxu1 }
 0x120   :  { %v1073_v33 = vadd.f32 %v1072_v31, %v1071_v29  ;;  %v1074_v34 = vpop.f32.mrb[22].mxu0  ;;  %v1130_v35 = vpop.f32.mrb[21].mxu1 }
 0x121   :  { %v1075_v36 = vpop.f32.mrb[23].mxu0  ;;  %v1131_v37 = vadd.f32 %v1130_v35, %v1129_v32  ;;  %v1132_v38 = vpop.f32.mrb[22].mxu1 }
 0x122   :  { %v613_v39 = vadd.f32 %v1073_v33, %v1542_v11  ;;  %v1076_v40 = vadd.f32 %v1075_v36, %v1074_v34  ;;  %v1133_v42 = vpop.f32.mrb[23].mxu1 }
 0x123   :  { %v1134_v44 = vadd.f32 %v1133_v42, %v1132_v38 }
 0x124   :  { %v616_v45 = vadd.f32 %v1076_v40, %v1542_v11  ;;  %v701_v46 = vadd.f32 %v1131_v37, %v613_v39 }
 0x126   :  { %v1077_v47 = vpop.f32.mrb[24].mxu0  ;;  %v704_v48 = vadd.f32 %v1134_v44, %v616_v45 }
 0x127   :  { %v1078_v49 = vpop.f32.mrb[25].mxu0  ;;  %v1135_v50 = vpop.f32.mrb[24].mxu1 }
 0x128   :  { %v1079_v51 = vadd.f32 %v1078_v49, %v1077_v47  ;;  %v1080_v52 = vpop.f32.mrb[26].mxu0  ;;  %v1136_v53 = vpop.f32.mrb[25].mxu1 }
 0x129   :  { %v1081_v54 = vpop.f32.mrb[27].mxu0  ;;  %v1137_v55 = vadd.f32 %v1136_v53, %v1135_v50  ;;  %v1138_v56 = vpop.f32.mrb[26].mxu1 }
 0x12a   :  { %v621_v58 = vadd.f32 %v1079_v51, %v1542_v11  ;;  %v1139_v60 = vpop.f32.mrb[27].mxu1 }
 0x12c   :  { %v709_v61 = vadd.f32 %v1137_v55, %v621_v58 }
 0x12e   :  { %v748_v62 = vpop.f32.mrb[28].mxu0 }
 0x12f   :  { %v749_v63 = vadd.f32 %v748_v62, %v1546_v25  ;;  %v780_v0 = vpop.f32.mrb[28].mxu1  ;;  %v1162_v1 = vpop.f32.mrb[29].mxu0 }
 0x130   :  { %v781_v2 = vadd.f32 %v780_v0, %v693_v28  ;;  %v1178_v3 = vpop.f32.mrb[29].mxu1  ;;  %v751_v4 = vpop.f32.mrb[30].mxu0 }
 0x131   :  { %v752_v5 = vadd.f32 %v751_v4, %v1548_v27  ;;  %v783_v6 = vpop.f32.mrb[30].mxu1  ;;  %v1163_v7 = vpop.f32.mrb[31].mxu0  ;;  %v802_v13 = vmax.f32 %v749_v63, 0.0 }
 0x132   :  { %v784_v8 = vadd.f32 %v783_v6, %v696_v30  ;;  %v1179_v10 = vpop.f32.mrb[31].mxu1  ;;  %v810_v15 = vmax.f32 %v781_v2, 0.0 }
 0x133   :  { %v803_v14 = vmax.f32 %v752_v5, 0.0 }
 0x134   :  { %v811_v11 = vmax.f32 %v784_v8, 0.0 }
 0x135   :  { %v993_v16 = vpack.c.bf16 %v803_v14, %v802_v13 }
 0x136   :  { %v1013_v17 = vpack.c.bf16 %v811_v11, %v810_v15  ;;  %v756_v18 = vpop.f32.mrb[32].mxu0 }
 0x137   :  { %994 = vst [vmem:[%s1605_s3] sm:$0xff] %v993_v16   ;;  %v757_v25 = vadd.f32 %v756_v18, %v1552_v41  ;;  %v788_v19 = vpop.f32.mrb[32].mxu1  ;;  %v1166_v20 = vpop.f32.mrb[33].mxu0 }
 0x138   :  { %1023 = vst [vmem:[%s1605_s3 + $0x20] sm:$0xff] %v1013_v17   ;;  %v789_v27 = vadd.f32 %v788_v19, %v701_v46  ;;  %v1182_v21 = vpop.f32.mrb[33].mxu1  ;;  %v759_v22 = vpop.f32.mrb[34].mxu0 }
 0x139   :  { %v760_v23 = vadd.f32 %v759_v22, %v1554_v43  ;;  %v791_v24 = vpop.f32.mrb[34].mxu1  ;;  %v1167_v26 = vpop.f32.mrb[35].mxu0  ;;  %v804_v30 = vmax.f32 %v757_v25, 0.0 }
 0x13a   :  { %v792_v28 = vadd.f32 %v791_v24, %v704_v48  ;;  %v1183_v29 = vpop.f32.mrb[35].mxu1  ;;  %v812_v32 = vmax.f32 %v789_v27, 0.0 }
 0x13b   :  { %v805_v31 = vmax.f32 %v760_v23, 0.0 }
 0x13c   :  { %v813_v33 = vmax.f32 %v792_v28, 0.0 }
 0x13d   :  { %v998_v41 = vpack.c.bf16 %v805_v31, %v804_v30 }
 0x13e   :  { %v1018_v34 = vpack.c.bf16 %v813_v33, %v812_v32  ;;  %v764_v35 = vpop.f32.mrb[36].mxu0 }
 0x13f   :  { %1020 = vst [vmem:[%s1605_s3 + $0x8] sm:$0xff] %v998_v41   ;;  %v765_v36 = vadd.f32 %v764_v35, %v1558_v57  ;;  %v796_v37 = vpop.f32.mrb[36].mxu1  ;;  %v1170_v38 = vpop.f32.mrb[37].mxu0 }
 0x140   :  { %1024 = vst [vmem:[%s1605_s3 + $0x28] sm:$0xff] %v1018_v34   ;;  %v797_v43 = vadd.f32 %v796_v37, %v709_v61  ;;  %v767_v39 = vpop.f32.mrb[38].mxu0  ;;  %v1186_v40 = vpop.f32.mrb[37].mxu1 }
 0x141   :  { %v768_v42 = vadd.f32 %v767_v39, %v1560_v59  ;;  %v1171_v44 = vpop.f32.mrb[39].mxu0  ;;  %v799_v45 = vpop.f32.mrb[38].mxu1  ;;  %v806_v48 = vmax.f32 %v765_v36, 0.0 }
 0x142   :  { %v814_v46 = vmax.f32 %v797_v43, 0.0  ;;  %v1187_v47 = vpop.f32.mrb[39].mxu1 }
 0x143   :  { %v807_v49 = vmax.f32 %v768_v42, 0.0 }
 0x144   :  { %v989_v50 = vpack.c.bf16 %v814_v46, %v814_v46 }
 0x145   :  { %v1003_v51 = vpack.c.bf16 %v807_v49, %v806_v48 }
 0x146   :  { %880 = vst [vmem:[%s1605_s3 + $0x30] sm:$0x1] %v989_v50  ;;  %v772_v57 = vpop.f32.mrb[40].mxu0 }
 0x147   :  { %1021 = vst [vmem:[%s1605_s3 + $0x10] sm:$0xff] %v1003_v51   ;;  %v773_v52 = vadd.f32 %v772_v57, %v1564_v9  ;;  %v1174_v59 = vpop.f32.mrb[41].mxu0 }
 0x148   :  { %v775_v53 = vpop.f32.mrb[42].mxu0 }
 0x149   :  { %v776_v54 = vadd.f32 %v775_v53, %v1566_v12  ;;  %v1175_v55 = vpop.f32.mrb[43].mxu0  ;;  %v808_v56 = vmax.f32 %v773_v52, 0.0 }
 0x14b   :  { %v809_v58 = vmax.f32 %v776_v54, 0.0 }
 0x14d   :  { %v1008_v60 = vpack.c.bf16 %v809_v58, %v808_v56 }
 0x14f   :  { %1022 = vst [vmem:[%s1605_s3 + $0x18] sm:$0xff] %v1008_v60  }

// kernel: vae_forward.9
= control target key start
LH: loop header
LB: loop body
LE: loop exit
PB: predicated region body
PF: predicated region fallthrough
CT: control target
= control target key end

     0   :  { %s2299_s1 = inlined_call_operand.vmem [shape: bf16[1152,256], index: 1, kind: input, shape index: {}]   ;;  %s2300_s0 = inlined_call_operand.vmem [shape: bf16[32,1152], index: 0, kind: input, shape index: {}]   ;;  %s2301_s2 = inlined_call_operand.vmem [shape: f32[1,256], index: 2, kind: input, shape index: {}]   ;;  %s2302_s3 = inlined_call_operand.vmem [shape: bf16[32,256], index: 3, kind: output, shape index: {}]  }
   0x1   :  { %v1535_v0 = vld [vmem:[%s2299_s1 + $0x4] ss:$8 sps:$4 sm:$0xff]   ;;  %v1539_v2 = vld [vmem:[%s2299_s1] ss:$8 sps:$4 sm:$0xff]   ;;  %v1541_v4 = vld [vmem:[%s2299_s1 + $0x14] ss:$8 sps:$4 sm:$0xff]  }
   0x2   :  { %v1537_v1 = vld [vmem:[%s2299_s1 + $0x204] ss:$8 sps:$4 sm:$0xff]   ;;  %1003 = vmatprep.subr.bf16.mxu1 %v1535_v0  ;;  %v1540_v3 = vld [vmem:[%s2299_s1 + $0x200] ss:$8 sps:$4 sm:$0xff]   ;;  %v1543_v5 = vld [vmem:[%s2299_s1 + $0x214] ss:$8 sps:$4 sm:$0xff]  }
   0x3   :  { %1109 = vmatprep.subr.bf16.mxu0 %v1537_v1  ;;  %1004 = vmatpush1.bf16.msra.mxu1 %v1539_v2  ;;  %v1545_v6 = vld [vmem:[%s2299_s1 + $0x10] ss:$8 sps:$4 sm:$0xff]   ;;  %v1547_v8 = vld [vmem:[%s2299_s1 + $0x24] ss:$8 sps:$4 sm:$0xff]   ;;  %v1551_v10 = vld [vmem:[%s2299_s1 + $0x20] ss:$8 sps:$4 sm:$0xff]  }
   0x4   :  { %1110 = vmatpush1.bf16.msra.mxu0 %v1540_v3  ;;  %1005 = vmatprep.subr.bf16.mxu1 %v1541_v4  ;;  %v1546_v7 = vld [vmem:[%s2299_s1 + $0x210] ss:$8 sps:$4 sm:$0xff]   ;;  %v1549_v9 = vld [vmem:[%s2299_s1 + $0x224] ss:$8 sps:$4 sm:$0xff]   ;;  %v1552_v11 = vld [vmem:[%s2299_s1 + $0x220] ss:$8 sps:$4 sm:$0xff]  }
   0x5   :  { %1111 = vmatprep.subr.bf16.mxu0 %v1543_v5  ;;  %v1553_v12 = vld [vmem:[%s2299_s1 + $0x34] ss:$8 sps:$4 sm:$0xff]   ;;  %v1557_v14 = vld [vmem:[%s2299_s1 + $0x30] ss:$8 sps:$4 sm:$0xff]   ;;  %v1559_v16 = vld [vmem:[%s2299_s1 + $0x44] ss:$8 sps:$4 sm:$0xff]  }
   0x6   :  { %v1555_v13 = vld [vmem:[%s2299_s1 + $0x234] ss:$8 sps:$4 sm:$0xff]   ;;  %v1558_v15 = vld [vmem:[%s2299_s1 + $0x230] ss:$8 sps:$4 sm:$0xff]   ;;  %v1561_v17 = vld [vmem:[%s2299_s1 + $0x244] ss:$8 sps:$4 sm:$0xff]  }
   0x7   :  { %1006 = vmatpush1.bf16.msra.mxu1 %v1545_v6  ;;  %v1563_v18 = vld [vmem:[%s2299_s1 + $0x40] ss:$8 sps:$4 sm:$0xff]   ;;  %v1565_v20 = vld [vmem:[%s2299_s1 + $0x54] ss:$8 sps:$4 sm:$0xff]   ;;  %v1569_v22 = vld [vmem:[%s2299_s1 + $0x50] ss:$8 sps:$4 sm:$0xff]  }
   0x8   :  { %1112 = vmatpush1.bf16.msra.mxu0 %v1546_v7  ;;  %1007 = vmatprep.subr.bf16.mxu1 %v1547_v8  ;;  %v1564_v19 = vld [vmem:[%s2299_s1 + $0x240] ss:$8 sps:$4 sm:$0xff]   ;;  %v1567_v21 = vld [vmem:[%s2299_s1 + $0x254] ss:$8 sps:$4 sm:$0xff]   ;;  %v1570_v23 = vld [vmem:[%s2299_s1 + $0x250] ss:$8 sps:$4 sm:$0xff]  }
   0x9   :  { %1113 = vmatprep.subr.bf16.mxu0 %v1549_v9  ;;  %v1571_v24 = vld [vmem:[%s2299_s1 + $0x64] ss:$8 sps:$4 sm:$0xff]   ;;  %v1575_v26 = vld [vmem:[%s2299_s1 + $0x60] ss:$8 sps:$4 sm:$0xff]   ;;  %v1577_v28 = vld [vmem:[%s2299_s1 + $0x74] ss:$8 sps:$4 sm:$0xff]  }
   0xa   :  { %v1573_v25 = vld [vmem:[%s2299_s1 + $0x264] ss:$8 sps:$4 sm:$0xff]   ;;  %v1576_v27 = vld [vmem:[%s2299_s1 + $0x260] ss:$8 sps:$4 sm:$0xff]   ;;  %v1579_v29 = vld [vmem:[%s2299_s1 + $0x274] ss:$8 sps:$4 sm:$0xff]  }
   0xb   :  { %1008 = vmatpush1.bf16.msra.mxu1 %v1551_v10  ;;  %v1581_v30 = vld [vmem:[%s2299_s1 + $0x70] ss:$8 sps:$4 sm:$0xff]   ;;  %v1583_v32 = vld [vmem:[%s2299_s1 + $0x84] ss:$8 sps:$4 sm:$0xff]   ;;  %v1587_v34 = vld [vmem:[%s2299_s1 + $0x80] ss:$8 sps:$4 sm:$0xff]  }
   0xc   :  { %1114 = vmatpush1.bf16.msra.mxu0 %v1552_v11  ;;  %1009 = vmatprep.subr.bf16.mxu1 %v1553_v12  ;;  %v1582_v31 = vld [vmem:[%s2299_s1 + $0x270] ss:$8 sps:$4 sm:$0xff]   ;;  %v1585_v33 = vld [vmem:[%s2299_s1 + $0x284] ss:$8 sps:$4 sm:$0xff]   ;;  %v1588_v35 = vld [vmem:[%s2299_s1 + $0x280] ss:$8 sps:$4 sm:$0xff]  }
   0xd   :  { %1115 = vmatprep.subr.bf16.mxu0 %v1555_v13  ;;  %v1589_v36 = vld [vmem:[%s2299_s1 + $0x94] ss:$8 sps:$4 sm:$0xff]   ;;  %v1593_v38 = vld [vmem:[%s2299_s1 + $0x90] ss:$8 sps:$4 sm:$0xff]   ;;  %v1595_v40 = vld [vmem:[%s2299_s1 + $0xa4] ss:$8 sps:$4 sm:$0xff]  }
   0xe   :  { %v1591_v37 = vld [vmem:[%s2299_s1 + $0x294] ss:$8 sps:$4 sm:$0xff]   ;;  %v1594_v39 = vld [vmem:[%s2299_s1 + $0x290] ss:$8 sps:$4 sm:$0xff]   ;;  %v1597_v41 = vld [vmem:[%s2299_s1 + $0x2a4] ss:$8 sps:$4 sm:$0xff]  }
   0xf   :  { %1010 = vmatpush1.bf16.msra.mxu1 %v1557_v14  ;;  %v1599_v42 = vld [vmem:[%s2299_s1 + $0xa0] ss:$8 sps:$4 sm:$0xff]   ;;  %v1601_v44 = vld [vmem:[%s2299_s1 + $0xb4] ss:$8 sps:$4 sm:$0xff]   ;;  %v1605_v46 = vld [vmem:[%s2299_s1 + $0xb0] ss:$8 sps:$4 sm:$0xff]  }
  0x10   :  { %1116 = vmatpush1.bf16.msra.mxu0 %v1558_v15  ;;  %1011 = vmatprep.subr.bf16.mxu1 %v1559_v16  ;;  %v1600_v43 = vld [vmem:[%s2299_s1 + $0x2a0] ss:$8 sps:$4 sm:$0xff]   ;;  %v1603_v45 = vld [vmem:[%s2299_s1 + $0x2b4] ss:$8 sps:$4 sm:$0xff]   ;;  %v1606_v47 = vld [vmem:[%s2299_s1 + $0x2b0] ss:$8 sps:$4 sm:$0xff]  }
  0x11   :  { %1117 = vmatprep.subr.bf16.mxu0 %v1561_v17  ;;  %v1633_v48 = vld [vmem:[%s2300_s0 + $0x4] ss:$36 sps:$4 sm:$0xff]   ;;  %v1639_v51 = vld [vmem:[%s2300_s0 + $0x14] ss:$36 sps:$4 sm:$0xff]  }
  0x12   :  { %v1607_v49 = vld [vmem:[%s2299_s1 + $0xc4] ss:$8 sps:$4 sm:$0xff]   ;;  %1035 = vmatprep.mubr.bf16.mxu1 %v1633_v48  ;;  %v1611_v52 = vld [vmem:[%s2299_s1 + $0xc0] ss:$8 sps:$4 sm:$0xff]   ;;  %v1613_v54 = vld [vmem:[%s2299_s1 + $0xd4] ss:$8 sps:$4 sm:$0xff]   ;;  %1141 = vmatprep.mubr.bf16.mxu0 %v1639_v51 }
  0x13   :  { %1012 = vmatpush1.bf16.msra.mxu1 %v1563_v18  ;;  %v1609_v50 = vld [vmem:[%s2299_s1 + $0x2c4] ss:$8 sps:$4 sm:$0xff]   ;;  %v1612_v53 = vld [vmem:[%s2299_s1 + $0x2c0] ss:$8 sps:$4 sm:$0xff]   ;;  %v1615_v55 = vld [vmem:[%s2299_s1 + $0x2d4] ss:$8 sps:$4 sm:$0xff]  }
  0x14   :  { %1118 = vmatpush1.bf16.msra.mxu0 %v1564_v19  ;;  %1013 = vmatprep.subr.bf16.mxu1 %v1565_v20  ;;  %v1617_v56 = vld [vmem:[%s2299_s1 + $0xd0] ss:$8 sps:$4 sm:$0xff]   ;;  %v1619_v58 = vld [vmem:[%s2299_s1 + $0xe4] ss:$8 sps:$4 sm:$0xff]   ;;  %v1623_v60 = vld [vmem:[%s2299_s1 + $0xe0] ss:$8 sps:$4 sm:$0xff]  }
  0x15   :  { %1119 = vmatprep.subr.bf16.mxu0 %v1567_v21  ;;  %v1618_v57 = vld [vmem:[%s2299_s1 + $0x2d0] ss:$8 sps:$4 sm:$0xff]   ;;  %v1621_v59 = vld [vmem:[%s2299_s1 + $0x2e4] ss:$8 sps:$4 sm:$0xff]   ;;  %v1624_v61 = vld [vmem:[%s2299_s1 + $0x2e0] ss:$8 sps:$4 sm:$0xff]  }
  0x16   :  { %v1625_v62 = vld [vmem:[%s2299_s1 + $0xf4] ss:$8 sps:$4 sm:$0xff]   ;;  %v1629_v0 = vld [vmem:[%s2299_s1 + $0xf0] ss:$8 sps:$4 sm:$0xff]   ;;  %v1636_v2 = vld [vmem:[%s2299_s1 + $0x104] ss:$8 sps:$4 sm:$0xff]  }
  0x17   :  { %1014 = vmatpush1.bf16.msra.mxu1 %v1569_v22  ;;  %v1627_v63 = vld [vmem:[%s2299_s1 + $0x2f4] ss:$8 sps:$4 sm:$0xff]   ;;  %v1630_v1 = vld [vmem:[%s2299_s1 + $0x2f0] ss:$8 sps:$4 sm:$0xff]   ;;  %v1642_v3 = vld [vmem:[%s2299_s1 + $0x304] ss:$8 sps:$4 sm:$0xff]  }
  0x18   :  { %1120 = vmatpush1.bf16.msra.mxu0 %v1570_v23  ;;  %1015 = vmatprep.subr.bf16.mxu1 %v1571_v24  ;;  %v1631_v4 = vld [vmem:[%s2300_s0] ss:$36 sps:$4 sm:$0xff]   ;;  %v1637_v6 = vld [vmem:[%s2300_s0 + $0x10] ss:$36 sps:$4 sm:$0xff]  }
  0x19   :  { %1121 = vmatprep.subr.bf16.mxu0 %v1573_v25  ;;  %v1634_v5 = vld [vmem:[%s2299_s1 + $0x100] ss:$8 sps:$4 sm:$0xff]   ;;  %v1645_v8 = vld [vmem:[%s2299_s1 + $0x114] ss:$8 sps:$4 sm:$0xff]   ;;  %v1643_v10 = vld [vmem:[%s2299_s1 + $0x110] ss:$8 sps:$4 sm:$0xff]  }
  0x1a   :  { %v1640_v7 = vld [vmem:[%s2299_s1 + $0x300] ss:$8 sps:$4 sm:$0xff]   ;;  %v1648_v9 = vld [vmem:[%s2299_s1 + $0x314] ss:$8 sps:$4 sm:$0xff]   ;;  %v1646_v11 = vld [vmem:[%s2299_s1 + $0x310] ss:$8 sps:$4 sm:$0xff]  }
  0x1b   :  { %1016 = vmatpush1.bf16.msra.mxu1 %v1575_v26  ;;  %v1651_v12 = vld [vmem:[%s2299_s1 + $0x124] ss:$8 sps:$4 sm:$0xff]   ;;  %v1649_v14 = vld [vmem:[%s2299_s1 + $0x120] ss:$8 sps:$4 sm:$0xff]   ;;  %v1657_v16 = vld [vmem:[%s2299_s1 + $0x134] ss:$8 sps:$4 sm:$0xff]  }
  0x1c   :  { %1122 = vmatpush1.bf16.msra.mxu0 %v1576_v27  ;;  %1017 = vmatprep.subr.bf16.mxu1 %v1577_v28  ;;  %v1654_v13 = vld [vmem:[%s2299_s1 + $0x324] ss:$8 sps:$4 sm:$0xff]   ;;  %v1652_v15 = vld [vmem:[%s2299_s1 + $0x320] ss:$8 sps:$4 sm:$0xff]   ;;  %v1660_v17 = vld [vmem:[%s2299_s1 + $0x334] ss:$8 sps:$4 sm:$0xff]  }
  0x1d   :  { %1123 = vmatprep.subr.bf16.mxu0 %v1579_v29  ;;  %v1655_v18 = vld [vmem:[%s2299_s1 + $0x130] ss:$8 sps:$4 sm:$0xff]   ;;  %v1663_v20 = vld [vmem:[%s2299_s1 + $0x144] ss:$8 sps:$4 sm:$0xff]   ;;  %v1661_v22 = vld [vmem:[%s2299_s1 + $0x140] ss:$8 sps:$4 sm:$0xff]  }
  0x1e   :  { %v1658_v19 = vld [vmem:[%s2299_s1 + $0x330] ss:$8 sps:$4 sm:$0xff]   ;;  %v1666_v21 = vld [vmem:[%s2299_s1 + $0x344] ss:$8 sps:$4 sm:$0xff]   ;;  %v1664_v23 = vld [vmem:[%s2299_s1 + $0x340] ss:$8 sps:$4 sm:$0xff]  }
  0x1f   :  { %1018 = vmatpush1.bf16.msra.mxu1 %v1581_v30  ;;  %v1669_v24 = vld [vmem:[%s2299_s1 + $0x154] ss:$8 sps:$4 sm:$0xff]   ;;  %v1667_v26 = vld [vmem:[%s2299_s1 + $0x150] ss:$8 sps:$4 sm:$0xff]   ;;  %v1675_v28 = vld [vmem:[%s2299_s1 + $0x164] ss:$8 sps:$4 sm:$0xff]  }
  0x20   :  { %1124 = vmatpush1.bf16.msra.mxu0 %v1582_v31  ;;  %1019 = vmatprep.subr.bf16.mxu1 %v1583_v32  ;;  %v1672_v25 = vld [vmem:[%s2299_s1 + $0x354] ss:$8 sps:$4 sm:$0xff]   ;;  %v1670_v27 = vld [vmem:[%s2299_s1 + $0x350] ss:$8 sps:$4 sm:$0xff]   ;;  %v1725_v31 = vld [vmem:[%s2300_s0 + $0x48] ss:$36 sps:$4 sm:$0xff]  }
  0x21   :  { %1125 = vmatprep.subr.bf16.mxu0 %v1585_v33  ;;  %v1721_v29 = vld [vmem:[%s2300_s0 + $0x4c] ss:$36 sps:$4 sm:$0xff]   ;;  %v1723_v30 = vld [vmem:[%s2300_s0 + $0x5c] ss:$36 sps:$4 sm:$0xff]  }
  0x22   :  { %v1678_v32 = vld [vmem:[%s2299_s1 + $0x364] ss:$8 sps:$4 sm:$0xff]   ;;  %v1729_v33 = vld [vmem:[%s2300_s0 + $0x58] ss:$36 sps:$4 sm:$0xff]  }
  0x23   :  { %1020 = vmatpush1.bf16.msra.mxu1 %v1587_v34  ;;  %v1673_v34 = vld [vmem:[%s2299_s1 + $0x160] ss:$8 sps:$4 sm:$0xff]   ;;  %v1691_v48 = vld [vmem:[%s2299_s1 + $0x190] ss:$8 sps:$4 sm:$0xff]   ;;  %v1702_v51 = vld [vmem:[%s2299_s1 + $0x3a4] ss:$8 sps:$4 sm:$0xff]  }
  0x24   :  { %1126 = vmatpush1.bf16.msra.mxu0 %v1588_v35  ;;  %1021 = vmatprep.subr.bf16.mxu1 %v1589_v36  ;;  %v1676_v35 = vld [vmem:[%s2299_s1 + $0x360] ss:$8 sps:$4 sm:$0xff]   ;;  %v1681_v36 = vld [vmem:[%s2299_s1 + $0x174] ss:$8 sps:$4 sm:$0xff]  }
  0x25   :  { %1127 = vmatprep.subr.bf16.mxu0 %v1591_v37  ;;  %v1684_v37 = vld [vmem:[%s2299_s1 + $0x374] ss:$8 sps:$4 sm:$0xff]  }
  0x27   :  { %1022 = vmatpush1.bf16.msra.mxu1 %v1593_v38  ;;  %v1679_v38 = vld [vmem:[%s2299_s1 + $0x170] ss:$8 sps:$4 sm:$0xff]  }
  0x28   :  { %1128 = vmatpush1.bf16.msra.mxu0 %v1594_v39  ;;  %1023 = vmatprep.subr.bf16.mxu1 %v1595_v40  ;;  %v1682_v39 = vld [vmem:[%s2299_s1 + $0x370] ss:$8 sps:$4 sm:$0xff]   ;;  %v1687_v40 = vld [vmem:[%s2299_s1 + $0x184] ss:$8 sps:$4 sm:$0xff]  }
  0x29   :  { %1129 = vmatprep.subr.bf16.mxu0 %v1597_v41  ;;  %v1741_v41 = vld [vmem:[%s2300_s0 + $0xc] ss:$36 sps:$4 sm:$0xff]  }
  0x2b   :  { %1024 = vmatpush1.bf16.msra.mxu1 %v1599_v42  ;;  %v1690_v42 = vld [vmem:[%s2299_s1 + $0x384] ss:$8 sps:$4 sm:$0xff]  }
  0x2c   :  { %1130 = vmatpush1.bf16.msra.mxu0 %v1600_v43  ;;  %1025 = vmatprep.subr.bf16.mxu1 %v1601_v44  ;;  %v1744_v43 = vld [vmem:[%s2300_s0 + $0x1c] ss:$36 sps:$4 sm:$0xff]  }
  0x2d   :  { %1131 = vmatprep.subr.bf16.mxu0 %v1603_v45  ;;  %v1685_v44 = vld [vmem:[%s2299_s1 + $0x180] ss:$8 sps:$4 sm:$0xff]  }
  0x2e   :  { %v1688_v45 = vld [vmem:[%s2299_s1 + $0x380] ss:$8 sps:$4 sm:$0xff]  }
  0x2f   :  { %1026 = vmatpush1.bf16.msra.mxu1 %v1605_v46  ;;  %v1693_v46 = vld [vmem:[%s2299_s1 + $0x194] ss:$8 sps:$4 sm:$0xff]  }
  0x30   :  { %1132 = vmatpush1.bf16.msra.mxu0 %v1606_v47  ;;  %1027 = vmatprep.subr.bf16.mxu1 %v1607_v49  ;;  %v1696_v47 = vld [vmem:[%s2299_s1 + $0x394] ss:$8 sps:$4 sm:$0xff]   ;;  %v1694_v49 = vld [vmem:[%s2299_s1 + $0x390] ss:$8 sps:$4 sm:$0xff]  }
  0x31   :  { %1133 = vmatprep.subr.bf16.mxu0 %v1609_v50  ;;  %v1699_v50 = vld [vmem:[%s2299_s1 + $0x1a4] ss:$8 sps:$4 sm:$0xff]  }
  0x33   :  { %1028 = vmatpush1.bf16.msra.mxu1 %v1611_v52  ;;  %v1697_v52 = vld [vmem:[%s2299_s1 + $0x1a0] ss:$8 sps:$4 sm:$0xff]  }
  0x34   :  { %1134 = vmatpush1.bf16.msra.mxu0 %v1612_v53  ;;  %1029 = vmatprep.subr.bf16.mxu1 %v1613_v54  ;;  %v1700_v53 = vld [vmem:[%s2299_s1 + $0x3a0] ss:$8 sps:$4 sm:$0xff]   ;;  %v1705_v54 = vld [vmem:[%s2299_s1 + $0x1b4] ss:$8 sps:$4 sm:$0xff]  }
  0x35   :  { %1135 = vmatprep.subr.bf16.mxu0 %v1615_v55  ;;  %v1708_v55 = vld [vmem:[%s2299_s1 + $0x3b4] ss:$8 sps:$4 sm:$0xff]  }
  0x37   :  { %1030 = vmatpush1.bf16.msra.mxu1 %v1617_v56  ;;  %v1703_v56 = vld [vmem:[%s2299_s1 + $0x1b0] ss:$8 sps:$4 sm:$0xff]  }
  0x38   :  { %1136 = vmatpush1.bf16.msra.mxu0 %v1618_v57  ;;  %1031 = vmatprep.subr.bf16.mxu1 %v1619_v58  ;;  %v1706_v57 = vld [vmem:[%s2299_s1 + $0x3b0] ss:$8 sps:$4 sm:$0xff]   ;;  %v1711_v58 = vld [vmem:[%s2299_s1 + $0x1c4] ss:$8 sps:$4 sm:$0xff]  }
  0x39   :  { %1137 = vmatprep.subr.bf16.mxu0 %v1621_v59  ;;  %v1714_v59 = vld [vmem:[%s2299_s1 + $0x3c4] ss:$8 sps:$4 sm:$0xff]  }
  0x3b   :  { %1032 = vmatpush1.bf16.msra.mxu1 %v1623_v60  ;;  %v1709_v60 = vld [vmem:[%s2299_s1 + $0x1c0] ss:$8 sps:$4 sm:$0xff]  }
  0x3c   :  { %1138 = vmatpush1.bf16.msra.mxu0 %v1624_v61  ;;  %1033 = vmatprep.subr.bf16.mxu1 %v1625_v62  ;;  %v1712_v61 = vld [vmem:[%s2299_s1 + $0x3c0] ss:$8 sps:$4 sm:$0xff]   ;;  %v1717_v62 = vld [vmem:[%s2299_s1 + $0x1d4] ss:$8 sps:$4 sm:$0xff]  }
  0x3d   :  { %1139 = vmatprep.subr.bf16.mxu0 %v1627_v63  ;;  %v1720_v63 = vld [vmem:[%s2299_s1 + $0x3d4] ss:$8 sps:$4 sm:$0xff]  }
  0x3f   :  { %1034 = vmatpush1.bf16.msra.mxu1 %v1629_v0  ;;  %v1715_v0 = vld [vmem:[%s2299_s1 + $0x1d0] ss:$8 sps:$4 sm:$0xff]  }
  0x40   :  { %1140 = vmatpush1.bf16.msra.mxu0 %v1630_v1  ;;  %1056 = vmatprep.subr.bf16.mxu1 %v1636_v2  ;;  %v1718_v1 = vld [vmem:[%s2299_s1 + $0x3d0] ss:$8 sps:$4 sm:$0xff]   ;;  %v1728_v2 = vld [vmem:[%s2299_s1 + $0x1e4] ss:$8 sps:$4 sm:$0xff]  }
  0x41   :  { %1162 = vmatprep.subr.bf16.mxu0 %v1642_v3  ;;  %v1732_v3 = vld [vmem:[%s2299_s1 + $0x3e4] ss:$8 sps:$4 sm:$0xff]  }
  0x42   :  { %1036 = vmatmul.mubr.bf16.vlgmr.msra.gmra.mrb[0].mxu1 %v1631_v4  ;;  %v1726_v4 = vld [vmem:[%s2299_s1 + $0x1e0] ss:$8 sps:$4 sm:$0xff]  }
  0x43   :  { %1142 = vmatmul.mubr.bf16.vlgmr.msra.gmra.mrb[0].mxu0 %v1637_v6  ;;  %1057 = vmatpush1.bf16.msra.mxu1 %v1634_v5  ;;  %v1730_v5 = vld [vmem:[%s2299_s1 + $0x3e0] ss:$8 sps:$4 sm:$0xff]   ;;  %v1735_v6 = vld [vmem:[%s2299_s1 + $0x1f4] ss:$8 sps:$4 sm:$0xff]  }
  0x44   :  { %1163 = vmatpush1.bf16.msra.mxu0 %v1640_v7  ;;  %1058 = vmatprep.subr.bf16.mxu1 %v1645_v8  ;;  %v1738_v7 = vld [vmem:[%s2299_s1 + $0x3f4] ss:$8 sps:$4 sm:$0xff]   ;;  %v1733_v8 = vld [vmem:[%s2299_s1 + $0x1f0] ss:$8 sps:$4 sm:$0xff]  }
  0x45   :  { %1164 = vmatprep.subr.bf16.mxu0 %v1648_v9  ;;  %1045 = vmatprep.mubr.bf16.mxu1 %v1721_v29  ;;  %v1736_v9 = vld [vmem:[%s2299_s1 + $0x3f0] ss:$8 sps:$4 sm:$0xff]   ;;  %v1771_v29 = vld [vmem:[%s2299_s1 + $0x464] ss:$8 sps:$4 sm:$0xff]  }
  0x46   :  { %1151 = vmatprep.mubr.bf16.mxu0 %v1723_v30  ;;  %v1769_v30 = vld [vmem:[%s2299_s1 + $0x460] ss:$8 sps:$4 sm:$0xff]  }
  0x47   :  { %1059 = vmatpush1.bf16.msra.mxu1 %v1643_v10  ;;  %v1747_v10 = vld [vmem:[%s2299_s1 + $0x404] ss:$8 sps:$4 sm:$0xff]  }
  0x48   :  { %1165 = vmatpush1.bf16.msra.mxu0 %v1646_v11  ;;  %1060 = vmatprep.subr.bf16.mxu1 %v1651_v12  ;;  %v1739_v11 = vld [vmem:[%s2300_s0 + $0x8] ss:$36 sps:$4 sm:$0xff]   ;;  %v1742_v12 = vld [vmem:[%s2300_s0 + $0x18] ss:$36 sps:$4 sm:$0xff]  }
  0x49   :  { %1166 = vmatprep.subr.bf16.mxu0 %v1654_v13  ;;  %v1745_v13 = vld [vmem:[%s2299_s1 + $0x400] ss:$8 sps:$4 sm:$0xff]  }
  0x4a   :  { %1046 = vmatmul.mubr.bf16.gmra.mrb[4].mxu1 %v1725_v31  ;;  %v1774_v31 = vld [vmem:[%s2299_s1 + $0x474] ss:$8 sps:$4 sm:$0xff]  }
  0x4b   :  { %1061 = vmatpush1.bf16.msra.mxu1 %v1649_v14  ;;  %1152 = vmatmul.mubr.bf16.gmra.mrb[4].mxu0 %v1729_v33  ;;  %v1750_v14 = vld [vmem:[%s2299_s1 + $0x414] ss:$8 sps:$4 sm:$0xff]   ;;  %v1775_v33 = vld [vmem:[%s2300_s0 + $0x20] ss:$36 sps:$4 sm:$0xff]  }
  0x4c   :  { %1167 = vmatpush1.bf16.msra.mxu0 %v1652_v15  ;;  %1062 = vmatprep.subr.bf16.mxu1 %v1657_v16  ;;  %v1751_v15 = vld [vmem:[%s2300_s0 + $0x54] ss:$36 sps:$4 sm:$0xff]   ;;  %v1753_v16 = vld [vmem:[%s2300_s0 + $0x64] ss:$36 sps:$4 sm:$0xff]  }
  0x4d   :  { %1168 = vmatprep.subr.bf16.mxu0 %v1660_v17  ;;  %1088 = vmatprep.mubr.bf16.mxu1 %v1741_v41  ;;  %v1748_v17 = vld [vmem:[%s2299_s1 + $0x410] ss:$8 sps:$4 sm:$0xff]  }
  0x4e   :  { %1194 = vmatprep.mubr.bf16.mxu0 %v1744_v43 }
  0x4f   :  { %1063 = vmatpush1.bf16.msra.mxu1 %v1655_v18  ;;  %v1759_v18 = vld [vmem:[%s2299_s1 + $0x424] ss:$8 sps:$4 sm:$0xff]  }
  0x50   :  { %1169 = vmatpush1.bf16.msra.mxu0 %v1658_v19  ;;  %1064 = vmatprep.subr.bf16.mxu1 %v1663_v20  ;;  %v1755_v19 = vld [vmem:[%s2300_s0 + $0x50] ss:$36 sps:$4 sm:$0xff]   ;;  %v1756_v20 = vld [vmem:[%s2300_s0 + $0x60] ss:$36 sps:$4 sm:$0xff]  }
  0x51   :  { %1170 = vmatprep.subr.bf16.mxu0 %v1666_v21  ;;  %v1757_v21 = vld [vmem:[%s2299_s1 + $0x420] ss:$8 sps:$4 sm:$0xff]  }
  0x53   :  { %1065 = vmatpush1.bf16.msra.mxu1 %v1661_v22  ;;  %v1762_v22 = vld [vmem:[%s2299_s1 + $0x434] ss:$8 sps:$4 sm:$0xff]  }
  0x54   :  { %1171 = vmatpush1.bf16.msra.mxu0 %v1664_v23  ;;  %1066 = vmatprep.subr.bf16.mxu1 %v1669_v24  ;;  %v1760_v23 = vld [vmem:[%s2299_s1 + $0x430] ss:$8 sps:$4 sm:$0xff]   ;;  %v1765_v24 = vld [vmem:[%s2299_s1 + $0x444] ss:$8 sps:$4 sm:$0xff]  }
  0x55   :  { %1172 = vmatprep.subr.bf16.mxu0 %v1672_v25  ;;  %v1777_v25 = vmov 0  }
  0x57   :  { %1067 = vmatpush1.bf16.msra.mxu1 %v1667_v26  ;;  %v1763_v26 = vld [vmem:[%s2299_s1 + $0x440] ss:$8 sps:$4 sm:$0xff]  }
  0x58   :  { %1173 = vmatpush1.bf16.msra.mxu0 %v1670_v27  ;;  %1068 = vmatprep.subr.bf16.mxu1 %v1675_v28  ;;  %v1768_v27 = vld [vmem:[%s2299_s1 + $0x454] ss:$8 sps:$4 sm:$0xff]   ;;  %v1766_v28 = vld [vmem:[%s2299_s1 + $0x450] ss:$8 sps:$4 sm:$0xff]  }
  0x59   :  { %1174 = vmatprep.subr.bf16.mxu0 %v1678_v32  ;;  %v1772_v32 = vld [vmem:[%s2299_s1 + $0x470] ss:$8 sps:$4 sm:$0xff]  }
  0x5b   :  { %1069 = vmatpush1.bf16.msra.mxu1 %v1673_v34  ;;  %v1776_v34 = vld [vmem:[%s2300_s0 + $0x68] ss:$36 sps:$4 sm:$0xff]  }
  0x5c   :  { %1175 = vmatpush1.bf16.msra.mxu0 %v1676_v35  ;;  %1070 = vmatprep.subr.bf16.mxu1 %v1681_v36  ;;  %v181_v35 = vlaneseq }
  0x5d   :  { %1176 = vmatprep.subr.bf16.mxu0 %v1684_v37 }
  0x5e   :  { %v182_v36 = vshrl.u32 %v181_v35, 7 }
  0x5f   :  { %1071 = vmatpush1.bf16.msra.mxu1 %v1679_v38 }
  0x60   :  { %1177 = vmatpush1.bf16.msra.mxu0 %v1682_v39  ;;  %1072 = vmatprep.subr.bf16.mxu1 %v1687_v40  ;;  %v183_v40 = vsub.s32 0, %v182_v36  ;;  %v187_v43 = vsub.s32 1, %v182_v36 }
  0x61   :  { %1178 = vmatprep.subr.bf16.mxu0 %v1690_v42  ;;  %v179_v42 = vld [vmem:[%s2301_s2] sm:$0x3] }
  0x63   :  { %1073 = vmatpush1.bf16.msra.mxu1 %v1685_v44  ;;  %v184_v44 = vrot.slane %v179_v42, %v183_v40 }
  0x64   :  { %1179 = vmatpush1.bf16.msra.mxu0 %v1688_v45  ;;  %1074 = vmatprep.subr.bf16.mxu1 %v1693_v46  ;;  %v188_v45 = vrot.slane %v179_v42, %v187_v43 }
  0x65   :  { %1180 = vmatprep.subr.bf16.mxu0 %v1696_v47 }
  0x67   :  { %1075 = vmatpush1.bf16.msra.mxu1 %v1691_v48 }
  0x68   :  { %1181 = vmatpush1.bf16.msra.mxu0 %v1694_v49  ;;  %1076 = vmatprep.subr.bf16.mxu1 %v1699_v50 }
  0x69   :  { %1182 = vmatprep.subr.bf16.mxu0 %v1702_v51 }
  0x6b   :  { %1077 = vmatpush1.bf16.msra.mxu1 %v1697_v52 }
  0x6c   :  { %1183 = vmatpush1.bf16.msra.mxu0 %v1700_v53  ;;  %1078 = vmatprep.subr.bf16.mxu1 %v1705_v54 }
  0x6d   :  { %1184 = vmatprep.subr.bf16.mxu0 %v1708_v55 }
  0x6f   :  { %1079 = vmatpush1.bf16.msra.mxu1 %v1703_v56 }
  0x70   :  { %1185 = vmatpush1.bf16.msra.mxu0 %v1706_v57  ;;  %1080 = vmatprep.subr.bf16.mxu1 %v1711_v58 }
  0x71   :  { %1186 = vmatprep.subr.bf16.mxu0 %v1714_v59 }
  0x73   :  { %1081 = vmatpush1.bf16.msra.mxu1 %v1709_v60 }
  0x74   :  { %1187 = vmatpush1.bf16.msra.mxu0 %v1712_v61  ;;  %1082 = vmatprep.subr.bf16.mxu1 %v1717_v62 }
  0x75   :  { %1188 = vmatprep.subr.bf16.mxu0 %v1720_v63 }
  0x77   :  { %1083 = vmatpush1.bf16.msra.mxu1 %v1715_v0 }
  0x78   :  { %1189 = vmatpush1.bf16.msra.mxu0 %v1718_v1  ;;  %1084 = vmatprep.subr.bf16.mxu1 %v1728_v2 }
  0x79   :  { %1190 = vmatprep.subr.bf16.mxu0 %v1732_v3 }
  0x7b   :  { %1085 = vmatpush1.bf16.msra.mxu1 %v1726_v4 }
  0x7c   :  { %1191 = vmatpush1.bf16.msra.mxu0 %v1730_v5  ;;  %1086 = vmatprep.subr.bf16.mxu1 %v1735_v6 }
  0x7d   :  { %1192 = vmatprep.subr.bf16.mxu0 %v1738_v7 }
  0x7f   :  { %1087 = vmatpush1.bf16.msra.mxu1 %v1733_v8 }
  0x80   :  { %1193 = vmatpush1.bf16.msra.mxu0 %v1736_v9  ;;  %1478 = vmatprep.subr.bf16.mxu1 %v1747_v10 }
  0x81   :  { %1215 = vmatprep.subr.bf16.mxu0 %v1747_v10 }
  0x82   :  { %1089 = vmatmul.mubr.bf16.vlgmr.msra.gmra.mrb[0].mxu1 %v1739_v11 }
  0x83   :  { %1195 = vmatmul.mubr.bf16.vlgmr.msra.gmra.mrb[0].mxu0 %v1742_v12  ;;  %1486 = vmatpush1.bf16.msra.mxu1 %v1745_v13 }
  0x84   :  { %1216 = vmatpush1.bf16.msra.mxu0 %v1745_v13  ;;  %1479 = vmatprep.subr.bf16.mxu1 %v1750_v14 }
  0x85   :  { %1217 = vmatprep.subr.bf16.mxu0 %v1750_v14  ;;  %1098 = vmatprep.mubr.bf16.mxu1 %v1751_v15 }
  0x86   :  { %1204 = vmatprep.mubr.bf16.mxu0 %v1753_v16 }
  0x87   :  { %1487 = vmatpush1.bf16.msra.mxu1 %v1748_v17 }
  0x88   :  { %1218 = vmatpush1.bf16.msra.mxu0 %v1748_v17  ;;  %1480 = vmatprep.subr.bf16.mxu1 %v1759_v18 }
  0x89   :  { %1219 = vmatprep.subr.bf16.mxu0 %v1759_v18 }
  0x8a   :  { %1099 = vmatmul.mubr.bf16.gmra.mrb[4].mxu1 %v1755_v19 }
  0x8b   :  { %1205 = vmatmul.mubr.bf16.gmra.mrb[4].mxu0 %v1756_v20  ;;  %1488 = vmatpush1.bf16.msra.mxu1 %v1757_v21 }
  0x8c   :  { %1220 = vmatpush1.bf16.msra.mxu0 %v1757_v21  ;;  %1481 = vmatprep.subr.bf16.mxu1 %v1762_v22 }
  0x8d   :  { %1221 = vmatprep.subr.bf16.mxu0 %v1762_v22  ;;  %1247 = vmatprep.mubr.bf16.mxu0 %v1777_v25 }
  0x8e   :  { %1257 = vmatprep.mubr.bf16.mxu1 %v1777_v25 }
  0x8f   :  { %1489 = vmatpush1.bf16.msra.mxu1 %v1760_v23 }
  0x90   :  { %1222 = vmatpush1.bf16.msra.mxu0 %v1760_v23  ;;  %1482 = vmatprep.subr.bf16.mxu1 %v1765_v24 }
  0x91   :  { %1223 = vmatprep.subr.bf16.mxu0 %v1765_v24 }
  0x93   :  { %1490 = vmatpush1.bf16.msra.mxu1 %v1763_v26 }
  0x94   :  { %1224 = vmatpush1.bf16.msra.mxu0 %v1763_v26  ;;  %1483 = vmatprep.subr.bf16.mxu1 %v1768_v27 }
  0x95   :  { %1225 = vmatprep.subr.bf16.mxu0 %v1768_v27 }
  0x97   :  { %1491 = vmatpush1.bf16.msra.mxu1 %v1766_v28 }
  0x98   :  { %1226 = vmatpush1.bf16.msra.mxu0 %v1766_v28  ;;  %1484 = vmatprep.subr.bf16.mxu1 %v1771_v29 }
  0x99   :  { %1227 = vmatprep.subr.bf16.mxu0 %v1771_v29 }
  0x9b   :  { %1492 = vmatpush1.bf16.msra.mxu1 %v1769_v30 }
  0x9c   :  { %1228 = vmatpush1.bf16.msra.mxu0 %v1769_v30  ;;  %1485 = vmatprep.subr.bf16.mxu1 %v1774_v31 }
  0x9d   :  { %1229 = vmatprep.subr.bf16.mxu0 %v1774_v31 }
  0x9f   :  { %1493 = vmatpush1.bf16.msra.mxu1 %v1772_v32 }
  0xa0   :  { %1230 = vmatpush1.bf16.msra.mxu0 %v1772_v32 }
  0xa2   :  { %1258 = vmatmul.mubr.bf16.vlgmr.msra.gmra.mrb[8].mxu1 %v1776_v34 }
  0xa3   :  { %1248 = vmatmul.mubr.bf16.vlgmr.msra.gmra.mrb[0].mxu0 %v1775_v33 }
 0x155   :  { %v1090_v37 = vpop.f32.mrb[0].mxu1 }
 0x156   :  { %v1092_v38 = vpop.f32.mrb[1].mxu1  ;;  %v1494_v62 = vadd.f32 %v1090_v37, %v184_v44 }
 0x157   :  { %v1094_v39 = vpop.f32.mrb[2].mxu1  ;;  %v1496_v63 = vadd.f32 %v1092_v38, %v188_v45 }
 0x158   :  { %v1096_v41 = vpop.f32.mrb[3].mxu1  ;;  %v1498_v2 = vadd.f32 %v1094_v39, %v184_v44 }
 0x159   :  { %v1500_v7 = vadd.f32 %v1096_v41, %v188_v45 }
 0x15d   :  { %v1100_v46 = vpop.f32.mrb[4].mxu1 }
 0x15e   :  { %v1206_v47 = vpop.f32.mrb[4].mxu0  ;;  %v1502_v48 = vadd.f32 %v1100_v46, %v184_v44  ;;  %v1102_v49 = vpop.f32.mrb[5].mxu1 }
 0x15f   :  { %v1208_v50 = vpop.f32.mrb[5].mxu0  ;;  %v1505_v51 = vadd.f32 %v1102_v49, %v188_v45  ;;  %v1104_v52 = vpop.f32.mrb[6].mxu1 }
 0x160   :  { %v1210_v53 = vpop.f32.mrb[6].mxu0  ;;  %v1503_v54 = vadd.f32 %v1502_v48, %v1206_v47  ;;  %v1508_v55 = vadd.f32 %v1104_v52, %v184_v44  ;;  %v1106_v56 = vpop.f32.mrb[7].mxu1 }
 0x161   :  { %v1212_v57 = vpop.f32.mrb[7].mxu0  ;;  %v1506_v58 = vadd.f32 %v1505_v51, %v1208_v50  ;;  %v1511_v59 = vadd.f32 %v1106_v56, %v188_v45 }
 0x162   :  { %v1509_v60 = vadd.f32 %v1508_v55, %v1210_v53 }
 0x163   :  { %v1512_v61 = vadd.f32 %v1511_v59, %v1212_v57 }
 0x175   :  { %v1259_v1 = vpop.f32.mrb[8].mxu1 }
 0x176   :  { %v1249_v0 = vpop.f32.mrb[0].mxu0  ;;  %v1504_v4 = vadd.f32 %v1503_v54, %v1259_v1  ;;  %v1261_v6 = vpop.f32.mrb[9].mxu1 }
 0x177   :  { %v1495_v3 = vadd.f32 %v1494_v62, %v1249_v0  ;;  %v1251_v5 = vpop.f32.mrb[1].mxu0  ;;  %v1507_v9 = vadd.f32 %v1506_v58, %v1261_v6  ;;  %v1263_v11 = vpop.f32.mrb[10].mxu1 }
 0x178   :  { %v1497_v8 = vadd.f32 %v1496_v63, %v1251_v5  ;;  %v1253_v10 = vpop.f32.mrb[2].mxu0  ;;  %v1272_v13 = vmax.f32 %v1504_v4, 0.0  ;;  %v1510_v15 = vadd.f32 %v1509_v60, %v1263_v11  ;;  %v1265_v17 = vpop.f32.mrb[11].mxu1 }
 0x179   :  { %v1268_v12 = vmax.f32 %v1495_v3, 0.0  ;;  %v1499_v14 = vadd.f32 %v1498_v2, %v1253_v10  ;;  %v1255_v16 = vpop.f32.mrb[3].mxu0  ;;  %v1273_v19 = vmax.f32 %v1507_v9, 0.0  ;;  %v1513_v21 = vadd.f32 %v1512_v61, %v1265_v17 }
 0x17a   :  { %v1269_v18 = vmax.f32 %v1497_v8, 0.0  ;;  %v1501_v20 = vadd.f32 %v1500_v7, %v1255_v16  ;;  %v1274_v23 = vmax.f32 %v1510_v15, 0.0 }
 0x17b   :  { %v1270_v22 = vmax.f32 %v1499_v14, 0.0  ;;  %v1476_v25 = vpack.c.bf16 %v1273_v19, %v1272_v13  ;;  %v1275_v27 = vmax.f32 %v1513_v21, 0.0 }
 0x17c   :  { %v1474_v24 = vpack.c.bf16 %v1269_v18, %v1268_v12  ;;  %v1271_v26 = vmax.f32 %v1501_v20, 0.0 }
 0x17d   :  { %1302 = vst [vmem:[%s2302_s3 + $0x10] sm:$0xff] %v1476_v25  ;;  %v1477_v29 = vpack.c.bf16 %v1275_v27, %v1274_v23 }
 0x17e   :  { %1300 = vst [vmem:[%s2302_s3] sm:$0xff] %v1474_v24  ;;  %v1475_v28 = vpack.c.bf16 %v1271_v26, %v1270_v22 }
 0x17f   :  { %1303 = vst [vmem:[%s2302_s3 + $0x18] sm:$0xff] %v1477_v29 }
 0x180   :  { %1301 = vst [vmem:[%s2302_s3 + $0x8] sm:$0xff] %v1475_v28 }

// kernel: vae_forward.10
= control target key start
LH: loop header
LB: loop body
LE: loop exit
PB: predicated region body
PF: predicated region fallthrough
CT: control target
= control target key end

     0   :  { %18 = vsyncpa [#allocation3], 0  ;;  %v572_v28 = vlaneseq  ;;  %v6226_v36 = vmov 1966171168   ;;  %s7759_s0 = inlined_call_operand.vmem [shape: bf16[2,4096], index: 0, kind: input, shape index: {}]   ;;  %s7760_s1 = inlined_call_operand.vmem [shape: bf16[4096,64], index: 1, kind: input, shape index: {}]   ;;  %s7761_s2 = inlined_call_operand.vmem [shape: f32[1,64], index: 2, kind: input, shape index: {}]   ;;  %s7762_s3 = inlined_call_operand.vmem [shape: bf16[64,128], index: 3, kind: input, shape index: {}]   ;;  %s7763_s4 = inlined_call_operand.vmem [shape: f32[1,128], index: 4, kind: input, shape index: {}]   ;;  %s7764_s5 = inlined_call_operand.vmem [shape: f32[2,64], index: 5, kind: input, shape index: {}]   ;;  %s7765_s6 = inlined_call_operand.vmem [shape: bf16[64,64], index: 6, kind: input, shape index: {}]   ;;  %s7766_s7 = inlined_call_operand.vmem [shape: f32[1,64], index: 7, kind: input, shape index: {}]   ;;  %s7767_s8 = inlined_call_operand.vmem [shape: bf16[64,4096], index: 8, kind: input, shape index: {}]   ;;  %s7768_s9 = inlined_call_operand.vmem [shape: f32[1,4096], index: 9, kind: input, shape index: {}]   ;;  %s7769_s10 = inlined_call_operand.hbm [shape: f32[2,64], index: 10, kind: output, shape index: {0}]   ;;  %s7770_s11 = inlined_call_operand.hbm [shape: f32[2,64], index: 11, kind: output, shape index: {1}]   ;;  %s7771_s12 = inlined_call_operand.vmem [shape: bf16[2,4096], index: 12, kind: output, shape index: {2}]  }
   0x1   :  { %v5908_v0 = vld [vmem:[%s7760_s1 + $0x40] sm:$0xff]   ;;  %v5912_v4 = vld [vmem:[%s7760_s1 + $0x48] sm:$0xff]   ;;  %v5916_v8 = vld [vmem:[%s7760_s1 + $0x50] sm:$0xff]   ;;  %v570_v37 = vunpack.c.l.s4 %v6226_v36 }
   0x2   :  { %v5909_v1 = vld [vmem:[%s7760_s1 + $0xc0] sm:$0xff]   ;;  %5515 = vmatprep.subr.bf16.mxu0 %v5908_v0  ;;  %v5913_v5 = vld [vmem:[%s7760_s1 + $0xc8] sm:$0xff]   ;;  %v5917_v9 = vld [vmem:[%s7760_s1 + $0xd0] sm:$0xff]   ;;  %v6394_v33 = vshrl.u32 %v572_v28, 7 }
   0x3   :  { %v5910_v2 = vld [vmem:[%s7760_s1] sm:$0xff]   ;;  %5537 = vmatprep.subr.bf16.mxu1 %v5909_v1  ;;  %v5914_v6 = vld [vmem:[%s7760_s1 + $0x8] sm:$0xff]   ;;  %v5918_v10 = vld [vmem:[%s7760_s1 + $0x10] sm:$0xff]   ;;  %v571_v40 = vunpack.c.0.s8 %v570_v37 }
   0x4   :  { %v5911_v3 = vld [vmem:[%s7760_s1 + $0x80] sm:$0xff]   ;;  %5516 = vmatpush3.bf16.msra.mxu0 %v5910_v2  ;;  %v5915_v7 = vld [vmem:[%s7760_s1 + $0x88] sm:$0xff]   ;;  %v5919_v11 = vld [vmem:[%s7760_s1 + $0x90] sm:$0xff]  }
   0x5   :  { %5538 = vmatpush3.bf16.msra.mxu1 %v5911_v3  ;;  %5517 = vmatprep.subr.bf16.mxu0 %v5912_v4  ;;  %v5920_v12 = vld [vmem:[%s7760_s1 + $0x58] sm:$0xff]   ;;  %v5924_v16 = vld [vmem:[%s7760_s1 + $0x60] sm:$0xff]   ;;  %v5928_v20 = vld [vmem:[%s7760_s1 + $0x68] sm:$0xff]   ;;  %v6406_v41 = vsub.s32 %v571_v40, %v6394_v33 }
   0x6   :  { %5539 = vmatprep.subr.bf16.mxu1 %v5913_v5  ;;  %v5921_v13 = vld [vmem:[%s7760_s1 + $0xd8] sm:$0xff]   ;;  %v5925_v17 = vld [vmem:[%s7760_s1 + $0xe0] sm:$0xff]   ;;  %v5929_v21 = vld [vmem:[%s7760_s1 + $0xe8] sm:$0xff]  }
   0x7   :  { %v5922_v14 = vld [vmem:[%s7760_s1 + $0x18] sm:$0xff]   ;;  %v5926_v18 = vld [vmem:[%s7760_s1 + $0x20] sm:$0xff]   ;;  %v5930_v22 = vld [vmem:[%s7760_s1 + $0x28] sm:$0xff]  }
   0x8   :  { %5518 = vmatpush3.bf16.msra.mxu0 %v5914_v6  ;;  %v5923_v15 = vld [vmem:[%s7760_s1 + $0x98] sm:$0xff]   ;;  %v5927_v19 = vld [vmem:[%s7760_s1 + $0xa0] sm:$0xff]   ;;  %v5931_v23 = vld [vmem:[%s7760_s1 + $0xa8] sm:$0xff]  }
   0x9   :  { %5540 = vmatpush3.bf16.msra.mxu1 %v5915_v7  ;;  %5519 = vmatprep.subr.bf16.mxu0 %v5916_v8  ;;  %v5932_v24 = vld [vmem:[%s7760_s1 + $0x70] sm:$0xff]   ;;  %v5936_v29 = vld [vmem:[%s7760_s1 + $0x78] sm:$0xff]   ;;  %v41_v34 = vld [vmem:[%s7759_s0] sm:$0xff] }
   0xa   :  { %5541 = vmatprep.subr.bf16.mxu1 %v5917_v9  ;;  %v5933_v25 = vld [vmem:[%s7760_s1 + $0xf0] sm:$0xff]   ;;  %v5937_v30 = vld [vmem:[%s7760_s1 + $0xf8] sm:$0xff]   ;;  %v5941_v35 = vld [vmem:[%s7760_s1 + $0x140] sm:$0xff]   ;;  %v568_v39 = vcombine.high %v41_v34, %v41_v34  ;;  %v575_v42 = vrot.slane %v41_v34, %v6406_v41 }
   0xb   :  { %v5934_v26 = vld [vmem:[%s7760_s1 + $0x30] sm:$0xff]   ;;  %v5938_v31 = vld [vmem:[%s7760_s1 + $0x38] sm:$0xff]   ;;  %v5942_v38 = vld [vmem:[%s7760_s1 + $0x1c0] sm:$0xff]  }
   0xc   :  { %5520 = vmatpush3.bf16.msra.mxu0 %v5918_v10  ;;  %v5935_v27 = vld [vmem:[%s7760_s1 + $0xb0] sm:$0xff]   ;;  %v5939_v32 = vld [vmem:[%s7760_s1 + $0xb8] sm:$0xff]   ;;  %v6410_v43 = vrot.slane %v568_v39, %v6406_v41  ;;  %v583_v44 = vcombine.high %v575_v42, %v575_v42  ;;  %v591_v45 = vrot.slane %v575_v42, %v6406_v41  ;;  %v5943_v47 = vld [vmem:[%s7760_s1 + $0x100] sm:$0xff]  }
   0xd   :  { %5542 = vmatpush3.bf16.msra.mxu1 %v5919_v11  ;;  %5521 = vmatprep.subr.bf16.mxu0 %v5920_v12  ;;  %v5944_v49 = vld [vmem:[%s7760_s1 + $0x180] sm:$0xff]   ;;  %v5945_v52 = vld [vmem:[%s7760_s1 + $0x148] sm:$0xff]   ;;  %v5949_v58 = vld [vmem:[%s7760_s1 + $0x150] sm:$0xff]  }
   0xe   :  { %5543 = vmatprep.subr.bf16.mxu1 %v5921_v13  ;;  %v584_v46 = vcombine.high %v6410_v43, %v6410_v43  ;;  %v605_v48 = vrot.slane %v583_v44, %v6406_v41  ;;  %v613_v51 = vcombine.high %v591_v45, %v591_v45  ;;  %v5946_v54 = vld [vmem:[%s7760_s1 + $0x1c8] sm:$0xff]   ;;  %v5950_v59 = vld [vmem:[%s7760_s1 + $0x1d0] sm:$0xff]   ;;  %v5953_v62 = vld [vmem:[%s7760_s1 + $0x158] sm:$0xff]  }
   0xf   :  { %v5947_v55 = vld [vmem:[%s7760_s1 + $0x108] sm:$0xff]   ;;  %v5951_v60 = vld [vmem:[%s7760_s1 + $0x110] sm:$0xff]   ;;  %v5954_v63 = vld [vmem:[%s7760_s1 + $0x1d8] sm:$0xff]  }
  0x10   :  { %5522 = vmatpush3.bf16.msra.mxu0 %v5922_v14  ;;  %v612_v50 = vrot.slane %v584_v46, %v6406_v41  ;;  %2364 = vmatprep.mubr.bf16.mxu0 %v605_v48  ;;  %v615_v53 = vcombine.high %v605_v48, %v605_v48  ;;  %v5948_v57 = vld [vmem:[%s7760_s1 + $0x188] sm:$0xff]   ;;  %v5952_v61 = vld [vmem:[%s7760_s1 + $0x190] sm:$0xff]   ;;  %v5955_v0 = vld [vmem:[%s7760_s1 + $0x118] sm:$0xff]  }
  0x11   :  { %5544 = vmatpush3.bf16.msra.mxu1 %v5923_v15  ;;  %5523 = vmatprep.subr.bf16.mxu0 %v5924_v16  ;;  %v5956_v1 = vld [vmem:[%s7760_s1 + $0x198] sm:$0xff]   ;;  %v5957_v2 = vld [vmem:[%s7760_s1 + $0x160] sm:$0xff]   ;;  %v5961_v6 = vld [vmem:[%s7760_s1 + $0x168] sm:$0xff]  }
  0x12   :  { %5545 = vmatprep.subr.bf16.mxu1 %v5925_v17  ;;  %v616_v56 = vcombine.high %v612_v50, %v612_v50  ;;  %2404 = vmatprep.mubr.bf16.mxu1 %v615_v53  ;;  %v5958_v3 = vld [vmem:[%s7760_s1 + $0x1e0] sm:$0xff]   ;;  %v5962_v7 = vld [vmem:[%s7760_s1 + $0x1e8] sm:$0xff]   ;;  %v5965_v10 = vld [vmem:[%s7760_s1 + $0x170] sm:$0xff]  }
  0x13   :  { %v5959_v4 = vld [vmem:[%s7760_s1 + $0x120] sm:$0xff]   ;;  %v5963_v8 = vld [vmem:[%s7760_s1 + $0x128] sm:$0xff]   ;;  %v5966_v11 = vld [vmem:[%s7760_s1 + $0x1f0] sm:$0xff]  }
  0x14   :  { %5524 = vmatpush3.bf16.msra.mxu0 %v5926_v18  ;;  %v5960_v5 = vld [vmem:[%s7760_s1 + $0x1a0] sm:$0xff]   ;;  %v5964_v9 = vld [vmem:[%s7760_s1 + $0x1a8] sm:$0xff]   ;;  %v5967_v12 = vld [vmem:[%s7760_s1 + $0x130] sm:$0xff]   ;;  %v598_v18 = vrot.slane %v6410_v43, %v6406_v41 }
  0x15   :  { %5546 = vmatpush3.bf16.msra.mxu1 %v5927_v19  ;;  %5525 = vmatprep.subr.bf16.mxu0 %v5928_v20  ;;  %v5968_v13 = vld [vmem:[%s7760_s1 + $0x1b0] sm:$0xff]   ;;  %v5969_v14 = vld [vmem:[%s7760_s1 + $0x178] sm:$0xff]   ;;  %v5973_v19 = vld [vmem:[%s7760_s1 + $0x240] sm:$0xff]  }
  0x16   :  { %5547 = vmatprep.subr.bf16.mxu1 %v5929_v21  ;;  %v5970_v15 = vld [vmem:[%s7760_s1 + $0x1f8] sm:$0xff]   ;;  %v5974_v20 = vld [vmem:[%s7760_s1 + $0x2c0] sm:$0xff]   ;;  %v5981_v28 = vld [vmem:[%s7760_s1 + $0x250] sm:$0xff]  }
  0x17   :  { %v5971_v16 = vld [vmem:[%s7760_s1 + $0x138] sm:$0xff]   ;;  %v5975_v21 = vld [vmem:[%s7760_s1 + $0x200] sm:$0xff]   ;;  %v5993_v42 = vld [vmem:[%s7760_s1 + $0x268] sm:$0xff]  }
  0x18   :  { %5526 = vmatpush3.bf16.msra.mxu0 %v5930_v22  ;;  %v5972_v17 = vld [vmem:[%s7760_s1 + $0x1b8] sm:$0xff]   ;;  %v5976_v22 = vld [vmem:[%s7760_s1 + $0x280] sm:$0xff]   ;;  %v5994_v43 = vld [vmem:[%s7760_s1 + $0x2e8] sm:$0xff]  }
  0x19   :  { %5548 = vmatpush3.bf16.msra.mxu1 %v5931_v23  ;;  %5527 = vmatprep.subr.bf16.mxu0 %v5932_v24  ;;  %v614_v23 = vcombine.high %v598_v18, %v598_v18  ;;  %v5977_v24 = vld [vmem:[%s7760_s1 + $0x248] sm:$0xff]   ;;  %v5986_v34 = vld [vmem:[%s7760_s1 + $0x2d8] sm:$0xff]   ;;  %v5989_v37 = vld [vmem:[%s7760_s1 + $0x260] sm:$0xff]  }
  0x1a   :  { %5549 = vmatprep.subr.bf16.mxu1 %v5933_v25  ;;  %v5978_v25 = vld [vmem:[%s7760_s1 + $0x2c8] sm:$0xff]   ;;  %v5988_v36 = vld [vmem:[%s7760_s1 + $0x298] sm:$0xff]   ;;  %v5991_v39 = vld [vmem:[%s7760_s1 + $0x220] sm:$0xff]  }
  0x1b   :  { %v5992_v40 = vld [vmem:[%s7760_s1 + $0x2a0] sm:$0xff]   ;;  %v5995_v44 = vld [vmem:[%s7760_s1 + $0x228] sm:$0xff]   ;;  %v5997_v46 = vld [vmem:[%s7760_s1 + $0x270] sm:$0xff]  }
  0x1c   :  { %5528 = vmatpush3.bf16.msra.mxu0 %v5934_v26  ;;  %v5979_v26 = vld [vmem:[%s7760_s1 + $0x208] sm:$0xff]   ;;  %v5998_v48 = vld [vmem:[%s7760_s1 + $0x2f0] sm:$0xff]  }
  0x1d   :  { %5550 = vmatpush3.bf16.msra.mxu1 %v5935_v27  ;;  %5529 = vmatprep.subr.bf16.mxu0 %v5936_v29  ;;  %v5980_v27 = vld [vmem:[%s7760_s1 + $0x288] sm:$0xff]   ;;  %v5982_v29 = vld [vmem:[%s7760_s1 + $0x2d0] sm:$0xff]  }
  0x1e   :  { %5551 = vmatprep.subr.bf16.mxu1 %v5937_v30  ;;  %v5983_v30 = vld [vmem:[%s7760_s1 + $0x210] sm:$0xff]  }
  0x20   :  { %5530 = vmatpush3.bf16.msra.mxu0 %v5938_v31  ;;  %v5984_v31 = vld [vmem:[%s7760_s1 + $0x290] sm:$0xff]  }
  0x21   :  { %5552 = vmatpush3.bf16.msra.mxu1 %v5939_v32  ;;  %5559 = vmatprep.subr.bf16.mxu0 %v5941_v35  ;;  %v5985_v32 = vld [vmem:[%s7760_s1 + $0x258] sm:$0xff]  }
  0x22   :  { %5581 = vmatprep.subr.bf16.mxu1 %v5942_v38  ;;  %v5987_v35 = vld [vmem:[%s7760_s1 + $0x218] sm:$0xff]   ;;  %v5990_v38 = vld [vmem:[%s7760_s1 + $0x2e0] sm:$0xff]  }
  0x23   :  { %2365 = vmatmul.mubr.bf16.vlgmr.msra.gmra.mrb[0].mxu0 %v591_v45  ;;  %v5996_v45 = vld [vmem:[%s7760_s1 + $0x2a8] sm:$0xff]  }
  0x24   :  { %5560 = vmatpush3.bf16.msra.mxu0 %v5943_v47  ;;  %2405 = vmatmul.mubr.bf16.vlgmr.msra.gmra.mrb[0].mxu1 %v613_v51  ;;  %v42_v47 = vld [vmem:[%s7759_s0 + $0x8] sm:$0xff]  ;;  %v5999_v51 = vld [vmem:[%s7760_s1 + $0x230] sm:$0xff]  }
  0x25   :  { %5561 = vmatprep.subr.bf16.mxu0 %v5945_v52  ;;  %5582 = vmatpush3.bf16.msra.mxu1 %v5944_v49  ;;  %v624_v49 = vrot.slane %v42_v47, %v6406_v41  ;;  %v6000_v52 = vld [vmem:[%s7760_s1 + $0x2b0] sm:$0xff]  }
  0x26   :  { %2444 = vmatprep.mubr.bf16.mxu0 %v612_v50  ;;  %5583 = vmatprep.subr.bf16.mxu1 %v5946_v54  ;;  %v617_v50 = vcombine.high %v42_v47, %v42_v47  ;;  %v6047_v47 = vld [vmem:[%s7760_s1 + $0x4d0] sm:$0xff]  }
  0x27   :  { %2484 = vmatprep.mubr.bf16.mxu1 %v616_v56  ;;  %v632_v53 = vcombine.high %v624_v49, %v624_v49  ;;  %v6002_v56 = vld [vmem:[%s7760_s1 + $0x2f8] sm:$0xff]  }
  0x28   :  { %5562 = vmatpush3.bf16.msra.mxu0 %v5947_v55  ;;  %v6598_v54 = vrot.slane %v617_v50, %v6406_v41  ;;  %v6001_v55 = vld [vmem:[%s7760_s1 + $0x278] sm:$0xff]  }
  0x29   :  { %5563 = vmatprep.subr.bf16.mxu0 %v5949_v58  ;;  %5584 = vmatpush3.bf16.msra.mxu1 %v5948_v57  ;;  %v654_v57 = vrot.slane %v632_v53, %v6406_v41  ;;  %v6050_v50 = vld [vmem:[%s7760_s1 + $0x458] sm:$0xff]  }
  0x2a   :  { %5585 = vmatprep.subr.bf16.mxu1 %v5950_v59  ;;  %v633_v58 = vcombine.high %v6598_v54, %v6598_v54  ;;  %v6003_v59 = vld [vmem:[%s7760_s1 + $0x238] sm:$0xff]  }
  0x2b   :  { %v6053_v53 = vld [vmem:[%s7760_s1 + $0x498] sm:$0xff]  }
  0x2c   :  { %5564 = vmatpush3.bf16.msra.mxu0 %v5951_v60  ;;  %v6004_v60 = vld [vmem:[%s7760_s1 + $0x2b8] sm:$0xff]  }
  0x2d   :  { %5565 = vmatprep.subr.bf16.mxu0 %v5953_v62  ;;  %5586 = vmatpush3.bf16.msra.mxu1 %v5952_v61  ;;  %v664_v61 = vcombine.high %v654_v57, %v654_v57  ;;  %v640_v62 = vrot.slane %v624_v49, %v6406_v41  ;;  %v6049_v49 = vld [vmem:[%s7760_s1 + $0x490] sm:$0xff]  }
  0x2e   :  { %5587 = vmatprep.subr.bf16.mxu1 %v5954_v63  ;;  %v6005_v63 = vld [vmem:[%s7760_s1 + $0x340] sm:$0xff]  }
  0x30   :  { %5566 = vmatpush3.bf16.msra.mxu0 %v5955_v0  ;;  %v6006_v0 = vld [vmem:[%s7760_s1 + $0x3c0] sm:$0xff]  }
  0x31   :  { %5567 = vmatprep.subr.bf16.mxu0 %v5957_v2  ;;  %5588 = vmatpush3.bf16.msra.mxu1 %v5956_v1  ;;  %v661_v1 = vrot.slane %v633_v58, %v6406_v41  ;;  %v6007_v2 = vld [vmem:[%s7760_s1 + $0x300] sm:$0xff]   ;;  %v6058_v58 = vld [vmem:[%s7760_s1 + $0x468] sm:$0xff]  }
  0x32   :  { %5589 = vmatprep.subr.bf16.mxu1 %v5958_v3  ;;  %v6008_v3 = vld [vmem:[%s7760_s1 + $0x380] sm:$0xff]  }
  0x34   :  { %5568 = vmatpush3.bf16.msra.mxu0 %v5959_v4  ;;  %v662_v4 = vcombine.high %v640_v62, %v640_v62 }
  0x35   :  { %5569 = vmatprep.subr.bf16.mxu0 %v5961_v6  ;;  %5590 = vmatpush3.bf16.msra.mxu1 %v5960_v5  ;;  %v6009_v5 = vld [vmem:[%s7760_s1 + $0x348] sm:$0xff]  }
  0x36   :  { %5591 = vmatprep.subr.bf16.mxu1 %v5962_v7  ;;  %v6010_v6 = vld [vmem:[%s7760_s1 + $0x3c8] sm:$0xff]   ;;  %v665_v7 = vcombine.high %v661_v1, %v661_v1 }
  0x38   :  { %5570 = vmatpush3.bf16.msra.mxu0 %v5963_v8  ;;  %v6011_v8 = vld [vmem:[%s7760_s1 + $0x308] sm:$0xff]  }
  0x39   :  { %5571 = vmatprep.subr.bf16.mxu0 %v5965_v10  ;;  %5592 = vmatpush3.bf16.msra.mxu1 %v5964_v9  ;;  %v6012_v9 = vld [vmem:[%s7760_s1 + $0x388] sm:$0xff]   ;;  %v6013_v10 = vld [vmem:[%s7760_s1 + $0x350] sm:$0xff]  }
  0x3a   :  { %5593 = vmatprep.subr.bf16.mxu1 %v5966_v11  ;;  %v6014_v11 = vld [vmem:[%s7760_s1 + $0x3d0] sm:$0xff]  }
  0x3c   :  { %5572 = vmatpush3.bf16.msra.mxu0 %v5967_v12  ;;  %v6015_v12 = vld [vmem:[%s7760_s1 + $0x310] sm:$0xff]  }
  0x3d   :  { %5573 = vmatprep.subr.bf16.mxu0 %v5969_v14  ;;  %5594 = vmatpush3.bf16.msra.mxu1 %v5968_v13  ;;  %v6016_v13 = vld [vmem:[%s7760_s1 + $0x390] sm:$0xff]   ;;  %v6017_v14 = vld [vmem:[%s7760_s1 + $0x358] sm:$0xff]  }
  0x3e   :  { %5595 = vmatprep.subr.bf16.mxu1 %v5970_v15  ;;  %v6018_v15 = vld [vmem:[%s7760_s1 + $0x3d8] sm:$0xff]  }
  0x40   :  { %5574 = vmatpush3.bf16.msra.mxu0 %v5971_v16  ;;  %v6019_v16 = vld [vmem:[%s7760_s1 + $0x318] sm:$0xff]  }
  0x41   :  { %5603 = vmatprep.subr.bf16.mxu0 %v5973_v19  ;;  %5596 = vmatpush3.bf16.msra.mxu1 %v5972_v17  ;;  %v6020_v17 = vld [vmem:[%s7760_s1 + $0x398] sm:$0xff]   ;;  %v6022_v19 = vld [vmem:[%s7760_s1 + $0x3e0] sm:$0xff]  }
  0x42   :  { %5625 = vmatprep.subr.bf16.mxu1 %v5974_v20  ;;  %v6023_v20 = vld [vmem:[%s7760_s1 + $0x320] sm:$0xff]  }
  0x43   :  { %2445 = vmatmul.mubr.bf16.vlgmr.msra.gmra.mrb[4].mxu0 %v598_v18  ;;  %v6021_v18 = vld [vmem:[%s7760_s1 + $0x360] sm:$0xff]  }
  0x44   :  { %5604 = vmatpush3.bf16.msra.mxu0 %v5975_v21  ;;  %2485 = vmatmul.mubr.bf16.vlgmr.msra.gmra.mrb[4].mxu1 %v614_v23  ;;  %v6024_v21 = vld [vmem:[%s7760_s1 + $0x3a0] sm:$0xff]   ;;  %v6026_v23 = vld [vmem:[%s7760_s1 + $0x3e8] sm:$0xff]  }
  0x45   :  { %5605 = vmatprep.subr.bf16.mxu0 %v5977_v24  ;;  %5626 = vmatpush3.bf16.msra.mxu1 %v5976_v22  ;;  %v6025_v22 = vld [vmem:[%s7760_s1 + $0x368] sm:$0xff]  }
  0x46   :  { %5627 = vmatprep.subr.bf16.mxu1 %v5978_v25  ;;  %2524 = vmatprep.mubr.bf16.mxu0 %v654_v57  ;;  %v6027_v24 = vld [vmem:[%s7760_s1 + $0x328] sm:$0xff]   ;;  %v6057_v57 = vld [vmem:[%s7760_s1 + $0x4a0] sm:$0xff]  }
  0x47   :  { %2564 = vmatprep.mubr.bf16.mxu1 %v664_v61  ;;  %v6028_v25 = vld [vmem:[%s7760_s1 + $0x3a8] sm:$0xff]  }
  0x48   :  { %5606 = vmatpush3.bf16.msra.mxu0 %v5979_v26  ;;  %v6029_v26 = vld [vmem:[%s7760_s1 + $0x370] sm:$0xff]   ;;  %v6061_v61 = vld [vmem:[%s7760_s1 + $0x4a8] sm:$0xff]  }
  0x49   :  { %5607 = vmatprep.subr.bf16.mxu0 %v5981_v28  ;;  %5628 = vmatpush3.bf16.msra.mxu1 %v5980_v27  ;;  %v6030_v27 = vld [vmem:[%s7760_s1 + $0x3f0] sm:$0xff]  }
  0x4a   :  { %5629 = vmatprep.subr.bf16.mxu1 %v5982_v29  ;;  %v6031_v28 = vld [vmem:[%s7760_s1 + $0x330] sm:$0xff]  }
  0x4b   :  { %v6032_v29 = vld [vmem:[%s7760_s1 + $0x3b0] sm:$0xff]  }
  0x4c   :  { %5608 = vmatpush3.bf16.msra.mxu0 %v5983_v30  ;;  %v6033_v30 = vld [vmem:[%s7760_s1 + $0x378] sm:$0xff]  }
  0x4d   :  { %5609 = vmatprep.subr.bf16.mxu0 %v5985_v32  ;;  %5630 = vmatpush3.bf16.msra.mxu1 %v5984_v31  ;;  %v6034_v31 = vld [vmem:[%s7760_s1 + $0x3f8] sm:$0xff]  }
  0x4e   :  { %5631 = vmatprep.subr.bf16.mxu1 %v5986_v34  ;;  %v6035_v32 = vld [vmem:[%s7760_s1 + $0x338] sm:$0xff]  }
  0x4f   :  { %v6036_v34 = vld [vmem:[%s7760_s1 + $0x3b8] sm:$0xff]  }
  0x50   :  { %5610 = vmatpush3.bf16.msra.mxu0 %v5987_v35  ;;  %v647_v35 = vrot.slane %v6598_v54, %v6406_v41  ;;  %v6054_v54 = vld [vmem:[%s7760_s1 + $0x460] sm:$0xff]  }
  0x51   :  { %5611 = vmatprep.subr.bf16.mxu0 %v5989_v37  ;;  %5632 = vmatpush3.bf16.msra.mxu1 %v5988_v36  ;;  %v6038_v36 = vld [vmem:[%s7760_s1 + $0x440] sm:$0xff]  }
  0x52   :  { %5633 = vmatprep.subr.bf16.mxu1 %v5990_v38  ;;  %v6039_v37 = vld [vmem:[%s7760_s1 + $0x4c0] sm:$0xff]  }
  0x53   :  { %v6040_v38 = vld [vmem:[%s7760_s1 + $0x400] sm:$0xff]  }
  0x54   :  { %5612 = vmatpush3.bf16.msra.mxu0 %v5991_v39  ;;  %v6041_v39 = vld [vmem:[%s7760_s1 + $0x480] sm:$0xff]  }
  0x55   :  { %5613 = vmatprep.subr.bf16.mxu0 %v5993_v42  ;;  %5634 = vmatpush3.bf16.msra.mxu1 %v5992_v40  ;;  %v663_v40 = vcombine.high %v647_v35, %v647_v35  ;;  %v6042_v42 = vld [vmem:[%s7760_s1 + $0x448] sm:$0xff]  }
  0x56   :  { %5635 = vmatprep.subr.bf16.mxu1 %v5994_v43  ;;  %v6043_v43 = vld [vmem:[%s7760_s1 + $0x4c8] sm:$0xff]  }
  0x58   :  { %5614 = vmatpush3.bf16.msra.mxu0 %v5995_v44  ;;  %v6044_v44 = vld [vmem:[%s7760_s1 + $0x408] sm:$0xff]  }
  0x59   :  { %5615 = vmatprep.subr.bf16.mxu0 %v5997_v46  ;;  %5636 = vmatpush3.bf16.msra.mxu1 %v5996_v45  ;;  %v6045_v45 = vld [vmem:[%s7760_s1 + $0x488] sm:$0xff]   ;;  %v6046_v46 = vld [vmem:[%s7760_s1 + $0x450] sm:$0xff]  }
  0x5a   :  { %5637 = vmatprep.subr.bf16.mxu1 %v5998_v48  ;;  %v6048_v48 = vld [vmem:[%s7760_s1 + $0x410] sm:$0xff]  }
  0x5c   :  { %5616 = vmatpush3.bf16.msra.mxu0 %v5999_v51  ;;  %v6051_v51 = vld [vmem:[%s7760_s1 + $0x4d8] sm:$0xff]  }
  0x5d   :  { %5617 = vmatprep.subr.bf16.mxu0 %v6001_v55  ;;  %5638 = vmatpush3.bf16.msra.mxu1 %v6000_v52  ;;  %v6052_v52 = vld [vmem:[%s7760_s1 + $0x418] sm:$0xff]   ;;  %v6055_v55 = vld [vmem:[%s7760_s1 + $0x4e0] sm:$0xff]  }
  0x5e   :  { %5639 = vmatprep.subr.bf16.mxu1 %v6002_v56  ;;  %v6056_v56 = vld [vmem:[%s7760_s1 + $0x420] sm:$0xff]  }
  0x60   :  { %5618 = vmatpush3.bf16.msra.mxu0 %v6003_v59  ;;  %v6059_v59 = vld [vmem:[%s7760_s1 + $0x4e8] sm:$0xff]  }
  0x61   :  { %5647 = vmatprep.subr.bf16.mxu0 %v6005_v63  ;;  %5640 = vmatpush3.bf16.msra.mxu1 %v6004_v60  ;;  %v6060_v60 = vld [vmem:[%s7760_s1 + $0x428] sm:$0xff]   ;;  %v43_v63 = vld [vmem:[%s7759_s0 + $0x10] sm:$0xff] }
  0x62   :  { %5669 = vmatprep.subr.bf16.mxu1 %v6006_v0  ;;  %v6063_v0 = vld [vmem:[%s7760_s1 + $0x4f0] sm:$0xff]  }
  0x63   :  { %2525 = vmatmul.mubr.bf16.vlgmr.msra.gmra.mrb[8].mxu0 %v640_v62  ;;  %v6062_v62 = vld [vmem:[%s7760_s1 + $0x470] sm:$0xff]  }
  0x64   :  { %5648 = vmatpush3.bf16.msra.mxu0 %v6007_v2  ;;  %2604 = vmatprep.mubr.bf16.mxu0 %v661_v1  ;;  %v673_v1 = vrot.slane %v43_v63, %v6406_v41  ;;  %v666_v2 = vcombine.high %v43_v63, %v43_v63  ;;  %v6112_v63 = vld [vmem:[%s7760_s1 + $0x6d0] sm:$0xff]  }
  0x65   :  { %2565 = vmatmul.mubr.bf16.vlgmr.msra.gmra.mrb[8].mxu1 %v662_v4  ;;  %5649 = vmatprep.subr.bf16.mxu0 %v6009_v5  ;;  %v6065_v4 = vld [vmem:[%s7760_s1 + $0x4b0] sm:$0xff]  }
  0x66   :  { %5670 = vmatpush3.bf16.msra.mxu1 %v6008_v3  ;;  %2644 = vmatprep.mubr.bf16.mxu1 %v665_v7  ;;  %v6064_v3 = vld [vmem:[%s7760_s1 + $0x430] sm:$0xff]   ;;  %v681_v5 = vcombine.high %v673_v1, %v673_v1  ;;  %v6066_v7 = vld [vmem:[%s7760_s1 + $0x478] sm:$0xff]  }
  0x67   :  { %5671 = vmatprep.subr.bf16.mxu1 %v6010_v6  ;;  %v6804_v6 = vrot.slane %v666_v2, %v6406_v41  ;;  %v6115_v2 = vld [vmem:[%s7760_s1 + $0x658] sm:$0xff]  }
  0x68   :  { %5650 = vmatpush3.bf16.msra.mxu0 %v6011_v8  ;;  %v6067_v8 = vld [vmem:[%s7760_s1 + $0x4f8] sm:$0xff]  }
  0x69   :  { %5651 = vmatprep.subr.bf16.mxu0 %v6013_v10  ;;  %v682_v10 = vcombine.high %v6804_v6, %v6804_v6 }
  0x6a   :  { %5672 = vmatpush3.bf16.msra.mxu1 %v6012_v9  ;;  %v703_v9 = vrot.slane %v681_v5, %v6406_v41  ;;  %v6118_v5 = vld [vmem:[%s7760_s1 + $0x698] sm:$0xff]  }
  0x6b   :  { %5673 = vmatprep.subr.bf16.mxu1 %v6014_v11  ;;  %v6068_v11 = vld [vmem:[%s7760_s1 + $0x438] sm:$0xff]  }
  0x6c   :  { %5652 = vmatpush3.bf16.msra.mxu0 %v6015_v12  ;;  %v6069_v12 = vld [vmem:[%s7760_s1 + $0x4b8] sm:$0xff]  }
  0x6d   :  { %5653 = vmatprep.subr.bf16.mxu0 %v6017_v14  ;;  %v689_v14 = vrot.slane %v673_v1, %v6406_v41  ;;  %v6114_v1 = vld [vmem:[%s7760_s1 + $0x690] sm:$0xff]  }
  0x6e   :  { %5674 = vmatpush3.bf16.msra.mxu1 %v6016_v13  ;;  %v713_v13 = vcombine.high %v703_v9, %v703_v9 }
  0x6f   :  { %5675 = vmatprep.subr.bf16.mxu1 %v6018_v15  ;;  %v6070_v15 = vld [vmem:[%s7760_s1 + $0x540] sm:$0xff]  }
  0x70   :  { %5654 = vmatpush3.bf16.msra.mxu0 %v6019_v16  ;;  %v6071_v16 = vld [vmem:[%s7760_s1 + $0x5c0] sm:$0xff]  }
  0x71   :  { %5655 = vmatprep.subr.bf16.mxu0 %v6021_v18  ;;  %v6072_v18 = vld [vmem:[%s7760_s1 + $0x500] sm:$0xff]  }
  0x72   :  { %5676 = vmatpush3.bf16.msra.mxu1 %v6020_v17  ;;  %v710_v17 = vrot.slane %v682_v10, %v6406_v41  ;;  %v6123_v10 = vld [vmem:[%s7760_s1 + $0x668] sm:$0xff]  }
  0x73   :  { %5677 = vmatprep.subr.bf16.mxu1 %v6022_v19  ;;  %v6073_v19 = vld [vmem:[%s7760_s1 + $0x580] sm:$0xff]  }
  0x74   :  { %5656 = vmatpush3.bf16.msra.mxu0 %v6023_v20  ;;  %v711_v20 = vcombine.high %v689_v14, %v689_v14 }
  0x75   :  { %5657 = vmatprep.subr.bf16.mxu0 %v6025_v22  ;;  %v6075_v22 = vld [vmem:[%s7760_s1 + $0x5c8] sm:$0xff]  }
  0x76   :  { %5678 = vmatpush3.bf16.msra.mxu1 %v6024_v21  ;;  %v6074_v21 = vld [vmem:[%s7760_s1 + $0x548] sm:$0xff]  }
  0x77   :  { %5679 = vmatprep.subr.bf16.mxu1 %v6026_v23  ;;  %v714_v23 = vcombine.high %v710_v17, %v710_v17 }
  0x78   :  { %5658 = vmatpush3.bf16.msra.mxu0 %v6027_v24  ;;  %v6076_v24 = vld [vmem:[%s7760_s1 + $0x508] sm:$0xff]  }
  0x79   :  { %5659 = vmatprep.subr.bf16.mxu0 %v6029_v26  ;;  %v6078_v26 = vld [vmem:[%s7760_s1 + $0x550] sm:$0xff]  }
  0x7a   :  { %5680 = vmatpush3.bf16.msra.mxu1 %v6028_v25  ;;  %v6077_v25 = vld [vmem:[%s7760_s1 + $0x588] sm:$0xff]  }
  0x7b   :  { %5681 = vmatprep.subr.bf16.mxu1 %v6030_v27  ;;  %v6079_v27 = vld [vmem:[%s7760_s1 + $0x5d0] sm:$0xff]  }
  0x7c   :  { %5660 = vmatpush3.bf16.msra.mxu0 %v6031_v28  ;;  %v6080_v28 = vld [vmem:[%s7760_s1 + $0x510] sm:$0xff]  }
  0x7d   :  { %5661 = vmatprep.subr.bf16.mxu0 %v6033_v30  ;;  %v6082_v30 = vld [vmem:[%s7760_s1 + $0x558] sm:$0xff]  }
  0x7e   :  { %5682 = vmatpush3.bf16.msra.mxu1 %v6032_v29  ;;  %v6081_v29 = vld [vmem:[%s7760_s1 + $0x590] sm:$0xff]  }
  0x7f   :  { %5683 = vmatprep.subr.bf16.mxu1 %v6034_v31  ;;  %v6083_v31 = vld [vmem:[%s7760_s1 + $0x5d8] sm:$0xff]  }
  0x80   :  { %5662 = vmatpush3.bf16.msra.mxu0 %v6035_v32  ;;  %v6084_v32 = vld [vmem:[%s7760_s1 + $0x518] sm:$0xff]  }
  0x81   :  { %5691 = vmatprep.subr.bf16.mxu0 %v6038_v36  ;;  %v6087_v36 = vld [vmem:[%s7760_s1 + $0x5e0] sm:$0xff]  }
  0x82   :  { %5684 = vmatpush3.bf16.msra.mxu1 %v6036_v34  ;;  %v6085_v34 = vld [vmem:[%s7760_s1 + $0x598] sm:$0xff]  }
  0x83   :  { %2605 = vmatmul.mubr.bf16.vlgmr.msra.gmra.mrb[12].mxu0 %v647_v35  ;;  %5713 = vmatprep.subr.bf16.mxu1 %v6039_v37  ;;  %v6086_v35 = vld [vmem:[%s7760_s1 + $0x560] sm:$0xff]  }
  0x84   :  { %5692 = vmatpush3.bf16.msra.mxu0 %v6040_v38  ;;  %2684 = vmatprep.mubr.bf16.mxu0 %v703_v9  ;;  %v6088_v37 = vld [vmem:[%s7760_s1 + $0x520] sm:$0xff]  }
  0x85   :  { %2645 = vmatmul.mubr.bf16.vlgmr.msra.gmra.mrb[12].mxu1 %v663_v40  ;;  %5693 = vmatprep.subr.bf16.mxu0 %v6042_v42  ;;  %v6089_v38 = vld [vmem:[%s7760_s1 + $0x5a0] sm:$0xff]   ;;  %v6091_v40 = vld [vmem:[%s7760_s1 + $0x5e8] sm:$0xff]  }
  0x86   :  { %5714 = vmatpush3.bf16.msra.mxu1 %v6041_v39  ;;  %2724 = vmatprep.mubr.bf16.mxu1 %v713_v13  ;;  %v6090_v39 = vld [vmem:[%s7760_s1 + $0x568] sm:$0xff]   ;;  %v6122_v9 = vld [vmem:[%s7760_s1 + $0x6a0] sm:$0xff]  }
  0x87   :  { %5715 = vmatprep.subr.bf16.mxu1 %v6043_v43  ;;  %v6092_v42 = vld [vmem:[%s7760_s1 + $0x528] sm:$0xff]  }
  0x88   :  { %5694 = vmatpush3.bf16.msra.mxu0 %v6044_v44  ;;  %v6093_v43 = vld [vmem:[%s7760_s1 + $0x5a8] sm:$0xff]   ;;  %v6094_v44 = vld [vmem:[%s7760_s1 + $0x570] sm:$0xff]  }
  0x89   :  { %5695 = vmatprep.subr.bf16.mxu0 %v6046_v46  ;;  %v6096_v46 = vld [vmem:[%s7760_s1 + $0x530] sm:$0xff]   ;;  %v6126_v13 = vld [vmem:[%s7760_s1 + $0x6a8] sm:$0xff]  }
  0x8a   :  { %5716 = vmatpush3.bf16.msra.mxu1 %v6045_v45  ;;  %v6095_v45 = vld [vmem:[%s7760_s1 + $0x5f0] sm:$0xff]  }
  0x8b   :  { %5717 = vmatprep.subr.bf16.mxu1 %v6047_v47  ;;  %v6097_v47 = vld [vmem:[%s7760_s1 + $0x5b0] sm:$0xff]  }
  0x8c   :  { %5696 = vmatpush3.bf16.msra.mxu0 %v6048_v48  ;;  %v6098_v48 = vld [vmem:[%s7760_s1 + $0x578] sm:$0xff]  }
  0x8d   :  { %5697 = vmatprep.subr.bf16.mxu0 %v6050_v50  ;;  %v6100_v50 = vld [vmem:[%s7760_s1 + $0x538] sm:$0xff]  }
  0x8e   :  { %5718 = vmatpush3.bf16.msra.mxu1 %v6049_v49  ;;  %v6099_v49 = vld [vmem:[%s7760_s1 + $0x5f8] sm:$0xff]  }
  0x8f   :  { %5719 = vmatprep.subr.bf16.mxu1 %v6051_v51  ;;  %v6101_v51 = vld [vmem:[%s7760_s1 + $0x5b8] sm:$0xff]  }
  0x90   :  { %5698 = vmatpush3.bf16.msra.mxu0 %v6052_v52  ;;  %v696_v52 = vrot.slane %v6804_v6, %v6406_v41  ;;  %v6119_v6 = vld [vmem:[%s7760_s1 + $0x660] sm:$0xff]  }
  0x91   :  { %5699 = vmatprep.subr.bf16.mxu0 %v6054_v54  ;;  %v6104_v54 = vld [vmem:[%s7760_s1 + $0x6c0] sm:$0xff]  }
  0x92   :  { %5720 = vmatpush3.bf16.msra.mxu1 %v6053_v53  ;;  %v6103_v53 = vld [vmem:[%s7760_s1 + $0x640] sm:$0xff]  }
  0x93   :  { %5721 = vmatprep.subr.bf16.mxu1 %v6055_v55  ;;  %v6105_v55 = vld [vmem:[%s7760_s1 + $0x600] sm:$0xff]  }
  0x94   :  { %5700 = vmatpush3.bf16.msra.mxu0 %v6056_v56  ;;  %v6106_v56 = vld [vmem:[%s7760_s1 + $0x680] sm:$0xff]  }
  0x95   :  { %5701 = vmatprep.subr.bf16.mxu0 %v6058_v58  ;;  %v6107_v58 = vld [vmem:[%s7760_s1 + $0x648] sm:$0xff]  }
  0x96   :  { %5722 = vmatpush3.bf16.msra.mxu1 %v6057_v57  ;;  %v712_v57 = vcombine.high %v696_v52, %v696_v52 }
  0x97   :  { %5723 = vmatprep.subr.bf16.mxu1 %v6059_v59  ;;  %v6108_v59 = vld [vmem:[%s7760_s1 + $0x6c8] sm:$0xff]  }
  0x98   :  { %5702 = vmatpush3.bf16.msra.mxu0 %v6060_v60  ;;  %v6109_v60 = vld [vmem:[%s7760_s1 + $0x608] sm:$0xff]  }
  0x99   :  { %5703 = vmatprep.subr.bf16.mxu0 %v6062_v62  ;;  %v6111_v62 = vld [vmem:[%s7760_s1 + $0x650] sm:$0xff]  }
  0x9a   :  { %5724 = vmatpush3.bf16.msra.mxu1 %v6061_v61  ;;  %v6110_v61 = vld [vmem:[%s7760_s1 + $0x688] sm:$0xff]  }
  0x9b   :  { %5725 = vmatprep.subr.bf16.mxu1 %v6063_v0  ;;  %v6113_v0 = vld [vmem:[%s7760_s1 + $0x610] sm:$0xff]  }
  0x9c   :  { %5704 = vmatpush3.bf16.msra.mxu0 %v6064_v3  ;;  %v6116_v3 = vld [vmem:[%s7760_s1 + $0x6d8] sm:$0xff]  }
  0x9d   :  { %5705 = vmatprep.subr.bf16.mxu0 %v6066_v7  ;;  %v6120_v7 = vld [vmem:[%s7760_s1 + $0x6e0] sm:$0xff]  }
  0x9e   :  { %5726 = vmatpush3.bf16.msra.mxu1 %v6065_v4  ;;  %v6117_v4 = vld [vmem:[%s7760_s1 + $0x618] sm:$0xff]  }
  0x9f   :  { %5727 = vmatprep.subr.bf16.mxu1 %v6067_v8  ;;  %v6121_v8 = vld [vmem:[%s7760_s1 + $0x620] sm:$0xff]  }
  0xa0   :  { %5706 = vmatpush3.bf16.msra.mxu0 %v6068_v11  ;;  %v6124_v11 = vld [vmem:[%s7760_s1 + $0x6e8] sm:$0xff]  }
  0xa1   :  { %5735 = vmatprep.subr.bf16.mxu0 %v6070_v15  ;;  %v44_v15 = vld [vmem:[%s7759_s0 + $0x18] sm:$0xff] }
  0xa2   :  { %5728 = vmatpush3.bf16.msra.mxu1 %v6069_v12  ;;  %v6125_v12 = vld [vmem:[%s7760_s1 + $0x628] sm:$0xff]  }
  0xa3   :  { %2685 = vmatmul.mubr.bf16.vlgmr.msra.gmra.mrb[16].mxu0 %v689_v14  ;;  %5757 = vmatprep.subr.bf16.mxu1 %v6071_v16  ;;  %v6127_v14 = vld [vmem:[%s7760_s1 + $0x670] sm:$0xff]  }
  0xa4   :  { %5736 = vmatpush3.bf16.msra.mxu0 %v6072_v18  ;;  %2764 = vmatprep.mubr.bf16.mxu0 %v710_v17  ;;  %v6128_v16 = vld [vmem:[%s7760_s1 + $0x6f0] sm:$0xff]   ;;  %v722_v17 = vrot.slane %v44_v15, %v6406_v41  ;;  %v715_v18 = vcombine.high %v44_v15, %v44_v15 }
  0xa5   :  { %2725 = vmatmul.mubr.bf16.vlgmr.msra.gmra.mrb[16].mxu1 %v711_v20  ;;  %5737 = vmatprep.subr.bf16.mxu0 %v6074_v21  ;;  %v6131_v20 = vld [vmem:[%s7760_s1 + $0x678] sm:$0xff]  }
  0xa6   :  { %5758 = vmatpush3.bf16.msra.mxu1 %v6073_v19  ;;  %2804 = vmatprep.mubr.bf16.mxu1 %v714_v23  ;;  %v6129_v19 = vld [vmem:[%s7760_s1 + $0x630] sm:$0xff]   ;;  %v730_v21 = vcombine.high %v722_v17, %v722_v17 }
  0xa7   :  { %5759 = vmatprep.subr.bf16.mxu1 %v6075_v22  ;;  %v7010_v22 = vrot.slane %v715_v18, %v6406_v41  ;;  %v6130_v23 = vld [vmem:[%s7760_s1 + $0x6b0] sm:$0xff]  }
  0xa8   :  { %5738 = vmatpush3.bf16.msra.mxu0 %v6076_v24  ;;  %v6132_v24 = vld [vmem:[%s7760_s1 + $0x6f8] sm:$0xff]  }
  0xa9   :  { %5739 = vmatprep.subr.bf16.mxu0 %v6078_v26  ;;  %v731_v26 = vcombine.high %v7010_v22, %v7010_v22 }
  0xaa   :  { %5760 = vmatpush3.bf16.msra.mxu1 %v6077_v25  ;;  %v752_v25 = vrot.slane %v730_v21, %v6406_v41 }
  0xab   :  { %5761 = vmatprep.subr.bf16.mxu1 %v6079_v27  ;;  %v6133_v27 = vld [vmem:[%s7760_s1 + $0x638] sm:$0xff]  }
  0xac   :  { %5740 = vmatpush3.bf16.msra.mxu0 %v6080_v28  ;;  %v762_v28 = vcombine.high %v752_v25, %v752_v25 }
  0xad   :  { %5741 = vmatprep.subr.bf16.mxu0 %v6082_v30  ;;  %v6135_v30 = vld [vmem:[%s7760_s1 + $0x740] sm:$0xff]  }
  0xae   :  { %5762 = vmatpush3.bf16.msra.mxu1 %v6081_v29  ;;  %v738_v29 = vrot.slane %v722_v17, %v6406_v41 }
  0xaf   :  { %5763 = vmatprep.subr.bf16.mxu1 %v6083_v31  ;;  %v6134_v31 = vld [vmem:[%s7760_s1 + $0x6b8] sm:$0xff]  }
  0xb0   :  { %5742 = vmatpush3.bf16.msra.mxu0 %v6084_v32  ;;  %v759_v32 = vrot.slane %v731_v26, %v6406_v41 }
  0xb1   :  { %5743 = vmatprep.subr.bf16.mxu0 %v6086_v35  ;;  %v6137_v35 = vld [vmem:[%s7760_s1 + $0x700] sm:$0xff]  }
  0xb2   :  { %5764 = vmatpush3.bf16.msra.mxu1 %v6085_v34  ;;  %v6136_v34 = vld [vmem:[%s7760_s1 + $0x7c0] sm:$0xff]  }
  0xb3   :  { %5765 = vmatprep.subr.bf16.mxu1 %v6087_v36  ;;  %v760_v36 = vcombine.high %v738_v29, %v738_v29 }
  0xb4   :  { %5744 = vmatpush3.bf16.msra.mxu0 %v6088_v37  ;;  %v6139_v37 = vld [vmem:[%s7760_s1 + $0x748] sm:$0xff]  }
  0xb5   :  { %5745 = vmatprep.subr.bf16.mxu0 %v6090_v39  ;;  %v763_v39 = vcombine.high %v759_v32, %v759_v32 }
  0xb6   :  { %5766 = vmatpush3.bf16.msra.mxu1 %v6089_v38  ;;  %v6138_v38 = vld [vmem:[%s7760_s1 + $0x780] sm:$0xff]  }
  0xb7   :  { %5767 = vmatprep.subr.bf16.mxu1 %v6091_v40  ;;  %v6140_v40 = vld [vmem:[%s7760_s1 + $0x7c8] sm:$0xff]  }
  0xb8   :  { %5746 = vmatpush3.bf16.msra.mxu0 %v6092_v42  ;;  %v6141_v42 = vld [vmem:[%s7760_s1 + $0x708] sm:$0xff]  }
  0xb9   :  { %5747 = vmatprep.subr.bf16.mxu0 %v6094_v44  ;;  %v6142_v44 = vld [vmem:[%s7760_s1 + $0x788] sm:$0xff]  }
  0xba   :  { %5768 = vmatpush3.bf16.msra.mxu1 %v6093_v43  ;;  %v6143_v43 = vld [vmem:[%s7760_s1 + $0x750] sm:$0xff]  }
  0xbb   :  { %5769 = vmatprep.subr.bf16.mxu1 %v6095_v45  ;;  %v6144_v45 = vld [vmem:[%s7760_s1 + $0x7d0] sm:$0xff]  }
  0xbc   :  { %5748 = vmatpush3.bf16.msra.mxu0 %v6096_v46  ;;  %v6145_v46 = vld [vmem:[%s7760_s1 + $0x710] sm:$0xff]  }
  0xbd   :  { %5749 = vmatprep.subr.bf16.mxu0 %v6098_v48  ;;  %v6146_v48 = vld [vmem:[%s7760_s1 + $0x790] sm:$0xff]  }
  0xbe   :  { %5770 = vmatpush3.bf16.msra.mxu1 %v6097_v47  ;;  %v6147_v47 = vld [vmem:[%s7760_s1 + $0x758] sm:$0xff]  }
  0xbf   :  { %5771 = vmatprep.subr.bf16.mxu1 %v6099_v49  ;;  %v6148_v49 = vld [vmem:[%s7760_s1 + $0x7d8] sm:$0xff]  }
  0xc0   :  { %5750 = vmatpush3.bf16.msra.mxu0 %v6100_v50  ;;  %v6149_v50 = vld [vmem:[%s7760_s1 + $0x718] sm:$0xff]  }
  0xc1   :  { %5779 = vmatprep.subr.bf16.mxu0 %v6103_v53  ;;  %v6152_v53 = vld [vmem:[%s7760_s1 + $0x7e0] sm:$0xff]  }
  0xc2   :  { %5772 = vmatpush3.bf16.msra.mxu1 %v6101_v51  ;;  %v6150_v51 = vld [vmem:[%s7760_s1 + $0x798] sm:$0xff]  }
  0xc3   :  { %2765 = vmatmul.mubr.bf16.vlgmr.msra.gmra.mrb[20].mxu0 %v696_v52  ;;  %5801 = vmatprep.subr.bf16.mxu1 %v6104_v54  ;;  %v6151_v52 = vld [vmem:[%s7760_s1 + $0x760] sm:$0xff]  }
  0xc4   :  { %5780 = vmatpush3.bf16.msra.mxu0 %v6105_v55  ;;  %2844 = vmatprep.mubr.bf16.mxu0 %v752_v25  ;;  %v6153_v54 = vld [vmem:[%s7760_s1 + $0x720] sm:$0xff]  }
  0xc5   :  { %2805 = vmatmul.mubr.bf16.vlgmr.msra.gmra.mrb[20].mxu1 %v712_v57  ;;  %5781 = vmatprep.subr.bf16.mxu0 %v6107_v58  ;;  %v6154_v55 = vld [vmem:[%s7760_s1 + $0x7a0] sm:$0xff]   ;;  %v6156_v57 = vld [vmem:[%s7760_s1 + $0x7e8] sm:$0xff]  }
  0xc6   :  { %5802 = vmatpush3.bf16.msra.mxu1 %v6106_v56  ;;  %2884 = vmatprep.mubr.bf16.mxu1 %v762_v28  ;;  %v6155_v56 = vld [vmem:[%s7760_s1 + $0x768] sm:$0xff]  }
  0xc7   :  { %5803 = vmatprep.subr.bf16.mxu1 %v6108_v59  ;;  %v6157_v58 = vld [vmem:[%s7760_s1 + $0x728] sm:$0xff]  }
  0xc8   :  { %5782 = vmatpush3.bf16.msra.mxu0 %v6109_v60  ;;  %v6158_v59 = vld [vmem:[%s7760_s1 + $0x7a8] sm:$0xff]   ;;  %v6159_v60 = vld [vmem:[%s7760_s1 + $0x770] sm:$0xff]  }
  0xc9   :  { %5783 = vmatprep.subr.bf16.mxu0 %v6111_v62  ;;  %v6160_v62 = vld [vmem:[%s7760_s1 + $0x7f0] sm:$0xff]  }
  0xca   :  { %5804 = vmatpush3.bf16.msra.mxu1 %v6110_v61  ;;  %v5086_v61 = vld [vmem:[%s7761_s2] ss:$0 sm:$0xff] }
  0xcb   :  { %5805 = vmatprep.subr.bf16.mxu1 %v6112_v63 }
  0xcc   :  { %5784 = vmatpush3.bf16.msra.mxu0 %v6113_v0  ;;  %v6161_v0 = vld [vmem:[%s7760_s1 + $0x730] sm:$0xff]  }
  0xcd   :  { %5785 = vmatprep.subr.bf16.mxu0 %v6115_v2  ;;  %v6163_v2 = vld [vmem:[%s7760_s1 + $0x778] sm:$0xff]  }
  0xce   :  { %5806 = vmatpush3.bf16.msra.mxu1 %v6114_v1 }
  0xcf   :  { %5807 = vmatprep.subr.bf16.mxu1 %v6116_v3 }
  0xd0   :  { %5786 = vmatpush3.bf16.msra.mxu0 %v6117_v4 }
  0xd1   :  { %5787 = vmatprep.subr.bf16.mxu0 %v6119_v6  ;;  %v6162_v6 = vld [vmem:[%s7760_s1 + $0x7b0] sm:$0xff]  }
  0xd2   :  { %5808 = vmatpush3.bf16.msra.mxu1 %v6118_v5 }
  0xd3   :  { %5809 = vmatprep.subr.bf16.mxu1 %v6120_v7 }
  0xd4   :  { %5788 = vmatpush3.bf16.msra.mxu0 %v6121_v8 }
  0xd5   :  { %5789 = vmatprep.subr.bf16.mxu0 %v6123_v10 }
  0xd6   :  { %5810 = vmatpush3.bf16.msra.mxu1 %v6122_v9 }
  0xd7   :  { %5811 = vmatprep.subr.bf16.mxu1 %v6124_v11 }
  0xd8   :  { %5790 = vmatpush3.bf16.msra.mxu0 %v6125_v12  ;;  %v6164_v12 = vld [vmem:[%s7760_s1 + $0x7f8] sm:$0xff]  }
  0xd9   :  { %5791 = vmatprep.subr.bf16.mxu0 %v6127_v14  ;;  %v6165_v14 = vld [vmem:[%s7760_s1 + $0x738] sm:$0xff]  }
  0xda   :  { %5812 = vmatpush3.bf16.msra.mxu1 %v6126_v13 }
  0xdb   :  { %5813 = vmatprep.subr.bf16.mxu1 %v6128_v16  ;;  %v745_v16 = vrot.slane %v7010_v22, %v6406_v41 }
  0xdc   :  { %5792 = vmatpush3.bf16.msra.mxu0 %v6129_v19 }
  0xdd   :  { %5793 = vmatprep.subr.bf16.mxu0 %v6131_v20 }
  0xde   :  { %5814 = vmatpush3.bf16.msra.mxu1 %v6130_v23 }
  0xdf   :  { %5815 = vmatprep.subr.bf16.mxu1 %v6132_v24 }
  0xe0   :  { %5794 = vmatpush3.bf16.msra.mxu0 %v6133_v27 }
  0xe1   :  { %5823 = vmatprep.subr.bf16.mxu0 %v6135_v30 }
  0xe2   :  { %5816 = vmatpush3.bf16.msra.mxu1 %v6134_v31 }
  0xe3   :  { %2845 = vmatmul.mubr.bf16.vlgmr.msra.gmra.mrb[24].mxu0 %v738_v29  ;;  %5845 = vmatprep.subr.bf16.mxu1 %v6136_v34 }
  0xe4   :  { %5824 = vmatpush3.bf16.msra.mxu0 %v6137_v35  ;;  %2924 = vmatprep.mubr.bf16.mxu0 %v759_v32 }
  0xe5   :  { %2885 = vmatmul.mubr.bf16.vlgmr.msra.gmra.mrb[24].mxu1 %v760_v36  ;;  %5825 = vmatprep.subr.bf16.mxu0 %v6139_v37 }
  0xe6   :  { %5846 = vmatpush3.bf16.msra.mxu1 %v6138_v38  ;;  %2964 = vmatprep.mubr.bf16.mxu1 %v763_v39 }
  0xe7   :  { %5847 = vmatprep.subr.bf16.mxu1 %v6140_v40 }
  0xe8   :  { %5826 = vmatpush3.bf16.msra.mxu0 %v6141_v42 }
  0xe9   :  { %5827 = vmatprep.subr.bf16.mxu0 %v6143_v43 }
  0xea   :  { %5848 = vmatpush3.bf16.msra.mxu1 %v6142_v44 }
  0xeb   :  { %5849 = vmatprep.subr.bf16.mxu1 %v6144_v45 }
  0xec   :  { %5828 = vmatpush3.bf16.msra.mxu0 %v6145_v46 }
  0xed   :  { %5829 = vmatprep.subr.bf16.mxu0 %v6147_v47 }
  0xee   :  { %5850 = vmatpush3.bf16.msra.mxu1 %v6146_v48 }
  0xef   :  { %5851 = vmatprep.subr.bf16.mxu1 %v6148_v49 }
  0xf0   :  { %5830 = vmatpush3.bf16.msra.mxu0 %v6149_v50 }
  0xf1   :  { %5831 = vmatprep.subr.bf16.mxu0 %v6151_v52 }
  0xf2   :  { %5852 = vmatpush3.bf16.msra.mxu1 %v6150_v51 }
  0xf3   :  { %5853 = vmatprep.subr.bf16.mxu1 %v6152_v53 }
  0xf4   :  { %5832 = vmatpush3.bf16.msra.mxu0 %v6153_v54 }
  0xf5   :  { %5833 = vmatprep.subr.bf16.mxu0 %v6155_v56 }
  0xf6   :  { %5854 = vmatpush3.bf16.msra.mxu1 %v6154_v55  ;;  %v5531_v63 = vpop.f32.mrb[0].mxu0 }
  0xf7   :  { %v5532_v1 = vpop.f32.mrb[1].mxu0  ;;  %5855 = vmatprep.subr.bf16.mxu1 %v6156_v57  ;;  %v5553_v3 = vpop.f32.mrb[0].mxu1 }
  0xf8   :  { %v5533_v4 = vadd.f32 %v5532_v1, %v5531_v63  ;;  %v5534_v5 = vpop.f32.mrb[2].mxu0  ;;  %5834 = vmatpush3.bf16.msra.mxu0 %v6157_v58  ;;  %v5554_v7 = vpop.f32.mrb[1].mxu1 }
  0xf9   :  { %v5535_v8 = vpop.f32.mrb[3].mxu0  ;;  %5835 = vmatprep.subr.bf16.mxu0 %v6159_v60  ;;  %v5555_v10 = vadd.f32 %v5554_v7, %v5553_v3  ;;  %v5556_v11 = vpop.f32.mrb[2].mxu1 }
  0xfa   :  { %v2367_v9 = vadd.f32 %v5533_v4, %v5086_v61  ;;  %5856 = vmatpush3.bf16.msra.mxu1 %v6158_v59  ;;  %v5557_v13 = vpop.f32.mrb[3].mxu1 }
  0xfb   :  { %5857 = vmatprep.subr.bf16.mxu1 %v6160_v62 }
  0xfc   :  { %v2407_v15 = vadd.f32 %v5555_v10, %v2367_v9  ;;  %5836 = vmatpush3.bf16.msra.mxu0 %v6161_v0 }
  0xfd   :  { %5837 = vmatprep.subr.bf16.mxu0 %v6163_v2 }
  0xfe   :  { %19 = vsyncpa [#allocation5], 0  ;;  %5858 = vmatpush3.bf16.msra.mxu1 %v6162_v6  ;;  %v6166_v17 = vld [vmem:[%s7760_s1 + $0x7b8] sm:$0xff]   ;;  %v761_v18 = vcombine.high %v745_v16, %v745_v16  ;;  %v6168_v45 = vld [vmem:[%s7762_s3] sm:$0xff]   ;;  %v6227_v46 = vmov 0.0   ;;  %vm6228_vm0 = vmmov 0  }
  0xff   :  { %5859 = vmatprep.subr.bf16.mxu1 %v6164_v12  ;;  %v6169_v47 = vld [vmem:[%s7762_s3 + $0x8] sm:$0xff]   ;;  %v6170_v55 = vld [vmem:[%s7762_s3 + $0x10] sm:$0xff]   ;;  %v6171_v61 = vld [vmem:[%s7762_s3 + $0x18] sm:$0xff]   ;;  %s6229_s24 = smov 64   ;;  %vm3012_vm1 = vcmask 523264   ;;  %vm4783_vm2 = vcmask 517120  }
 0x100   :  { %5838 = vmatpush3.bf16.msra.mxu0 %v6165_v14  ;;  %v3058_v62 = vld [vmem:[%s7764_s5] sm:$0x3]  ;;  %s6231_s13 = smov [#allocation2]   ;;  %s6232_s15 = smov [#allocation4]  }
 0x101   :  { %5877 = vmatprep.subr.bf16.mxu0 %v6227_v46  ;;  %3060 = vrot.lane.b32.xlu0 %v3058_v62, %s6229_s24  ;;  %v3156_v62 = vld [vmem:[%s7767_s8] sm:$0xff]  ;;  %s5060_s14 = sshll.u32 %s6231_s13, 4  ;;  %s5070_s1 = sshll.u32 %s6232_s15, 4  ;;  %s5061_s14 = int_to_ptr.vmem [resolvable:$true] %s5060_s14  ;;  %s7639_s1 = int_to_ptr.vmem [resolvable:$true] %s5070_s1 }
 0x102   :  { %5860 = vmatpush3.bf16.msra.mxu1 %v6166_v17  ;;  %s6178_s16 = scalar_lea.vmem %s5061_s14, 32  ;;  %p6183_p1 = scmp.lt.s32.totalorder %s5061_s14, %s5061_s14 }
 0x103   :  { %2925 = vmatmul.mubr.bf16.vlgmr.msra.gmra.mrb[28].mxu0 %v745_v16  ;;  %5889 = vmatprep.subr.bf16.mxu1 %v6227_v46  ;;  %p6179_p0 = scmp.ne.s32.totalorder %s5061_s14, %s6178_s16  ;;  %p6184_p2 = scmp.lt.s32.totalorder %s6178_s16, %s6178_s16 }
 0x104   :  { %5878 = vmatpush3.bf16.msra.mxu0 %v6168_v45  ;;  %5885 = vmatprep.mubr.msk.bf16.mxu0 %vm6228_vm0, %v6227_v46 }
 0x105   :  { %2965 = vmatmul.mubr.bf16.vlgmr.msra.gmra.mrb[28].mxu1 %v761_v18  ;;  %5879 = vmatprep.subr.bf16.mxu0 %v6227_v46  ;;  %p6185_p3 = por %p6184_p2, %p6183_p1 }
 0x106   :  { %5897 = vmatprep.mubr.msk.bf16.mxu1 %vm6228_vm0, %v6227_v46 }
 0x107   :  { %p6186_p4 = pnand %p6185_p3, %p6179_p0 }
 0x108   :  { %5880 = vmatpush3.bf16.msra.mxu0 %v6169_v47 }
 0x109   :  { %5881 = vmatprep.subr.bf16.mxu0 %v6227_v46 }
 0x10c   :  { %5882 = vmatpush3.bf16.msra.mxu0 %v6170_v55  ;;  %v6174_v55 = vld [vmem:[%s7765_s6 + $0x10] sm:$0xff]  }
 0x10d   :  { %5883 = vmatprep.subr.bf16.mxu0 %v6227_v46 }
 0x110   :  { %5884 = vmatpush3.bf16.msra.mxu0 %v6171_v61 }
 0x116   :  { %v5575_v19 = vpop.f32.mrb[4].mxu0 }
 0x117   :  { %v5576_v20 = vpop.f32.mrb[5].mxu0  ;;  %v5597_v21 = vpop.f32.mrb[4].mxu1 }
 0x118   :  { %v5577_v23 = vadd.f32 %v5576_v20, %v5575_v19  ;;  %v5578_v24 = vpop.f32.mrb[6].mxu0  ;;  %v5598_v25 = vpop.f32.mrb[5].mxu1 }
 0x119   :  { %v5579_v26 = vpop.f32.mrb[7].mxu0  ;;  %v5599_v27 = vadd.f32 %v5598_v25, %v5597_v21  ;;  %v5600_v28 = vpop.f32.mrb[6].mxu1 }
 0x11a   :  { %v2447_v22 = vadd.f32 %v5577_v23, %v2407_v15  ;;  %v5601_v29 = vpop.f32.mrb[7].mxu1 }
 0x11c   :  { %v2487_v30 = vadd.f32 %v5599_v27, %v2447_v22 }
 0x136   :  { %v5619_v31 = vpop.f32.mrb[8].mxu0 }
 0x137   :  { %v5620_v32 = vpop.f32.mrb[9].mxu0 }
 0x138   :  { %v5641_v34 = vpop.f32.mrb[8].mxu1  ;;  %v5621_v35 = vadd.f32 %v5620_v32, %v5619_v31  ;;  %v5622_v36 = vpop.f32.mrb[10].mxu0 }
 0x139   :  { %v5642_v37 = vpop.f32.mrb[9].mxu1  ;;  %v5623_v38 = vpop.f32.mrb[11].mxu0 }
 0x13a   :  { %v2527_v39 = vadd.f32 %v5621_v35, %v2487_v30  ;;  %v5643_v40 = vadd.f32 %v5642_v37, %v5641_v34  ;;  %v5644_v42 = vpop.f32.mrb[10].mxu1 }
 0x13b   :  { %v5645_v43 = vpop.f32.mrb[11].mxu1 }
 0x13c   :  { %v2567_v44 = vadd.f32 %v5643_v40, %v2527_v39 }
 0x156   :  { %v5663_v48 = vpop.f32.mrb[12].mxu0 }
 0x157   :  { %v5664_v49 = vpop.f32.mrb[13].mxu0 }
 0x158   :  { %v5685_v50 = vpop.f32.mrb[12].mxu1  ;;  %v5665_v51 = vadd.f32 %v5664_v49, %v5663_v48  ;;  %v5666_v52 = vpop.f32.mrb[14].mxu0 }
 0x159   :  { %v5686_v53 = vpop.f32.mrb[13].mxu1  ;;  %v5667_v54 = vpop.f32.mrb[15].mxu0  ;;  %v6173_v52 = vld [vmem:[%s7765_s6 + $0x8] sm:$0xff]  }
 0x15a   :  { %v2607_v56 = vadd.f32 %v5665_v51, %v2567_v44  ;;  %v5687_v57 = vadd.f32 %v5686_v53, %v5685_v50  ;;  %v5688_v58 = vpop.f32.mrb[14].mxu1  ;;  %v6172_v51 = vld [vmem:[%s7765_s6] sm:$0xff]  }
 0x15b   :  { %v5689_v59 = vpop.f32.mrb[15].mxu1  ;;  %5890 = vmatpush3.bf16.msra.mxu1 %v6172_v51  ;;  %v5343_v53 = vld [vmem:[%s7763_s4] ss:$0 sm:$0xff]  ;;  %v3206_v51 = vld [vmem:[%s7767_s8 + $0x190] sm:$0xff] }
 0x15c   :  { %v2647_v60 = vadd.f32 %v5687_v57, %v2607_v56  ;;  %5891 = vmatprep.subr.bf16.mxu1 %v6227_v46 }
 0x15f   :  { %5892 = vmatpush3.bf16.msra.mxu1 %v6173_v52  ;;  %v3191_v52 = vld [vmem:[%s7767_s8 + $0x118] sm:$0xff] }
 0x160   :  { %5893 = vmatprep.subr.bf16.mxu1 %v6227_v46 }
 0x163   :  { %5894 = vmatpush3.bf16.msra.mxu1 %v6174_v55 }
 0x164   :  { %5895 = vmatprep.subr.bf16.mxu1 %v6227_v46  ;;  %v3173_v46 = vld [vmem:[%s7767_s8 + $0x88] sm:$0xff] }
 0x176   :  { %v5707_v63 = vpop.f32.mrb[16].mxu0 }
 0x177   :  { %v5708_v0 = vpop.f32.mrb[17].mxu0 }
 0x178   :  { %v5729_v1 = vpop.f32.mrb[16].mxu1  ;;  %v5709_v2 = vadd.f32 %v5708_v0, %v5707_v63  ;;  %v5710_v3 = vpop.f32.mrb[18].mxu0  ;;  %v3172_v63 = vld [vmem:[%s7767_s8 + $0x80] sm:$0xff]  ;;  %v3157_v0 = vld [vmem:[%s7767_s8 + $0x8] sm:$0xff] }
 0x179   :  { %v5730_v4 = vpop.f32.mrb[17].mxu1  ;;  %v5711_v5 = vpop.f32.mrb[19].mxu0  ;;  %v3188_v3 = vld [vmem:[%s7767_s8 + $0x100] sm:$0xff] }
 0x17a   :  { %v2687_v6 = vadd.f32 %v5709_v2, %v2647_v60  ;;  %v5731_v7 = vadd.f32 %v5730_v4, %v5729_v1  ;;  %v5732_v8 = vpop.f32.mrb[18].mxu1  ;;  %v6175_v60 = vld [vmem:[%s7765_s6 + $0x18] sm:$0xff]   ;;  %v5355_v1 = vcombine.low %v3156_v62, %v3172_v63  ;;  %v5356_v2 = vcombine.high %v3156_v62, %v3172_v63  ;;  %v3204_v4 = vld [vmem:[%s7767_s8 + $0x180] sm:$0xff]  ;;  %v3238_v62 = vld [vmem:[%s7767_s8 + $0x290] sm:$0xff] }
 0x17b   :  { %v5733_v9 = vpop.f32.mrb[19].mxu1  ;;  %5896 = vmatpush3.bf16.msra.mxu1 %v6175_v60  ;;  %v5357_v5 = vcombine.low %v3157_v0, %v3173_v46  ;;  %v3223_v63 = vld [vmem:[%s7767_s8 + $0x218] sm:$0xff] }
 0x17c   :  { %v2727_v10 = vadd.f32 %v5731_v7, %v2687_v6  ;;  %v5358_v6 = vcombine.high %v3157_v0, %v3173_v46  ;;  %v5388_v7 = vcombine.high %v3188_v3, %v3204_v4  ;;  %4095 = vmatprep.subr.bf16.mxu0 %v5356_v2  ;;  %v3061_v9 = vpop.permute.xlu0 %3060  ;;  %v3239_v0 = vld [vmem:[%s7767_s8 + $0x298] sm:$0xff] }
 0x17e   :  { %4136 = vmatprep.subr.bf16.mxu1 %v5358_v6  ;;  %v3255_v6 = vld [vmem:[%s7767_s8 + $0x318] sm:$0xff] }
 0x196   :  { %v5751_v11 = vpop.f32.mrb[20].mxu0 }
 0x197   :  { %v5752_v12 = vpop.f32.mrb[21].mxu0 }
 0x198   :  { %v5773_v13 = vpop.f32.mrb[20].mxu1  ;;  %v5753_v14 = vadd.f32 %v5752_v12, %v5751_v11  ;;  %v5754_v15 = vpop.f32.mrb[22].mxu0  ;;  %v3220_v11 = vld [vmem:[%s7767_s8 + $0x200] sm:$0xff] }
 0x199   :  { %v5774_v16 = vpop.f32.mrb[21].mxu1  ;;  %v5755_v17 = vpop.f32.mrb[23].mxu0  ;;  %v3236_v12 = vld [vmem:[%s7767_s8 + $0x280] sm:$0xff] }
 0x19a   :  { %v2767_v18 = vadd.f32 %v5753_v14, %v2727_v10  ;;  %v5775_v19 = vadd.f32 %v5774_v16, %v5773_v13  ;;  %v5776_v20 = vpop.f32.mrb[22].mxu1  ;;  %v5387_v10 = vcombine.low %v3188_v3, %v3204_v4  ;;  %v5420_v13 = vcombine.high %v3220_v11, %v3236_v12  ;;  %v3254_v4 = vld [vmem:[%s7767_s8 + $0x310] sm:$0xff] }
 0x19b   :  { %v5777_v21 = vpop.f32.mrb[23].mxu1  ;;  %v5419_v16 = vcombine.low %v3220_v11, %v3236_v12  ;;  %v3205_v20 = vld [vmem:[%s7767_s8 + $0x188] sm:$0xff]  ;;  %v5426_v3 = vcombine.high %v3223_v63, %v3239_v0  ;;  %v3160_v12 = vld [vmem:[%s7767_s8 + $0x20] sm:$0xff] }
 0x19c   :  { %v2807_v23 = vadd.f32 %v5775_v19, %v2767_v18  ;;  %v3189_v19 = vld [vmem:[%s7767_s8 + $0x108] sm:$0xff] }
 0x19d   :  { %v5390_v21 = vcombine.high %v3189_v19, %v3205_v20 }
 0x1b6   :  { %v5795_v24 = vpop.f32.mrb[24].mxu0 }
 0x1b7   :  { %v5796_v25 = vpop.f32.mrb[25].mxu0 }
 0x1b8   :  { %v5817_v26 = vpop.f32.mrb[24].mxu1  ;;  %v5797_v22 = vadd.f32 %v5796_v25, %v5795_v24  ;;  %v5798_v27 = vpop.f32.mrb[26].mxu0  ;;  %v3221_v24 = vld [vmem:[%s7767_s8 + $0x208] sm:$0xff] }
 0x1b9   :  { %v5818_v28 = vpop.f32.mrb[25].mxu1  ;;  %v5799_v29 = vpop.f32.mrb[27].mxu0  ;;  %v3237_v25 = vld [vmem:[%s7767_s8 + $0x288] sm:$0xff] }
 0x1ba   :  { %v2847_v30 = vadd.f32 %v5797_v22, %v2807_v23  ;;  %v5819_v31 = vadd.f32 %v5818_v28, %v5817_v26  ;;  %v5820_v32 = vpop.f32.mrb[26].mxu1  ;;  %v5389_v26 = vcombine.low %v3189_v19, %v3205_v20  ;;  %v5422_v22 = vcombine.high %v3221_v24, %v3237_v25  ;;  %v3252_v28 = vld [vmem:[%s7767_s8 + $0x300] sm:$0xff] }
 0x1bb   :  { %v5821_v34 = vpop.f32.mrb[27].mxu1  ;;  %v5421_v27 = vcombine.low %v3221_v24, %v3237_v25  ;;  %v3268_v29 = vld [vmem:[%s7767_s8 + $0x380] sm:$0xff]  ;;  %v3269_v32 = vld [vmem:[%s7767_s8 + $0x388] sm:$0xff] }
 0x1bc   :  { %v2887_v35 = vadd.f32 %v5819_v31, %v2847_v30  ;;  %v3253_v30 = vld [vmem:[%s7767_s8 + $0x308] sm:$0xff]  ;;  %v5452_v31 = vcombine.high %v3252_v28, %v3268_v29  ;;  %v5451_v34 = vcombine.low %v3252_v28, %v3268_v29  ;;  %v3192_v20 = vld [vmem:[%s7767_s8 + $0x120] sm:$0xff] }
 0x1bd   :  { %v3209_v24 = vld [vmem:[%s7767_s8 + $0x1a8] sm:$0xff]  ;;  %v3224_v28 = vld [vmem:[%s7767_s8 + $0x220] sm:$0xff] }
 0x1be   :  { %v3240_v29 = vld [vmem:[%s7767_s8 + $0x2a0] sm:$0xff] }
 0x1d6   :  { %v5839_v36 = vpop.f32.mrb[28].mxu0 }
 0x1d7   :  { %v5840_v37 = vpop.f32.mrb[29].mxu0 }
 0x1d8   :  { %v5861_v38 = vpop.f32.mrb[28].mxu1  ;;  %v5841_v39 = vadd.f32 %v5840_v37, %v5839_v36  ;;  %v5842_v40 = vpop.f32.mrb[30].mxu0  ;;  %v5454_v36 = vcombine.high %v3253_v30, %v3269_v32  ;;  %v3158_v37 = vld [vmem:[%s7767_s8 + $0x10] sm:$0xff] }
 0x1d9   :  { %v5862_v42 = vpop.f32.mrb[29].mxu1  ;;  %v5843_v43 = vpop.f32.mrb[31].mxu0  ;;  %v6230_v40 = vmov 0  }
 0x1da   :  { %v2927_v44 = vadd.f32 %v5841_v39, %v2887_v35  ;;  %v5863_v45 = vadd.f32 %v5862_v42, %v5861_v38  ;;  %v5864_v47 = vpop.f32.mrb[30].mxu1  ;;  %v5453_v35 = vcombine.low %v3253_v30, %v3269_v32  ;;  %v3174_v38 = vld [vmem:[%s7767_s8 + $0x90] sm:$0xff]  ;;  %v3159_v39 = vld [vmem:[%s7767_s8 + $0x18] sm:$0xff]  ;;  %v3225_v30 = vld [vmem:[%s7767_s8 + $0x228] sm:$0xff] }
 0x1db   :  { %v5865_v48 = vpop.f32.mrb[31].mxu1  ;;  %v5359_v42 = vcombine.low %v3158_v37, %v3174_v38  ;;  %v5360_v43 = vcombine.high %v3158_v37, %v3174_v38  ;;  %v3256_v37 = vld [vmem:[%s7767_s8 + $0x320] sm:$0xff] }
 0x1dc   :  { %v2967_v49 = vadd.f32 %v5863_v45, %v2927_v44  ;;  %v3175_v44 = vld [vmem:[%s7767_s8 + $0x98] sm:$0xff]  ;;  %v5349_v48 = vld [vmem:[%s7766_s7] ss:$0 sm:$0xff] }
 0x1dd   :  { %v5361_v45 = vcombine.low %v3159_v39, %v3175_v44  ;;  %v5362_v47 = vcombine.high %v3159_v39, %v3175_v44  ;;  %v3272_v38 = vld [vmem:[%s7767_s8 + $0x3a0] sm:$0xff]  ;;  %v3257_v39 = vld [vmem:[%s7767_s8 + $0x328] sm:$0xff] }
 0x1de   :  { %v2972_v50 = vpack.c.bf16 %v2967_v49, %v2967_v49  ;;  %v3190_v49 = vld [vmem:[%s7767_s8 + $0x110] sm:$0xff] }
 0x1e0   :  { %5886 = vmatmul.mubr.msk.bf16.vlgmr.msra.gmra.mrb[32].mxu0 %vm3012_vm1, %v2972_v50 }
 0x1e1   :  { %4096 = vmatpush1.bf16.msra.mxu0 %v5355_v1  ;;  %4127 = vmatprep.mubr.bf16.mxu0 %v6230_v40  ;;  %v5391_v1 = vcombine.low %v3190_v49, %v3206_v51 }
 0x1e2   :  { %4097 = vmatprep.subr.bf16.mxu0 %v5388_v7  ;;  %v3271_v7 = vld [vmem:[%s7767_s8 + $0x398] sm:$0xff] }
 0x1e3   :  { %v5458_v11 = vcombine.high %v3255_v6, %v3271_v7 }
 0x1e5   :  { %4098 = vmatpush1.bf16.msra.mxu0 %v5387_v10 }
 0x1e6   :  { %4099 = vmatprep.subr.bf16.mxu0 %v5420_v13  ;;  %v3176_v13 = vld [vmem:[%s7767_s8 + $0xa0] sm:$0xff] }
 0x1e7   :  { %v5363_v25 = vcombine.low %v3160_v12, %v3176_v13 }
 0x1e9   :  { %4100 = vmatpush1.bf16.msra.mxu0 %v5419_v16 }
 0x1ea   :  { %4101 = vmatprep.subr.bf16.mxu0 %v5452_v31  ;;  %v3241_v31 = vld [vmem:[%s7767_s8 + $0x2a8] sm:$0xff] }
 0x1eb   :  { %v5429_v44 = vcombine.low %v3225_v30, %v3241_v31 }
 0x1ed   :  { %4102 = vmatpush1.bf16.msra.mxu0 %v5451_v34 }
 0x1ee   :  { %4177 = vmatprep.subr.bf16.mxu0 %v5360_v43  ;;  %v5427_v43 = vcombine.low %v3224_v28, %v3240_v29 }
 0x2b3   :  { %v3050_v54 = vpop.f32.mrb[32].mxu0 }
 0x2b4   :  { %v3051_v56 = vadd.f32 %v5343_v53, %v3050_v54  ;;  %v5887_v57 = vpop.f32.mrb[33].mxu0  ;;  %v3207_v53 = vld [vmem:[%s7767_s8 + $0x198] sm:$0xff] }
 0x2b5   :  { %v3053_v58 = vpop.f32.mrb[34].mxu0  ;;  %v5394_v60 = vcombine.high %v3191_v52, %v3207_v53  ;;  %v5393_v2 = vcombine.low %v3191_v52, %v3207_v53  ;;  %v5459_v52 = vcombine.low %v3256_v37, %v3272_v38 }
 0x2b6   :  { %3065 = vrot.lane.b32.xlu0 %v3051_v56, %s6229_s24  ;;  %v5888_v59 = vpop.f32.mrb[35].mxu0  ;;  %4784 = vst.msk [vmem:[#allocation2] sm:$0x3] %vm4783_vm2, %v3051_v56  ;;  %v3056_v61 = vmul.f32 1.442695, %v3051_v56 }
 0x2b7   :  { %v5392_v59 = vcombine.high %v3190_v49, %v3206_v51  ;;  %v3178_v49 = vld [vmem:[%s7767_s8 + $0xb0] sm:$0xff]  ;;  %v3179_v51 = vld [vmem:[%s7767_s8 + $0xb8] sm:$0xff] }
 0x2b8   :  { %6176 = vpow2.f32 %v3056_v61  ;;  %v3222_v61 = vld [vmem:[%s7767_s8 + $0x210] sm:$0xff] }
 0x2b9   :  { %v5424_v46 = vcombine.high %v3222_v61, %v3238_v62 }
 0x2c2   :  { %v6177_v8 = vpop.eup %6176 }
 0x2c3   :  { %v3063_v14 = vmul.f32 %v6177_v8, %v3061_v9  ;;  %v5423_v8 = vcombine.low %v3222_v61, %v3238_v62  ;;  %v5425_v9 = vcombine.low %v3223_v63, %v3239_v0 }
 0x328   :  { %v3066_v15 = vpop.permute.xlu0 %3065 }
 0x329   :  { %v3068_v17 = vadd.f32 %v3066_v15, %v3063_v14  ;;  %4785 = vst.msk [vmem:[#allocation4] sm:$0x3] %vm4783_vm2, %v3066_v15  ;;  %v3161_v14 = vld [vmem:[%s7767_s8 + $0x28] sm:$0xff] }
 0x32a   :  { %v3177_v15 = vld [vmem:[%s7767_s8 + $0xa8] sm:$0xff] }
 0x32b   :  { %v3069_v18 = vpack.c.bf16 %v3068_v17, %v3068_v17  ;;  %v5457_v17 = vcombine.low %v3255_v6, %v3271_v7  ;;  %v5366_v19 = vcombine.high %v3161_v14, %v3177_v15 }
 0x32d   :  { %3086 = vrot.lane.b32.xlu1 %v3069_v18, %s6229_s24  ;;  %v5364_v18 = vcombine.high %v3160_v12, %v3176_v13 }
 0x39f   :  { %v3087_v23 = vpop.permute.xlu1 %3086 }
 0x3a0   :  { %5898 = vmatmul.mubr.msk.bf16.vlgmr.msra.gmra.mrb[32].mxu1 %vm3012_vm1, %v3087_v23  ;;  %v3193_v23 = vld [vmem:[%s7767_s8 + $0x128] sm:$0xff] }
 0x3a1   :  { %4137 = vmatpush1.bf16.msra.mxu1 %v5357_v5  ;;  %4168 = vmatprep.mubr.bf16.mxu1 %v6230_v40  ;;  %v3270_v5 = vld [vmem:[%s7767_s8 + $0x390] sm:$0xff]  ;;  %v5397_v34 = vcombine.low %v3193_v23, %v3209_v24 }
 0x3a2   :  { %4138 = vmatprep.subr.bf16.mxu1 %v5390_v21  ;;  %v5456_v10 = vcombine.high %v3254_v4, %v3270_v5  ;;  %v5455_v16 = vcombine.low %v3254_v4, %v3270_v5  ;;  %v3208_v21 = vld [vmem:[%s7767_s8 + $0x1a0] sm:$0xff] }
 0x3a3   :  { %v5395_v32 = vcombine.low %v3192_v20, %v3208_v21 }
 0x3a5   :  { %4139 = vmatpush1.bf16.msra.mxu1 %v5389_v26  ;;  %v5365_v26 = vcombine.low %v3161_v14, %v3177_v15 }
 0x3a6   :  { %4140 = vmatprep.subr.bf16.mxu1 %v5422_v22  ;;  %v5396_v22 = vcombine.high %v3192_v20, %v3208_v21 }
 0x3a9   :  { %4141 = vmatpush1.bf16.msra.mxu1 %v5421_v27  ;;  %v5398_v27 = vcombine.high %v3193_v23, %v3209_v24 }
 0x3aa   :  { %4142 = vmatprep.subr.bf16.mxu1 %v5454_v36  ;;  %v5430_v36 = vcombine.high %v3225_v30, %v3241_v31 }
 0x3ad   :  { %4143 = vmatpush1.bf16.msra.mxu1 %v5453_v35  ;;  %v5428_v35 = vcombine.high %v3224_v28, %v3240_v29 }
 0x3ae   :  { %4218 = vmatprep.subr.bf16.mxu1 %v5362_v47 }
 0x473   :  { %v3149_v50 = vpop.f32.mrb[32].mxu1 }
 0x474   :  { %v3150_v54 = vadd.f32 %v5349_v48, %v3149_v50  ;;  %v5899_v55 = vpop.f32.mrb[33].mxu1  ;;  %v3162_v48 = vld [vmem:[%s7767_s8 + $0x30] sm:$0xff]  ;;  %v3163_v50 = vld [vmem:[%s7767_s8 + $0x38] sm:$0xff] }
 0x475   :  { %v3152_v56 = vpop.f32.mrb[34].mxu1  ;;  %v5370_v55 = vcombine.high %v3163_v50, %v3179_v51  ;;  %v5367_v61 = vcombine.low %v3162_v48, %v3178_v49  ;;  %v5369_v62 = vcombine.low %v3163_v50, %v3179_v51 }
 0x476   :  { %v7254_v57 = vpack.c.bf16 %v3150_v54, %v3150_v54  ;;  %v5900_v58 = vpop.f32.mrb[35].mxu1  ;;  %v5368_v54 = vcombine.high %v3162_v48, %v3178_v49  ;;  %v3194_v56 = vld [vmem:[%s7767_s8 + $0x130] sm:$0xff] }
 0x477   :  { %v3210_v58 = vld [vmem:[%s7767_s8 + $0x1b0] sm:$0xff] }
 0x478   :  { %5483 = vmatmul.mubr.msk.bf16.vlgmr.msra.gmra.mrb[36].mxu0 %vm3012_vm1, %v7254_v57  ;;  %5484 = vmatmul.mubr.msk.bf16.vlgmr.msra.gmra.mrb[36].mxu1 %vm3012_vm1, %v7254_v57  ;;  %v5400_v63 = vcombine.high %v3194_v56, %v3210_v58  ;;  %v5399_v4 = vcombine.low %v3194_v56, %v3210_v58 }
 0x479   :  { %4178 = vmatpush1.bf16.msra.mxu0 %v5359_v42  ;;  %4219 = vmatpush1.bf16.msra.mxu1 %v5361_v45  ;;  %v3273_v42 = vld [vmem:[%s7767_s8 + $0x3a8] sm:$0xff]  ;;  %v5460_v45 = vcombine.high %v3256_v37, %v3272_v38 }
 0x47a   :  { %4179 = vmatprep.subr.bf16.mxu0 %v5392_v59  ;;  %4220 = vmatprep.subr.bf16.mxu1 %v5394_v60  ;;  %v5462_v47 = vcombine.high %v3257_v39, %v3273_v42  ;;  %v5461_v53 = vcombine.low %v3257_v39, %v3273_v42  ;;  %v3195_v59 = vld [vmem:[%s7767_s8 + $0x138] sm:$0xff] }
 0x47b   :  { %4209 = vmatprep.mubr.bf16.mxu0 %v6230_v40  ;;  %4250 = vmatprep.mubr.bf16.mxu1 %v6230_v40  ;;  %v3211_v60 = vld [vmem:[%s7767_s8 + $0x1b8] sm:$0xff] }
 0x47c   :  { %v5402_v0 = vcombine.high %v3195_v59, %v3211_v60  ;;  %v5401_v5 = vcombine.low %v3195_v59, %v3211_v60 }
 0x47d   :  { %4180 = vmatpush1.bf16.msra.mxu0 %v5391_v1  ;;  %4221 = vmatpush1.bf16.msra.mxu1 %v5393_v2  ;;  %v3226_v1 = vld [vmem:[%s7767_s8 + $0x230] sm:$0xff] }
 0x47e   :  { %4181 = vmatprep.subr.bf16.mxu0 %v5424_v46  ;;  %4222 = vmatprep.subr.bf16.mxu1 %v5426_v3  ;;  %v3242_v2 = vld [vmem:[%s7767_s8 + $0x2b0] sm:$0xff]  ;;  %v3227_v46 = vld [vmem:[%s7767_s8 + $0x238] sm:$0xff] }
 0x47f   :  { %v3243_v3 = vld [vmem:[%s7767_s8 + $0x2b8] sm:$0xff]  ;;  %v5432_v6 = vcombine.high %v3226_v1, %v3242_v2  ;;  %v5431_v12 = vcombine.low %v3226_v1, %v3242_v2 }
 0x480   :  { %v5434_v7 = vcombine.high %v3227_v46, %v3243_v3  ;;  %v5433_v13 = vcombine.low %v3227_v46, %v3243_v3 }
 0x481   :  { %4182 = vmatpush1.bf16.msra.mxu0 %v5423_v8  ;;  %4223 = vmatpush1.bf16.msra.mxu1 %v5425_v9  ;;  %v3258_v8 = vld [vmem:[%s7767_s8 + $0x330] sm:$0xff] }
 0x482   :  { %4183 = vmatprep.subr.bf16.mxu0 %v5456_v10  ;;  %4224 = vmatprep.subr.bf16.mxu1 %v5458_v11  ;;  %v3274_v9 = vld [vmem:[%s7767_s8 + $0x3b0] sm:$0xff]  ;;  %v3259_v10 = vld [vmem:[%s7767_s8 + $0x338] sm:$0xff] }
 0x483   :  { %v3275_v11 = vld [vmem:[%s7767_s8 + $0x3b8] sm:$0xff]  ;;  %v5464_v14 = vcombine.high %v3258_v8, %v3274_v9  ;;  %v5463_v20 = vcombine.low %v3258_v8, %v3274_v9 }
 0x484   :  { %v5466_v15 = vcombine.high %v3259_v10, %v3275_v11  ;;  %v5465_v21 = vcombine.low %v3259_v10, %v3275_v11 }
 0x485   :  { %4184 = vmatpush1.bf16.msra.mxu0 %v5455_v16  ;;  %4225 = vmatpush1.bf16.msra.mxu1 %v5457_v17  ;;  %v3164_v16 = vld [vmem:[%s7767_s8 + $0x40] sm:$0xff] }
 0x486   :  { %4259 = vmatprep.subr.bf16.mxu0 %v5364_v18  ;;  %4300 = vmatprep.subr.bf16.mxu1 %v5366_v19  ;;  %v3180_v17 = vld [vmem:[%s7767_s8 + $0xc0] sm:$0xff]  ;;  %v3165_v18 = vld [vmem:[%s7767_s8 + $0x48] sm:$0xff] }
 0x487   :  { %v3181_v19 = vld [vmem:[%s7767_s8 + $0xc8] sm:$0xff]  ;;  %v5372_v23 = vcombine.high %v3164_v16, %v3180_v17  ;;  %v5371_v28 = vcombine.low %v3164_v16, %v3180_v17 }
 0x488   :  { %5485 = vmatmul.mubr.msk.bf16.vlgmr.msra.gmra.mrb[40].mxu0 %vm3012_vm1, %v7254_v57  ;;  %5486 = vmatmul.mubr.msk.bf16.vlgmr.msra.gmra.mrb[40].mxu1 %vm3012_vm1, %v7254_v57  ;;  %v5374_v24 = vcombine.high %v3165_v18, %v3181_v19  ;;  %v5373_v29 = vcombine.low %v3165_v18, %v3181_v19 }
 0x489   :  { %4260 = vmatpush1.bf16.msra.mxu0 %v5363_v25  ;;  %4301 = vmatpush1.bf16.msra.mxu1 %v5365_v26  ;;  %v3196_v25 = vld [vmem:[%s7767_s8 + $0x140] sm:$0xff] }
 0x48a   :  { %4261 = vmatprep.subr.bf16.mxu0 %v5396_v22  ;;  %4302 = vmatprep.subr.bf16.mxu1 %v5398_v27  ;;  %v3212_v26 = vld [vmem:[%s7767_s8 + $0x1c0] sm:$0xff]  ;;  %v3197_v22 = vld [vmem:[%s7767_s8 + $0x148] sm:$0xff] }
 0x48b   :  { %4291 = vmatprep.mubr.bf16.mxu0 %v6230_v40  ;;  %4332 = vmatprep.mubr.bf16.mxu1 %v6230_v40  ;;  %v3213_v27 = vld [vmem:[%s7767_s8 + $0x1c8] sm:$0xff]  ;;  %v5404_v30 = vcombine.high %v3196_v25, %v3212_v26  ;;  %v5403_v37 = vcombine.low %v3196_v25, %v3212_v26 }
 0x48c   :  { %v5406_v31 = vcombine.high %v3197_v22, %v3213_v27  ;;  %v5405_v38 = vcombine.low %v3197_v22, %v3213_v27 }
 0x48d   :  { %4262 = vmatpush1.bf16.msra.mxu0 %v5395_v32  ;;  %4303 = vmatpush1.bf16.msra.mxu1 %v5397_v34  ;;  %v3228_v32 = vld [vmem:[%s7767_s8 + $0x240] sm:$0xff] }
 0x48e   :  { %4263 = vmatprep.subr.bf16.mxu0 %v5428_v35  ;;  %4304 = vmatprep.subr.bf16.mxu1 %v5430_v36  ;;  %v3244_v34 = vld [vmem:[%s7767_s8 + $0x2c0] sm:$0xff]  ;;  %v3229_v35 = vld [vmem:[%s7767_s8 + $0x248] sm:$0xff] }
 0x48f   :  { %v3245_v36 = vld [vmem:[%s7767_s8 + $0x2c8] sm:$0xff]  ;;  %v5436_v39 = vcombine.high %v3228_v32, %v3244_v34  ;;  %v5435_v48 = vcombine.low %v3228_v32, %v3244_v34 }
 0x490   :  { %v5438_v42 = vcombine.high %v3229_v35, %v3245_v36  ;;  %v5437_v49 = vcombine.low %v3229_v35, %v3245_v36 }
 0x491   :  { %4264 = vmatpush1.bf16.msra.mxu0 %v5427_v43  ;;  %4305 = vmatpush1.bf16.msra.mxu1 %v5429_v44  ;;  %v3260_v43 = vld [vmem:[%s7767_s8 + $0x340] sm:$0xff] }
 0x492   :  { %4265 = vmatprep.subr.bf16.mxu0 %v5460_v45  ;;  %4306 = vmatprep.subr.bf16.mxu1 %v5462_v47  ;;  %v3276_v44 = vld [vmem:[%s7767_s8 + $0x3c0] sm:$0xff]  ;;  %v3261_v45 = vld [vmem:[%s7767_s8 + $0x348] sm:$0xff] }
 0x493   :  { %v3277_v47 = vld [vmem:[%s7767_s8 + $0x3c8] sm:$0xff]  ;;  %v5468_v50 = vcombine.high %v3260_v43, %v3276_v44  ;;  %v5467_v56 = vcombine.low %v3260_v43, %v3276_v44 }
 0x494   :  { %v5470_v51 = vcombine.high %v3261_v45, %v3277_v47  ;;  %v5469_v58 = vcombine.low %v3261_v45, %v3277_v47 }
 0x495   :  { %4266 = vmatpush1.bf16.msra.mxu0 %v5459_v52  ;;  %4307 = vmatpush1.bf16.msra.mxu1 %v5461_v53  ;;  %v3166_v52 = vld [vmem:[%s7767_s8 + $0x50] sm:$0xff] }
 0x496   :  { %4341 = vmatprep.subr.bf16.mxu0 %v5368_v54  ;;  %4382 = vmatprep.subr.bf16.mxu1 %v5370_v55  ;;  %v3182_v53 = vld [vmem:[%s7767_s8 + $0xd0] sm:$0xff]  ;;  %v3167_v54 = vld [vmem:[%s7767_s8 + $0x58] sm:$0xff] }
 0x497   :  { %v3183_v55 = vld [vmem:[%s7767_s8 + $0xd8] sm:$0xff]  ;;  %v5376_v59 = vcombine.high %v3166_v52, %v3182_v53  ;;  %v5375_v1 = vcombine.low %v3166_v52, %v3182_v53 }
 0x498   :  { %5487 = vmatmul.mubr.msk.bf16.vlgmr.msra.gmra.mrb[44].mxu0 %vm3012_vm1, %v7254_v57  ;;  %5488 = vmatmul.mubr.msk.bf16.vlgmr.msra.gmra.mrb[44].mxu1 %vm3012_vm1, %v7254_v57  ;;  %v5378_v60 = vcombine.high %v3167_v54, %v3183_v55  ;;  %v5377_v2 = vcombine.low %v3167_v54, %v3183_v55 }
 0x499   :  { %4342 = vmatpush1.bf16.msra.mxu0 %v5367_v61  ;;  %4383 = vmatpush1.bf16.msra.mxu1 %v5369_v62  ;;  %v3198_v61 = vld [vmem:[%s7767_s8 + $0x150] sm:$0xff] }
 0x49a   :  { %4343 = vmatprep.subr.bf16.mxu0 %v5400_v63  ;;  %4384 = vmatprep.subr.bf16.mxu1 %v5402_v0  ;;  %v3214_v62 = vld [vmem:[%s7767_s8 + $0x1d0] sm:$0xff]  ;;  %v3199_v63 = vld [vmem:[%s7767_s8 + $0x158] sm:$0xff] }
 0x49b   :  { %4373 = vmatprep.mubr.bf16.mxu0 %v6230_v40  ;;  %4414 = vmatprep.mubr.bf16.mxu1 %v6230_v40  ;;  %v3215_v0 = vld [vmem:[%s7767_s8 + $0x1d8] sm:$0xff]  ;;  %v5408_v46 = vcombine.high %v3198_v61, %v3214_v62  ;;  %v5407_v8 = vcombine.low %v3198_v61, %v3214_v62 }
 0x49c   :  { %v5410_v3 = vcombine.high %v3199_v63, %v3215_v0  ;;  %v5409_v9 = vcombine.low %v3199_v63, %v3215_v0 }
 0x49d   :  { %4344 = vmatpush1.bf16.msra.mxu0 %v5399_v4  ;;  %4385 = vmatpush1.bf16.msra.mxu1 %v5401_v5  ;;  %v3230_v4 = vld [vmem:[%s7767_s8 + $0x250] sm:$0xff] }
 0x49e   :  { %4345 = vmatprep.subr.bf16.mxu0 %v5432_v6  ;;  %4386 = vmatprep.subr.bf16.mxu1 %v5434_v7  ;;  %v3246_v5 = vld [vmem:[%s7767_s8 + $0x2d0] sm:$0xff]  ;;  %v3231_v6 = vld [vmem:[%s7767_s8 + $0x258] sm:$0xff] }
 0x49f   :  { %v3247_v7 = vld [vmem:[%s7767_s8 + $0x2d8] sm:$0xff]  ;;  %v5440_v10 = vcombine.high %v3230_v4, %v3246_v5  ;;  %v5439_v16 = vcombine.low %v3230_v4, %v3246_v5 }
 0x4a0   :  { %v5442_v11 = vcombine.high %v3231_v6, %v3247_v7  ;;  %v5441_v17 = vcombine.low %v3231_v6, %v3247_v7 }
 0x4a1   :  { %4346 = vmatpush1.bf16.msra.mxu0 %v5431_v12  ;;  %4387 = vmatpush1.bf16.msra.mxu1 %v5433_v13  ;;  %v3262_v12 = vld [vmem:[%s7767_s8 + $0x350] sm:$0xff] }
 0x4a2   :  { %4347 = vmatprep.subr.bf16.mxu0 %v5464_v14  ;;  %4388 = vmatprep.subr.bf16.mxu1 %v5466_v15  ;;  %v3278_v13 = vld [vmem:[%s7767_s8 + $0x3d0] sm:$0xff]  ;;  %v3263_v14 = vld [vmem:[%s7767_s8 + $0x358] sm:$0xff] }
 0x4a3   :  { %v3279_v15 = vld [vmem:[%s7767_s8 + $0x3d8] sm:$0xff]  ;;  %v5472_v18 = vcombine.high %v3262_v12, %v3278_v13  ;;  %v5471_v25 = vcombine.low %v3262_v12, %v3278_v13 }
 0x4a4   :  { %v5474_v19 = vcombine.high %v3263_v14, %v3279_v15  ;;  %v5473_v26 = vcombine.low %v3263_v14, %v3279_v15 }
 0x4a5   :  { %4348 = vmatpush1.bf16.msra.mxu0 %v5463_v20  ;;  %4389 = vmatpush1.bf16.msra.mxu1 %v5465_v21  ;;  %v3168_v20 = vld [vmem:[%s7767_s8 + $0x60] sm:$0xff] }
 0x4a6   :  { %4423 = vmatprep.subr.bf16.mxu0 %v5372_v23  ;;  %4464 = vmatprep.subr.bf16.mxu1 %v5374_v24  ;;  %v3184_v21 = vld [vmem:[%s7767_s8 + $0xe0] sm:$0xff]  ;;  %v3169_v23 = vld [vmem:[%s7767_s8 + $0x68] sm:$0xff] }
 0x4a7   :  { %v3185_v24 = vld [vmem:[%s7767_s8 + $0xe8] sm:$0xff]  ;;  %v5380_v22 = vcombine.high %v3168_v20, %v3184_v21  ;;  %v5379_v32 = vcombine.low %v3168_v20, %v3184_v21 }
 0x4a8   :  { %5489 = vmatmul.mubr.msk.bf16.vlgmr.msra.gmra.mrb[48].mxu0 %vm3012_vm1, %v7254_v57  ;;  %5490 = vmatmul.mubr.msk.bf16.vlgmr.msra.gmra.mrb[48].mxu1 %vm3012_vm1, %v7254_v57  ;;  %v5382_v27 = vcombine.high %v3169_v23, %v3185_v24  ;;  %v5381_v34 = vcombine.low %v3169_v23, %v3185_v24 }
 0x4a9   :  { %4424 = vmatpush1.bf16.msra.mxu0 %v5371_v28  ;;  %4465 = vmatpush1.bf16.msra.mxu1 %v5373_v29  ;;  %v3200_v28 = vld [vmem:[%s7767_s8 + $0x160] sm:$0xff] }
 0x4aa   :  { %4425 = vmatprep.subr.bf16.mxu0 %v5404_v30  ;;  %4466 = vmatprep.subr.bf16.mxu1 %v5406_v31  ;;  %v3216_v29 = vld [vmem:[%s7767_s8 + $0x1e0] sm:$0xff]  ;;  %v3201_v30 = vld [vmem:[%s7767_s8 + $0x168] sm:$0xff] }
 0x4ab   :  { %4455 = vmatprep.mubr.bf16.mxu0 %v6230_v40  ;;  %4496 = vmatprep.mubr.bf16.mxu1 %v6230_v40  ;;  %v3217_v31 = vld [vmem:[%s7767_s8 + $0x1e8] sm:$0xff]  ;;  %v5412_v35 = vcombine.high %v3200_v28, %v3216_v29  ;;  %v5411_v43 = vcombine.low %v3200_v28, %v3216_v29  ;;  %v7626_v28 = vsub.s32 1, %v6394_v33  ;;  %v7629_v29 = vsub.s32 3, %v6394_v33 }
 0x4ac   :  { %v5414_v36 = vcombine.high %v3201_v30, %v3217_v31  ;;  %v5413_v44 = vcombine.low %v3201_v30, %v3217_v31 }
 0x4ad   :  { %4426 = vmatpush1.bf16.msra.mxu0 %v5403_v37  ;;  %4467 = vmatpush1.bf16.msra.mxu1 %v5405_v38  ;;  %v3232_v37 = vld [vmem:[%s7767_s8 + $0x260] sm:$0xff] }
 0x4ae   :  { %4427 = vmatprep.subr.bf16.mxu0 %v5436_v39  ;;  %4468 = vmatprep.subr.bf16.mxu1 %v5438_v42  ;;  %v3248_v38 = vld [vmem:[%s7767_s8 + $0x2e0] sm:$0xff]  ;;  %v3233_v39 = vld [vmem:[%s7767_s8 + $0x268] sm:$0xff] }
 0x4af   :  { %v3249_v42 = vld [vmem:[%s7767_s8 + $0x2e8] sm:$0xff]  ;;  %v5444_v45 = vcombine.high %v3232_v37, %v3248_v38  ;;  %v5443_v52 = vcombine.low %v3232_v37, %v3248_v38 }
 0x4b0   :  { %v5446_v47 = vcombine.high %v3233_v39, %v3249_v42  ;;  %v5445_v53 = vcombine.low %v3233_v39, %v3249_v42 }
 0x4b1   :  { %4428 = vmatpush1.bf16.msra.mxu0 %v5435_v48  ;;  %4469 = vmatpush1.bf16.msra.mxu1 %v5437_v49  ;;  %v3264_v48 = vld [vmem:[%s7767_s8 + $0x360] sm:$0xff] }
 0x4b2   :  { %4429 = vmatprep.subr.bf16.mxu0 %v5468_v50  ;;  %4470 = vmatprep.subr.bf16.mxu1 %v5470_v51  ;;  %v3280_v49 = vld [vmem:[%s7767_s8 + $0x3e0] sm:$0xff]  ;;  %v3265_v50 = vld [vmem:[%s7767_s8 + $0x368] sm:$0xff] }
 0x4b3   :  { %v3281_v51 = vld [vmem:[%s7767_s8 + $0x3e8] sm:$0xff]  ;;  %v5476_v54 = vcombine.high %v3264_v48, %v3280_v49  ;;  %v5475_v61 = vcombine.low %v3264_v48, %v3280_v49 }
 0x4b4   :  { %v5478_v55 = vcombine.high %v3265_v50, %v3281_v51  ;;  %v5477_v62 = vcombine.low %v3265_v50, %v3281_v51 }
 0x4b5   :  { %4430 = vmatpush1.bf16.msra.mxu0 %v5467_v56  ;;  %4471 = vmatpush1.bf16.msra.mxu1 %v5469_v58  ;;  %v3170_v56 = vld [vmem:[%s7767_s8 + $0x70] sm:$0xff] }
 0x4b6   :  { %4505 = vmatprep.subr.bf16.mxu0 %v5376_v59  ;;  %4546 = vmatprep.subr.bf16.mxu1 %v5378_v60  ;;  %v3186_v58 = vld [vmem:[%s7767_s8 + $0xf0] sm:$0xff]  ;;  %v3171_v59 = vld [vmem:[%s7767_s8 + $0x78] sm:$0xff] }
 0x4b7   :  { %v3187_v60 = vld [vmem:[%s7767_s8 + $0xf8] sm:$0xff]  ;;  %v5384_v63 = vcombine.high %v3170_v56, %v3186_v58  ;;  %v5383_v4 = vcombine.low %v3170_v56, %v3186_v58 }
 0x4b8   :  { %5491 = vmatmul.mubr.msk.bf16.vlgmr.msra.gmra.mrb[52].mxu0 %vm3012_vm1, %v7254_v57  ;;  %5492 = vmatmul.mubr.msk.bf16.vlgmr.msra.gmra.mrb[52].mxu1 %vm3012_vm1, %v7254_v57  ;;  %v5386_v0 = vcombine.high %v3171_v59, %v3187_v60  ;;  %v5385_v5 = vcombine.low %v3171_v59, %v3187_v60 }
 0x4b9   :  { %4506 = vmatpush1.bf16.msra.mxu0 %v5375_v1  ;;  %4547 = vmatpush1.bf16.msra.mxu1 %v5377_v2  ;;  %v3202_v1 = vld [vmem:[%s7767_s8 + $0x170] sm:$0xff] }
 0x4ba   :  { %4507 = vmatprep.subr.bf16.mxu0 %v5408_v46  ;;  %4548 = vmatprep.subr.bf16.mxu1 %v5410_v3  ;;  %v3218_v2 = vld [vmem:[%s7767_s8 + $0x1f0] sm:$0xff]  ;;  %v3203_v46 = vld [vmem:[%s7767_s8 + $0x178] sm:$0xff] }
 0x4bb   :  { %4537 = vmatprep.mubr.bf16.mxu0 %v6230_v40  ;;  %4578 = vmatprep.mubr.bf16.mxu1 %v6230_v40  ;;  %v3219_v3 = vld [vmem:[%s7767_s8 + $0x1f8] sm:$0xff]  ;;  %v5416_v6 = vcombine.high %v3202_v1, %v3218_v2  ;;  %v5415_v12 = vcombine.low %v3202_v1, %v3218_v2 }
 0x4bc   :  { %v5418_v7 = vcombine.high %v3203_v46, %v3219_v3  ;;  %v5417_v13 = vcombine.low %v3203_v46, %v3219_v3 }
 0x4bd   :  { %4508 = vmatpush1.bf16.msra.mxu0 %v5407_v8  ;;  %4549 = vmatpush1.bf16.msra.mxu1 %v5409_v9  ;;  %v3234_v8 = vld [vmem:[%s7767_s8 + $0x270] sm:$0xff] }
 0x4be   :  { %4509 = vmatprep.subr.bf16.mxu0 %v5440_v10  ;;  %4550 = vmatprep.subr.bf16.mxu1 %v5442_v11  ;;  %v3250_v9 = vld [vmem:[%s7767_s8 + $0x2f0] sm:$0xff]  ;;  %v3235_v10 = vld [vmem:[%s7767_s8 + $0x278] sm:$0xff] }
 0x4bf   :  { %v3251_v11 = vld [vmem:[%s7767_s8 + $0x2f8] sm:$0xff]  ;;  %v5448_v14 = vcombine.high %v3234_v8, %v3250_v9  ;;  %v5447_v20 = vcombine.low %v3234_v8, %v3250_v9 }
 0x4c0   :  { %v5450_v15 = vcombine.high %v3235_v10, %v3251_v11  ;;  %v5449_v21 = vcombine.low %v3235_v10, %v3251_v11 }
 0x4c1   :  { %4510 = vmatpush1.bf16.msra.mxu0 %v5439_v16  ;;  %4551 = vmatpush1.bf16.msra.mxu1 %v5441_v17  ;;  %v3266_v16 = vld [vmem:[%s7767_s8 + $0x370] sm:$0xff] }
 0x4c2   :  { %4511 = vmatprep.subr.bf16.mxu0 %v5472_v18  ;;  %4552 = vmatprep.subr.bf16.mxu1 %v5474_v19  ;;  %v3282_v17 = vld [vmem:[%s7767_s8 + $0x3f0] sm:$0xff]  ;;  %v3267_v18 = vld [vmem:[%s7767_s8 + $0x378] sm:$0xff] }
 0x4c3   :  { %v3283_v19 = vld [vmem:[%s7767_s8 + $0x3f8] sm:$0xff]  ;;  %v5480_v23 = vcombine.high %v3266_v16, %v3282_v17 }
 0x4c4   :  { %v5482_v24 = vcombine.high %v3267_v18, %v3283_v19 }
 0x4c5   :  { %4512 = vmatpush1.bf16.msra.mxu0 %v5471_v25  ;;  %4553 = vmatpush1.bf16.msra.mxu1 %v5473_v26  ;;  %v5479_v25 = vcombine.low %v3266_v16, %v3282_v17  ;;  %v5481_v26 = vcombine.low %v3267_v18, %v3283_v19 }
 0x4c6   :  { %4587 = vmatprep.subr.bf16.mxu0 %v5380_v22  ;;  %4628 = vmatprep.subr.bf16.mxu1 %v5382_v27  ;;  %v7618_v22 = vsub.s32 2, %v6394_v33  ;;  %v7623_v27 = vld [vmem:[%s7768_s9] sm:$0xff] }
 0x4c7   :  { %v3299_v31 = vrot.slane %v7623_v27, %v7626_v28 }
 0x4c8   :  { %5493 = vmatmul.mubr.msk.bf16.vlgmr.msra.gmra.mrb[56].mxu0 %vm3012_vm1, %v7254_v57  ;;  %5494 = vmatmul.mubr.msk.bf16.vlgmr.msra.gmra.mrb[56].mxu1 %vm3012_vm1, %v7254_v57  ;;  %v3303_v30 = vrot.slane %v7623_v27, %v7618_v22 }
 0x4c9   :  { %4588 = vmatpush1.bf16.msra.mxu0 %v5379_v32  ;;  %4629 = vmatpush1.bf16.msra.mxu1 %v5381_v34  ;;  %v3307_v32 = vrot.slane %v7623_v27, %v7629_v29 }
 0x4ca   :  { %4589 = vmatprep.subr.bf16.mxu0 %v5412_v35  ;;  %4630 = vmatprep.subr.bf16.mxu1 %v5414_v36 }
 0x4cb   :  { %4619 = vmatprep.mubr.bf16.mxu0 %v6230_v40  ;;  %4660 = vmatprep.mubr.bf16.mxu1 %v6230_v40 }
 0x4cd   :  { %4590 = vmatpush1.bf16.msra.mxu0 %v5411_v43  ;;  %4631 = vmatpush1.bf16.msra.mxu1 %v5413_v44 }
 0x4ce   :  { %4591 = vmatprep.subr.bf16.mxu0 %v5444_v45  ;;  %4632 = vmatprep.subr.bf16.mxu1 %v5446_v47 }
 0x4d1   :  { %4592 = vmatpush1.bf16.msra.mxu0 %v5443_v52  ;;  %4633 = vmatpush1.bf16.msra.mxu1 %v5445_v53 }
 0x4d2   :  { %4593 = vmatprep.subr.bf16.mxu0 %v5476_v54  ;;  %4634 = vmatprep.subr.bf16.mxu1 %v5478_v55 }
 0x4d5   :  { %4594 = vmatpush1.bf16.msra.mxu0 %v5475_v61  ;;  %4635 = vmatpush1.bf16.msra.mxu1 %v5477_v62 }
 0x4d6   :  { %4669 = vmatprep.subr.bf16.mxu0 %v5384_v63  ;;  %4710 = vmatprep.subr.bf16.mxu1 %v5386_v0 }
 0x4d8   :  { %5495 = vmatmul.mubr.msk.bf16.vlgmr.msra.gmra.mrb[60].mxu0 %vm3012_vm1, %v7254_v57  ;;  %5496 = vmatmul.mubr.msk.bf16.vlgmr.msra.gmra.mrb[60].mxu1 %vm3012_vm1, %v7254_v57 }
 0x4d9   :  { %4670 = vmatpush1.bf16.msra.mxu0 %v5383_v4  ;;  %4711 = vmatpush1.bf16.msra.mxu1 %v5385_v5 }
 0x4da   :  { %4671 = vmatprep.subr.bf16.mxu0 %v5416_v6  ;;  %4712 = vmatprep.subr.bf16.mxu1 %v5418_v7 }
 0x4db   :  { %4701 = vmatprep.mubr.bf16.mxu0 %v6230_v40  ;;  %4742 = vmatprep.mubr.bf16.mxu1 %v6230_v40  ;;  %v7615_v40 = vsub.s32 0, %v6394_v33 }
 0x4dd   :  { %4672 = vmatpush1.bf16.msra.mxu0 %v5415_v12  ;;  %4713 = vmatpush1.bf16.msra.mxu1 %v5417_v13 }
 0x4de   :  { %4673 = vmatprep.subr.bf16.mxu0 %v5448_v14  ;;  %4714 = vmatprep.subr.bf16.mxu1 %v5450_v15 }
 0x4e1   :  { %4674 = vmatpush1.bf16.msra.mxu0 %v5447_v20  ;;  %4715 = vmatpush1.bf16.msra.mxu1 %v5449_v21 }
 0x4e2   :  { %4675 = vmatprep.subr.bf16.mxu0 %v5480_v23  ;;  %4716 = vmatprep.subr.bf16.mxu1 %v5482_v24 }
 0x4e5   :  { %4676 = vmatpush1.bf16.msra.mxu0 %v5479_v25  ;;  %4717 = vmatpush1.bf16.msra.mxu1 %v5481_v26 }
 0x4e8   :  { %5497 = vmatmul.mubr.msk.bf16.vlgmr.msra.gmra.mrb[64].mxu0 %vm3012_vm1, %v7254_v57  ;;  %5498 = vmatmul.mubr.msk.bf16.vlgmr.msra.gmra.mrb[64].mxu1 %vm3012_vm1, %v7254_v57  ;;  %v3295_v57 = vrot.slane %v7623_v27, %v7615_v40 }
 0x54b   :  { %v4129_v34 = vpop.f32.mrb[36].mxu0  ;;  %v4170_v35 = vpop.f32.mrb[36].mxu1 }
 0x54c   :  { %v4130_v36 = vadd.f32 %v4129_v34, %v3295_v57  ;;  %v4171_v37 = vadd.f32 %v4170_v35, %v3303_v30  ;;  %v4131_v38 = vpop.f32.mrb[37].mxu0  ;;  %v4172_v39 = vpop.f32.mrb[37].mxu1 }
 0x54d   :  { %6189 = shalt.err (!%p6186_p4)
}
 0x54e   :  { %s6190_s18 = scalar_lea.hbm %s7769_s10, 32 }
 0x54f   :  { %p6191_p5 = scmp.ne.s32.totalorder %s7769_s10, %s6190_s18  ;;  %p6194_p6 = scmp.lt.u32.totalorder %s6190_s18, %s7769_s10 }
 0x551   :  { %p6196_p7 = pnand %p6194_p6, %p6191_p5 }
 0x553   :  { %6199 = shalt.err (!%p6196_p7)
}
 0x554   :  { %5063 = dma.vmem_to_hbm [thread:$0]  %s5061_s14, 32, %s7769_s10, [#allocation3]   ;;  %v4132_v42 = vadd.f32 %v4131_v38, %v3299_v31  ;;  %v4173_v43 = vadd.f32 %v4172_v39, %v3307_v32  ;;  %v4133_v44 = vpop.f32.mrb[38].mxu0  ;;  %v4174_v45 = vpop.f32.mrb[38].mxu1 }
 0x555   :  { %s6200_s3 = scalar_lea.vmem %s7639_s1, 32  ;;  %p6205_p9 = scmp.lt.s32.totalorder %s7639_s1, %s7639_s1 }
 0x556   :  { %p6201_p8 = scmp.ne.s32.totalorder %s7639_s1, %s6200_s3  ;;  %p6206_p10 = scmp.lt.s32.totalorder %s6200_s3, %s6200_s3 }
 0x558   :  { %p6207_p11 = por %p6206_p10, %p6205_p9 }
 0x55a   :  { %p6208_p12 = pnand %p6207_p11, %p6201_p8 }
 0x55c   :  { %6211 = shalt.err (!%p6208_p12)
}
 0x55d   :  { %s6212_s26 = scalar_lea.hbm %s7770_s11, 32 }
 0x55e   :  { %p6213_p13 = scmp.ne.s32.totalorder %s7770_s11, %s6212_s26  ;;  %p6216_p0 = scmp.lt.u32.totalorder %s6212_s26, %s7770_s11 }
 0x560   :  { %p6218_p1 = pnand %p6216_p0, %p6213_p13 }
 0x562   :  { %6221 = shalt.err (!%p6218_p1)
}
 0x563   :  { %5073 = dma.vmem_to_hbm [thread:$0]  %s7639_s1, 32, %s7770_s11, [#allocation5]   ;;  %v4751_v47 = vmax.f32 %v4130_v36, 0.0  ;;  %v4753_v48 = vmax.f32 %v4171_v37, 0.0  ;;  %v4134_v49 = vpop.f32.mrb[39].mxu0  ;;  %v4175_v50 = vpop.f32.mrb[39].mxu1 }
 0x564   :  { %v4752_v51 = vmax.f32 %v4132_v42, 0.0  ;;  %v4754_v52 = vmax.f32 %v4173_v43, 0.0  ;;  %v7673_v58 = vsub.s32 4, %v6394_v33  ;;  %v7676_v59 = vsub.s32 6, %v6394_v33  ;;  %v4211_v46 = vpop.f32.mrb[40].mxu0  ;;  %v4252_v3 = vpop.f32.mrb[40].mxu1 }
 0x565   :  { %v7679_v61 = vsub.s32 5, %v6394_v33  ;;  %v7682_v62 = vsub.s32 7, %v6394_v33  ;;  %v4213_v6 = vpop.f32.mrb[41].mxu0  ;;  %v4254_v7 = vpop.f32.mrb[41].mxu1  ;;  %v3285_v23 = vld [vmem:[%s7768_s9 + $0x8] sm:$0xff] }
 0x566   :  { %v5499_v53 = vpack.c.bf16 %v4752_v51, %v4751_v47  ;;  %v5500_v54 = vpack.c.bf16 %v4754_v52, %v4753_v48  ;;  %v3311_v63 = vrot.slane %v7623_v27, %v7673_v58  ;;  %v3319_v0 = vrot.slane %v7623_v27, %v7676_v59  ;;  %v4215_v9 = vpop.f32.mrb[42].mxu0  ;;  %v4256_v10 = vpop.f32.mrb[42].mxu1 }
 0x567   :  { %v3315_v1 = vrot.slane %v7623_v27, %v7679_v61  ;;  %v3323_v2 = vrot.slane %v7623_v27, %v7682_v62  ;;  %v4216_v13 = vpop.f32.mrb[43].mxu0  ;;  %v4257_v14 = vpop.f32.mrb[43].mxu1  ;;  %v3327_v26 = vrot.slane %v3285_v23, %v7615_v40  ;;  %v3335_v27 = vrot.slane %v3285_v23, %v7618_v22 }
 0x568   :  { %v4860_v55 = vrot.slane %v5499_v53, %v6406_v41  ;;  %v4867_v56 = vrot.slane %v5500_v54, %v6406_v41  ;;  %v4212_v4 = vadd.f32 %v4211_v46, %v3311_v63  ;;  %v4253_v5 = vadd.f32 %v4252_v3, %v3319_v0 }
 0x569   :  { %v4214_v33 = vadd.f32 %v4213_v6, %v3315_v1  ;;  %v4255_v8 = vadd.f32 %v4254_v7, %v3323_v2  ;;  %v3331_v30 = vrot.slane %v3285_v23, %v7626_v28  ;;  %v3339_v31 = vrot.slane %v3285_v23, %v7629_v29 }
 0x56a   :  { %v4882_v60 = vcombine.low %v4860_v55, %v4867_v56  ;;  %v4755_v11 = vmax.f32 %v4212_v4, 0.0  ;;  %v4757_v12 = vmax.f32 %v4253_v5, 0.0  ;;  %v3351_v63 = vrot.slane %v3285_v23, %v7676_v59 }
 0x56b   :  { %v4756_v15 = vmax.f32 %v4214_v33, 0.0  ;;  %v4758_v16 = vmax.f32 %v4255_v8, 0.0  ;;  %v4293_v32 = vpop.f32.mrb[44].mxu0  ;;  %v4334_v34 = vpop.f32.mrb[44].mxu1  ;;  %v3347_v0 = vrot.slane %v3285_v23, %v7679_v61  ;;  %v3355_v1 = vrot.slane %v3285_v23, %v7682_v62 }
 0x56c   :  { %v4890_v24 = vrot.slane %v4882_v60, %v6406_v41  ;;  %v4294_v35 = vadd.f32 %v4293_v32, %v3327_v26  ;;  %v4335_v36 = vadd.f32 %v4334_v34, %v3335_v27  ;;  %v4295_v37 = vpop.f32.mrb[45].mxu0  ;;  %v4336_v38 = vpop.f32.mrb[45].mxu1  ;;  %v3343_v60 = vrot.slane %v3285_v23, %v7673_v58 }
 0x56d   :  { %v5501_v17 = vpack.c.bf16 %v4756_v15, %v4755_v11  ;;  %v5502_v18 = vpack.c.bf16 %v4758_v16, %v4757_v12  ;;  %v4296_v39 = vadd.f32 %v4295_v37, %v3331_v30  ;;  %v4337_v42 = vadd.f32 %v4336_v38, %v3339_v31  ;;  %v4297_v43 = vpop.f32.mrb[46].mxu0  ;;  %v4338_v44 = vpop.f32.mrb[46].mxu1 }
 0x56e   :  { %v4759_v45 = vmax.f32 %v4294_v35, 0.0  ;;  %v4761_v47 = vmax.f32 %v4335_v36, 0.0  ;;  %v4298_v48 = vpop.f32.mrb[47].mxu0  ;;  %v4339_v49 = vpop.f32.mrb[47].mxu1 }
 0x56f   :  { %v4874_v19 = vrot.slane %v5501_v17, %v6406_v41  ;;  %v4881_v20 = vrot.slane %v5502_v18, %v6406_v41  ;;  %v4760_v50 = vmax.f32 %v4296_v39, 0.0  ;;  %v4762_v51 = vmax.f32 %v4337_v42, 0.0 }
 0x571   :  { %v4883_v21 = vcombine.low %v4874_v19, %v4881_v20  ;;  %v5503_v52 = vpack.c.bf16 %v4760_v50, %v4759_v45  ;;  %v5504_v53 = vpack.c.bf16 %v4762_v51, %v4761_v47 }
 0x573   :  { %v4897_v25 = vrot.slane %v4883_v21, %v6406_v41  ;;  %v4909_v54 = vrot.slane %v5503_v52, %v6406_v41  ;;  %v4916_v55 = vrot.slane %v5504_v53, %v6406_v41  ;;  %v3286_v21 = vld [vmem:[%s7768_s9 + $0x10] sm:$0xff] }
 0x574   :  { %v3367_v26 = vrot.slane %v3286_v21, %v7618_v22  ;;  %v3371_v30 = vrot.slane %v3286_v21, %v7629_v29 }
 0x575   :  { %v4898_v57 = vcombine.low %v4890_v24, %v4897_v25  ;;  %v4931_v56 = vcombine.low %v4909_v54, %v4916_v55  ;;  %v3359_v25 = vrot.slane %v3286_v21, %v7615_v40 }
 0x577   :  { %5050 = vst [vmem:[%s7771_s12] sm:$0xff] %v4898_v57  ;;  %v4939_v23 = vrot.slane %v4931_v56, %v6406_v41  ;;  %v3363_v57 = vrot.slane %v3286_v21, %v7626_v28  ;;  %v3375_v56 = vrot.slane %v3286_v21, %v7673_v58 }
 0x57b   :  { %v4375_v2 = vpop.f32.mrb[48].mxu0  ;;  %v4416_v46 = vpop.f32.mrb[48].mxu1 }
 0x57c   :  { %v4376_v3 = vadd.f32 %v4375_v2, %v3343_v60  ;;  %v4417_v4 = vadd.f32 %v4416_v46, %v3351_v63  ;;  %v4377_v5 = vpop.f32.mrb[49].mxu0  ;;  %v4418_v6 = vpop.f32.mrb[49].mxu1  ;;  %v3383_v60 = vrot.slane %v3286_v21, %v7676_v59  ;;  %v3379_v63 = vrot.slane %v3286_v21, %v7679_v61 }
 0x57d   :  { %v4378_v7 = vadd.f32 %v4377_v5, %v3347_v0  ;;  %v4419_v33 = vadd.f32 %v4418_v6, %v3355_v1  ;;  %v4379_v8 = vpop.f32.mrb[50].mxu0  ;;  %v4420_v9 = vpop.f32.mrb[50].mxu1  ;;  %v3387_v0 = vrot.slane %v3286_v21, %v7682_v62 }
 0x57e   :  { %v4763_v10 = vmax.f32 %v4376_v3, 0.0  ;;  %v4765_v11 = vmax.f32 %v4417_v4, 0.0  ;;  %v4380_v12 = vpop.f32.mrb[51].mxu0  ;;  %v4421_v13 = vpop.f32.mrb[51].mxu1 }
 0x57f   :  { %v4764_v14 = vmax.f32 %v4378_v7, 0.0  ;;  %v4766_v15 = vmax.f32 %v4419_v33, 0.0 }
 0x581   :  { %v5505_v16 = vpack.c.bf16 %v4764_v14, %v4763_v10  ;;  %v5506_v17 = vpack.c.bf16 %v4766_v15, %v4765_v11 }
 0x583   :  { %v4923_v18 = vrot.slane %v5505_v16, %v6406_v41  ;;  %v4930_v19 = vrot.slane %v5506_v17, %v6406_v41 }
 0x585   :  { %v4932_v20 = vcombine.low %v4923_v18, %v4930_v19 }
 0x587   :  { %v4946_v24 = vrot.slane %v4932_v20, %v6406_v41  ;;  %v3287_v20 = vld [vmem:[%s7768_s9 + $0x18] sm:$0xff] }
 0x589   :  { %v4947_v27 = vcombine.low %v4939_v23, %v4946_v24  ;;  %v3391_v24 = vrot.slane %v3287_v20, %v7615_v40 }
 0x58b   :  { %5051 = vst [vmem:[%s7771_s12 + $0x8] sm:$0xff] %v4947_v27  ;;  %v4457_v31 = vpop.f32.mrb[52].mxu0  ;;  %v4498_v32 = vpop.f32.mrb[52].mxu1  ;;  %v3395_v27 = vrot.slane %v3287_v20, %v7626_v28 }
 0x58c   :  { %v4458_v34 = vadd.f32 %v4457_v31, %v3359_v25  ;;  %v4499_v35 = vadd.f32 %v4498_v32, %v3367_v26  ;;  %v4459_v36 = vpop.f32.mrb[53].mxu0  ;;  %v4500_v37 = vpop.f32.mrb[53].mxu1  ;;  %v3399_v25 = vrot.slane %v3287_v20, %v7618_v22 }
 0x58d   :  { %v4460_v38 = vadd.f32 %v4459_v36, %v3363_v57  ;;  %v4501_v39 = vadd.f32 %v4500_v37, %v3371_v30  ;;  %v4461_v42 = vpop.f32.mrb[54].mxu0  ;;  %v4502_v43 = vpop.f32.mrb[54].mxu1  ;;  %v3403_v57 = vrot.slane %v3287_v20, %v7629_v29 }
 0x58e   :  { %v4767_v44 = vmax.f32 %v4458_v34, 0.0  ;;  %v4769_v45 = vmax.f32 %v4499_v35, 0.0  ;;  %v4462_v47 = vpop.f32.mrb[55].mxu0  ;;  %v4503_v48 = vpop.f32.mrb[55].mxu1 }
 0x58f   :  { %v4768_v49 = vmax.f32 %v4460_v38, 0.0  ;;  %v4770_v50 = vmax.f32 %v4501_v39, 0.0 }
 0x591   :  { %v5507_v51 = vpack.c.bf16 %v4768_v49, %v4767_v44  ;;  %v5508_v52 = vpack.c.bf16 %v4770_v50, %v4769_v45 }
 0x593   :  { %v4958_v53 = vrot.slane %v5507_v51, %v6406_v41  ;;  %v4965_v54 = vrot.slane %v5508_v52, %v6406_v41  ;;  %v3407_v51 = vrot.slane %v3287_v20, %v7673_v58  ;;  %v3415_v52 = vrot.slane %v3287_v20, %v7676_v59 }
 0x595   :  { %v4980_v55 = vcombine.low %v4958_v53, %v4965_v54  ;;  %v3411_v53 = vrot.slane %v3287_v20, %v7679_v61  ;;  %v3419_v54 = vrot.slane %v3287_v20, %v7682_v62 }
 0x597   :  { %v4988_v21 = vrot.slane %v4980_v55, %v6406_v41 }
 0x59b   :  { %v4539_v1 = vpop.f32.mrb[56].mxu0  ;;  %v4580_v2 = vpop.f32.mrb[56].mxu1 }
 0x59c   :  { %v4540_v46 = vadd.f32 %v4539_v1, %v3375_v56  ;;  %v4581_v3 = vadd.f32 %v4580_v2, %v3383_v60  ;;  %v4541_v4 = vpop.f32.mrb[57].mxu0  ;;  %v4582_v5 = vpop.f32.mrb[57].mxu1 }
 0x59d   :  { %v4542_v6 = vadd.f32 %v4541_v4, %v3379_v63  ;;  %v4583_v7 = vadd.f32 %v4582_v5, %v3387_v0  ;;  %v4543_v33 = vpop.f32.mrb[58].mxu0  ;;  %v4584_v8 = vpop.f32.mrb[58].mxu1 }
 0x59e   :  { %v4771_v9 = vmax.f32 %v4540_v46, 0.0  ;;  %v4773_v10 = vmax.f32 %v4581_v3, 0.0  ;;  %v4544_v11 = vpop.f32.mrb[59].mxu0  ;;  %v4585_v12 = vpop.f32.mrb[59].mxu1 }
 0x59f   :  { %v4772_v13 = vmax.f32 %v4542_v6, 0.0  ;;  %v4774_v14 = vmax.f32 %v4583_v7, 0.0 }
 0x5a1   :  { %v5509_v15 = vpack.c.bf16 %v4772_v13, %v4771_v9  ;;  %v5510_v16 = vpack.c.bf16 %v4774_v14, %v4773_v10 }
 0x5a3   :  { %v4972_v17 = vrot.slane %v5509_v15, %v6406_v41  ;;  %v4979_v18 = vrot.slane %v5510_v16, %v6406_v41 }
 0x5a5   :  { %v4981_v19 = vcombine.low %v4972_v17, %v4979_v18 }
 0x5a7   :  { %v4995_v23 = vrot.slane %v4981_v19, %v6406_v41 }
 0x5a9   :  { %v4996_v26 = vcombine.low %v4988_v21, %v4995_v23 }
 0x5ab   :  { %5052 = vst [vmem:[%s7771_s12 + $0x10] sm:$0xff] %v4996_v26  ;;  %v4621_v30 = vpop.f32.mrb[60].mxu0  ;;  %v4662_v31 = vpop.f32.mrb[60].mxu1 }
 0x5ac   :  { %v4622_v32 = vadd.f32 %v4621_v30, %v3391_v24  ;;  %v4663_v34 = vadd.f32 %v4662_v31, %v3399_v25  ;;  %v4623_v35 = vpop.f32.mrb[61].mxu0  ;;  %v4664_v36 = vpop.f32.mrb[61].mxu1 }
 0x5ad   :  { %v4624_v37 = vadd.f32 %v4623_v35, %v3395_v27  ;;  %v4665_v38 = vadd.f32 %v4664_v36, %v3403_v57  ;;  %v4625_v40 = vpop.f32.mrb[62].mxu0  ;;  %v4666_v39 = vpop.f32.mrb[62].mxu1 }
 0x5ae   :  { %v4775_v22 = vmax.f32 %v4622_v32, 0.0  ;;  %v4777_v42 = vmax.f32 %v4663_v34, 0.0  ;;  %v4626_v43 = vpop.f32.mrb[63].mxu0  ;;  %v4667_v28 = vpop.f32.mrb[63].mxu1 }
 0x5af   :  { %v4776_v44 = vmax.f32 %v4624_v37, 0.0  ;;  %v4778_v29 = vmax.f32 %v4665_v38, 0.0 }
 0x5b1   :  { %v5511_v45 = vpack.c.bf16 %v4776_v44, %v4775_v22  ;;  %v5512_v47 = vpack.c.bf16 %v4778_v29, %v4777_v42 }
 0x5b3   :  { %v5007_v48 = vrot.slane %v5511_v45, %v6406_v41  ;;  %v5014_v49 = vrot.slane %v5512_v47, %v6406_v41 }
 0x5b5   :  { %v5029_v50 = vcombine.low %v5007_v48, %v5014_v49 }
 0x5b7   :  { %v5037_v11 = vrot.slane %v5029_v50, %v6406_v41 }
 0x5bb   :  { %v4703_v55 = vpop.f32.mrb[64].mxu0  ;;  %v4744_v56 = vpop.f32.mrb[64].mxu1 }
 0x5bc   :  { %v4704_v60 = vadd.f32 %v4703_v55, %v3407_v51  ;;  %v4745_v63 = vadd.f32 %v4744_v56, %v3415_v52  ;;  %v4705_v0 = vpop.f32.mrb[65].mxu0  ;;  %v4746_v1 = vpop.f32.mrb[65].mxu1 }
 0x5bd   :  { %v4706_v2 = vadd.f32 %v4705_v0, %v3411_v53  ;;  %v4747_v46 = vadd.f32 %v4746_v1, %v3419_v54  ;;  %v4707_v3 = vpop.f32.mrb[66].mxu0  ;;  %v4748_v4 = vpop.f32.mrb[66].mxu1 }
 0x5be   :  { %v4779_v5 = vmax.f32 %v4704_v60, 0.0  ;;  %v4781_v6 = vmax.f32 %v4745_v63, 0.0  ;;  %v4708_v7 = vpop.f32.mrb[67].mxu0  ;;  %v4749_v58 = vpop.f32.mrb[67].mxu1 }
 0x5bf   :  { %v4780_v33 = vmax.f32 %v4706_v2, 0.0  ;;  %v4782_v59 = vmax.f32 %v4747_v46, 0.0 }
 0x5c1   :  { %v5513_v8 = vpack.c.bf16 %v4780_v33, %v4779_v5  ;;  %v5514_v61 = vpack.c.bf16 %v4782_v59, %v4781_v6 }
 0x5c3   :  { %v5021_v62 = vrot.slane %v5513_v8, %v6406_v41  ;;  %v5028_v9 = vrot.slane %v5514_v61, %v6406_v41 }
 0x5c5   :  { %v5030_v10 = vcombine.low %v5021_v62, %v5028_v9 }
 0x5c7   :  { %v5044_v12 = vrot.slane %v5030_v10, %v6406_v41 }
 0x5c9   :  { %v5045_v13 = vcombine.low %v5037_v11, %v5044_v12 }
 0x5cb   :  { %5053 = vst [vmem:[%s7771_s12 + $0x18] sm:$0xff] %v5045_v13 }
 0x5cc   :  { %6222 = dma.done.wait [#allocation3], 32  }
 0x5cd   :  { %6223 = vsyncadd [#allocation3], 4294967264 }
 0x5ce   :  { %6224 = dma.done.wait [#allocation5], 32  }
 0x5cf   :  { %6225 = vsyncadd [#allocation5], 4294967264 }
 0x5d0   :  { %5084 = vsyncpa [#allocation3], 1 }
 0x5d1   :  { %5085 = vsyncpa [#allocation5], 1 }

// kernel: vae_forward.11
= control target key start
LH: loop header
LB: loop body
LE: loop exit
PB: predicated region body
PF: predicated region fallthrough
CT: control target
= control target key end

     0   :  { %s4961_s1 = inlined_call_operand.vmem [shape: bf16[2304,128], index: 1, kind: input, shape index: {}]   ;;  %s4962_s0 = inlined_call_operand.vmem [shape: bf16[98,2304], index: 0, kind: input, shape index: {}]   ;;  %s4963_s2 = inlined_call_operand.vmem [shape: f32[1,128], index: 2, kind: input, shape index: {}]   ;;  %s4964_s3 = inlined_call_operand.vmem [shape: bf16[98,128], index: 3, kind: output, shape index: {}]  }
   0x1   :  { %v3639_v0 = vld [vmem:[%s4961_s1 + $0x40] sm:$0xff]   ;;  %v3641_v2 = vld [vmem:[%s4961_s1 + $0x48] sm:$0xff]   ;;  %v3643_v4 = vld [vmem:[%s4961_s1 + $0x50] sm:$0xff]  }
   0x2   :  { %v3640_v1 = vld [vmem:[%s4961_s1] sm:$0xff]   ;;  %3101 = vmatprep.subr.bf16.mxu0 %v3639_v0  ;;  %3623 = vmatprep.subr.bf16.mxu1 %v3639_v0  ;;  %v3642_v3 = vld [vmem:[%s4961_s1 + $0x8] sm:$0xff]   ;;  %v3644_v5 = vld [vmem:[%s4961_s1 + $0x10] sm:$0xff]  }
   0x3   :  { %3102 = vmatpush3.bf16.msra.mxu0 %v3640_v1  ;;  %3631 = vmatpush3.bf16.msra.mxu1 %v3640_v1  ;;  %v3645_v6 = vld [vmem:[%s4961_s1 + $0x58] sm:$0xff]   ;;  %v3647_v8 = vld [vmem:[%s4961_s1 + $0x60] sm:$0xff]   ;;  %v3649_v10 = vld [vmem:[%s4961_s1 + $0x68] sm:$0xff]  }
   0x4   :  { %3103 = vmatprep.subr.bf16.mxu0 %v3641_v2  ;;  %3624 = vmatprep.subr.bf16.mxu1 %v3641_v2  ;;  %v3646_v7 = vld [vmem:[%s4961_s1 + $0x18] sm:$0xff]   ;;  %v3648_v9 = vld [vmem:[%s4961_s1 + $0x20] sm:$0xff]   ;;  %v3650_v13 = vld [vmem:[%s4961_s1 + $0x28] sm:$0xff]  }
   0x5   :  { %v3657_v11 = vld [vmem:[%s4962_s0 + $0x4] ss:$72 sps:$4 sm:$0xff]   ;;  %v3651_v14 = vld [vmem:[%s4961_s1 + $0x70] sm:$0xff]   ;;  %v3653_v16 = vld [vmem:[%s4961_s1 + $0x78] sm:$0xff]  }
   0x6   :  { %v3660_v12 = vld [vmem:[%s4962_s0 + $0x244] ss:$72 sps:$4 sm:$0xff]   ;;  %1926 = vmatprep.mubr.bf16.mxu0 %v3657_v11  ;;  %v3652_v15 = vld [vmem:[%s4961_s1 + $0x30] sm:$0xff]   ;;  %v3654_v17 = vld [vmem:[%s4961_s1 + $0x38] sm:$0xff]  }
   0x7   :  { %3104 = vmatpush3.bf16.msra.mxu0 %v3642_v3  ;;  %3632 = vmatpush3.bf16.msra.mxu1 %v3642_v3  ;;  %v3661_v18 = vld [vmem:[%s4961_s1 + $0xc0] sm:$0xff]   ;;  %v3665_v24 = vld [vmem:[%s4961_s1 + $0xc8] sm:$0xff]   ;;  %v3669_v28 = vld [vmem:[%s4962_s0 + $0x94] ss:$72 sps:$4 sm:$0xff]  }
   0x8   :  { %3105 = vmatprep.subr.bf16.mxu0 %v3643_v4  ;;  %3625 = vmatprep.subr.bf16.mxu1 %v3643_v4  ;;  %v3655_v19 = vld [vmem:[%s4962_s0] ss:$72 sps:$4 sm:$0xff]   ;;  %v3678_v29 = vld [vmem:[%s4962_s0 + $0x2d4] ss:$72 sps:$4 sm:$0xff]   ;;  %v3671_v31 = vld [vmem:[%s4962_s0 + $0x90] ss:$72 sps:$4 sm:$0xff]  }
   0x9   :  { %1958 = vmatprep.mubr.bf16.mxu1 %v3660_v12  ;;  %v3658_v20 = vld [vmem:[%s4962_s0 + $0x240] ss:$72 sps:$4 sm:$0xff]   ;;  %v3672_v30 = vld [vmem:[%s4961_s1 + $0xd0] sm:$0xff]   ;;  %v3676_v36 = vld [vmem:[%s4961_s1 + $0xd8] sm:$0xff]  }
   0xa   :  { %v3662_v21 = vld [vmem:[%s4961_s1 + $0x140] sm:$0xff]   ;;  %v3666_v25 = vld [vmem:[%s4961_s1 + $0x148] sm:$0xff]   ;;  %v3673_v32 = vld [vmem:[%s4961_s1 + $0x150] sm:$0xff]  }
   0xb   :  { %3106 = vmatpush3.bf16.msra.mxu0 %v3644_v5  ;;  %3633 = vmatpush3.bf16.msra.mxu1 %v3644_v5  ;;  %v3663_v22 = vld [vmem:[%s4961_s1 + $0x80] sm:$0xff]   ;;  %v3667_v26 = vld [vmem:[%s4961_s1 + $0x88] sm:$0xff]   ;;  %v3674_v33 = vld [vmem:[%s4961_s1 + $0x90] sm:$0xff]  }
   0xc   :  { %3107 = vmatprep.subr.bf16.mxu0 %v3645_v6  ;;  %3626 = vmatprep.subr.bf16.mxu1 %v3645_v6  ;;  %v3664_v23 = vld [vmem:[%s4961_s1 + $0x100] sm:$0xff]   ;;  %v3668_v27 = vld [vmem:[%s4961_s1 + $0x108] sm:$0xff]   ;;  %v3675_v34 = vld [vmem:[%s4961_s1 + $0x110] sm:$0xff]  }
   0xd   :  { %v3682_v35 = vld [vmem:[%s4962_s0 + $0x2d0] ss:$72 sps:$4 sm:$0xff]   ;;  %v3683_v39 = vld [vmem:[%s4962_s0 + $0x124] ss:$72 sps:$4 sm:$0xff]   ;;  %v3685_v42 = vld [vmem:[%s4962_s0 + $0x120] ss:$72 sps:$4 sm:$0xff]  }
   0xe   :  { %v3677_v37 = vld [vmem:[%s4961_s1 + $0x158] sm:$0xff]   ;;  %v3686_v41 = vld [vmem:[%s4961_s1 + $0xe0] sm:$0xff]   ;;  %v3690_v49 = vld [vmem:[%s4961_s1 + $0xe8] sm:$0xff]  }
   0xf   :  { %3108 = vmatpush3.bf16.msra.mxu0 %v3646_v7  ;;  %3634 = vmatpush3.bf16.msra.mxu1 %v3646_v7  ;;  %v3680_v38 = vld [vmem:[%s4961_s1 + $0x98] sm:$0xff]   ;;  %v3687_v43 = vld [vmem:[%s4961_s1 + $0x160] sm:$0xff]   ;;  %v3691_v50 = vld [vmem:[%s4961_s1 + $0x168] sm:$0xff]  }
  0x10   :  { %3109 = vmatprep.subr.bf16.mxu0 %v3647_v8  ;;  %3627 = vmatprep.subr.bf16.mxu1 %v3647_v8  ;;  %v3681_v40 = vld [vmem:[%s4961_s1 + $0x118] sm:$0xff]   ;;  %v123_v44 = vld [vmem:[%s4962_s0 + $0x360] sm:$0x11]  ;;  %v3693_v51 = vld [vmem:[%s4961_s1 + $0xa8] sm:$0xff]  }
  0x11   :  { %v3688_v45 = vld [vmem:[%s4961_s1 + $0xa0] sm:$0xff]   ;;  %v2879_v46 = vcombine.high %v123_v44, %v123_v44  ;;  %v2878_v48 = vcombine.low %v123_v44, %v123_v44  ;;  %v3696_v52 = vld [vmem:[%s4962_s0 + $0x1b4] ss:$72 sps:$4 sm:$0xff]   ;;  %v3694_v53 = vld [vmem:[%s4961_s1 + $0x128] sm:$0xff]  }
  0x12   :  { %v3689_v47 = vld [vmem:[%s4961_s1 + $0x120] sm:$0xff]   ;;  %v3699_v54 = vld [vmem:[%s4961_s1 + $0xf0] sm:$0xff]   ;;  %v3703_v59 = vld [vmem:[%s4961_s1 + $0xf8] sm:$0xff]  }
  0x13   :  { %3110 = vmatpush3.bf16.msra.mxu0 %v3648_v9  ;;  %3635 = vmatpush3.bf16.msra.mxu1 %v3648_v9  ;;  %v3698_v55 = vld [vmem:[%s4962_s0 + $0x1b0] ss:$72 sps:$4 sm:$0xff]   ;;  %v3709_v61 = vld [vmem:[%s4962_s0 + $0xc] ss:$72 sps:$4 sm:$0xff]   ;;  %v3713_v3 = vld [vmem:[%s4961_s1 + $0x1c0] sm:$0xff]  }
  0x14   :  { %3111 = vmatprep.subr.bf16.mxu0 %v3649_v10  ;;  %3628 = vmatprep.subr.bf16.mxu1 %v3649_v10  ;;  %v3700_v56 = vld [vmem:[%s4961_s1 + $0x170] sm:$0xff]   ;;  %v3704_v60 = vld [vmem:[%s4961_s1 + $0x178] sm:$0xff]   ;;  %v3714_v4 = vld [vmem:[%s4961_s1 + $0x180] sm:$0xff]  }
  0x15   :  { %v3701_v57 = vld [vmem:[%s4961_s1 + $0xb0] sm:$0xff]   ;;  %v3705_v62 = vld [vmem:[%s4961_s1 + $0xb8] sm:$0xff]   ;;  %v3715_v5 = vld [vmem:[%s4961_s1 + $0x240] sm:$0xff]  }
  0x16   :  { %v3702_v58 = vld [vmem:[%s4961_s1 + $0x130] sm:$0xff]   ;;  %v3706_v0 = vld [vmem:[%s4961_s1 + $0x138] sm:$0xff]   ;;  %v3716_v6 = vld [vmem:[%s4961_s1 + $0x200] sm:$0xff]  }
  0x17   :  { %3112 = vmatpush3.bf16.msra.mxu0 %v3650_v13  ;;  %3636 = vmatpush3.bf16.msra.mxu1 %v3650_v13  ;;  %v3712_v63 = vld [vmem:[%s4962_s0 + $0x14] ss:$72 sps:$4 sm:$0xff]   ;;  %v3707_v1 = vld [vmem:[%s4962_s0 + $0x8] ss:$72 sps:$4 sm:$0xff]   ;;  %v3719_v8 = vld [vmem:[%s4962_s0 + $0xa4] ss:$72 sps:$4 sm:$0xff]  }
  0x18   :  { %3113 = vmatprep.subr.bf16.mxu0 %v3651_v14  ;;  %3629 = vmatprep.subr.bf16.mxu1 %v3651_v14  ;;  %v3710_v2 = vld [vmem:[%s4962_s0 + $0x10] ss:$72 sps:$4 sm:$0xff]   ;;  %v3717_v7 = vld [vmem:[%s4962_s0 + $0x9c] ss:$72 sps:$4 sm:$0xff]   ;;  %v3721_v9 = vld [vmem:[%s4961_s1 + $0x1c8] sm:$0xff]  }
  0x19   :  { %v3724_v10 = vld [vmem:[%s4961_s1 + $0x188] sm:$0xff]   ;;  %v3722_v11 = vld [vmem:[%s4962_s0 + $0x98] ss:$72 sps:$4 sm:$0xff]  }
  0x1a   :  { %v3723_v12 = vld [vmem:[%s4962_s0 + $0xa0] ss:$72 sps:$4 sm:$0xff]   ;;  %v3763_v44 = vld [vmem:[%s4962_s0 + $0x2e4] ss:$72 sps:$4 sm:$0xff]  }
  0x1b   :  { %3114 = vmatpush3.bf16.msra.mxu0 %v3652_v15  ;;  %3637 = vmatpush3.bf16.msra.mxu1 %v3652_v15  ;;  %v3725_v13 = vld [vmem:[%s4961_s1 + $0x248] sm:$0xff]   ;;  %v3727_v15 = vld [vmem:[%s4961_s1 + $0x1d0] sm:$0xff]  }
  0x1c   :  { %3115 = vmatprep.subr.bf16.mxu0 %v3653_v16  ;;  %3630 = vmatprep.subr.bf16.mxu1 %v3653_v16  ;;  %v3726_v14 = vld [vmem:[%s4961_s1 + $0x208] sm:$0xff]  }
  0x1d   :  { %v3728_v16 = vld [vmem:[%s4962_s0 + $0x12c] ss:$72 sps:$4 sm:$0xff]  }
  0x1f   :  { %3116 = vmatpush3.bf16.msra.mxu0 %v3654_v17  ;;  %3638 = vmatpush3.bf16.msra.mxu1 %v3654_v17  ;;  %v3730_v17 = vld [vmem:[%s4962_s0 + $0x134] ss:$72 sps:$4 sm:$0xff]  }
  0x20   :  { %3159 = vmatprep.subr.bf16.mxu1 %v3661_v18  ;;  %3217 = vmatprep.subr.bf16.mxu0 %v3662_v21  ;;  %v3732_v18 = vld [vmem:[%s4961_s1 + $0x190] sm:$0xff]  }
  0x21   :  { %v3734_v21 = vld [vmem:[%s4962_s0 + $0x130] ss:$72 sps:$4 sm:$0xff]  }
  0x22   :  { %1927 = vmatmul.mubr.bf16.vlgmr.msra.gmra.mrb[0].mxu0 %v3655_v19  ;;  %1959 = vmatmul.mubr.bf16.vlgmr.msra.gmra.mrb[0].mxu1 %v3658_v20  ;;  %v3735_v19 = vld [vmem:[%s4961_s1 + $0x250] sm:$0xff]  }
  0x23   :  { %3160 = vmatpush3.bf16.msra.mxu1 %v3663_v22  ;;  %3218 = vmatpush3.bf16.msra.mxu0 %v3664_v23  ;;  %v3733_v20 = vld [vmem:[%s4962_s0 + $0x128] ss:$72 sps:$4 sm:$0xff]   ;;  %v3737_v23 = vld [vmem:[%s4961_s1 + $0x1d8] sm:$0xff]  }
  0x24   :  { %3161 = vmatprep.subr.bf16.mxu1 %v3665_v24  ;;  %3219 = vmatprep.subr.bf16.mxu0 %v3666_v25  ;;  %v3736_v22 = vld [vmem:[%s4961_s1 + $0x210] sm:$0xff]   ;;  %v3738_v24 = vld [vmem:[%s4961_s1 + $0x198] sm:$0xff]  }
  0x25   :  { %1934 = vmatprep.mubr.bf16.mxu0 %v3669_v28  ;;  %1966 = vmatprep.mubr.bf16.mxu1 %v3678_v29  ;;  %v3739_v25 = vld [vmem:[%s4962_s0 + $0x1bc] ss:$72 sps:$4 sm:$0xff]  }
  0x26   :  { %v3746_v28 = vld [vmem:[%s4961_s1 + $0x218] sm:$0xff]   ;;  %v3747_v29 = vld [vmem:[%s4961_s1 + $0x1e0] sm:$0xff]  }
  0x27   :  { %3162 = vmatpush3.bf16.msra.mxu1 %v3667_v26  ;;  %3220 = vmatpush3.bf16.msra.mxu0 %v3668_v27  ;;  %v3741_v26 = vld [vmem:[%s4962_s0 + $0x1c4] ss:$72 sps:$4 sm:$0xff]   ;;  %v3743_v27 = vld [vmem:[%s4961_s1 + $0x258] sm:$0xff]  }
  0x28   :  { %3163 = vmatprep.subr.bf16.mxu1 %v3672_v30  ;;  %3221 = vmatprep.subr.bf16.mxu0 %v3673_v32  ;;  %v3744_v30 = vld [vmem:[%s4962_s0 + $0x1b8] ss:$72 sps:$4 sm:$0xff]  }
  0x29   :  { %v3748_v32 = vld [vmem:[%s4961_s1 + $0x1a0] sm:$0xff]  }
  0x2a   :  { %1935 = vmatmul.mubr.bf16.gmra.mrb[4].mxu0 %v3671_v31  ;;  %1967 = vmatmul.mubr.bf16.gmra.mrb[4].mxu1 %v3682_v35  ;;  %v3745_v31 = vld [vmem:[%s4962_s0 + $0x1c0] ss:$72 sps:$4 sm:$0xff]   ;;  %v3752_v35 = vld [vmem:[%s4962_s0 + $0x254] ss:$72 sps:$4 sm:$0xff]  }
  0x2b   :  { %3164 = vmatpush3.bf16.msra.mxu1 %v3674_v33  ;;  %3222 = vmatpush3.bf16.msra.mxu0 %v3675_v34  ;;  %v3749_v33 = vld [vmem:[%s4961_s1 + $0x260] sm:$0xff]   ;;  %v3750_v34 = vld [vmem:[%s4962_s0 + $0x24c] ss:$72 sps:$4 sm:$0xff]  }
  0x2c   :  { %3165 = vmatprep.subr.bf16.mxu1 %v3676_v36  ;;  %3223 = vmatprep.subr.bf16.mxu0 %v3677_v37  ;;  %v3754_v36 = vld [vmem:[%s4961_s1 + $0x220] sm:$0xff]   ;;  %v3757_v37 = vld [vmem:[%s4961_s1 + $0x1e8] sm:$0xff]  }
  0x2d   :  { %1942 = vmatprep.mubr.bf16.mxu0 %v3683_v39  ;;  %1974 = vmatprep.mubr.bf16.mxu1 %v2879_v46  ;;  %v3755_v39 = vld [vmem:[%s4962_s0 + $0x248] ss:$72 sps:$4 sm:$0xff]  }
  0x2e   :  { %v3768_v46 = vld [vmem:[%s4961_s1 + $0x1b0] sm:$0xff]  }
  0x2f   :  { %3166 = vmatpush3.bf16.msra.mxu1 %v3680_v38  ;;  %3224 = vmatpush3.bf16.msra.mxu0 %v3681_v40  ;;  %v3758_v38 = vld [vmem:[%s4961_s1 + $0x1a8] sm:$0xff]  }
  0x30   :  { %3167 = vmatprep.subr.bf16.mxu1 %v3686_v41  ;;  %3225 = vmatprep.subr.bf16.mxu0 %v3687_v43  ;;  %v3759_v40 = vld [vmem:[%s4961_s1 + $0x268] sm:$0xff]   ;;  %v3761_v43 = vld [vmem:[%s4962_s0 + $0x2dc] ss:$72 sps:$4 sm:$0xff]  }
  0x31   :  { %v3760_v41 = vld [vmem:[%s4961_s1 + $0x228] sm:$0xff]  }
  0x32   :  { %1943 = vmatmul.mubr.bf16.gmra.mrb[8].mxu0 %v3685_v42  ;;  %1975 = vmatmul.mubr.bf16.gmra.mrb[8].mxu1 %v2878_v48  ;;  %v3756_v42 = vld [vmem:[%s4962_s0 + $0x250] ss:$72 sps:$4 sm:$0xff]  }
  0x33   :  { %3168 = vmatpush3.bf16.msra.mxu1 %v3688_v45  ;;  %3226 = vmatpush3.bf16.msra.mxu0 %v3689_v47  ;;  %v3767_v45 = vld [vmem:[%s4961_s1 + $0x1f0] sm:$0xff]   ;;  %v3765_v48 = vld [vmem:[%s4962_s0 + $0x2d8] ss:$72 sps:$4 sm:$0xff]  }
  0x34   :  { %3169 = vmatprep.subr.bf16.mxu1 %v3690_v49  ;;  %3227 = vmatprep.subr.bf16.mxu0 %v3691_v50  ;;  %v3769_v47 = vld [vmem:[%s4961_s1 + $0x270] sm:$0xff]   ;;  %v3766_v49 = vld [vmem:[%s4962_s0 + $0x2e0] ss:$72 sps:$4 sm:$0xff]  }
  0x35   :  { %1950 = vmatprep.mubr.bf16.mxu0 %v3696_v52  ;;  %2014 = vmatprep.mubr.bf16.mxu1 %v3709_v61  ;;  %v3770_v50 = vld [vmem:[%s4961_s1 + $0x230] sm:$0xff]  }
  0x36   :  { %v125_v52 = vld [vmem:[%s4962_s0 + $0x370] sm:$0x11] }
  0x37   :  { %3170 = vmatpush3.bf16.msra.mxu1 %v3693_v51  ;;  %3228 = vmatpush3.bf16.msra.mxu0 %v3694_v53  ;;  %v124_v51 = vld [vmem:[%s4962_s0 + $0x368] sm:$0x11]  ;;  %v3775_v53 = vld [vmem:[%s4961_s1 + $0x1f8] sm:$0xff]  }
  0x38   :  { %3171 = vmatprep.subr.bf16.mxu1 %v3699_v54  ;;  %3229 = vmatprep.subr.bf16.mxu0 %v3700_v56  ;;  %v3776_v54 = vld [vmem:[%s4961_s1 + $0x1b8] sm:$0xff]   ;;  %v2883_v56 = vcombine.high %v125_v52, %v125_v52  ;;  %v2880_v61 = vcombine.low %v124_v51, %v124_v51 }
  0x3a   :  { %1951 = vmatmul.mubr.bf16.gmra.mrb[12].mxu0 %v3698_v55  ;;  %v2881_v55 = vcombine.high %v124_v51, %v124_v51  ;;  %v126_v51 = vld [vmem:[%s4962_s0 + $0x378] sm:$0x11] }
  0x3b   :  { %3172 = vmatpush3.bf16.msra.mxu1 %v3701_v57  ;;  %3230 = vmatpush3.bf16.msra.mxu0 %v3702_v58  ;;  %v3777_v57 = vld [vmem:[%s4961_s1 + $0x278] sm:$0xff]  }
  0x3c   :  { %3173 = vmatprep.subr.bf16.mxu1 %v3703_v59  ;;  %3231 = vmatprep.subr.bf16.mxu0 %v3704_v60  ;;  %v3778_v58 = vld [vmem:[%s4961_s1 + $0x238] sm:$0xff]   ;;  %v3785_v59 = vld [vmem:[%s4961_s1 + $0x2c0] sm:$0xff]  }
  0x3d   :  { %2102 = vmatprep.mubr.bf16.mxu0 %v3712_v63  ;;  %v3781_v60 = vld [vmem:[%s4962_s0 + $0x1c] ss:$72 sps:$4 sm:$0xff]  }
  0x3e   :  { %v3787_v63 = vld [vmem:[%s4961_s1 + $0x340] sm:$0xff]  }
  0x3f   :  { %3174 = vmatpush3.bf16.msra.mxu1 %v3705_v62  ;;  %3232 = vmatpush3.bf16.msra.mxu0 %v3706_v0  ;;  %v2882_v62 = vcombine.low %v125_v52, %v125_v52  ;;  %v3784_v0 = vld [vmem:[%s4962_s0 + $0x24] ss:$72 sps:$4 sm:$0xff]   ;;  %v3837_v52 = vld [vmem:[%s4962_s0 + $0x2e8] ss:$72 sps:$4 sm:$0xff]  }
  0x40   :  { %3275 = vmatprep.subr.bf16.mxu1 %v3713_v3  ;;  %3333 = vmatprep.subr.bf16.mxu0 %v3715_v5  ;;  %v3786_v3 = vld [vmem:[%s4961_s1 + $0x280] sm:$0xff]   ;;  %v3789_v5 = vld [vmem:[%s4962_s0 + $0xac] ss:$72 sps:$4 sm:$0xff]  }
  0x42   :  { %2015 = vmatmul.mubr.bf16.vlgmr.msra.gmra.mrb[12].mxu1 %v3707_v1  ;;  %2103 = vmatmul.mubr.bf16.vlgmr.msra.gmra.mrb[16].mxu0 %v3710_v2  ;;  %v3779_v1 = vld [vmem:[%s4962_s0 + $0x18] ss:$72 sps:$4 sm:$0xff]  }
  0x43   :  { %3276 = vmatpush3.bf16.msra.mxu1 %v3714_v4  ;;  %3334 = vmatpush3.bf16.msra.mxu0 %v3716_v6  ;;  %v3782_v2 = vld [vmem:[%s4962_s0 + $0x20] ss:$72 sps:$4 sm:$0xff]   ;;  %v3791_v6 = vld [vmem:[%s4962_s0 + $0xb4] ss:$72 sps:$4 sm:$0xff]  }
  0x44   :  { %2022 = vmatprep.mubr.bf16.mxu1 %v3717_v7  ;;  %2110 = vmatprep.mubr.bf16.mxu0 %v3719_v8  ;;  %v3788_v4 = vld [vmem:[%s4961_s1 + $0x300] sm:$0xff]   ;;  %v3793_v7 = vld [vmem:[%s4961_s1 + $0x2c8] sm:$0xff]  }
  0x45   :  { %3277 = vmatprep.subr.bf16.mxu1 %v3721_v9  ;;  %3335 = vmatprep.subr.bf16.mxu0 %v3725_v13  ;;  %v3797_v8 = vld [vmem:[%s4961_s1 + $0x348] sm:$0xff]   ;;  %v3795_v13 = vld [vmem:[%s4962_s0 + $0xb0] ss:$72 sps:$4 sm:$0xff]  }
  0x46   :  { %v3796_v9 = vld [vmem:[%s4961_s1 + $0x288] sm:$0xff]  }
  0x47   :  { %3278 = vmatpush3.bf16.msra.mxu1 %v3724_v10  ;;  %3336 = vmatpush3.bf16.msra.mxu0 %v3726_v14  ;;  %v3798_v10 = vld [vmem:[%s4961_s1 + $0x308] sm:$0xff]   ;;  %v3807_v14 = vld [vmem:[%s4961_s1 + $0x350] sm:$0xff]  }
  0x48   :  { %3279 = vmatprep.subr.bf16.mxu1 %v3727_v15  ;;  %3337 = vmatprep.subr.bf16.mxu0 %v3735_v19  ;;  %v3800_v15 = vld [vmem:[%s4962_s0 + $0x13c] ss:$72 sps:$4 sm:$0xff]  }
  0x49   :  { %v3809_v19 = vld [vmem:[%s4961_s1 + $0x2d8] sm:$0xff]  }
  0x4a   :  { %2023 = vmatmul.mubr.bf16.gmra.mrb[16].mxu1 %v3722_v11  ;;  %2111 = vmatmul.mubr.bf16.gmra.mrb[20].mxu0 %v3723_v12  ;;  %v3799_v11 = vld [vmem:[%s4961_s1 + $0x2d0] sm:$0xff]  }
  0x4b   :  { %2030 = vmatprep.mubr.bf16.mxu1 %v3728_v16  ;;  %2118 = vmatprep.mubr.bf16.mxu0 %v3730_v17  ;;  %v3794_v12 = vld [vmem:[%s4962_s0 + $0xa8] ss:$72 sps:$4 sm:$0xff]   ;;  %v3802_v16 = vld [vmem:[%s4962_s0 + $0x144] ss:$72 sps:$4 sm:$0xff]  }
  0x4c   :  { %3280 = vmatpush3.bf16.msra.mxu1 %v3732_v18  ;;  %3338 = vmatpush3.bf16.msra.mxu0 %v3736_v22  ;;  %v3804_v17 = vld [vmem:[%s4961_s1 + $0x290] sm:$0xff]   ;;  %v3805_v22 = vld [vmem:[%s4962_s0 + $0x138] ss:$72 sps:$4 sm:$0xff]  }
  0x4d   :  { %3281 = vmatprep.subr.bf16.mxu1 %v3737_v23  ;;  %3339 = vmatprep.subr.bf16.mxu0 %v3743_v27  ;;  %v3808_v18 = vld [vmem:[%s4961_s1 + $0x310] sm:$0xff]   ;;  %v3806_v23 = vld [vmem:[%s4962_s0 + $0x140] ss:$72 sps:$4 sm:$0xff]  }
  0x4e   :  { %v3821_v27 = vld [vmem:[%s4961_s1 + $0x360] sm:$0xff]  }
  0x50   :  { %3282 = vmatpush3.bf16.msra.mxu1 %v3738_v24  ;;  %3340 = vmatpush3.bf16.msra.mxu0 %v3746_v28  ;;  %v3818_v24 = vld [vmem:[%s4961_s1 + $0x318] sm:$0xff]  }
  0x51   :  { %3283 = vmatprep.subr.bf16.mxu1 %v3747_v29  ;;  %3341 = vmatprep.subr.bf16.mxu0 %v3749_v33  ;;  %v3813_v28 = vld [vmem:[%s4962_s0 + $0x1d4] ss:$72 sps:$4 sm:$0xff]   ;;  %v3820_v29 = vld [vmem:[%s4961_s1 + $0x2a0] sm:$0xff]   ;;  %v3817_v33 = vld [vmem:[%s4962_s0 + $0x1d0] ss:$72 sps:$4 sm:$0xff]  }
  0x52   :  { %2031 = vmatmul.mubr.bf16.gmra.mrb[20].mxu1 %v3733_v20  ;;  %2119 = vmatmul.mubr.bf16.gmra.mrb[24].mxu0 %v3734_v21  ;;  %v3815_v20 = vld [vmem:[%s4961_s1 + $0x358] sm:$0xff]  }
  0x53   :  { %2038 = vmatprep.mubr.bf16.mxu1 %v3739_v25  ;;  %2126 = vmatprep.mubr.bf16.mxu0 %v3741_v26  ;;  %v3810_v21 = vld [vmem:[%s4961_s1 + $0x298] sm:$0xff]   ;;  %v3811_v25 = vld [vmem:[%s4962_s0 + $0x1cc] ss:$72 sps:$4 sm:$0xff]   ;;  %v3819_v26 = vld [vmem:[%s4961_s1 + $0x2e0] sm:$0xff]  }
  0x54   :  { %3284 = vmatpush3.bf16.msra.mxu1 %v3748_v32  ;;  %3342 = vmatpush3.bf16.msra.mxu0 %v3754_v36  ;;  %v3816_v32 = vld [vmem:[%s4962_s0 + $0x1c8] ss:$72 sps:$4 sm:$0xff]  }
  0x55   :  { %3285 = vmatprep.subr.bf16.mxu1 %v3757_v37  ;;  %3343 = vmatprep.subr.bf16.mxu0 %v3759_v40  ;;  %v3831_v36 = vld [vmem:[%s4961_s1 + $0x368] sm:$0xff]   ;;  %v3840_v40 = vld [vmem:[%s4961_s1 + $0x2b0] sm:$0xff]  }
  0x56   :  { %v3832_v37 = vld [vmem:[%s4961_s1 + $0x328] sm:$0xff]  }
  0x58   :  { %3286 = vmatpush3.bf16.msra.mxu1 %v3758_v38  ;;  %3344 = vmatpush3.bf16.msra.mxu0 %v3760_v41  ;;  %v3824_v38 = vld [vmem:[%s4962_s0 + $0x264] ss:$72 sps:$4 sm:$0xff]   ;;  %v3841_v41 = vld [vmem:[%s4961_s1 + $0x370] sm:$0xff]  }
  0x59   :  { %3287 = vmatprep.subr.bf16.mxu1 %v3767_v45  ;;  %3345 = vmatprep.subr.bf16.mxu0 %v3769_v47  ;;  %v3833_v45 = vld [vmem:[%s4962_s0 + $0x2ec] ss:$72 sps:$4 sm:$0xff]   ;;  %v3847_v47 = vld [vmem:[%s4961_s1 + $0x2f8] sm:$0xff]  }
  0x5a   :  { %2039 = vmatmul.mubr.bf16.gmra.mrb[24].mxu1 %v3744_v30  ;;  %2127 = vmatmul.mubr.bf16.gmra.mrb[28].mxu0 %v3745_v31  ;;  %v3826_v30 = vld [vmem:[%s4961_s1 + $0x320] sm:$0xff]   ;;  %v3829_v31 = vld [vmem:[%s4961_s1 + $0x2e8] sm:$0xff]  }
  0x5b   :  { %2046 = vmatprep.mubr.bf16.mxu1 %v3750_v34  ;;  %2134 = vmatprep.mubr.bf16.mxu0 %v3752_v35  ;;  %v3830_v34 = vld [vmem:[%s4961_s1 + $0x2a8] sm:$0xff]   ;;  %v3822_v35 = vld [vmem:[%s4962_s0 + $0x25c] ss:$72 sps:$4 sm:$0xff]  }
  0x5c   :  { %3288 = vmatpush3.bf16.msra.mxu1 %v3768_v46  ;;  %3346 = vmatpush3.bf16.msra.mxu0 %v3770_v50  ;;  %v3835_v46 = vld [vmem:[%s4962_s0 + $0x2f4] ss:$72 sps:$4 sm:$0xff]  }
  0x5d   :  { %3289 = vmatprep.subr.bf16.mxu1 %v3775_v53  ;;  %3347 = vmatprep.subr.bf16.mxu0 %v3777_v57  ;;  %v3850_v50 = vld [vmem:[%s4961_s1 + $0x338] sm:$0xff]   ;;  %v127_v53 = vld [vmem:[%s4962_s0 + $0x380] sm:$0x11] }
  0x5e   :  { %v2887_v57 = vcombine.high %v127_v53, %v127_v53 }
  0x60   :  { %3290 = vmatpush3.bf16.msra.mxu1 %v3776_v54  ;;  %3348 = vmatpush3.bf16.msra.mxu0 %v3778_v58  ;;  %v3857_v54 = vld [vmem:[%s4961_s1 + $0x3c0] sm:$0xff]  }
  0x61   :  { %3391 = vmatprep.subr.bf16.mxu1 %v3785_v59  ;;  %3449 = vmatprep.subr.bf16.mxu0 %v3787_v63  ;;  %v3859_v58 = vld [vmem:[%s4961_s1 + $0x440] sm:$0xff]   ;;  %v2884_v59 = vcombine.low %v126_v51, %v126_v51  ;;  %v3851_v63 = vld [vmem:[%s4962_s0 + $0x28] ss:$72 sps:$4 sm:$0xff]  }
  0x62   :  { %2047 = vmatmul.mubr.bf16.gmra.mrb[28].mxu1 %v3755_v39  ;;  %2135 = vmatmul.mubr.bf16.gmra.mrb[32].mxu0 %v3756_v42  ;;  %v3839_v39 = vld [vmem:[%s4961_s1 + $0x2f0] sm:$0xff]   ;;  %v3827_v42 = vld [vmem:[%s4962_s0 + $0x258] ss:$72 sps:$4 sm:$0xff]  }
  0x63   :  { %2054 = vmatprep.mubr.bf16.mxu1 %v3761_v43  ;;  %2142 = vmatprep.mubr.bf16.mxu0 %v3763_v44  ;;  %v3828_v43 = vld [vmem:[%s4962_s0 + $0x260] ss:$72 sps:$4 sm:$0xff]   ;;  %v3842_v44 = vld [vmem:[%s4961_s1 + $0x330] sm:$0xff]  }
  0x6a   :  { %2055 = vmatmul.mubr.bf16.gmra.mrb[32].mxu1 %v3765_v48  ;;  %2143 = vmatmul.mubr.bf16.gmra.mrb[36].mxu0 %v3766_v49  ;;  %v3848_v48 = vld [vmem:[%s4961_s1 + $0x2b8] sm:$0xff]  }
  0x6b   :  { %2062 = vmatprep.mubr.bf16.mxu1 %v2881_v55  ;;  %2150 = vmatprep.mubr.bf16.mxu0 %v2883_v56  ;;  %v3849_v49 = vld [vmem:[%s4961_s1 + $0x378] sm:$0xff]   ;;  %v2885_v56 = vcombine.high %v126_v51, %v126_v51 }
  0x6c   :  { %v3838_v55 = vld [vmem:[%s4962_s0 + $0x2f0] ss:$72 sps:$4 sm:$0xff]  }
  0x6d   :  { %v3909_v51 = vld [vmem:[%s4962_s0 + $0x2f8] ss:$72 sps:$4 sm:$0xff]  }
  0x72   :  { %2063 = vmatmul.mubr.bf16.gmra.mrb[36].mxu1 %v2880_v61  ;;  %2151 = vmatmul.mubr.bf16.gmra.mrb[40].mxu0 %v2882_v62  ;;  %v3853_v61 = vld [vmem:[%s4962_s0 + $0x2c] ss:$72 sps:$4 sm:$0xff]  }
  0x73   :  { %2190 = vmatprep.mubr.bf16.mxu1 %v3781_v60  ;;  %2278 = vmatprep.mubr.bf16.mxu0 %v3784_v0  ;;  %v2886_v60 = vcombine.low %v127_v53, %v127_v53  ;;  %v3856_v62 = vld [vmem:[%s4962_s0 + $0x34] ss:$72 sps:$4 sm:$0xff]   ;;  %v3854_v0 = vld [vmem:[%s4962_s0 + $0x30] ss:$72 sps:$4 sm:$0xff]  }
  0x7a   :  { %2191 = vmatmul.mubr.bf16.vlgmr.msra.gmra.mrb[40].mxu1 %v3779_v1  ;;  %2279 = vmatmul.mubr.bf16.vlgmr.msra.gmra.mrb[44].mxu0 %v3782_v2  ;;  %v3858_v1 = vld [vmem:[%s4961_s1 + $0x380] sm:$0xff]  }
  0x7b   :  { %3392 = vmatpush3.bf16.msra.mxu1 %v3786_v3  ;;  %3450 = vmatpush3.bf16.msra.mxu0 %v3788_v4  ;;  %v3860_v2 = vld [vmem:[%s4961_s1 + $0x400] sm:$0xff]  }
  0x7c   :  { %2198 = vmatprep.mubr.bf16.mxu1 %v3789_v5  ;;  %2286 = vmatprep.mubr.bf16.mxu0 %v3791_v6  ;;  %v3861_v3 = vld [vmem:[%s4962_s0 + $0xbc] ss:$72 sps:$4 sm:$0xff]   ;;  %v3865_v5 = vld [vmem:[%s4961_s1 + $0x3c8] sm:$0xff]  }
  0x7d   :  { %3393 = vmatprep.subr.bf16.mxu1 %v3793_v7  ;;  %3451 = vmatprep.subr.bf16.mxu0 %v3797_v8  ;;  %v3863_v4 = vld [vmem:[%s4962_s0 + $0xc4] ss:$72 sps:$4 sm:$0xff]  }
  0x7e   :  { %v3869_v6 = vld [vmem:[%s4961_s1 + $0x448] sm:$0xff]  }
  0x7f   :  { %3394 = vmatpush3.bf16.msra.mxu1 %v3796_v9  ;;  %3452 = vmatpush3.bf16.msra.mxu0 %v3798_v10  ;;  %v3868_v7 = vld [vmem:[%s4961_s1 + $0x388] sm:$0xff]   ;;  %v3871_v9 = vld [vmem:[%s4961_s1 + $0x3d0] sm:$0xff]   ;;  %v3866_v10 = vld [vmem:[%s4962_s0 + $0xb8] ss:$72 sps:$4 sm:$0xff]  }
  0x80   :  { %3395 = vmatprep.subr.bf16.mxu1 %v3799_v11  ;;  %3453 = vmatprep.subr.bf16.mxu0 %v3807_v14  ;;  %v3870_v8 = vld [vmem:[%s4961_s1 + $0x408] sm:$0xff]   ;;  %v3874_v14 = vld [vmem:[%s4962_s0 + $0x154] ss:$72 sps:$4 sm:$0xff]  }
  0x81   :  { %v3867_v11 = vld [vmem:[%s4962_s0 + $0xc0] ss:$72 sps:$4 sm:$0xff]  }
  0x82   :  { %2199 = vmatmul.mubr.bf16.gmra.mrb[44].mxu1 %v3794_v12  ;;  %2287 = vmatmul.mubr.bf16.gmra.mrb[48].mxu0 %v3795_v13  ;;  %v3879_v12 = vld [vmem:[%s4961_s1 + $0x450] sm:$0xff]  }
  0x83   :  { %2206 = vmatprep.mubr.bf16.mxu1 %v3800_v15  ;;  %2294 = vmatprep.mubr.bf16.mxu0 %v3802_v16  ;;  %v3872_v13 = vld [vmem:[%s4962_s0 + $0x14c] ss:$72 sps:$4 sm:$0xff]  }
  0x84   :  { %3396 = vmatpush3.bf16.msra.mxu1 %v3804_v17  ;;  %3454 = vmatpush3.bf16.msra.mxu0 %v3808_v18  ;;  %v3876_v15 = vld [vmem:[%s4961_s1 + $0x390] sm:$0xff]   ;;  %v3881_v17 = vld [vmem:[%s4961_s1 + $0x3d8] sm:$0xff]  }
  0x85   :  { %3397 = vmatprep.subr.bf16.mxu1 %v3809_v19  ;;  %3455 = vmatprep.subr.bf16.mxu0 %v3815_v20  ;;  %v3880_v16 = vld [vmem:[%s4961_s1 + $0x410] sm:$0xff]   ;;  %v3887_v18 = vld [vmem:[%s4961_s1 + $0x458] sm:$0xff]  }
  0x86   :  { %v3882_v19 = vld [vmem:[%s4961_s1 + $0x398] sm:$0xff]  }
  0x87   :  { %v3890_v20 = vld [vmem:[%s4961_s1 + $0x418] sm:$0xff]  }
  0x88   :  { %3398 = vmatpush3.bf16.msra.mxu1 %v3810_v21  ;;  %3456 = vmatpush3.bf16.msra.mxu0 %v3818_v24  ;;  %v3877_v21 = vld [vmem:[%s4962_s0 + $0x148] ss:$72 sps:$4 sm:$0xff]   ;;  %v3883_v24 = vld [vmem:[%s4962_s0 + $0x1dc] ss:$72 sps:$4 sm:$0xff]  }
  0x89   :  { %3399 = vmatprep.subr.bf16.mxu1 %v3819_v26  ;;  %3457 = vmatprep.subr.bf16.mxu0 %v3821_v27  ;;  %v3885_v26 = vld [vmem:[%s4962_s0 + $0x1e4] ss:$72 sps:$4 sm:$0xff]  }
  0x8a   :  { %2207 = vmatmul.mubr.bf16.gmra.mrb[48].mxu1 %v3805_v22  ;;  %2295 = vmatmul.mubr.bf16.gmra.mrb[52].mxu0 %v3806_v23  ;;  %v3878_v22 = vld [vmem:[%s4962_s0 + $0x150] ss:$72 sps:$4 sm:$0xff]   ;;  %v3891_v23 = vld [vmem:[%s4961_s1 + $0x3e0] sm:$0xff]  }
  0x8b   :  { %2214 = vmatprep.mubr.bf16.mxu1 %v3811_v25  ;;  %2302 = vmatprep.mubr.bf16.mxu0 %v3813_v28  ;;  %v3893_v25 = vld [vmem:[%s4961_s1 + $0x460] sm:$0xff]  }
  0x8c   :  { %3400 = vmatpush3.bf16.msra.mxu1 %v3820_v29  ;;  %3458 = vmatpush3.bf16.msra.mxu0 %v3826_v30  ;;  %v3892_v27 = vld [vmem:[%s4961_s1 + $0x3a0] sm:$0xff]   ;;  %v3901_v29 = vld [vmem:[%s4961_s1 + $0x3e8] sm:$0xff]  }
  0x8d   :  { %3401 = vmatprep.subr.bf16.mxu1 %v3829_v31  ;;  %3459 = vmatprep.subr.bf16.mxu0 %v3831_v36  ;;  %v3898_v28 = vld [vmem:[%s4961_s1 + $0x420] sm:$0xff]   ;;  %v3903_v30 = vld [vmem:[%s4961_s1 + $0x468] sm:$0xff]   ;;  %v3896_v36 = vld [vmem:[%s4962_s0 + $0x274] ss:$72 sps:$4 sm:$0xff]  }
  0x8e   :  { %v3902_v31 = vld [vmem:[%s4961_s1 + $0x3a8] sm:$0xff]  }
  0x90   :  { %3402 = vmatpush3.bf16.msra.mxu1 %v3830_v34  ;;  %3460 = vmatpush3.bf16.msra.mxu0 %v3832_v37  ;;  %v3904_v34 = vld [vmem:[%s4961_s1 + $0x428] sm:$0xff]   ;;  %v3911_v37 = vld [vmem:[%s4961_s1 + $0x3f0] sm:$0xff]  }
  0x91   :  { %3403 = vmatprep.subr.bf16.mxu1 %v3839_v39  ;;  %3461 = vmatprep.subr.bf16.mxu0 %v3841_v41  ;;  %v3912_v39 = vld [vmem:[%s4961_s1 + $0x3b0] sm:$0xff]   ;;  %v3919_v41 = vld [vmem:[%s4961_s1 + $0x3f8] sm:$0xff]  }
  0x92   :  { %2215 = vmatmul.mubr.bf16.gmra.mrb[52].mxu1 %v3816_v32  ;;  %2303 = vmatmul.mubr.bf16.gmra.mrb[56].mxu0 %v3817_v33  ;;  %v3888_v32 = vld [vmem:[%s4962_s0 + $0x1d8] ss:$72 sps:$4 sm:$0xff]  }
  0x93   :  { %2222 = vmatprep.mubr.bf16.mxu1 %v3822_v35  ;;  %2310 = vmatprep.mubr.bf16.mxu0 %v3824_v38  ;;  %v3889_v33 = vld [vmem:[%s4962_s0 + $0x1e0] ss:$72 sps:$4 sm:$0xff]   ;;  %v3894_v35 = vld [vmem:[%s4962_s0 + $0x26c] ss:$72 sps:$4 sm:$0xff]  }
  0x94   :  { %3404 = vmatpush3.bf16.msra.mxu1 %v3840_v40  ;;  %3462 = vmatpush3.bf16.msra.mxu0 %v3842_v44  ;;  %v3913_v38 = vld [vmem:[%s4961_s1 + $0x470] sm:$0xff]   ;;  %v3922_v44 = vld [vmem:[%s4961_s1 + $0x438] sm:$0xff]  }
  0x95   :  { %3405 = vmatprep.subr.bf16.mxu1 %v3847_v47  ;;  %3463 = vmatprep.subr.bf16.mxu0 %v3849_v49  ;;  %v3914_v40 = vld [vmem:[%s4961_s1 + $0x430] sm:$0xff]   ;;  %v3905_v47 = vld [vmem:[%s4962_s0 + $0x2fc] ss:$72 sps:$4 sm:$0xff]   ;;  %v128_v49 = vld [vmem:[%s4962_s0 + $0x388] sm:$0x11] }
  0x96   :  { %v2889_v53 = vcombine.high %v128_v49, %v128_v49 }
  0x98   :  { %3406 = vmatpush3.bf16.msra.mxu1 %v3848_v48  ;;  %3464 = vmatpush3.bf16.msra.mxu0 %v3850_v50  ;;  %v3907_v48 = vld [vmem:[%s4962_s0 + $0x304] ss:$72 sps:$4 sm:$0xff]   ;;  %v129_v50 = vld [vmem:[%s4962_s0 + $0x390] sm:$0x11] }
  0x99   :  { %3507 = vmatprep.subr.bf16.mxu1 %v3857_v54  ;;  %3565 = vmatprep.subr.bf16.mxu0 %v3859_v58  ;;  %v2891_v54 = vcombine.high %v129_v50, %v129_v50  ;;  %v3928_v58 = vld [vmem:[%s4962_s0 + $0x44] ss:$72 sps:$4 sm:$0xff]  }
  0x9a   :  { %2223 = vmatmul.mubr.bf16.gmra.mrb[56].mxu1 %v3827_v42  ;;  %2311 = vmatmul.mubr.bf16.gmra.mrb[60].mxu0 %v3828_v43  ;;  %v3921_v42 = vld [vmem:[%s4961_s1 + $0x478] sm:$0xff]  }
  0x9b   :  { %2230 = vmatprep.mubr.bf16.mxu1 %v3833_v45  ;;  %2318 = vmatprep.mubr.bf16.mxu0 %v3835_v46  ;;  %v3920_v43 = vld [vmem:[%s4961_s1 + $0x3b8] sm:$0xff]   ;;  %v3899_v45 = vld [vmem:[%s4962_s0 + $0x268] ss:$72 sps:$4 sm:$0xff]  }
  0x9c   :  { %v3900_v46 = vld [vmem:[%s4962_s0 + $0x270] ss:$72 sps:$4 sm:$0xff]  }
  0xa2   :  { %2231 = vmatmul.mubr.bf16.gmra.mrb[60].mxu1 %v3837_v52  ;;  %2319 = vmatmul.mubr.bf16.gmra.mrb[64].mxu0 %v3838_v55  ;;  %v3910_v52 = vld [vmem:[%s4962_s0 + $0x300] ss:$72 sps:$4 sm:$0xff]   ;;  %v2888_v55 = vcombine.low %v128_v49, %v128_v49 }
  0xa3   :  { %2238 = vmatprep.mubr.bf16.mxu1 %v2885_v56  ;;  %2326 = vmatprep.mubr.bf16.mxu0 %v2887_v57  ;;  %v2890_v56 = vcombine.low %v129_v50, %v129_v50  ;;  %v3925_v57 = vld [vmem:[%s4962_s0 + $0x3c] ss:$72 sps:$4 sm:$0xff]  }
  0xa4   :  { %v130_v50 = vld [vmem:[%s4962_s0 + $0x398] sm:$0x11] }
  0xaa   :  { %2239 = vmatmul.mubr.bf16.gmra.mrb[64].mxu1 %v2884_v59  ;;  %2327 = vmatmul.mubr.bf16.gmra.mrb[68].mxu0 %v2886_v60  ;;  %v3923_v59 = vld [vmem:[%s4962_s0 + $0x38] ss:$72 sps:$4 sm:$0xff]  }
  0xab   :  { %2366 = vmatprep.mubr.bf16.mxu1 %v3853_v61  ;;  %2454 = vmatprep.mubr.bf16.mxu0 %v3856_v62  ;;  %v3926_v60 = vld [vmem:[%s4962_s0 + $0x40] ss:$72 sps:$4 sm:$0xff]   ;;  %v3929_v61 = vld [vmem:[%s4962_s0 + $0xcc] ss:$72 sps:$4 sm:$0xff]  }
  0xac   :  { %v3931_v62 = vld [vmem:[%s4962_s0 + $0xd4] ss:$72 sps:$4 sm:$0xff]  }
  0xb2   :  { %2367 = vmatmul.mubr.bf16.vlgmr.msra.gmra.mrb[68].mxu1 %v3851_v63  ;;  %2455 = vmatmul.mubr.bf16.vlgmr.msra.gmra.mrb[72].mxu0 %v3854_v0  ;;  %v3933_v63 = vld [vmem:[%s4962_s0 + $0xc8] ss:$72 sps:$4 sm:$0xff]  }
  0xb3   :  { %3508 = vmatpush3.bf16.msra.mxu1 %v3858_v1  ;;  %3566 = vmatpush3.bf16.msra.mxu0 %v3860_v2  ;;  %v3934_v0 = vld [vmem:[%s4962_s0 + $0xd0] ss:$72 sps:$4 sm:$0xff]   ;;  %v3935_v1 = vld [vmem:[%s4962_s0 + $0x15c] ss:$72 sps:$4 sm:$0xff]  }
  0xb4   :  { %2374 = vmatprep.mubr.bf16.mxu1 %v3861_v3  ;;  %2462 = vmatprep.mubr.bf16.mxu0 %v3863_v4  ;;  %v3937_v2 = vld [vmem:[%s4962_s0 + $0x164] ss:$72 sps:$4 sm:$0xff]  }
  0xb5   :  { %3509 = vmatprep.subr.bf16.mxu1 %v3865_v5  ;;  %3567 = vmatprep.subr.bf16.mxu0 %v3869_v6 }
  0xb7   :  { %3510 = vmatpush3.bf16.msra.mxu1 %v3868_v7  ;;  %3568 = vmatpush3.bf16.msra.mxu0 %v3870_v8  ;;  %v3939_v7 = vld [vmem:[%s4962_s0 + $0x158] ss:$72 sps:$4 sm:$0xff]  }
  0xb8   :  { %3511 = vmatprep.subr.bf16.mxu1 %v3871_v9  ;;  %3569 = vmatprep.subr.bf16.mxu0 %v3879_v12  ;;  %v3940_v8 = vld [vmem:[%s4962_s0 + $0x160] ss:$72 sps:$4 sm:$0xff]  }
  0xba   :  { %2375 = vmatmul.mubr.bf16.gmra.mrb[72].mxu1 %v3866_v10  ;;  %2463 = vmatmul.mubr.bf16.gmra.mrb[76].mxu0 %v3867_v11 }
  0xbb   :  { %2382 = vmatprep.mubr.bf16.mxu1 %v3872_v13  ;;  %2470 = vmatprep.mubr.bf16.mxu0 %v3874_v14  ;;  %v3941_v13 = vld [vmem:[%s4962_s0 + $0x1ec] ss:$72 sps:$4 sm:$0xff]  }
  0xbc   :  { %3512 = vmatpush3.bf16.msra.mxu1 %v3876_v15  ;;  %3570 = vmatpush3.bf16.msra.mxu0 %v3880_v16  ;;  %v3943_v14 = vld [vmem:[%s4962_s0 + $0x1f4] ss:$72 sps:$4 sm:$0xff]  }
  0xbd   :  { %3513 = vmatprep.subr.bf16.mxu1 %v3881_v17  ;;  %3571 = vmatprep.subr.bf16.mxu0 %v3887_v18 }
  0xc0   :  { %3514 = vmatpush3.bf16.msra.mxu1 %v3882_v19  ;;  %3572 = vmatpush3.bf16.msra.mxu0 %v3890_v20 }
  0xc1   :  { %3515 = vmatprep.subr.bf16.mxu1 %v3891_v23  ;;  %3573 = vmatprep.subr.bf16.mxu0 %v3893_v25  ;;  %v3946_v23 = vld [vmem:[%s4962_s0 + $0x1f0] ss:$72 sps:$4 sm:$0xff]  }
  0xc2   :  { %2383 = vmatmul.mubr.bf16.gmra.mrb[76].mxu1 %v3877_v21  ;;  %2471 = vmatmul.mubr.bf16.gmra.mrb[80].mxu0 %v3878_v22  ;;  %v3945_v22 = vld [vmem:[%s4962_s0 + $0x1e8] ss:$72 sps:$4 sm:$0xff]  }
  0xc3   :  { %2390 = vmatprep.mubr.bf16.mxu1 %v3883_v24  ;;  %2478 = vmatprep.mubr.bf16.mxu0 %v3885_v26 }
  0xc4   :  { %3516 = vmatpush3.bf16.msra.mxu1 %v3892_v27  ;;  %3574 = vmatpush3.bf16.msra.mxu0 %v3898_v28 }
  0xc5   :  { %3517 = vmatprep.subr.bf16.mxu1 %v3901_v29  ;;  %3575 = vmatprep.subr.bf16.mxu0 %v3903_v30  ;;  %v3947_v29 = vld [vmem:[%s4962_s0 + $0x27c] ss:$72 sps:$4 sm:$0xff]  }
  0xc6   :  { %v3949_v30 = vld [vmem:[%s4962_s0 + $0x284] ss:$72 sps:$4 sm:$0xff]  }
  0xc8   :  { %3518 = vmatpush3.bf16.msra.mxu1 %v3902_v31  ;;  %3576 = vmatpush3.bf16.msra.mxu0 %v3904_v34 }
  0xc9   :  { %3519 = vmatprep.subr.bf16.mxu1 %v3911_v37  ;;  %3577 = vmatprep.subr.bf16.mxu0 %v3913_v38  ;;  %v3951_v38 = vld [vmem:[%s4962_s0 + $0x278] ss:$72 sps:$4 sm:$0xff]  }
  0xca   :  { %2391 = vmatmul.mubr.bf16.gmra.mrb[80].mxu1 %v3888_v32  ;;  %2479 = vmatmul.mubr.bf16.gmra.mrb[84].mxu0 %v3889_v33 }
  0xcb   :  { %2398 = vmatprep.mubr.bf16.mxu1 %v3894_v35  ;;  %2486 = vmatprep.mubr.bf16.mxu0 %v3896_v36 }
  0xcc   :  { %3520 = vmatpush3.bf16.msra.mxu1 %v3912_v39  ;;  %3578 = vmatpush3.bf16.msra.mxu0 %v3914_v40  ;;  %v3952_v39 = vld [vmem:[%s4962_s0 + $0x280] ss:$72 sps:$4 sm:$0xff]  }
  0xcd   :  { %3521 = vmatprep.subr.bf16.mxu1 %v3919_v41  ;;  %3579 = vmatprep.subr.bf16.mxu0 %v3921_v42 }
  0xd0   :  { %3522 = vmatpush3.bf16.msra.mxu1 %v3920_v43  ;;  %3580 = vmatpush3.bf16.msra.mxu0 %v3922_v44 }
  0xd2   :  { %2399 = vmatmul.mubr.bf16.gmra.mrb[84].mxu1 %v3899_v45  ;;  %2487 = vmatmul.mubr.bf16.gmra.mrb[88].mxu0 %v3900_v46  ;;  %v3953_v45 = vld [vmem:[%s4962_s0 + $0x30c] ss:$72 sps:$4 sm:$0xff]  }
  0xd3   :  { %2406 = vmatprep.mubr.bf16.mxu1 %v3905_v47  ;;  %2494 = vmatprep.mubr.bf16.mxu0 %v3907_v48  ;;  %v3955_v46 = vld [vmem:[%s4962_s0 + $0x314] ss:$72 sps:$4 sm:$0xff]  }
  0xda   :  { %2407 = vmatmul.mubr.bf16.gmra.mrb[88].mxu1 %v3909_v51  ;;  %2495 = vmatmul.mubr.bf16.gmra.mrb[92].mxu0 %v3910_v52  ;;  %v131_v51 = vld [vmem:[%s4962_s0 + $0x3a0] sm:$0x11] }
  0xdb   :  { %2414 = vmatprep.mubr.bf16.mxu1 %v2889_v53  ;;  %2502 = vmatprep.mubr.bf16.mxu0 %v2891_v54  ;;  %v3957_v54 = vld [vmem:[%s4962_s0 + $0x308] ss:$72 sps:$4 sm:$0xff]  }
  0xe2   :  { %2415 = vmatmul.mubr.bf16.gmra.mrb[92].mxu1 %v2888_v55  ;;  %2503 = vmatmul.mubr.bf16.gmra.mrb[96].mxu0 %v2890_v56  ;;  %v3958_v55 = vld [vmem:[%s4962_s0 + $0x310] ss:$72 sps:$4 sm:$0xff]  }
  0xe3   :  { %2542 = vmatprep.mubr.bf16.mxu1 %v3925_v57  ;;  %2630 = vmatprep.mubr.bf16.mxu0 %v3928_v58  ;;  %v2893_v58 = vcombine.high %v130_v50, %v130_v50 }
  0xea   :  { %2543 = vmatmul.mubr.bf16.vlgmr.msra.gmra.mrb[96].mxu1 %v3923_v59  ;;  %2631 = vmatmul.mubr.bf16.vlgmr.msra.gmra.mrb[100].mxu0 %v3926_v60  ;;  %v2895_v59 = vcombine.high %v131_v51, %v131_v51 }
  0xeb   :  { %2550 = vmatprep.mubr.bf16.mxu1 %v3929_v61  ;;  %2638 = vmatprep.mubr.bf16.mxu0 %v3931_v62  ;;  %v4795_v62 = vld [vmem:[%s4963_s2] ss:$0 sm:$0xff] }
  0xf2   :  { %2551 = vmatmul.mubr.bf16.gmra.mrb[100].mxu1 %v3933_v63  ;;  %2639 = vmatmul.mubr.bf16.gmra.mrb[104].mxu0 %v3934_v0 }
  0xf3   :  { %2558 = vmatprep.mubr.bf16.mxu1 %v3935_v1  ;;  %2646 = vmatprep.mubr.bf16.mxu0 %v3937_v2 }
  0xf5   :  { %v3117_v3 = vpop.f32.mrb[0].mxu0  ;;  %v3141_v4 = vpop.f32.mrb[0].mxu1 }
  0xf6   :  { %v3118_v5 = vpop.f32.mrb[1].mxu0  ;;  %v3142_v6 = vpop.f32.mrb[1].mxu1 }
  0xf7   :  { %v4724_v9 = vadd.f32 %v3118_v5, %v3117_v3  ;;  %v4726_v10 = vadd.f32 %v3142_v6, %v3141_v4  ;;  %v3120_v11 = vpop.f32.mrb[2].mxu0  ;;  %v3144_v12 = vpop.f32.mrb[2].mxu1  ;;  %v2892_v3 = vcombine.low %v130_v50, %v130_v50  ;;  %v2894_v4 = vcombine.low %v131_v51, %v131_v51 }
  0xf8   :  { %v3121_v15 = vpop.f32.mrb[3].mxu0  ;;  %v3145_v16 = vpop.f32.mrb[3].mxu1 }
  0xf9   :  { %v4734_v17 = vadd.f32 %v3121_v15, %v3120_v11  ;;  %v4736_v18 = vadd.f32 %v3145_v16, %v3144_v12  ;;  %v1929_v5 = vadd.f32 %v4724_v9, %v4795_v62 }
  0xfa   :  { %2559 = vmatmul.mubr.bf16.gmra.mrb[104].mxu1 %v3939_v7  ;;  %2647 = vmatmul.mubr.bf16.gmra.mrb[108].mxu0 %v3940_v8 }
  0xfb   :  { %2566 = vmatprep.mubr.bf16.mxu1 %v3941_v13  ;;  %2654 = vmatprep.mubr.bf16.mxu0 %v3943_v14  ;;  %v1932_v14 = vadd.f32 %v4734_v17, %v4795_v62 }
  0xfd   :  { %v3123_v19 = vpop.f32.mrb[4].mxu0  ;;  %v3147_v20 = vpop.f32.mrb[4].mxu1 }
  0xfe   :  { %v3124_v21 = vpop.f32.mrb[5].mxu0  ;;  %v3148_v24 = vpop.f32.mrb[5].mxu1 }
  0xff   :  { %v4744_v25 = vadd.f32 %v3124_v21, %v3123_v19  ;;  %v3126_v26 = vpop.f32.mrb[6].mxu0  ;;  %v4746_v27 = vadd.f32 %v3148_v24, %v3147_v20  ;;  %v3150_v28 = vpop.f32.mrb[6].mxu1 }
 0x100   :  { %v3127_v31 = vpop.f32.mrb[7].mxu0  ;;  %v3151_v32 = vpop.f32.mrb[7].mxu1 }
 0x101   :  { %v4754_v33 = vadd.f32 %v3127_v31, %v3126_v26  ;;  %v4756_v34 = vadd.f32 %v3151_v32, %v3150_v28  ;;  %v1937_v28 = vadd.f32 %v4744_v25, %v4795_v62 }
 0x102   :  { %2567 = vmatmul.mubr.bf16.gmra.mrb[108].mxu1 %v3945_v22  ;;  %2655 = vmatmul.mubr.bf16.gmra.mrb[112].mxu0 %v3946_v23 }
 0x103   :  { %2574 = vmatprep.mubr.bf16.mxu1 %v3947_v29  ;;  %2662 = vmatprep.mubr.bf16.mxu0 %v3949_v30 }
 0x105   :  { %v3129_v35 = vpop.f32.mrb[8].mxu0  ;;  %v3153_v36 = vpop.f32.mrb[8].mxu1 }
 0x106   :  { %v3130_v37 = vpop.f32.mrb[9].mxu0  ;;  %v3154_v40 = vpop.f32.mrb[9].mxu1 }
 0x107   :  { %v4764_v41 = vadd.f32 %v3130_v37, %v3129_v35  ;;  %v3132_v42 = vpop.f32.mrb[10].mxu0  ;;  %v4766_v43 = vadd.f32 %v3154_v40, %v3153_v36  ;;  %v3156_v44 = vpop.f32.mrb[10].mxu1  ;;  %v1940_v36 = vadd.f32 %v4754_v33, %v4795_v62 }
 0x108   :  { %v3133_v47 = vpop.f32.mrb[11].mxu0  ;;  %v3157_v48 = vpop.f32.mrb[11].mxu1 }
 0x109   :  { %v4774_v49 = vadd.f32 %v3133_v47, %v3132_v42  ;;  %v1945_v48 = vadd.f32 %v4764_v41, %v4795_v62 }
 0x10a   :  { %2575 = vmatmul.mubr.bf16.gmra.mrb[112].mxu1 %v3951_v38  ;;  %2663 = vmatmul.mubr.bf16.gmra.mrb[116].mxu0 %v3952_v39 }
 0x10b   :  { %2582 = vmatprep.mubr.bf16.mxu1 %v3953_v45  ;;  %2670 = vmatprep.mubr.bf16.mxu0 %v3955_v46 }
 0x10d   :  { %v3135_v52 = vpop.f32.mrb[12].mxu0 }
 0x10e   :  { %v3136_v53 = vpop.f32.mrb[13].mxu0 }
 0x10f   :  { %v4788_v56 = vadd.f32 %v3136_v53, %v3135_v52  ;;  %v3138_v57 = vpop.f32.mrb[14].mxu0 }
 0x110   :  { %v3139_v60 = vpop.f32.mrb[15].mxu0 }
 0x111   :  { %v4790_v61 = vadd.f32 %v3139_v60, %v3138_v57 }
 0x112   :  { %2583 = vmatmul.mubr.bf16.gmra.mrb[116].mxu1 %v3957_v54  ;;  %2671 = vmatmul.mubr.bf16.gmra.mrb[120].mxu0 %v3958_v55  ;;  %v1948_v55 = vadd.f32 %v4774_v49, %v4795_v62 }
 0x113   :  { %2590 = vmatprep.mubr.bf16.mxu1 %v2893_v58  ;;  %2678 = vmatprep.mubr.bf16.mxu0 %v2895_v59 }
 0x115   :  { %v3175_v63 = vpop.f32.mrb[12].mxu1  ;;  %v3233_v0 = vpop.f32.mrb[16].mxu0 }
 0x116   :  { %v3176_v1 = vpop.f32.mrb[13].mxu1  ;;  %v3234_v2 = vpop.f32.mrb[17].mxu0 }
 0x117   :  { %v3177_v6 = vadd.f32 %v3176_v1, %v3175_v63  ;;  %v3235_v7 = vadd.f32 %v3234_v2, %v3233_v0  ;;  %v3178_v8 = vpop.f32.mrb[14].mxu1  ;;  %v3236_v11 = vpop.f32.mrb[18].mxu0 }
 0x118   :  { %v3179_v12 = vpop.f32.mrb[15].mxu1  ;;  %v3237_v13 = vpop.f32.mrb[19].mxu0 }
 0x119   :  { %v2017_v15 = vadd.f32 %v3177_v6, %v1929_v5  ;;  %v3180_v16 = vadd.f32 %v3179_v12, %v3178_v8  ;;  %v3238_v19 = vadd.f32 %v3237_v13, %v3236_v11  ;;  %v1956_v12 = vadd.f32 %v4790_v61, %v4795_v62 }
 0x11a   :  { %2591 = vmatmul.mubr.bf16.gmra.mrb[120].mxu1 %v2892_v3  ;;  %2679 = vmatmul.mubr.bf16.gmra.mrb[124].mxu0 %v2894_v4  ;;  %v1953_v4 = vadd.f32 %v4788_v56, %v4795_v62 }
 0x11b   :  { %v4801_v20 = vadd.f32 %v3235_v7, %v2017_v15  ;;  %v2020_v21 = vadd.f32 %v3180_v16, %v1932_v14 }
 0x11d   :  { %v4803_v22 = vadd.f32 %v3238_v19, %v2020_v21  ;;  %v3181_v9 = vpop.f32.mrb[16].mxu1  ;;  %v3239_v23 = vpop.f32.mrb[20].mxu0 }
 0x11e   :  { %v3182_v24 = vpop.f32.mrb[17].mxu1  ;;  %v3240_v26 = vpop.f32.mrb[21].mxu0 }
 0x11f   :  { %v3183_v29 = vadd.f32 %v3182_v24, %v3181_v9  ;;  %v3241_v30 = vadd.f32 %v3240_v26, %v3239_v23  ;;  %v3184_v17 = vpop.f32.mrb[18].mxu1  ;;  %v3242_v31 = vpop.f32.mrb[22].mxu0  ;;  %v1961_v26 = vadd.f32 %v4726_v10, %v4795_v62 }
 0x120   :  { %v3185_v32 = vpop.f32.mrb[19].mxu1  ;;  %v3243_v35 = vpop.f32.mrb[23].mxu0 }
 0x121   :  { %v2025_v37 = vadd.f32 %v3183_v29, %v1937_v28  ;;  %v3186_v38 = vadd.f32 %v3185_v32, %v3184_v17  ;;  %v3244_v39 = vadd.f32 %v3243_v35, %v3242_v31  ;;  %v1964_v32 = vadd.f32 %v4736_v18, %v4795_v62 }
 0x123   :  { %v4809_v40 = vadd.f32 %v3241_v30, %v2025_v37  ;;  %v2028_v42 = vadd.f32 %v3186_v38, %v1940_v36 }
 0x125   :  { %v4811_v44 = vadd.f32 %v3244_v39, %v2028_v42  ;;  %v3187_v45 = vpop.f32.mrb[20].mxu1  ;;  %v3245_v46 = vpop.f32.mrb[24].mxu0 }
 0x126   :  { %v3188_v25 = vpop.f32.mrb[21].mxu1  ;;  %v3246_v47 = vpop.f32.mrb[25].mxu0 }
 0x127   :  { %v3189_v50 = vadd.f32 %v3188_v25, %v3187_v45  ;;  %v3247_v51 = vadd.f32 %v3246_v47, %v3245_v46  ;;  %v3190_v52 = vpop.f32.mrb[22].mxu1  ;;  %v3248_v53 = vpop.f32.mrb[26].mxu0  ;;  %v1969_v47 = vadd.f32 %v4746_v27, %v4795_v62 }
 0x128   :  { %v3191_v33 = vpop.f32.mrb[23].mxu1  ;;  %v3249_v54 = vpop.f32.mrb[27].mxu0 }
 0x129   :  { %v2033_v57 = vadd.f32 %v3189_v50, %v1945_v48  ;;  %v3192_v58 = vadd.f32 %v3191_v33, %v3190_v52  ;;  %v3250_v59 = vadd.f32 %v3249_v54, %v3248_v53  ;;  %v1972_v33 = vadd.f32 %v4756_v34, %v4795_v62 }
 0x12b   :  { %v4817_v60 = vadd.f32 %v3247_v51, %v2033_v57  ;;  %v2036_v63 = vadd.f32 %v3192_v58, %v1948_v55 }
 0x12d   :  { %v4819_v0 = vadd.f32 %v3250_v59, %v2036_v63  ;;  %v3193_v1 = vpop.f32.mrb[24].mxu1  ;;  %v3251_v2 = vpop.f32.mrb[28].mxu0 }
 0x12e   :  { %v3194_v41 = vpop.f32.mrb[25].mxu1  ;;  %v3252_v3 = vpop.f32.mrb[29].mxu0 }
 0x12f   :  { %v3195_v5 = vadd.f32 %v3194_v41, %v3193_v1  ;;  %v3253_v6 = vadd.f32 %v3252_v3, %v3251_v2  ;;  %v3196_v7 = vpop.f32.mrb[26].mxu1  ;;  %v3254_v8 = vpop.f32.mrb[30].mxu0  ;;  %v1977_v3 = vadd.f32 %v4766_v43, %v4795_v62 }
 0x130   :  { %v3197_v49 = vpop.f32.mrb[27].mxu1  ;;  %v3255_v11 = vpop.f32.mrb[31].mxu0 }
 0x131   :  { %v2041_v13 = vadd.f32 %v3195_v5, %v1953_v4  ;;  %v3198_v14 = vadd.f32 %v3197_v49, %v3196_v7  ;;  %v3256_v15 = vadd.f32 %v3255_v11, %v3254_v8 }
 0x133   :  { %v4825_v16 = vadd.f32 %v3253_v6, %v2041_v13  ;;  %v2044_v19 = vadd.f32 %v3198_v14, %v1956_v12 }
 0x135   :  { %v4827_v21 = vadd.f32 %v3256_v15, %v2044_v19  ;;  %v3199_v9 = vpop.f32.mrb[28].mxu1  ;;  %v3257_v23 = vpop.f32.mrb[32].mxu0 }
 0x136   :  { %v3200_v56 = vpop.f32.mrb[29].mxu1  ;;  %v3258_v24 = vpop.f32.mrb[33].mxu0 }
 0x137   :  { %v3201_v28 = vadd.f32 %v3200_v56, %v3199_v9  ;;  %v3259_v29 = vadd.f32 %v3258_v24, %v3257_v23  ;;  %v3202_v30 = vpop.f32.mrb[30].mxu1  ;;  %v3260_v17 = vpop.f32.mrb[34].mxu0 }
 0x138   :  { %v3203_v61 = vpop.f32.mrb[31].mxu1  ;;  %v3261_v31 = vpop.f32.mrb[35].mxu0 }
 0x139   :  { %v2049_v35 = vadd.f32 %v3201_v28, %v1961_v26  ;;  %v3204_v36 = vadd.f32 %v3203_v61, %v3202_v30  ;;  %v3262_v37 = vadd.f32 %v3261_v31, %v3260_v17 }
 0x13b   :  { %v4833_v38 = vadd.f32 %v3259_v29, %v2049_v35  ;;  %v2052_v39 = vadd.f32 %v3204_v36, %v1964_v32 }
 0x13d   :  { %v4835_v42 = vadd.f32 %v3262_v37, %v2052_v39  ;;  %v3205_v45 = vpop.f32.mrb[32].mxu1  ;;  %v3263_v46 = vpop.f32.mrb[36].mxu0 }
 0x13e   :  { %v3206_v10 = vpop.f32.mrb[33].mxu1  ;;  %v3264_v25 = vpop.f32.mrb[37].mxu0 }
 0x13f   :  { %v3207_v48 = vadd.f32 %v3206_v10, %v3205_v45  ;;  %v3265_v50 = vadd.f32 %v3264_v25, %v3263_v46  ;;  %v3208_v51 = vpop.f32.mrb[34].mxu1  ;;  %v3266_v52 = vpop.f32.mrb[38].mxu0 }
 0x140   :  { %v3209_v18 = vpop.f32.mrb[35].mxu1  ;;  %v3267_v53 = vpop.f32.mrb[39].mxu0 }
 0x141   :  { %v2057_v54 = vadd.f32 %v3207_v48, %v1969_v47  ;;  %v3210_v55 = vadd.f32 %v3209_v18, %v3208_v51  ;;  %v3268_v57 = vadd.f32 %v3267_v53, %v3266_v52 }
 0x143   :  { %v4841_v58 = vadd.f32 %v3265_v50, %v2057_v54  ;;  %v2060_v59 = vadd.f32 %v3210_v55, %v1972_v33 }
 0x145   :  { %v4843_v63 = vadd.f32 %v3268_v57, %v2060_v59  ;;  %v3211_v1 = vpop.f32.mrb[36].mxu1  ;;  %v3269_v2 = vpop.f32.mrb[40].mxu0 }
 0x146   :  { %v3212_v27 = vpop.f32.mrb[37].mxu1  ;;  %v3270_v41 = vpop.f32.mrb[41].mxu0 }
 0x147   :  { %v3213_v4 = vadd.f32 %v3212_v27, %v3211_v1  ;;  %v3271_v5 = vadd.f32 %v3270_v41, %v3269_v2  ;;  %v3214_v6 = vpop.f32.mrb[38].mxu1  ;;  %v3272_v7 = vpop.f32.mrb[42].mxu0 }
 0x148   :  { %v3215_v34 = vpop.f32.mrb[39].mxu1  ;;  %v3273_v8 = vpop.f32.mrb[43].mxu0 }
 0x149   :  { %v2065_v49 = vadd.f32 %v3213_v4, %v1977_v3 }
 0x14b   :  { %v4847_v11 = vadd.f32 %v3271_v5, %v2065_v49 }
 0x14d   :  { %v3291_v12 = vpop.f32.mrb[40].mxu1  ;;  %v3349_v13 = vpop.f32.mrb[44].mxu0 }
 0x14e   :  { %v3292_v14 = vpop.f32.mrb[41].mxu1  ;;  %v3350_v15 = vpop.f32.mrb[45].mxu0 }
 0x14f   :  { %v3293_v19 = vadd.f32 %v3292_v14, %v3291_v12  ;;  %v3351_v9 = vadd.f32 %v3350_v15, %v3349_v13  ;;  %v3294_v23 = vpop.f32.mrb[42].mxu1  ;;  %v3352_v56 = vpop.f32.mrb[46].mxu0 }
 0x150   :  { %v3295_v24 = vpop.f32.mrb[43].mxu1  ;;  %v3353_v26 = vpop.f32.mrb[47].mxu0 }
 0x151   :  { %v2193_v43 = vadd.f32 %v3293_v19, %v4801_v20  ;;  %v3296_v62 = vadd.f32 %v3295_v24, %v3294_v23  ;;  %v3354_v28 = vadd.f32 %v3353_v26, %v3352_v56 }
 0x153   :  { %v4850_v29 = vadd.f32 %v3351_v9, %v2193_v43  ;;  %v2196_v30 = vadd.f32 %v3296_v62, %v4803_v22 }
 0x155   :  { %v4853_v17 = vadd.f32 %v3354_v28, %v2196_v30  ;;  %v3297_v61 = vpop.f32.mrb[44].mxu1  ;;  %v3355_v31 = vpop.f32.mrb[48].mxu0 }
 0x156   :  { %v3298_v32 = vpop.f32.mrb[45].mxu1  ;;  %v3356_v35 = vpop.f32.mrb[49].mxu0 }
 0x157   :  { %v3299_v36 = vadd.f32 %v3298_v32, %v3297_v61  ;;  %v3357_v37 = vadd.f32 %v3356_v35, %v3355_v31  ;;  %v3300_v39 = vpop.f32.mrb[46].mxu1  ;;  %v3358_v45 = vpop.f32.mrb[50].mxu0 }
 0x158   :  { %v3301_v46 = vpop.f32.mrb[47].mxu1  ;;  %v3359_v10 = vpop.f32.mrb[51].mxu0 }
 0x159   :  { %v2201_v20 = vadd.f32 %v3299_v36, %v4809_v40  ;;  %v3302_v25 = vadd.f32 %v3301_v46, %v3300_v39  ;;  %v3360_v47 = vadd.f32 %v3359_v10, %v3358_v45 }
 0x15b   :  { %v4856_v48 = vadd.f32 %v3357_v37, %v2201_v20  ;;  %v2204_v22 = vadd.f32 %v3302_v25, %v4811_v44 }
 0x15d   :  { %v4859_v50 = vadd.f32 %v3360_v47, %v2204_v22  ;;  %v3303_v51 = vpop.f32.mrb[48].mxu1  ;;  %v3361_v52 = vpop.f32.mrb[52].mxu0 }
 0x15e   :  { %v3304_v18 = vpop.f32.mrb[49].mxu1  ;;  %v3362_v53 = vpop.f32.mrb[53].mxu0 }
 0x15f   :  { %v3305_v33 = vadd.f32 %v3304_v18, %v3303_v51  ;;  %v3363_v54 = vadd.f32 %v3362_v53, %v3361_v52  ;;  %v3306_v55 = vpop.f32.mrb[50].mxu1  ;;  %v3364_v57 = vpop.f32.mrb[54].mxu0 }
 0x160   :  { %v3307_v59 = vpop.f32.mrb[51].mxu1  ;;  %v3365_v1 = vpop.f32.mrb[55].mxu0 }
 0x161   :  { %v2209_v40 = vadd.f32 %v3305_v33, %v4817_v60  ;;  %v3308_v2 = vadd.f32 %v3307_v59, %v3306_v55  ;;  %v3366_v27 = vadd.f32 %v3365_v1, %v3364_v57 }
 0x163   :  { %v4862_v41 = vadd.f32 %v3363_v54, %v2209_v40  ;;  %v2212_v44 = vadd.f32 %v3308_v2, %v4819_v0 }
 0x165   :  { %v4865_v3 = vadd.f32 %v3366_v27, %v2212_v44  ;;  %v3309_v4 = vpop.f32.mrb[52].mxu1  ;;  %v3367_v5 = vpop.f32.mrb[56].mxu0 }
 0x166   :  { %v3310_v6 = vpop.f32.mrb[53].mxu1  ;;  %v3368_v7 = vpop.f32.mrb[57].mxu0 }
 0x167   :  { %v3311_v34 = vadd.f32 %v3310_v6, %v3309_v4  ;;  %v3369_v8 = vadd.f32 %v3368_v7, %v3367_v5  ;;  %v3312_v49 = vpop.f32.mrb[54].mxu1  ;;  %v3370_v12 = vpop.f32.mrb[58].mxu0 }
 0x168   :  { %v3313_v13 = vpop.f32.mrb[55].mxu1  ;;  %v3371_v14 = vpop.f32.mrb[59].mxu0 }
 0x169   :  { %v2217_v60 = vadd.f32 %v3311_v34, %v4825_v16  ;;  %v3314_v15 = vadd.f32 %v3313_v13, %v3312_v49  ;;  %v3372_v19 = vadd.f32 %v3371_v14, %v3370_v12 }
 0x16b   :  { %v4868_v9 = vadd.f32 %v3369_v8, %v2217_v60  ;;  %v2220_v0 = vadd.f32 %v3314_v15, %v4827_v21 }
 0x16d   :  { %v4871_v23 = vadd.f32 %v3372_v19, %v2220_v0  ;;  %v3315_v56 = vpop.f32.mrb[56].mxu1  ;;  %v3373_v24 = vpop.f32.mrb[60].mxu0 }
 0x16e   :  { %v3316_v26 = vpop.f32.mrb[57].mxu1  ;;  %v3374_v43 = vpop.f32.mrb[61].mxu0 }
 0x16f   :  { %v3317_v62 = vadd.f32 %v3316_v26, %v3315_v56  ;;  %v3375_v28 = vadd.f32 %v3374_v43, %v3373_v24  ;;  %v3318_v30 = vpop.f32.mrb[58].mxu1  ;;  %v3376_v61 = vpop.f32.mrb[62].mxu0 }
 0x170   :  { %v3319_v31 = vpop.f32.mrb[59].mxu1  ;;  %v3377_v32 = vpop.f32.mrb[63].mxu0 }
 0x171   :  { %v2225_v16 = vadd.f32 %v3317_v62, %v4833_v38  ;;  %v3320_v35 = vadd.f32 %v3319_v31, %v3318_v30  ;;  %v3378_v36 = vadd.f32 %v3377_v32, %v3376_v61 }
 0x173   :  { %v4874_v37 = vadd.f32 %v3375_v28, %v2225_v16  ;;  %v2228_v21 = vadd.f32 %v3320_v35, %v4835_v42 }
 0x175   :  { %v4877_v39 = vadd.f32 %v3378_v36, %v2228_v21  ;;  %v3321_v45 = vpop.f32.mrb[60].mxu1  ;;  %v3379_v46 = vpop.f32.mrb[64].mxu0 }
 0x176   :  { %v3322_v10 = vpop.f32.mrb[61].mxu1  ;;  %v3380_v20 = vpop.f32.mrb[65].mxu0 }
 0x177   :  { %v3323_v25 = vadd.f32 %v3322_v10, %v3321_v45  ;;  %v3381_v47 = vadd.f32 %v3380_v20, %v3379_v46  ;;  %v3324_v22 = vpop.f32.mrb[62].mxu1  ;;  %v3382_v51 = vpop.f32.mrb[66].mxu0 }
 0x178   :  { %v3325_v52 = vpop.f32.mrb[63].mxu1  ;;  %v3383_v18 = vpop.f32.mrb[67].mxu0 }
 0x179   :  { %v2233_v38 = vadd.f32 %v3323_v25, %v4841_v58  ;;  %v3326_v53 = vadd.f32 %v3325_v52, %v3324_v22  ;;  %v3384_v33 = vadd.f32 %v3383_v18, %v3382_v51 }
 0x17b   :  { %v4880_v54 = vadd.f32 %v3381_v47, %v2233_v38  ;;  %v2236_v42 = vadd.f32 %v3326_v53, %v4843_v63 }
 0x17d   :  { %v4883_v55 = vadd.f32 %v3384_v33, %v2236_v42  ;;  %v3327_v57 = vpop.f32.mrb[64].mxu1  ;;  %v3385_v59 = vpop.f32.mrb[68].mxu0 }
 0x17e   :  { %v3328_v1 = vpop.f32.mrb[65].mxu1  ;;  %v3386_v40 = vpop.f32.mrb[69].mxu0 }
 0x17f   :  { %v3329_v2 = vadd.f32 %v3328_v1, %v3327_v57  ;;  %v3387_v27 = vadd.f32 %v3386_v40, %v3385_v59  ;;  %v3330_v44 = vpop.f32.mrb[66].mxu1  ;;  %v3388_v4 = vpop.f32.mrb[70].mxu0 }
 0x180   :  { %v3331_v5 = vpop.f32.mrb[67].mxu1  ;;  %v3389_v6 = vpop.f32.mrb[71].mxu0 }
 0x181   :  { %v2241_v58 = vadd.f32 %v3329_v2, %v4847_v11 }
 0x183   :  { %v4886_v7 = vadd.f32 %v3387_v27, %v2241_v58 }
 0x185   :  { %v3407_v34 = vpop.f32.mrb[68].mxu1  ;;  %v3465_v8 = vpop.f32.mrb[72].mxu0 }
 0x186   :  { %v3408_v49 = vpop.f32.mrb[69].mxu1  ;;  %v3466_v63 = vpop.f32.mrb[73].mxu0 }
 0x187   :  { %v3409_v12 = vadd.f32 %v3408_v49, %v3407_v34  ;;  %v3467_v13 = vadd.f32 %v3466_v63, %v3465_v8  ;;  %v3410_v14 = vpop.f32.mrb[70].mxu1  ;;  %v3468_v60 = vpop.f32.mrb[74].mxu0 }
 0x188   :  { %v3411_v15 = vpop.f32.mrb[71].mxu1  ;;  %v3469_v19 = vpop.f32.mrb[75].mxu0 }
 0x189   :  { %v2369_v0 = vadd.f32 %v3409_v12, %v4850_v29  ;;  %v3412_v56 = vadd.f32 %v3411_v15, %v3410_v14  ;;  %v3470_v24 = vadd.f32 %v3469_v19, %v3468_v60 }
 0x18b   :  { %v4889_v26 = vadd.f32 %v3467_v13, %v2369_v0  ;;  %v2372_v11 = vadd.f32 %v3412_v56, %v4853_v17 }
 0x18d   :  { %v4892_v43 = vadd.f32 %v3470_v24, %v2372_v11  ;;  %v3413_v62 = vpop.f32.mrb[72].mxu1  ;;  %v3471_v28 = vpop.f32.mrb[76].mxu0 }
 0x18e   :  { %v3414_v30 = vpop.f32.mrb[73].mxu1  ;;  %v3472_v61 = vpop.f32.mrb[77].mxu0 }
 0x18f   :  { %v3415_v31 = vadd.f32 %v3414_v30, %v3413_v62  ;;  %v3473_v32 = vadd.f32 %v3472_v61, %v3471_v28  ;;  %v3416_v16 = vpop.f32.mrb[74].mxu1  ;;  %v3474_v35 = vpop.f32.mrb[78].mxu0 }
 0x190   :  { %v3417_v36 = vpop.f32.mrb[75].mxu1  ;;  %v3475_v21 = vpop.f32.mrb[79].mxu0 }
 0x191   :  { %v2377_v29 = vadd.f32 %v3415_v31, %v4856_v48  ;;  %v3418_v45 = vadd.f32 %v3417_v36, %v3416_v16  ;;  %v3476_v46 = vadd.f32 %v3475_v21, %v3474_v35 }
 0x193   :  { %v4895_v10 = vadd.f32 %v3473_v32, %v2377_v29  ;;  %v2380_v17 = vadd.f32 %v3418_v45, %v4859_v50 }
 0x195   :  { %v4898_v20 = vadd.f32 %v3476_v46, %v2380_v17  ;;  %v3419_v25 = vpop.f32.mrb[76].mxu1  ;;  %v3477_v47 = vpop.f32.mrb[80].mxu0 }
 0x196   :  { %v3420_v22 = vpop.f32.mrb[77].mxu1  ;;  %v3478_v51 = vpop.f32.mrb[81].mxu0 }
 0x197   :  { %v3421_v52 = vadd.f32 %v3420_v22, %v3419_v25  ;;  %v3479_v18 = vadd.f32 %v3478_v51, %v3477_v47  ;;  %v3422_v38 = vpop.f32.mrb[78].mxu1  ;;  %v3480_v53 = vpop.f32.mrb[82].mxu0 }
 0x198   :  { %v3423_v33 = vpop.f32.mrb[79].mxu1  ;;  %v3481_v42 = vpop.f32.mrb[83].mxu0 }
 0x199   :  { %v2385_v48 = vadd.f32 %v3421_v52, %v4862_v41  ;;  %v3424_v57 = vadd.f32 %v3423_v33, %v3422_v38  ;;  %v3482_v59 = vadd.f32 %v3481_v42, %v3480_v53 }
 0x19b   :  { %v4901_v1 = vadd.f32 %v3479_v18, %v2385_v48  ;;  %v2388_v50 = vadd.f32 %v3424_v57, %v4865_v3 }
 0x19d   :  { %v4904_v40 = vadd.f32 %v3482_v59, %v2388_v50  ;;  %v3425_v2 = vpop.f32.mrb[80].mxu1  ;;  %v3483_v27 = vpop.f32.mrb[84].mxu0 }
 0x19e   :  { %v3426_v44 = vpop.f32.mrb[81].mxu1  ;;  %v3484_v4 = vpop.f32.mrb[85].mxu0 }
 0x19f   :  { %v3427_v5 = vadd.f32 %v3426_v44, %v3425_v2  ;;  %v3485_v6 = vadd.f32 %v3484_v4, %v3483_v27  ;;  %v3428_v58 = vpop.f32.mrb[82].mxu1  ;;  %v3486_v34 = vpop.f32.mrb[86].mxu0 }
 0x1a0   :  { %v3429_v8 = vpop.f32.mrb[83].mxu1  ;;  %v3487_v49 = vpop.f32.mrb[87].mxu0 }
 0x1a1   :  { %v2393_v41 = vadd.f32 %v3427_v5, %v4868_v9  ;;  %v3430_v63 = vadd.f32 %v3429_v8, %v3428_v58  ;;  %v3488_v12 = vadd.f32 %v3487_v49, %v3486_v34 }
 0x1a3   :  { %v4907_v13 = vadd.f32 %v3485_v6, %v2393_v41  ;;  %v2396_v3 = vadd.f32 %v3430_v63, %v4871_v23 }
 0x1a5   :  { %v4910_v14 = vadd.f32 %v3488_v12, %v2396_v3  ;;  %v3431_v60 = vpop.f32.mrb[84].mxu1  ;;  %v3489_v15 = vpop.f32.mrb[88].mxu0 }
 0x1a6   :  { %v3432_v19 = vpop.f32.mrb[85].mxu1  ;;  %v3490_v0 = vpop.f32.mrb[89].mxu0 }
 0x1a7   :  { %v3433_v56 = vadd.f32 %v3432_v19, %v3431_v60  ;;  %v3491_v24 = vadd.f32 %v3490_v0, %v3489_v15  ;;  %v3434_v11 = vpop.f32.mrb[86].mxu1  ;;  %v3492_v62 = vpop.f32.mrb[90].mxu0 }
 0x1a8   :  { %v3435_v28 = vpop.f32.mrb[87].mxu1  ;;  %v3493_v30 = vpop.f32.mrb[91].mxu0 }
 0x1a9   :  { %v2401_v9 = vadd.f32 %v3433_v56, %v4874_v37  ;;  %v3436_v61 = vadd.f32 %v3435_v28, %v3434_v11  ;;  %v3494_v31 = vadd.f32 %v3493_v30, %v3492_v62 }
 0x1ab   :  { %v4913_v32 = vadd.f32 %v3491_v24, %v2401_v9  ;;  %v2404_v23 = vadd.f32 %v3436_v61, %v4877_v39 }
 0x1ad   :  { %v4916_v16 = vadd.f32 %v3494_v31, %v2404_v23  ;;  %v3437_v35 = vpop.f32.mrb[88].mxu1  ;;  %v3495_v36 = vpop.f32.mrb[92].mxu0 }
 0x1ae   :  { %v3438_v21 = vpop.f32.mrb[89].mxu1  ;;  %v3496_v29 = vpop.f32.mrb[93].mxu0 }
 0x1af   :  { %v3439_v45 = vadd.f32 %v3438_v21, %v3437_v35  ;;  %v3497_v46 = vadd.f32 %v3496_v29, %v3495_v36  ;;  %v3440_v17 = vpop.f32.mrb[90].mxu1  ;;  %v3498_v25 = vpop.f32.mrb[94].mxu0 }
 0x1b0   :  { %v3441_v47 = vpop.f32.mrb[91].mxu1  ;;  %v3499_v22 = vpop.f32.mrb[95].mxu0 }
 0x1b1   :  { %v2409_v37 = vadd.f32 %v3439_v45, %v4880_v54  ;;  %v3442_v51 = vadd.f32 %v3441_v47, %v3440_v17  ;;  %v3500_v52 = vadd.f32 %v3499_v22, %v3498_v25 }
 0x1b3   :  { %v4919_v18 = vadd.f32 %v3497_v46, %v2409_v37  ;;  %v2412_v39 = vadd.f32 %v3442_v51, %v4883_v55 }
 0x1b5   :  { %v4922_v38 = vadd.f32 %v3500_v52, %v2412_v39  ;;  %v3443_v53 = vpop.f32.mrb[92].mxu1  ;;  %v3501_v33 = vpop.f32.mrb[96].mxu0 }
 0x1b6   :  { %v3444_v42 = vpop.f32.mrb[93].mxu1  ;;  %v3502_v48 = vpop.f32.mrb[97].mxu0 }
 0x1b7   :  { %v3445_v57 = vadd.f32 %v3444_v42, %v3443_v53  ;;  %v3503_v59 = vadd.f32 %v3502_v48, %v3501_v33  ;;  %v3446_v50 = vpop.f32.mrb[94].mxu1  ;;  %v3504_v2 = vpop.f32.mrb[98].mxu0 }
 0x1b8   :  { %v3447_v27 = vpop.f32.mrb[95].mxu1  ;;  %v3505_v44 = vpop.f32.mrb[99].mxu0 }
 0x1b9   :  { %v2417_v54 = vadd.f32 %v3445_v57, %v4886_v7 }
 0x1bb   :  { %v4925_v4 = vadd.f32 %v3503_v59, %v2417_v54 }
 0x1bd   :  { %v3523_v5 = vpop.f32.mrb[96].mxu1  ;;  %v3581_v6 = vpop.f32.mrb[100].mxu0 }
 0x1be   :  { %v3524_v58 = vpop.f32.mrb[97].mxu1  ;;  %v3582_v55 = vpop.f32.mrb[101].mxu0 }
 0x1bf   :  { %v3525_v34 = vadd.f32 %v3524_v58, %v3523_v5  ;;  %v3583_v8 = vadd.f32 %v3582_v55, %v3581_v6  ;;  %v3526_v49 = vpop.f32.mrb[98].mxu1  ;;  %v3584_v41 = vpop.f32.mrb[102].mxu0 }
 0x1c0   :  { %v3527_v63 = vpop.f32.mrb[99].mxu1  ;;  %v3585_v12 = vpop.f32.mrb[103].mxu0 }
 0x1c1   :  { %v2545_v3 = vadd.f32 %v3525_v34, %v4889_v26  ;;  %v3528_v60 = vadd.f32 %v3527_v63, %v3526_v49  ;;  %v3586_v15 = vadd.f32 %v3585_v12, %v3584_v41 }
 0x1c3   :  { %v2633_v19 = vadd.f32 %v3583_v8, %v2545_v3  ;;  %v2548_v0 = vadd.f32 %v3528_v60, %v4892_v43 }
 0x1c5   :  { %v2636_v7 = vadd.f32 %v3586_v15, %v2548_v0  ;;  %v3529_v56 = vpop.f32.mrb[100].mxu1  ;;  %v3587_v24 = vpop.f32.mrb[104].mxu0  ;;  %v2686_v28 = vmax.f32 %v2633_v19, 0.0 }
 0x1c6   :  { %v3530_v11 = vpop.f32.mrb[101].mxu1  ;;  %v3588_v62 = vpop.f32.mrb[105].mxu0 }
 0x1c7   :  { %v2687_v30 = vmax.f32 %v2636_v7, 0.0  ;;  %v3531_v9 = vadd.f32 %v3530_v11, %v3529_v56  ;;  %v3589_v61 = vadd.f32 %v3588_v62, %v3587_v24  ;;  %v3532_v31 = vpop.f32.mrb[102].mxu1  ;;  %v3590_v23 = vpop.f32.mrb[106].mxu0 }
 0x1c8   :  { %v3533_v35 = vpop.f32.mrb[103].mxu1  ;;  %v3591_v36 = vpop.f32.mrb[107].mxu0 }
 0x1c9   :  { %v3069_v21 = vpack.c.bf16 %v2687_v30, %v2686_v28  ;;  %v2553_v26 = vadd.f32 %v3531_v9, %v4895_v10  ;;  %v3534_v29 = vadd.f32 %v3533_v35, %v3532_v31  ;;  %v3592_v45 = vadd.f32 %v3591_v36, %v3590_v23 }
 0x1cb   :  { %3070 = vst [vmem:[%s4964_s3] sm:$0xff] %v3069_v21   ;;  %v2641_v43 = vadd.f32 %v3589_v61, %v2553_v26  ;;  %v2556_v46 = vadd.f32 %v3534_v29, %v4898_v20 }
 0x1cd   :  { %v2644_v17 = vadd.f32 %v3592_v45, %v2556_v46  ;;  %v3535_v25 = vpop.f32.mrb[104].mxu1  ;;  %v3593_v47 = vpop.f32.mrb[108].mxu0  ;;  %v2688_v51 = vmax.f32 %v2641_v43, 0.0 }
 0x1ce   :  { %v3536_v22 = vpop.f32.mrb[105].mxu1  ;;  %v3594_v37 = vpop.f32.mrb[109].mxu0 }
 0x1cf   :  { %v2689_v52 = vmax.f32 %v2644_v17, 0.0  ;;  %v3537_v39 = vadd.f32 %v3536_v22, %v3535_v25  ;;  %v3595_v53 = vadd.f32 %v3594_v37, %v3593_v47  ;;  %v3538_v33 = vpop.f32.mrb[106].mxu1  ;;  %v3596_v10 = vpop.f32.mrb[110].mxu0 }
 0x1d0   :  { %v3539_v42 = vpop.f32.mrb[107].mxu1  ;;  %v3597_v48 = vpop.f32.mrb[111].mxu0 }
 0x1d1   :  { %v3074_v57 = vpack.c.bf16 %v2689_v52, %v2688_v51  ;;  %v2561_v59 = vadd.f32 %v3537_v39, %v4901_v1  ;;  %v3540_v50 = vadd.f32 %v3539_v42, %v3538_v33  ;;  %v3598_v2 = vadd.f32 %v3597_v48, %v3596_v10 }
 0x1d3   :  { %3096 = vst [vmem:[%s4964_s3 + $0x8] sm:$0xff] %v3074_v57   ;;  %v2649_v20 = vadd.f32 %v3595_v53, %v2561_v59  ;;  %v2564_v27 = vadd.f32 %v3540_v50, %v4904_v40 }
 0x1d5   :  { %v2652_v44 = vadd.f32 %v3598_v2, %v2564_v27  ;;  %v3541_v54 = vpop.f32.mrb[108].mxu1  ;;  %v3599_v5 = vpop.f32.mrb[112].mxu0  ;;  %v2690_v55 = vmax.f32 %v2649_v20, 0.0 }
 0x1d6   :  { %v3542_v6 = vpop.f32.mrb[109].mxu1  ;;  %v3600_v58 = vpop.f32.mrb[113].mxu0 }
 0x1d7   :  { %v2691_v34 = vmax.f32 %v2652_v44, 0.0  ;;  %v3543_v8 = vadd.f32 %v3542_v6, %v3541_v54  ;;  %v3601_v49 = vadd.f32 %v3600_v58, %v3599_v5  ;;  %v3544_v41 = vpop.f32.mrb[110].mxu1  ;;  %v3602_v1 = vpop.f32.mrb[114].mxu0 }
 0x1d8   :  { %v3545_v63 = vpop.f32.mrb[111].mxu1  ;;  %v3603_v12 = vpop.f32.mrb[115].mxu0 }
 0x1d9   :  { %v3079_v3 = vpack.c.bf16 %v2691_v34, %v2690_v55  ;;  %v2569_v60 = vadd.f32 %v3543_v8, %v4907_v13  ;;  %v3546_v15 = vadd.f32 %v3545_v63, %v3544_v41  ;;  %v3604_v19 = vadd.f32 %v3603_v12, %v3602_v1 }
 0x1db   :  { %3097 = vst [vmem:[%s4964_s3 + $0x10] sm:$0xff] %v3079_v3   ;;  %v2657_v40 = vadd.f32 %v3601_v49, %v2569_v60  ;;  %v2572_v0 = vadd.f32 %v3546_v15, %v4910_v14 }
 0x1dd   :  { %v2660_v7 = vadd.f32 %v3604_v19, %v2572_v0  ;;  %v3547_v56 = vpop.f32.mrb[112].mxu1  ;;  %v3605_v24 = vpop.f32.mrb[116].mxu0  ;;  %v2692_v28 = vmax.f32 %v2657_v40, 0.0 }
 0x1de   :  { %v3548_v11 = vpop.f32.mrb[113].mxu1  ;;  %v3606_v62 = vpop.f32.mrb[117].mxu0 }
 0x1df   :  { %v2693_v30 = vmax.f32 %v2660_v7, 0.0  ;;  %v3549_v9 = vadd.f32 %v3548_v11, %v3547_v56  ;;  %v3607_v61 = vadd.f32 %v3606_v62, %v3605_v24  ;;  %v3550_v31 = vpop.f32.mrb[114].mxu1  ;;  %v3608_v13 = vpop.f32.mrb[118].mxu0 }
 0x1e0   :  { %v3551_v23 = vpop.f32.mrb[115].mxu1  ;;  %v3609_v35 = vpop.f32.mrb[119].mxu0 }
 0x1e1   :  { %v3084_v36 = vpack.c.bf16 %v2693_v30, %v2692_v28  ;;  %v2577_v21 = vadd.f32 %v3549_v9, %v4913_v32  ;;  %v3552_v26 = vadd.f32 %v3551_v23, %v3550_v31  ;;  %v3610_v29 = vadd.f32 %v3609_v35, %v3608_v13 }
 0x1e3   :  { %3098 = vst [vmem:[%s4964_s3 + $0x18] sm:$0xff] %v3084_v36   ;;  %v2665_v14 = vadd.f32 %v3607_v61, %v2577_v21  ;;  %v2580_v45 = vadd.f32 %v3552_v26, %v4916_v16 }
 0x1e5   :  { %v2668_v43 = vadd.f32 %v3610_v29, %v2580_v45  ;;  %v3553_v46 = vpop.f32.mrb[116].mxu1  ;;  %v3611_v17 = vpop.f32.mrb[120].mxu0  ;;  %v2694_v22 = vmax.f32 %v2665_v14, 0.0 }
 0x1e6   :  { %v3554_v25 = vpop.f32.mrb[117].mxu1  ;;  %v3612_v47 = vpop.f32.mrb[121].mxu0 }
 0x1e7   :  { %v2695_v37 = vmax.f32 %v2668_v43, 0.0  ;;  %v3555_v51 = vadd.f32 %v3554_v25, %v3553_v46  ;;  %v3613_v52 = vadd.f32 %v3612_v47, %v3611_v17  ;;  %v3556_v39 = vpop.f32.mrb[118].mxu1  ;;  %v3614_v32 = vpop.f32.mrb[122].mxu0 }
 0x1e8   :  { %v3557_v53 = vpop.f32.mrb[119].mxu1  ;;  %v3615_v33 = vpop.f32.mrb[123].mxu0 }
 0x1e9   :  { %v3089_v10 = vpack.c.bf16 %v2695_v37, %v2694_v22  ;;  %v2585_v42 = vadd.f32 %v3555_v51, %v4919_v18  ;;  %v3558_v48 = vadd.f32 %v3557_v53, %v3556_v39  ;;  %v3616_v57 = vadd.f32 %v3615_v33, %v3614_v32 }
 0x1eb   :  { %3099 = vst [vmem:[%s4964_s3 + $0x20] sm:$0xff] %v3089_v10   ;;  %v2673_v16 = vadd.f32 %v3613_v52, %v2585_v42  ;;  %v2588_v59 = vadd.f32 %v3558_v48, %v4922_v38 }
 0x1ed   :  { %v2676_v50 = vadd.f32 %v3616_v57, %v2588_v59  ;;  %v3559_v2 = vpop.f32.mrb[120].mxu1  ;;  %v3617_v20 = vpop.f32.mrb[124].mxu0  ;;  %v2696_v54 = vmax.f32 %v2673_v16, 0.0 }
 0x1ee   :  { %v3560_v27 = vpop.f32.mrb[121].mxu1  ;;  %v3618_v44 = vpop.f32.mrb[125].mxu0 }
 0x1ef   :  { %v2697_v5 = vmax.f32 %v2676_v50, 0.0  ;;  %v3561_v6 = vadd.f32 %v3560_v27, %v3559_v2  ;;  %v3619_v58 = vadd.f32 %v3618_v44, %v3617_v20  ;;  %v3562_v55 = vpop.f32.mrb[122].mxu1  ;;  %v3620_v18 = vpop.f32.mrb[126].mxu0 }
 0x1f0   :  { %v3563_v34 = vpop.f32.mrb[123].mxu1  ;;  %v3621_v8 = vpop.f32.mrb[127].mxu0 }
 0x1f1   :  { %v3094_v49 = vpack.c.bf16 %v2697_v5, %v2696_v54  ;;  %v2593_v41 = vadd.f32 %v3561_v6, %v4925_v4 }
 0x1f3   :  { %3100 = vst [vmem:[%s4964_s3 + $0x28] sm:$0xff] %v3094_v49   ;;  %v2681_v38 = vadd.f32 %v3619_v58, %v2593_v41 }
 0x1f5   :  { %v2698_v1 = vmax.f32 %v2681_v38, 0.0 }
 0x1f7   :  { %v3065_v63 = vpack.c.bf16 %v2698_v1, %v2698_v1 }
 0x1f9   :  { %2764 = vst [vmem:[%s4964_s3 + $0x30] sm:$0x1] %v3065_v63 }

// kernel: vae_forward.12
= control target key start
LH: loop header
LB: loop body
LE: loop exit
PB: predicated region body
PF: predicated region fallthrough
CT: control target
= control target key end

     0   :  { %v4826_v0 = vmov 0   ;;  %vm4828_vm0 = vmmov 0   ;;  %vm3385_vm1 = vcmask 519168   ;;  %s6242_s1 = inlined_call_operand.vmem [shape: bf16[1152,64], index: 1, kind: input, shape index: {}]   ;;  %s6243_s0 = inlined_call_operand.vmem [shape: bf16[392,1152], index: 0, kind: input, shape index: {}]   ;;  %s6244_s2 = inlined_call_operand.vmem [shape: f32[1,64], index: 2, kind: input, shape index: {}]   ;;  %s6245_s3 = inlined_call_operand.vmem [shape: bf16[392,64], index: 3, kind: output, shape index: {}]  }
   0x1   :  { %1979 = vmatprep.subr.bf16.mxu1 %v4826_v0  ;;  %2443 = vmatprep.subr.bf16.mxu0 %v4826_v0  ;;  %v4417_v1 = vld [vmem:[%s6242_s1] sm:$0xff]   ;;  %v4419_v3 = vld [vmem:[%s6242_s1 + $0x8] sm:$0xff]   ;;  %v4421_v5 = vld [vmem:[%s6242_s1 + $0x10] sm:$0xff]  }
   0x2   :  { %v4418_v2 = vld [vmem:[%s6242_s1 + $0x100] sm:$0xff]   ;;  %1980 = vmatpush1.bf16.msra.mxu1 %v4417_v1  ;;  %v4420_v4 = vld [vmem:[%s6242_s1 + $0x108] sm:$0xff]   ;;  %v4422_v6 = vld [vmem:[%s6242_s1 + $0x110] sm:$0xff]  }
   0x3   :  { %2444 = vmatpush1.bf16.msra.mxu0 %v4418_v2  ;;  %1981 = vmatprep.subr.bf16.mxu1 %v4826_v0  ;;  %v4423_v7 = vld [vmem:[%s6242_s1 + $0x18] sm:$0xff]   ;;  %v4425_v9 = vld [vmem:[%s6242_s1 + $0x20] sm:$0xff]   ;;  %v4427_v11 = vld [vmem:[%s6242_s1 + $0x28] sm:$0xff]  }
   0x4   :  { %2445 = vmatprep.subr.bf16.mxu0 %v4826_v0  ;;  %v4424_v8 = vld [vmem:[%s6242_s1 + $0x118] sm:$0xff]   ;;  %v4426_v10 = vld [vmem:[%s6242_s1 + $0x120] sm:$0xff]   ;;  %v4428_v12 = vld [vmem:[%s6242_s1 + $0x128] sm:$0xff]  }
   0x5   :  { %v4429_v13 = vld [vmem:[%s6242_s1 + $0x30] sm:$0xff]   ;;  %v4431_v15 = vld [vmem:[%s6242_s1 + $0x38] sm:$0xff]   ;;  %v4433_v17 = vld [vmem:[%s6242_s1 + $0x40] sm:$0xff]  }
   0x6   :  { %1982 = vmatpush1.bf16.msra.mxu1 %v4419_v3  ;;  %v4430_v14 = vld [vmem:[%s6242_s1 + $0x130] sm:$0xff]   ;;  %v4432_v16 = vld [vmem:[%s6242_s1 + $0x138] sm:$0xff]   ;;  %v4434_v18 = vld [vmem:[%s6242_s1 + $0x140] sm:$0xff]  }
   0x7   :  { %2446 = vmatpush1.bf16.msra.mxu0 %v4420_v4  ;;  %1983 = vmatprep.subr.bf16.mxu1 %v4826_v0  ;;  %v4451_v19 = vld [vmem:[%s6243_s0 + $0x4] ss:$36 sps:$4 sm:$0xff]   ;;  %v4454_v21 = vld [vmem:[%s6243_s0 + $0x14] ss:$36 sps:$4 sm:$0xff]   ;;  %v4456_v38 = vld [vmem:[%s6243_s0 + $0x4c] ss:$36 sps:$4 sm:$0xff]  }
   0x8   :  { %2447 = vmatprep.subr.bf16.mxu0 %v4826_v0  ;;  %v4435_v20 = vld [vmem:[%s6242_s1 + $0x48] sm:$0xff]   ;;  %2011 = vmatprep.mubr.bf16.mxu1 %v4451_v19  ;;  %v4437_v23 = vld [vmem:[%s6242_s1 + $0x50] sm:$0xff]   ;;  %v4439_v25 = vld [vmem:[%s6242_s1 + $0x58] sm:$0xff]  }
   0x9   :  { %v4436_v22 = vld [vmem:[%s6242_s1 + $0x148] sm:$0xff]   ;;  %2475 = vmatprep.mubr.bf16.mxu0 %v4454_v21  ;;  %v4438_v24 = vld [vmem:[%s6242_s1 + $0x150] sm:$0xff]   ;;  %v4440_v26 = vld [vmem:[%s6242_s1 + $0x158] sm:$0xff]  }
   0xa   :  { %1984 = vmatpush1.bf16.msra.mxu1 %v4421_v5  ;;  %v4441_v27 = vld [vmem:[%s6242_s1 + $0x60] sm:$0xff]   ;;  %v4443_v29 = vld [vmem:[%s6242_s1 + $0x68] sm:$0xff]   ;;  %v4445_v31 = vld [vmem:[%s6242_s1 + $0x70] sm:$0xff]  }
   0xb   :  { %2448 = vmatpush1.bf16.msra.mxu0 %v4422_v6  ;;  %1985 = vmatprep.subr.bf16.mxu1 %v4826_v0  ;;  %v4442_v28 = vld [vmem:[%s6242_s1 + $0x160] sm:$0xff]   ;;  %v4444_v30 = vld [vmem:[%s6242_s1 + $0x168] sm:$0xff]   ;;  %v4446_v32 = vld [vmem:[%s6242_s1 + $0x170] sm:$0xff]  }
   0xc   :  { %2449 = vmatprep.subr.bf16.mxu0 %v4826_v0  ;;  %v4447_v33 = vld [vmem:[%s6242_s1 + $0x78] sm:$0xff]   ;;  %v4449_v35 = vld [vmem:[%s6243_s0] ss:$36 sps:$4 sm:$0xff]   ;;  %v4452_v36 = vld [vmem:[%s6243_s0 + $0x10] ss:$36 sps:$4 sm:$0xff]  }
   0xd   :  { %v4448_v34 = vld [vmem:[%s6242_s1 + $0x178] sm:$0xff]   ;;  %v4455_v37 = vld [vmem:[%s6242_s1 + $0x180] sm:$0xff]   ;;  %v4463_v41 = vld [vmem:[%s6242_s1 + $0x188] sm:$0xff]  }
   0xe   :  { %1986 = vmatpush1.bf16.msra.mxu1 %v4423_v7  ;;  %v4458_v39 = vld [vmem:[%s6242_s1 + $0x80] sm:$0xff]   ;;  %v4471_v42 = vld [vmem:[%s6242_s1 + $0x88] sm:$0xff]   ;;  %v4462_v44 = vld [vmem:[%s6243_s0 + $0x58] ss:$36 sps:$4 sm:$0xff]  }
   0xf   :  { %2450 = vmatpush1.bf16.msra.mxu0 %v4424_v8  ;;  %1987 = vmatprep.subr.bf16.mxu1 %v4826_v0  ;;  %v4459_v40 = vld [vmem:[%s6243_s0 + $0x5c] ss:$36 sps:$4 sm:$0xff]   ;;  %v4461_v43 = vld [vmem:[%s6243_s0 + $0x48] ss:$36 sps:$4 sm:$0xff]   ;;  %v4464_v45 = vld [vmem:[%s6242_s1 + $0x190] sm:$0xff]  }
  0x10   :  { %2451 = vmatprep.subr.bf16.mxu0 %v4826_v0  ;;  %v4465_v46 = vld [vmem:[%s6243_s0 + $0x94] ss:$36 sps:$4 sm:$0xff]   ;;  %v4467_v47 = vld [vmem:[%s6243_s0 + $0xa4] ss:$36 sps:$4 sm:$0xff]   ;;  %v4473_v53 = vld [vmem:[%s6243_s0 + $0xdc] ss:$36 sps:$4 sm:$0xff]  }
  0x11   :  { %v4485_v48 = vld [vmem:[%s6242_s1 + $0x90] sm:$0xff]   ;;  %v4472_v50 = vld [vmem:[%s6242_s1 + $0x198] sm:$0xff]   ;;  %v4470_v52 = vld [vmem:[%s6243_s0 + $0xa0] ss:$36 sps:$4 sm:$0xff]  }
  0x12   :  { %1988 = vmatpush1.bf16.msra.mxu1 %v4425_v9  ;;  %v4469_v49 = vld [vmem:[%s6243_s0 + $0x90] ss:$36 sps:$4 sm:$0xff]   ;;  %v4495_v51 = vld [vmem:[%s6242_s1 + $0x98] sm:$0xff]   ;;  %v4479_v55 = vld [vmem:[%s6242_s1 + $0x1a0] sm:$0xff]  }
  0x13   :  { %2452 = vmatpush1.bf16.msra.mxu0 %v4426_v10  ;;  %1989 = vmatprep.subr.bf16.mxu1 %v4826_v0  ;;  %v4475_v54 = vld [vmem:[%s6243_s0 + $0xec] ss:$36 sps:$4 sm:$0xff]   ;;  %v4510_v56 = vld [vmem:[%s6242_s1 + $0xa0] sm:$0xff]   ;;  %v4477_v58 = vld [vmem:[%s6243_s0 + $0xd8] ss:$36 sps:$4 sm:$0xff]  }
  0x14   :  { %2453 = vmatprep.subr.bf16.mxu0 %v4826_v0  ;;  %v4487_v57 = vld [vmem:[%s6242_s1 + $0x1a8] sm:$0xff]   ;;  %v4482_v62 = vld [vmem:[%s6243_s0 + $0x134] ss:$36 sps:$4 sm:$0xff]   ;;  %v4484_v2 = vld [vmem:[%s6243_s0 + $0x120] ss:$36 sps:$4 sm:$0xff]  }
  0x15   :  { %v4478_v59 = vld [vmem:[%s6243_s0 + $0xe8] ss:$36 sps:$4 sm:$0xff]   ;;  %v4494_v63 = vld [vmem:[%s6242_s1 + $0x1b0] sm:$0xff]   ;;  %v4500_v3 = vld [vmem:[%s6242_s1 + $0x1b8] sm:$0xff]  }
  0x16   :  { %1990 = vmatpush1.bf16.msra.mxu1 %v4427_v11  ;;  %v4519_v60 = vld [vmem:[%s6242_s1 + $0xa8] sm:$0xff]   ;;  %v4534_v1 = vld [vmem:[%s6242_s1 + $0xb0] sm:$0xff]   ;;  %v4545_v5 = vld [vmem:[%s6242_s1 + $0xb8] sm:$0xff]  }
  0x17   :  { %2454 = vmatpush1.bf16.msra.mxu0 %v4428_v12  ;;  %1991 = vmatprep.subr.bf16.mxu1 %v4826_v0  ;;  %v4480_v61 = vld [vmem:[%s6243_s0 + $0x124] ss:$36 sps:$4 sm:$0xff]   ;;  %v4486_v4 = vld [vmem:[%s6243_s0 + $0x130] ss:$36 sps:$4 sm:$0xff]   ;;  %v4490_v7 = vld [vmem:[%s6243_s0 + $0x17c] ss:$36 sps:$4 sm:$0xff]  }
  0x18   :  { %2455 = vmatprep.subr.bf16.mxu0 %v4826_v0  ;;  %v4488_v6 = vld [vmem:[%s6243_s0 + $0x16c] ss:$36 sps:$4 sm:$0xff]   ;;  %v4503_v8 = vld [vmem:[%s6242_s1 + $0x1c0] sm:$0xff]   ;;  %v4493_v12 = vld [vmem:[%s6243_s0 + $0x178] ss:$36 sps:$4 sm:$0xff]  }
  0x19   :  { %v4558_v9 = vld [vmem:[%s6242_s1 + $0xc0] sm:$0xff]   ;;  %v4511_v10 = vld [vmem:[%s6242_s1 + $0x1c8] sm:$0xff]   ;;  %v4501_v19 = vld [vmem:[%s6243_s0 + $0x1b0] ss:$36 sps:$4 sm:$0xff]  }
  0x1a   :  { %1992 = vmatpush1.bf16.msra.mxu1 %v4429_v13  ;;  %v4492_v11 = vld [vmem:[%s6243_s0 + $0x168] ss:$36 sps:$4 sm:$0xff]   ;;  %v4504_v21 = vld [vmem:[%s6243_s0 + $0x1fc] ss:$36 sps:$4 sm:$0xff]  }
  0x1b   :  { %2456 = vmatpush1.bf16.msra.mxu0 %v4430_v14  ;;  %1993 = vmatprep.subr.bf16.mxu1 %v4826_v0  ;;  %v4570_v13 = vld [vmem:[%s6242_s1 + $0xc8] sm:$0xff]   ;;  %v4496_v14 = vld [vmem:[%s6243_s0 + $0x1b4] ss:$36 sps:$4 sm:$0xff]  }
  0x1c   :  { %2457 = vmatprep.subr.bf16.mxu0 %v4826_v0 }
  0x1e   :  { %1994 = vmatpush1.bf16.msra.mxu1 %v4431_v15  ;;  %v4498_v15 = vld [vmem:[%s6243_s0 + $0x1c4] ss:$36 sps:$4 sm:$0xff]  }
  0x1f   :  { %2458 = vmatpush1.bf16.msra.mxu0 %v4432_v16  ;;  %1995 = vmatprep.subr.bf16.mxu1 %v4826_v0  ;;  %v4518_v16 = vld [vmem:[%s6242_s1 + $0x1d0] sm:$0xff]  }
  0x20   :  { %2459 = vmatprep.subr.bf16.mxu0 %v4826_v0 }
  0x22   :  { %1996 = vmatpush1.bf16.msra.mxu1 %v4433_v17  ;;  %v4579_v17 = vld [vmem:[%s6242_s1 + $0xd0] sm:$0xff]  }
  0x23   :  { %2460 = vmatpush1.bf16.msra.mxu0 %v4434_v18  ;;  %1997 = vmatprep.subr.bf16.mxu1 %v4826_v0  ;;  %v4526_v18 = vld [vmem:[%s6242_s1 + $0x1d8] sm:$0xff]  }
  0x24   :  { %2461 = vmatprep.subr.bf16.mxu0 %v4826_v0 }
  0x26   :  { %1998 = vmatpush1.bf16.msra.mxu1 %v4435_v20  ;;  %v4502_v20 = vld [vmem:[%s6243_s0 + $0x1c0] ss:$36 sps:$4 sm:$0xff]  }
  0x27   :  { %2462 = vmatpush1.bf16.msra.mxu0 %v4436_v22  ;;  %1999 = vmatprep.subr.bf16.mxu1 %v4826_v0  ;;  %v4506_v22 = vld [vmem:[%s6243_s0 + $0x20c] ss:$36 sps:$4 sm:$0xff]  }
  0x28   :  { %2463 = vmatprep.subr.bf16.mxu0 %v4826_v0 }
  0x2a   :  { %2000 = vmatpush1.bf16.msra.mxu1 %v4437_v23  ;;  %v4531_v23 = vld [vmem:[%s6242_s1 + $0x1e0] sm:$0xff]  }
  0x2b   :  { %2464 = vmatpush1.bf16.msra.mxu0 %v4438_v24  ;;  %2001 = vmatprep.subr.bf16.mxu1 %v4826_v0  ;;  %v4592_v24 = vld [vmem:[%s6242_s1 + $0xd8] sm:$0xff]  }
  0x2c   :  { %2465 = vmatprep.subr.bf16.mxu0 %v4826_v0 }
  0x2e   :  { %2002 = vmatpush1.bf16.msra.mxu1 %v4439_v25  ;;  %v4508_v25 = vld [vmem:[%s6243_s0 + $0x1f8] ss:$36 sps:$4 sm:$0xff]  }
  0x2f   :  { %2466 = vmatpush1.bf16.msra.mxu0 %v4440_v26  ;;  %2003 = vmatprep.subr.bf16.mxu1 %v4826_v0  ;;  %v4535_v26 = vld [vmem:[%s6242_s1 + $0x1e8] sm:$0xff]  }
  0x30   :  { %2467 = vmatprep.subr.bf16.mxu0 %v4826_v0 }
  0x32   :  { %2004 = vmatpush1.bf16.msra.mxu1 %v4441_v27  ;;  %v4509_v27 = vld [vmem:[%s6243_s0 + $0x208] ss:$36 sps:$4 sm:$0xff]  }
  0x33   :  { %2468 = vmatpush1.bf16.msra.mxu0 %v4442_v28  ;;  %2005 = vmatprep.subr.bf16.mxu1 %v4826_v0  ;;  %v4600_v28 = vld [vmem:[%s6242_s1 + $0xe0] sm:$0xff]  }
  0x34   :  { %2469 = vmatprep.subr.bf16.mxu0 %v4826_v0 }
  0x36   :  { %2006 = vmatpush1.bf16.msra.mxu1 %v4443_v29  ;;  %v4512_v29 = vld [vmem:[%s6243_s0 + $0x244] ss:$36 sps:$4 sm:$0xff]  }
  0x37   :  { %2470 = vmatpush1.bf16.msra.mxu0 %v4444_v30  ;;  %2007 = vmatprep.subr.bf16.mxu1 %v4826_v0  ;;  %v4514_v30 = vld [vmem:[%s6243_s0 + $0x254] ss:$36 sps:$4 sm:$0xff]  }
  0x38   :  { %2471 = vmatprep.subr.bf16.mxu0 %v4826_v0 }
  0x3a   :  { %2008 = vmatpush1.bf16.msra.mxu1 %v4445_v31  ;;  %v4542_v31 = vld [vmem:[%s6242_s1 + $0x1f0] sm:$0xff]  }
  0x3b   :  { %2472 = vmatpush1.bf16.msra.mxu0 %v4446_v32  ;;  %2009 = vmatprep.subr.bf16.mxu1 %v4826_v0  ;;  %v4550_v32 = vld [vmem:[%s6242_s1 + $0x1f8] sm:$0xff]  }
  0x3c   :  { %2473 = vmatprep.subr.bf16.mxu0 %v4826_v0 }
  0x3e   :  { %2010 = vmatpush1.bf16.msra.mxu1 %v4447_v33  ;;  %v4613_v33 = vld [vmem:[%s6242_s1 + $0xe8] sm:$0xff]  }
  0x3f   :  { %2474 = vmatpush1.bf16.msra.mxu0 %v4448_v34  ;;  %2211 = vmatprep.subr.bf16.mxu1 %v4826_v0  ;;  %v4516_v34 = vld [vmem:[%s6243_s0 + $0x240] ss:$36 sps:$4 sm:$0xff]  }
  0x40   :  { %2675 = vmatprep.subr.bf16.mxu0 %v4826_v0 }
  0x41   :  { %2012 = vmatmul.mubr.bf16.vlgmr.msra.gmra.mrb[0].mxu1 %v4449_v35  ;;  %v4517_v35 = vld [vmem:[%s6243_s0 + $0x250] ss:$36 sps:$4 sm:$0xff]  }
  0x42   :  { %2476 = vmatmul.mubr.bf16.vlgmr.msra.gmra.mrb[0].mxu0 %v4452_v36  ;;  %2019 = vmatprep.mubr.bf16.mxu1 %v4456_v38  ;;  %v4520_v36 = vld [vmem:[%s6243_s0 + $0x28c] ss:$36 sps:$4 sm:$0xff]   ;;  %v4827_v38 = vmov 0.0  }
  0x43   :  { %2676 = vmatpush1.bf16.msra.mxu0 %v4455_v37  ;;  %2212 = vmatpush1.bf16.msra.mxu1 %v4458_v39  ;;  %v4522_v37 = vld [vmem:[%s6243_s0 + $0x29c] ss:$36 sps:$4 sm:$0xff]   ;;  %v4621_v39 = vld [vmem:[%s6242_s1 + $0xf0] sm:$0xff]  }
  0x44   :  { %2483 = vmatprep.mubr.bf16.mxu0 %v4459_v40  ;;  %2677 = vmatprep.subr.bf16.mxu0 %v4826_v0  ;;  %v4524_v40 = vld [vmem:[%s6243_s0 + $0x288] ss:$36 sps:$4 sm:$0xff]  }
  0x45   :  { %2213 = vmatprep.subr.bf16.mxu1 %v4826_v0 }
  0x47   :  { %2678 = vmatpush1.bf16.msra.mxu0 %v4463_v41  ;;  %2214 = vmatpush1.bf16.msra.mxu1 %v4471_v42  ;;  %v4633_v41 = vld [vmem:[%s6242_s1 + $0xf8] sm:$0xff]  }
  0x48   :  { %2679 = vmatprep.subr.bf16.mxu0 %v4826_v0  ;;  %2215 = vmatprep.subr.bf16.mxu1 %v4826_v0  ;;  %v4525_v42 = vld [vmem:[%s6243_s0 + $0x298] ss:$36 sps:$4 sm:$0xff]  }
  0x49   :  { %2020 = vmatmul.mubr.bf16.gmra.mrb[4].mxu1 %v4461_v43  ;;  %v4527_v43 = vld [vmem:[%s6243_s0 + $0x2d4] ss:$36 sps:$4 sm:$0xff]  }
  0x4a   :  { %2484 = vmatmul.mubr.bf16.gmra.mrb[4].mxu0 %v4462_v44  ;;  %2027 = vmatprep.mubr.bf16.mxu1 %v4465_v46  ;;  %v4529_v44 = vld [vmem:[%s6243_s0 + $0x2e4] ss:$36 sps:$4 sm:$0xff]  }
  0x4b   :  { %2680 = vmatpush1.bf16.msra.mxu0 %v4464_v45  ;;  %2491 = vmatprep.mubr.bf16.mxu0 %v4467_v47  ;;  %v4532_v45 = vld [vmem:[%s6243_s0 + $0x2d0] ss:$36 sps:$4 sm:$0xff]   ;;  %v4533_v46 = vld [vmem:[%s6243_s0 + $0x2e0] ss:$36 sps:$4 sm:$0xff]  }
  0x4c   :  { %2681 = vmatprep.subr.bf16.mxu0 %v4826_v0  ;;  %2216 = vmatpush1.bf16.msra.mxu1 %v4485_v48  ;;  %v4536_v47 = vld [vmem:[%s6243_s0 + $0x31c] ss:$36 sps:$4 sm:$0xff]   ;;  %v4538_v48 = vld [vmem:[%s6243_s0 + $0x32c] ss:$36 sps:$4 sm:$0xff]  }
  0x4d   :  { %2217 = vmatprep.subr.bf16.mxu1 %v4826_v0 }
  0x4f   :  { %2682 = vmatpush1.bf16.msra.mxu0 %v4472_v50  ;;  %v4541_v50 = vld [vmem:[%s6243_s0 + $0x328] ss:$36 sps:$4 sm:$0xff]  }
  0x50   :  { %2683 = vmatprep.subr.bf16.mxu0 %v4826_v0  ;;  %2218 = vmatpush1.bf16.msra.mxu1 %v4495_v51  ;;  %v4543_v51 = vld [vmem:[%s6243_s0 + $0x364] ss:$36 sps:$4 sm:$0xff]  }
  0x51   :  { %2028 = vmatmul.mubr.bf16.gmra.mrb[8].mxu1 %v4469_v49  ;;  %2219 = vmatprep.subr.bf16.mxu1 %v4826_v0  ;;  %v4540_v49 = vld [vmem:[%s6243_s0 + $0x318] ss:$36 sps:$4 sm:$0xff]  }
  0x52   :  { %2492 = vmatmul.mubr.bf16.gmra.mrb[8].mxu0 %v4470_v52  ;;  %2035 = vmatprep.mubr.bf16.mxu1 %v4473_v53  ;;  %v4546_v52 = vld [vmem:[%s6243_s0 + $0x374] ss:$36 sps:$4 sm:$0xff]   ;;  %v4548_v53 = vld [vmem:[%s6243_s0 + $0x360] ss:$36 sps:$4 sm:$0xff]  }
  0x53   :  { %2499 = vmatprep.mubr.bf16.mxu0 %v4475_v54  ;;  %2684 = vmatpush1.bf16.msra.mxu0 %v4479_v55  ;;  %v4549_v54 = vld [vmem:[%s6243_s0 + $0x370] ss:$36 sps:$4 sm:$0xff]  }
  0x54   :  { %2685 = vmatprep.subr.bf16.mxu0 %v4826_v0  ;;  %2220 = vmatpush1.bf16.msra.mxu1 %v4510_v56  ;;  %v4551_v55 = vld [vmem:[%s6243_s0 + $0x3ac] ss:$36 sps:$4 sm:$0xff]   ;;  %v4555_v56 = vld [vmem:[%s6243_s0 + $0x1c] ss:$36 sps:$4 sm:$0xff]  }
  0x55   :  { %2221 = vmatprep.subr.bf16.mxu1 %v4826_v0 }
  0x57   :  { %2686 = vmatpush1.bf16.msra.mxu0 %v4487_v57  ;;  %v4556_v57 = vld [vmem:[%s6243_s0 + $0x3a8] ss:$36 sps:$4 sm:$0xff]  }
  0x58   :  { %2687 = vmatprep.subr.bf16.mxu0 %v4826_v0  ;;  %2222 = vmatpush1.bf16.msra.mxu1 %v4519_v60  ;;  %v4557_v60 = vld [vmem:[%s6242_s1 + $0x200] sm:$0xff]  }
  0x59   :  { %2036 = vmatmul.mubr.bf16.gmra.mrb[12].mxu1 %v4477_v58  ;;  %2223 = vmatprep.subr.bf16.mxu1 %v4826_v0  ;;  %v4553_v58 = vld [vmem:[%s6243_s0 + $0x18] ss:$36 sps:$4 sm:$0xff]  }
  0x5a   :  { %2500 = vmatmul.mubr.bf16.gmra.mrb[12].mxu0 %v4478_v59  ;;  %2043 = vmatprep.mubr.bf16.mxu1 %v4480_v61  ;;  %v4559_v59 = vld [vmem:[%s6243_s0 + $0x3f4] ss:$36 sps:$4 sm:$0xff]   ;;  %v4561_v61 = vld [vmem:[%s6243_s0 + $0x64] ss:$36 sps:$4 sm:$0xff]  }
  0x5b   :  { %2507 = vmatprep.mubr.bf16.mxu0 %v4482_v62  ;;  %2688 = vmatpush1.bf16.msra.mxu0 %v4494_v63  ;;  %v4563_v62 = vld [vmem:[%s6243_s0 + $0x3f0] ss:$36 sps:$4 sm:$0xff]   ;;  %v4578_v63 = vld [vmem:[%s6242_s1 + $0x208] sm:$0xff]  }
  0x5c   :  { %2689 = vmatprep.subr.bf16.mxu0 %v4826_v0  ;;  %2224 = vmatpush1.bf16.msra.mxu1 %v4534_v1  ;;  %v4564_v1 = vld [vmem:[%s6243_s0 + $0x60] ss:$36 sps:$4 sm:$0xff]  }
  0x5d   :  { %2225 = vmatprep.subr.bf16.mxu1 %v4826_v0 }
  0x5f   :  { %2690 = vmatpush1.bf16.msra.mxu0 %v4500_v3  ;;  %v4567_v3 = vld [vmem:[%s6243_s0 + $0xac] ss:$36 sps:$4 sm:$0xff]  }
  0x60   :  { %2691 = vmatprep.subr.bf16.mxu0 %v4826_v0  ;;  %2226 = vmatpush1.bf16.msra.mxu1 %v4545_v5  ;;  %v4569_v5 = vld [vmem:[%s6243_s0 + $0x438] ss:$36 sps:$4 sm:$0xff]  }
  0x61   :  { %2044 = vmatmul.mubr.bf16.gmra.mrb[16].mxu1 %v4484_v2  ;;  %2227 = vmatprep.subr.bf16.mxu1 %v4826_v0  ;;  %v4565_v2 = vld [vmem:[%s6243_s0 + $0x43c] ss:$36 sps:$4 sm:$0xff]  }
  0x62   :  { %2508 = vmatmul.mubr.bf16.gmra.mrb[16].mxu0 %v4486_v4  ;;  %2051 = vmatprep.mubr.bf16.mxu1 %v4488_v6  ;;  %v4599_v4 = vld [vmem:[%s6242_s1 + $0x210] sm:$0xff]   ;;  %v4620_v6 = vld [vmem:[%s6242_s1 + $0x218] sm:$0xff]  }
  0x63   :  { %2515 = vmatprep.mubr.bf16.mxu0 %v4490_v7  ;;  %2692 = vmatpush1.bf16.msra.mxu0 %v4503_v8  ;;  %v4571_v7 = vld [vmem:[%s6243_s0 + $0xa8] ss:$36 sps:$4 sm:$0xff]  }
  0x64   :  { %2693 = vmatprep.subr.bf16.mxu0 %v4826_v0  ;;  %2228 = vmatpush1.bf16.msra.mxu1 %v4558_v9  ;;  %v4572_v8 = vld [vmem:[%s6243_s0 + $0x484] ss:$36 sps:$4 sm:$0xff]   ;;  %v4574_v9 = vld [vmem:[%s6243_s0 + $0xf4] ss:$36 sps:$4 sm:$0xff]  }
  0x65   :  { %2229 = vmatprep.subr.bf16.mxu1 %v4826_v0 }
  0x67   :  { %2694 = vmatpush1.bf16.msra.mxu0 %v4511_v10  ;;  %v4640_v10 = vld [vmem:[%s6242_s1 + $0x220] sm:$0xff]  }
  0x68   :  { %2695 = vmatprep.subr.bf16.mxu0 %v4826_v0  ;;  %2230 = vmatpush1.bf16.msra.mxu1 %v4570_v13  ;;  %v4577_v13 = vld [vmem:[%s6243_s0 + $0xf0] ss:$36 sps:$4 sm:$0xff]  }
  0x69   :  { %2052 = vmatmul.mubr.bf16.gmra.mrb[20].mxu1 %v4492_v11  ;;  %2231 = vmatprep.subr.bf16.mxu1 %v4826_v0  ;;  %v4576_v11 = vld [vmem:[%s6243_s0 + $0x480] ss:$36 sps:$4 sm:$0xff]  }
  0x6a   :  { %2516 = vmatmul.mubr.bf16.gmra.mrb[20].mxu0 %v4493_v12  ;;  %2059 = vmatprep.mubr.bf16.mxu1 %v4496_v14  ;;  %v4659_v12 = vld [vmem:[%s6242_s1 + $0x228] sm:$0xff]  }
  0x6b   :  { %2523 = vmatprep.mubr.bf16.mxu0 %v4498_v15  ;;  %2696 = vmatpush1.bf16.msra.mxu0 %v4518_v16  ;;  %v4580_v14 = vld [vmem:[%s6243_s0 + $0x4cc] ss:$36 sps:$4 sm:$0xff]   ;;  %v4582_v15 = vld [vmem:[%s6243_s0 + $0x13c] ss:$36 sps:$4 sm:$0xff]  }
  0x6c   :  { %2697 = vmatprep.subr.bf16.mxu0 %v4826_v0  ;;  %2232 = vmatpush1.bf16.msra.mxu1 %v4579_v17  ;;  %v4682_v16 = vld [vmem:[%s6242_s1 + $0x230] sm:$0xff]   ;;  %v4584_v17 = vld [vmem:[%s6243_s0 + $0x4c8] ss:$36 sps:$4 sm:$0xff]  }
  0x6d   :  { %2233 = vmatprep.subr.bf16.mxu1 %v4826_v0 }
  0x6f   :  { %2698 = vmatpush1.bf16.msra.mxu0 %v4526_v18  ;;  %v4585_v18 = vld [vmem:[%s6243_s0 + $0x138] ss:$36 sps:$4 sm:$0xff]  }
  0x70   :  { %2699 = vmatprep.subr.bf16.mxu0 %v4826_v0  ;;  %2234 = vmatpush1.bf16.msra.mxu1 %v4592_v24  ;;  %v4595_v24 = vld [vmem:[%s6243_s0 + $0x1cc] ss:$36 sps:$4 sm:$0xff]  }
  0x71   :  { %2060 = vmatmul.mubr.bf16.gmra.mrb[24].mxu1 %v4501_v19  ;;  %2235 = vmatprep.subr.bf16.mxu1 %v4826_v0  ;;  %v4586_v19 = vld [vmem:[%s6243_s0 + $0x514] ss:$36 sps:$4 sm:$0xff]  }
  0x72   :  { %2524 = vmatmul.mubr.bf16.gmra.mrb[24].mxu0 %v4502_v20  ;;  %2067 = vmatprep.mubr.bf16.mxu1 %v4504_v21  ;;  %v4588_v20 = vld [vmem:[%s6243_s0 + $0x184] ss:$36 sps:$4 sm:$0xff]   ;;  %v4590_v21 = vld [vmem:[%s6243_s0 + $0x510] ss:$36 sps:$4 sm:$0xff]  }
  0x73   :  { %2531 = vmatprep.mubr.bf16.mxu0 %v4506_v22  ;;  %2700 = vmatpush1.bf16.msra.mxu0 %v4531_v23  ;;  %v4591_v22 = vld [vmem:[%s6243_s0 + $0x180] ss:$36 sps:$4 sm:$0xff]  }
  0x74   :  { %2701 = vmatprep.subr.bf16.mxu0 %v4826_v0  ;;  %2236 = vmatpush1.bf16.msra.mxu1 %v4600_v28  ;;  %v4593_v23 = vld [vmem:[%s6243_s0 + $0x55c] ss:$36 sps:$4 sm:$0xff]   ;;  %v4603_v28 = vld [vmem:[%s6243_s0 + $0x214] ss:$36 sps:$4 sm:$0xff]  }
  0x75   :  { %2237 = vmatprep.subr.bf16.mxu1 %v4826_v0 }
  0x77   :  { %2702 = vmatpush1.bf16.msra.mxu0 %v4535_v26  ;;  %v4598_v26 = vld [vmem:[%s6243_s0 + $0x1c8] ss:$36 sps:$4 sm:$0xff]  }
  0x78   :  { %2703 = vmatprep.subr.bf16.mxu0 %v4826_v0  ;;  %2238 = vmatpush1.bf16.msra.mxu1 %v4613_v33  ;;  %v4609_v33 = vld [vmem:[%s6243_s0 + $0x25c] ss:$36 sps:$4 sm:$0xff]  }
  0x79   :  { %2068 = vmatmul.mubr.bf16.gmra.mrb[28].mxu1 %v4508_v25  ;;  %2239 = vmatprep.subr.bf16.mxu1 %v4826_v0  ;;  %v4597_v25 = vld [vmem:[%s6243_s0 + $0x558] ss:$36 sps:$4 sm:$0xff]  }
  0x7a   :  { %2532 = vmatmul.mubr.bf16.gmra.mrb[28].mxu0 %v4509_v27  ;;  %2075 = vmatprep.mubr.bf16.mxu1 %v4512_v29  ;;  %v4601_v27 = vld [vmem:[%s6243_s0 + $0x5a4] ss:$36 sps:$4 sm:$0xff]   ;;  %v4703_v29 = vld [vmem:[%s6242_s1 + $0x238] sm:$0xff]  }
  0x7b   :  { %2539 = vmatprep.mubr.bf16.mxu0 %v4514_v30  ;;  %2704 = vmatpush1.bf16.msra.mxu0 %v4542_v31  ;;  %v4605_v30 = vld [vmem:[%s6243_s0 + $0x5a0] ss:$36 sps:$4 sm:$0xff]   ;;  %v4606_v31 = vld [vmem:[%s6243_s0 + $0x210] ss:$36 sps:$4 sm:$0xff]  }
  0x7c   :  { %2705 = vmatprep.subr.bf16.mxu0 %v4826_v0  ;;  %2240 = vmatpush1.bf16.msra.mxu1 %v4621_v39  ;;  %v4618_v39 = vld [vmem:[%s6243_s0 + $0x630] ss:$36 sps:$4 sm:$0xff]  }
  0x7d   :  { %2241 = vmatprep.subr.bf16.mxu1 %v4826_v0 }
  0x7f   :  { %2706 = vmatpush1.bf16.msra.mxu0 %v4550_v32  ;;  %v4607_v32 = vld [vmem:[%s6243_s0 + $0x5ec] ss:$36 sps:$4 sm:$0xff]  }
  0x80   :  { %3868 = vmatprep.subr.bf16.mxu0 %v4827_v38  ;;  %2242 = vmatpush1.bf16.msra.mxu1 %v4633_v41  ;;  %v4622_v41 = vld [vmem:[%s6243_s0 + $0x67c] ss:$36 sps:$4 sm:$0xff]  }
  0x81   :  { %2076 = vmatmul.mubr.bf16.gmra.mrb[32].mxu1 %v4516_v34  ;;  %3984 = vmatprep.subr.bf16.mxu1 %v4826_v0  ;;  %v4611_v34 = vld [vmem:[%s6243_s0 + $0x5e8] ss:$36 sps:$4 sm:$0xff]  }
  0x82   :  { %2540 = vmatmul.mubr.bf16.gmra.mrb[32].mxu0 %v4517_v35  ;;  %2083 = vmatprep.mubr.bf16.mxu1 %v4520_v36  ;;  %v4612_v35 = vld [vmem:[%s6243_s0 + $0x258] ss:$36 sps:$4 sm:$0xff]  }
  0x83   :  { %2547 = vmatprep.mubr.bf16.mxu0 %v4522_v37  ;;  %v4614_v36 = vld [vmem:[%s6243_s0 + $0x634] ss:$36 sps:$4 sm:$0xff]   ;;  %v4616_v37 = vld [vmem:[%s6243_s0 + $0x2a4] ss:$36 sps:$4 sm:$0xff]  }
  0x89   :  { %2084 = vmatmul.mubr.bf16.gmra.mrb[36].mxu1 %v4524_v40  ;;  %v4619_v40 = vld [vmem:[%s6243_s0 + $0x2a0] ss:$36 sps:$4 sm:$0xff]  }
  0x8a   :  { %2548 = vmatmul.mubr.bf16.gmra.mrb[36].mxu0 %v4525_v42  ;;  %2091 = vmatprep.mubr.bf16.mxu1 %v4527_v43  ;;  %v4624_v42 = vld [vmem:[%s6243_s0 + $0x2ec] ss:$36 sps:$4 sm:$0xff]   ;;  %v255_v43 = vld [vmem:[%s6243_s0 + $0x6c0] sm:$0xff] }
  0x8b   :  { %2555 = vmatprep.mubr.bf16.mxu0 %v4529_v44  ;;  %v4626_v44 = vld [vmem:[%s6243_s0 + $0x678] ss:$36 sps:$4 sm:$0xff]  }
  0x91   :  { %2092 = vmatmul.mubr.bf16.gmra.mrb[40].mxu1 %v4532_v45  ;;  %v4627_v45 = vld [vmem:[%s6243_s0 + $0x2e8] ss:$36 sps:$4 sm:$0xff]  }
  0x92   :  { %2556 = vmatmul.mubr.bf16.gmra.mrb[40].mxu0 %v4533_v46  ;;  %2099 = vmatprep.mubr.bf16.mxu1 %v4536_v47  ;;  %v3657_v46 = vcombine.high %v255_v43, %v255_v43  ;;  %v4629_v47 = vld [vmem:[%s6243_s0 + $0x334] ss:$36 sps:$4 sm:$0xff]  }
  0x93   :  { %2563 = vmatprep.mubr.bf16.mxu0 %v4538_v48  ;;  %v3656_v48 = vcombine.low %v255_v43, %v255_v43  ;;  %v4697_v43 = vld [vmem:[%s6243_s0 + $0x2dc] ss:$36 sps:$4 sm:$0xff]  }
  0x99   :  { %2100 = vmatmul.mubr.bf16.gmra.mrb[44].mxu1 %v4540_v49  ;;  %v4632_v49 = vld [vmem:[%s6243_s0 + $0x330] ss:$36 sps:$4 sm:$0xff]  }
  0x9a   :  { %2564 = vmatmul.mubr.bf16.gmra.mrb[44].mxu0 %v4541_v50  ;;  %2107 = vmatprep.mubr.bf16.mxu1 %v4543_v51  ;;  %v4636_v50 = vld [vmem:[%s6243_s0 + $0xc] ss:$36 sps:$4 sm:$0xff]   ;;  %v4637_v51 = vld [vmem:[%s6243_s0 + $0x37c] ss:$36 sps:$4 sm:$0xff]  }
  0x9b   :  { %2571 = vmatprep.mubr.bf16.mxu0 %v4546_v52  ;;  %v4634_v52 = vld [vmem:[%s6243_s0 + $0x8] ss:$36 sps:$4 sm:$0xff]  }
  0xa1   :  { %2108 = vmatmul.mubr.bf16.gmra.mrb[48].mxu1 %v4548_v53  ;;  %v4639_v53 = vld [vmem:[%s6243_s0 + $0x378] ss:$36 sps:$4 sm:$0xff]  }
  0xa2   :  { %2572 = vmatmul.mubr.bf16.gmra.mrb[48].mxu0 %v4549_v54  ;;  %2115 = vmatprep.mubr.bf16.mxu1 %v4551_v55  ;;  %v4641_v54 = vld [vmem:[%s6243_s0 + $0x54] ss:$36 sps:$4 sm:$0xff]   ;;  %v4643_v55 = vld [vmem:[%s6243_s0 + $0x3c4] ss:$36 sps:$4 sm:$0xff]  }
  0xa3   :  { %2707 = vmatprep.mubr.bf16.mxu0 %v4555_v56  ;;  %v4810_v56 = vld [vmem:[%s6242_s1 + $0x100] sm:$0xff]  }
  0xa9   :  { %2116 = vmatmul.mubr.bf16.gmra.mrb[52].mxu1 %v4556_v57  ;;  %v4645_v57 = vld [vmem:[%s6243_s0 + $0x50] ss:$36 sps:$4 sm:$0xff]  }
  0xaa   :  { %2708 = vmatmul.mubr.bf16.vlgmr.msra.gmra.mrb[0].mxu0 %v4553_v58  ;;  %2123 = vmatprep.mubr.bf16.mxu1 %v4559_v59  ;;  %v4646_v58 = vld [vmem:[%s6243_s0 + $0x3c0] ss:$36 sps:$4 sm:$0xff]  }
  0xab   :  { %3869 = vmatpush3.bf16.msra.mxu0 %v4557_v60  ;;  %2715 = vmatprep.mubr.bf16.mxu0 %v4561_v61  ;;  %v4647_v59 = vld [vmem:[%s6243_s0 + $0x9c] ss:$36 sps:$4 sm:$0xff]   ;;  %v4649_v60 = vld [vmem:[%s6243_s0 + $0x40c] ss:$36 sps:$4 sm:$0xff]  }
  0xac   :  { %3870 = vmatprep.subr.bf16.mxu0 %v4827_v38  ;;  %v4811_v61 = vld [vmem:[%s6242_s1 + $0x108] sm:$0xff]  }
  0xaf   :  { %3871 = vmatpush3.bf16.msra.mxu0 %v4578_v63  ;;  %v4651_v63 = vld [vmem:[%s6243_s0 + $0x98] ss:$36 sps:$4 sm:$0xff]  }
  0xb0   :  { %3872 = vmatprep.subr.bf16.mxu0 %v4827_v38 }
  0xb1   :  { %2124 = vmatmul.mubr.bf16.gmra.mrb[56].mxu1 %v4563_v62  ;;  %v4812_v62 = vld [vmem:[%s6242_s1 + $0x110] sm:$0xff]  }
  0xb2   :  { %2716 = vmatmul.mubr.bf16.gmra.mrb[4].mxu0 %v4564_v1  ;;  %2131 = vmatprep.mubr.bf16.mxu1 %v4565_v2  ;;  %v4652_v1 = vld [vmem:[%s6243_s0 + $0x408] ss:$36 sps:$4 sm:$0xff]  }
  0xb3   :  { %2723 = vmatprep.mubr.bf16.mxu0 %v4567_v3  ;;  %3873 = vmatpush3.bf16.msra.mxu0 %v4599_v4  ;;  %v4653_v2 = vld [vmem:[%s6243_s0 + $0xe4] ss:$36 sps:$4 sm:$0xff]   ;;  %v4655_v3 = vld [vmem:[%s6243_s0 + $0x454] ss:$36 sps:$4 sm:$0xff]  }
  0xb4   :  { %3874 = vmatprep.subr.bf16.mxu0 %v4827_v38  ;;  %v4813_v4 = vld [vmem:[%s6242_s1 + $0x118] sm:$0xff]  }
  0xb7   :  { %3875 = vmatpush3.bf16.msra.mxu0 %v4620_v6  ;;  %v4657_v6 = vld [vmem:[%s6243_s0 + $0xe0] ss:$36 sps:$4 sm:$0xff]  }
  0xb8   :  { %3876 = vmatprep.subr.bf16.mxu0 %v4827_v38 }
  0xb9   :  { %2132 = vmatmul.mubr.bf16.gmra.mrb[60].mxu1 %v4569_v5  ;;  %v4814_v5 = vld [vmem:[%s6242_s1 + $0x120] sm:$0xff]  }
  0xba   :  { %2724 = vmatmul.mubr.bf16.gmra.mrb[8].mxu0 %v4571_v7  ;;  %2139 = vmatprep.mubr.bf16.mxu1 %v4572_v8  ;;  %v4658_v7 = vld [vmem:[%s6243_s0 + $0x450] ss:$36 sps:$4 sm:$0xff]  }
  0xbb   :  { %2731 = vmatprep.mubr.bf16.mxu0 %v4574_v9  ;;  %3877 = vmatpush3.bf16.msra.mxu0 %v4640_v10  ;;  %v4660_v8 = vld [vmem:[%s6243_s0 + $0x12c] ss:$36 sps:$4 sm:$0xff]   ;;  %v4662_v9 = vld [vmem:[%s6243_s0 + $0x49c] ss:$36 sps:$4 sm:$0xff]  }
  0xbc   :  { %3878 = vmatprep.subr.bf16.mxu0 %v4827_v38  ;;  %v4815_v10 = vld [vmem:[%s6242_s1 + $0x128] sm:$0xff]  }
  0xbf   :  { %3879 = vmatpush3.bf16.msra.mxu0 %v4659_v12  ;;  %v4664_v12 = vld [vmem:[%s6243_s0 + $0x128] ss:$36 sps:$4 sm:$0xff]  }
  0xc0   :  { %3880 = vmatprep.subr.bf16.mxu0 %v4827_v38 }
  0xc1   :  { %2140 = vmatmul.mubr.bf16.gmra.mrb[64].mxu1 %v4576_v11  ;;  %v4816_v11 = vld [vmem:[%s6242_s1 + $0x130] sm:$0xff]  }
  0xc2   :  { %2732 = vmatmul.mubr.bf16.gmra.mrb[12].mxu0 %v4577_v13  ;;  %2147 = vmatprep.mubr.bf16.mxu1 %v4580_v14  ;;  %v4665_v13 = vld [vmem:[%s6243_s0 + $0x498] ss:$36 sps:$4 sm:$0xff]  }
  0xc3   :  { %2739 = vmatprep.mubr.bf16.mxu0 %v4582_v15  ;;  %3881 = vmatpush3.bf16.msra.mxu0 %v4682_v16  ;;  %v4666_v14 = vld [vmem:[%s6243_s0 + $0x174] ss:$36 sps:$4 sm:$0xff]   ;;  %v4668_v15 = vld [vmem:[%s6243_s0 + $0x4e4] ss:$36 sps:$4 sm:$0xff]  }
  0xc4   :  { %3882 = vmatprep.subr.bf16.mxu0 %v4827_v38  ;;  %v4817_v16 = vld [vmem:[%s6242_s1 + $0x138] sm:$0xff]  }
  0xc7   :  { %3883 = vmatpush3.bf16.msra.mxu0 %v4703_v29  ;;  %v4822_v29 = vld [vmem:[%s6242_s1 + $0x160] sm:$0xff]  }
  0xc9   :  { %2148 = vmatmul.mubr.bf16.gmra.mrb[68].mxu1 %v4584_v17  ;;  %v4818_v17 = vld [vmem:[%s6242_s1 + $0x140] sm:$0xff]  }
  0xca   :  { %2740 = vmatmul.mubr.bf16.gmra.mrb[16].mxu0 %v4585_v18  ;;  %2155 = vmatprep.mubr.bf16.mxu1 %v4586_v19  ;;  %v4670_v18 = vld [vmem:[%s6243_s0 + $0x170] ss:$36 sps:$4 sm:$0xff]   ;;  %v4671_v19 = vld [vmem:[%s6243_s0 + $0x4e0] ss:$36 sps:$4 sm:$0xff]  }
  0xcb   :  { %2747 = vmatprep.mubr.bf16.mxu0 %v4588_v20  ;;  %v4672_v20 = vld [vmem:[%s6243_s0 + $0x1bc] ss:$36 sps:$4 sm:$0xff]  }
  0xd1   :  { %2156 = vmatmul.mubr.bf16.gmra.mrb[72].mxu1 %v4590_v21  ;;  %v4674_v21 = vld [vmem:[%s6243_s0 + $0x52c] ss:$36 sps:$4 sm:$0xff]  }
  0xd2   :  { %2748 = vmatmul.mubr.bf16.gmra.mrb[20].mxu0 %v4591_v22  ;;  %2163 = vmatprep.mubr.bf16.mxu1 %v4593_v23  ;;  %v4819_v22 = vld [vmem:[%s6242_s1 + $0x148] sm:$0xff]   ;;  %v4820_v23 = vld [vmem:[%s6242_s1 + $0x150] sm:$0xff]  }
  0xd3   :  { %2755 = vmatprep.mubr.bf16.mxu0 %v4595_v24  ;;  %v4676_v24 = vld [vmem:[%s6243_s0 + $0x1b8] ss:$36 sps:$4 sm:$0xff]  }
  0xd9   :  { %2164 = vmatmul.mubr.bf16.gmra.mrb[76].mxu1 %v4597_v25  ;;  %v4677_v25 = vld [vmem:[%s6243_s0 + $0x528] ss:$36 sps:$4 sm:$0xff]  }
  0xda   :  { %2756 = vmatmul.mubr.bf16.gmra.mrb[24].mxu0 %v4598_v26  ;;  %2171 = vmatprep.mubr.bf16.mxu1 %v4601_v27  ;;  %v4678_v26 = vld [vmem:[%s6243_s0 + $0x204] ss:$36 sps:$4 sm:$0xff]   ;;  %v4680_v27 = vld [vmem:[%s6243_s0 + $0x574] ss:$36 sps:$4 sm:$0xff]  }
  0xdb   :  { %2763 = vmatprep.mubr.bf16.mxu0 %v4603_v28  ;;  %v4821_v28 = vld [vmem:[%s6242_s1 + $0x158] sm:$0xff]  }
  0xe1   :  { %2172 = vmatmul.mubr.bf16.gmra.mrb[80].mxu1 %v4605_v30  ;;  %v4683_v30 = vld [vmem:[%s6243_s0 + $0x200] ss:$36 sps:$4 sm:$0xff]  }
  0xe2   :  { %2764 = vmatmul.mubr.bf16.gmra.mrb[28].mxu0 %v4606_v31  ;;  %2179 = vmatprep.mubr.bf16.mxu1 %v4607_v32  ;;  %v4684_v31 = vld [vmem:[%s6243_s0 + $0x570] ss:$36 sps:$4 sm:$0xff]  }
  0xe3   :  { %2771 = vmatprep.mubr.bf16.mxu0 %v4609_v33  ;;  %v4685_v32 = vld [vmem:[%s6243_s0 + $0x24c] ss:$36 sps:$4 sm:$0xff]   ;;  %v4687_v33 = vld [vmem:[%s6243_s0 + $0x5bc] ss:$36 sps:$4 sm:$0xff]  }
  0xe9   :  { %2180 = vmatmul.mubr.bf16.gmra.mrb[84].mxu1 %v4611_v34  ;;  %v4823_v34 = vld [vmem:[%s6242_s1 + $0x168] sm:$0xff]  }
  0xea   :  { %2772 = vmatmul.mubr.bf16.gmra.mrb[32].mxu0 %v4612_v35  ;;  %2187 = vmatprep.mubr.bf16.mxu1 %v4614_v36  ;;  %v4824_v35 = vld [vmem:[%s6242_s1 + $0x170] sm:$0xff]   ;;  %v4689_v36 = vld [vmem:[%s6243_s0 + $0x248] ss:$36 sps:$4 sm:$0xff]  }
  0xeb   :  { %2779 = vmatprep.mubr.bf16.mxu0 %v4616_v37  ;;  %v4690_v37 = vld [vmem:[%s6243_s0 + $0x5b8] ss:$36 sps:$4 sm:$0xff]  }
  0xf1   :  { %2188 = vmatmul.mubr.bf16.gmra.mrb[88].mxu1 %v4618_v39  ;;  %v4691_v39 = vld [vmem:[%s6243_s0 + $0x294] ss:$36 sps:$4 sm:$0xff]  }
  0xf2   :  { %2780 = vmatmul.mubr.bf16.gmra.mrb[36].mxu0 %v4619_v40  ;;  %2195 = vmatprep.mubr.bf16.mxu1 %v4622_v41  ;;  %v4693_v40 = vld [vmem:[%s6243_s0 + $0x604] ss:$36 sps:$4 sm:$0xff]   ;;  %v4695_v41 = vld [vmem:[%s6243_s0 + $0x290] ss:$36 sps:$4 sm:$0xff]  }
  0xf3   :  { %2787 = vmatprep.mubr.bf16.mxu0 %v4624_v42  ;;  %v4696_v42 = vld [vmem:[%s6243_s0 + $0x600] ss:$36 sps:$4 sm:$0xff]  }
  0xf9   :  { %2196 = vmatmul.mubr.bf16.gmra.mrb[92].mxu1 %v4626_v44  ;;  %v4699_v44 = vld [vmem:[%s6243_s0 + $0x64c] ss:$36 sps:$4 sm:$0xff]  }
  0xfa   :  { %2788 = vmatmul.mubr.bf16.gmra.mrb[40].mxu0 %v4627_v45  ;;  %2203 = vmatprep.mubr.bf16.mxu1 %v3657_v46  ;;  %v4701_v45 = vld [vmem:[%s6243_s0 + $0x2d8] ss:$36 sps:$4 sm:$0xff]   ;;  %v4702_v46 = vld [vmem:[%s6243_s0 + $0x648] ss:$36 sps:$4 sm:$0xff]  }
  0xfb   :  { %2795 = vmatprep.mubr.bf16.mxu0 %v4629_v47  ;;  %v4704_v47 = vld [vmem:[%s6243_s0 + $0x324] ss:$36 sps:$4 sm:$0xff]  }
 0x101   :  { %2204 = vmatmul.mubr.bf16.gmra.mrb[96].mxu1 %v3656_v48  ;;  %v4706_v48 = vld [vmem:[%s6243_s0 + $0x694] ss:$36 sps:$4 sm:$0xff]  }
 0x102   :  { %2796 = vmatmul.mubr.bf16.gmra.mrb[44].mxu0 %v4632_v49  ;;  %2243 = vmatprep.mubr.bf16.mxu1 %v4636_v50  ;;  %v258_v49 = vld [vmem:[%s6243_s0 + $0x6d8] sm:$0xff]  ;;  %v4708_v50 = vld [vmem:[%s6243_s0 + $0x320] ss:$36 sps:$4 sm:$0xff]  }
 0x103   :  { %2803 = vmatprep.mubr.bf16.mxu0 %v4637_v51  ;;  %v4709_v51 = vld [vmem:[%s6243_s0 + $0x690] ss:$36 sps:$4 sm:$0xff]  }
 0x109   :  { %2244 = vmatmul.mubr.bf16.vlgmr.msra.gmra.mrb[0].mxu1 %v4634_v52  ;;  %v4710_v52 = vld [vmem:[%s6243_s0 + $0x36c] ss:$36 sps:$4 sm:$0xff]  }
 0x10a   :  { %2804 = vmatmul.mubr.bf16.gmra.mrb[48].mxu0 %v4639_v53  ;;  %2251 = vmatprep.mubr.bf16.mxu1 %v4641_v54  ;;  %v3663_v53 = vcombine.high %v258_v49, %v258_v49  ;;  %v4713_v54 = vld [vmem:[%s6243_s0 + $0x368] ss:$36 sps:$4 sm:$0xff]  }
 0x10b   :  { %4000 = vmatpush1.bf16.msra.mxu1 %v4810_v56  ;;  %2811 = vmatprep.mubr.bf16.mxu0 %v4643_v55  ;;  %v3662_v55 = vcombine.low %v258_v49, %v258_v49  ;;  %v4715_v56 = vld [vmem:[%s6243_s0 + $0x3b4] ss:$36 sps:$4 sm:$0xff]   ;;  %v4778_v49 = vld [vmem:[%s6243_s0 + $0x4dc] ss:$36 sps:$4 sm:$0xff]  }
 0x10c   :  { %3985 = vmatprep.subr.bf16.mxu1 %v4826_v0 }
 0x10f   :  { %4001 = vmatpush1.bf16.msra.mxu1 %v4811_v61  ;;  %v4722_v61 = vld [vmem:[%s6243_s0 + $0x68] ss:$36 sps:$4 sm:$0xff]  }
 0x110   :  { %3986 = vmatprep.subr.bf16.mxu1 %v4826_v0 }
 0x111   :  { %2252 = vmatmul.mubr.bf16.gmra.mrb[4].mxu1 %v4645_v57  ;;  %v4717_v57 = vld [vmem:[%s6243_s0 + $0x3b0] ss:$36 sps:$4 sm:$0xff]  }
 0x112   :  { %2812 = vmatmul.mubr.bf16.gmra.mrb[52].mxu0 %v4646_v58  ;;  %2259 = vmatprep.mubr.bf16.mxu1 %v4647_v59  ;;  %v4718_v58 = vld [vmem:[%s6243_s0 + $0x20] ss:$36 sps:$4 sm:$0xff]  }
 0x113   :  { %2819 = vmatprep.mubr.bf16.mxu0 %v4649_v60  ;;  %4002 = vmatpush1.bf16.msra.mxu1 %v4812_v62  ;;  %v4719_v59 = vld [vmem:[%s6243_s0 + $0x3fc] ss:$36 sps:$4 sm:$0xff]   ;;  %v4723_v62 = vld [vmem:[%s6243_s0 + $0x444] ss:$36 sps:$4 sm:$0xff]  }
 0x114   :  { %3987 = vmatprep.subr.bf16.mxu1 %v4826_v0  ;;  %v4721_v60 = vld [vmem:[%s6243_s0 + $0x3f8] ss:$36 sps:$4 sm:$0xff]  }
 0x117   :  { %4003 = vmatpush1.bf16.msra.mxu1 %v4813_v4  ;;  %v4730_v4 = vld [vmem:[%s6243_s0 + $0xf8] ss:$36 sps:$4 sm:$0xff]  }
 0x118   :  { %3988 = vmatprep.subr.bf16.mxu1 %v4826_v0 }
 0x119   :  { %2260 = vmatmul.mubr.bf16.gmra.mrb[8].mxu1 %v4651_v63  ;;  %v4725_v63 = vld [vmem:[%s6243_s0 + $0x440] ss:$36 sps:$4 sm:$0xff]  }
 0x11a   :  { %2820 = vmatmul.mubr.bf16.gmra.mrb[56].mxu0 %v4652_v1  ;;  %2267 = vmatprep.mubr.bf16.mxu1 %v4653_v2  ;;  %v4726_v1 = vld [vmem:[%s6243_s0 + $0xb0] ss:$36 sps:$4 sm:$0xff]  }
 0x11b   :  { %2827 = vmatprep.mubr.bf16.mxu0 %v4655_v3  ;;  %4004 = vmatpush1.bf16.msra.mxu1 %v4814_v5  ;;  %v4727_v2 = vld [vmem:[%s6243_s0 + $0x48c] ss:$36 sps:$4 sm:$0xff]   ;;  %v4731_v5 = vld [vmem:[%s6243_s0 + $0x4d4] ss:$36 sps:$4 sm:$0xff]  }
 0x11c   :  { %3989 = vmatprep.subr.bf16.mxu1 %v4826_v0  ;;  %v4729_v3 = vld [vmem:[%s6243_s0 + $0x488] ss:$36 sps:$4 sm:$0xff]  }
 0x11f   :  { %4005 = vmatpush1.bf16.msra.mxu1 %v4815_v10  ;;  %v4738_v10 = vld [vmem:[%s6243_s0 + $0x188] ss:$36 sps:$4 sm:$0xff]  }
 0x120   :  { %3990 = vmatprep.subr.bf16.mxu1 %v4826_v0 }
 0x121   :  { %2268 = vmatmul.mubr.bf16.gmra.mrb[12].mxu1 %v4657_v6  ;;  %v4733_v6 = vld [vmem:[%s6243_s0 + $0x4d0] ss:$36 sps:$4 sm:$0xff]  }
 0x122   :  { %2828 = vmatmul.mubr.bf16.gmra.mrb[60].mxu0 %v4658_v7  ;;  %2275 = vmatprep.mubr.bf16.mxu1 %v4660_v8  ;;  %v4734_v7 = vld [vmem:[%s6243_s0 + $0x140] ss:$36 sps:$4 sm:$0xff]  }
 0x123   :  { %2835 = vmatprep.mubr.bf16.mxu0 %v4662_v9  ;;  %4006 = vmatpush1.bf16.msra.mxu1 %v4816_v11  ;;  %v4735_v8 = vld [vmem:[%s6243_s0 + $0x51c] ss:$36 sps:$4 sm:$0xff]   ;;  %v4739_v11 = vld [vmem:[%s6243_s0 + $0x564] ss:$36 sps:$4 sm:$0xff]  }
 0x124   :  { %3991 = vmatprep.subr.bf16.mxu1 %v4826_v0  ;;  %v4737_v9 = vld [vmem:[%s6243_s0 + $0x518] ss:$36 sps:$4 sm:$0xff]  }
 0x127   :  { %4007 = vmatpush1.bf16.msra.mxu1 %v4817_v16  ;;  %v4746_v16 = vld [vmem:[%s6243_s0 + $0x218] ss:$36 sps:$4 sm:$0xff]  }
 0x128   :  { %3992 = vmatprep.subr.bf16.mxu1 %v4826_v0 }
 0x129   :  { %2276 = vmatmul.mubr.bf16.gmra.mrb[16].mxu1 %v4664_v12  ;;  %v4741_v12 = vld [vmem:[%s6243_s0 + $0x560] ss:$36 sps:$4 sm:$0xff]  }
 0x12a   :  { %2836 = vmatmul.mubr.bf16.gmra.mrb[64].mxu0 %v4665_v13  ;;  %2283 = vmatprep.mubr.bf16.mxu1 %v4666_v14  ;;  %v4742_v13 = vld [vmem:[%s6243_s0 + $0x1d0] ss:$36 sps:$4 sm:$0xff]  }
 0x12b   :  { %2843 = vmatprep.mubr.bf16.mxu0 %v4668_v15  ;;  %4008 = vmatpush1.bf16.msra.mxu1 %v4818_v17  ;;  %v4743_v14 = vld [vmem:[%s6243_s0 + $0x5ac] ss:$36 sps:$4 sm:$0xff]   ;;  %v4747_v17 = vld [vmem:[%s6243_s0 + $0x5f4] ss:$36 sps:$4 sm:$0xff]  }
 0x12c   :  { %3993 = vmatprep.subr.bf16.mxu1 %v4826_v0  ;;  %v4745_v15 = vld [vmem:[%s6243_s0 + $0x5a8] ss:$36 sps:$4 sm:$0xff]  }
 0x12f   :  { %4009 = vmatpush1.bf16.msra.mxu1 %v4819_v22  ;;  %v4754_v22 = vld [vmem:[%s6243_s0 + $0x2a8] ss:$36 sps:$4 sm:$0xff]  }
 0x130   :  { %3994 = vmatprep.subr.bf16.mxu1 %v4826_v0 }
 0x131   :  { %2284 = vmatmul.mubr.bf16.gmra.mrb[20].mxu1 %v4670_v18  ;;  %v4749_v18 = vld [vmem:[%s6243_s0 + $0x5f0] ss:$36 sps:$4 sm:$0xff]  }
 0x132   :  { %2844 = vmatmul.mubr.bf16.gmra.mrb[68].mxu0 %v4671_v19  ;;  %2291 = vmatprep.mubr.bf16.mxu1 %v4672_v20  ;;  %v4750_v19 = vld [vmem:[%s6243_s0 + $0x260] ss:$36 sps:$4 sm:$0xff]  }
 0x133   :  { %2851 = vmatprep.mubr.bf16.mxu0 %v4674_v21  ;;  %4010 = vmatpush1.bf16.msra.mxu1 %v4820_v23  ;;  %v4751_v20 = vld [vmem:[%s6243_s0 + $0x63c] ss:$36 sps:$4 sm:$0xff]   ;;  %v4755_v23 = vld [vmem:[%s6243_s0 + $0x684] ss:$36 sps:$4 sm:$0xff]  }
 0x134   :  { %3995 = vmatprep.subr.bf16.mxu1 %v4826_v0  ;;  %v4753_v21 = vld [vmem:[%s6243_s0 + $0x638] ss:$36 sps:$4 sm:$0xff]  }
 0x137   :  { %4011 = vmatpush1.bf16.msra.mxu1 %v4821_v28 }
 0x138   :  { %3996 = vmatprep.subr.bf16.mxu1 %v4826_v0 }
 0x139   :  { %2292 = vmatmul.mubr.bf16.gmra.mrb[24].mxu1 %v4676_v24  ;;  %v256_v24 = vld [vmem:[%s6243_s0 + $0x6c8] sm:$0xff] }
 0x13a   :  { %2852 = vmatmul.mubr.bf16.gmra.mrb[72].mxu0 %v4677_v25  ;;  %2299 = vmatprep.mubr.bf16.mxu1 %v4678_v26  ;;  %v4757_v25 = vld [vmem:[%s6243_s0 + $0x680] ss:$36 sps:$4 sm:$0xff]   ;;  %v4758_v26 = vld [vmem:[%s6243_s0 + $0x2f0] ss:$36 sps:$4 sm:$0xff]   ;;  %v3658_v28 = vcombine.low %v256_v24, %v256_v24 }
 0x13b   :  { %2859 = vmatprep.mubr.bf16.mxu0 %v4680_v27  ;;  %4012 = vmatpush1.bf16.msra.mxu1 %v4822_v29  ;;  %v3659_v27 = vcombine.high %v256_v24, %v256_v24  ;;  %v4761_v29 = vld [vmem:[%s6243_s0 + $0x338] ss:$36 sps:$4 sm:$0xff]  }
 0x13c   :  { %3997 = vmatprep.subr.bf16.mxu1 %v4826_v0 }
 0x13f   :  { %4013 = vmatpush1.bf16.msra.mxu1 %v4823_v34  ;;  %v4768_v34 = vld [vmem:[%s6243_s0 + $0x400] ss:$36 sps:$4 sm:$0xff]  }
 0x140   :  { %3998 = vmatprep.subr.bf16.mxu1 %v4826_v0 }
 0x141   :  { %2300 = vmatmul.mubr.bf16.gmra.mrb[28].mxu1 %v4683_v30  ;;  %v4764_v30 = vld [vmem:[%s6243_s0 + $0x3bc] ss:$36 sps:$4 sm:$0xff]  }
 0x142   :  { %2860 = vmatmul.mubr.bf16.gmra.mrb[76].mxu0 %v4684_v31  ;;  %2307 = vmatprep.mubr.bf16.mxu1 %v4685_v32  ;;  %v4762_v31 = vld [vmem:[%s6243_s0 + $0x3b8] ss:$36 sps:$4 sm:$0xff]   ;;  %v4765_v32 = vld [vmem:[%s6243_s0 + $0x380] ss:$36 sps:$4 sm:$0xff]  }
 0x143   :  { %2867 = vmatprep.mubr.bf16.mxu0 %v4687_v33  ;;  %4014 = vmatpush1.bf16.msra.mxu1 %v4824_v35  ;;  %v4766_v33 = vld [vmem:[%s6243_s0 + $0x404] ss:$36 sps:$4 sm:$0xff]  }
 0x144   :  { %3999 = vmatprep.subr.bf16.mxu1 %v4826_v0  ;;  %v4825_v0 = vld [vmem:[%s6242_s1 + $0x178] sm:$0xff]   ;;  %v4769_v35 = vld [vmem:[%s6243_s0 + $0x3c8] ss:$36 sps:$4 sm:$0xff]  }
 0x147   :  { %4015 = vmatpush1.bf16.msra.mxu1 %v4825_v0 }
 0x149   :  { %2308 = vmatmul.mubr.bf16.gmra.mrb[32].mxu1 %v4689_v36  ;;  %v4770_v36 = vld [vmem:[%s6243_s0 + $0x44c] ss:$36 sps:$4 sm:$0xff]  }
 0x14a   :  { %2868 = vmatmul.mubr.bf16.gmra.mrb[80].mxu0 %v4690_v37  ;;  %2315 = vmatprep.mubr.bf16.mxu1 %v4691_v39 }
 0x14b   :  { %2875 = vmatprep.mubr.bf16.mxu0 %v4693_v40  ;;  %v4772_v40 = vld [vmem:[%s6243_s0 + $0x448] ss:$36 sps:$4 sm:$0xff]  }
 0x151   :  { %2316 = vmatmul.mubr.bf16.gmra.mrb[36].mxu1 %v4695_v41  ;;  %v4773_v41 = vld [vmem:[%s6243_s0 + $0x410] ss:$36 sps:$4 sm:$0xff]  }
 0x152   :  { %2876 = vmatmul.mubr.bf16.gmra.mrb[84].mxu0 %v4696_v42  ;;  %2323 = vmatprep.mubr.bf16.mxu1 %v4697_v43  ;;  %v4774_v42 = vld [vmem:[%s6243_s0 + $0x494] ss:$36 sps:$4 sm:$0xff]  }
 0x153   :  { %2883 = vmatprep.mubr.bf16.mxu0 %v4699_v44 }
 0x159   :  { %2324 = vmatmul.mubr.bf16.gmra.mrb[40].mxu1 %v4701_v45 }
 0x15a   :  { %2884 = vmatmul.mubr.bf16.gmra.mrb[88].mxu0 %v4702_v46  ;;  %2331 = vmatprep.mubr.bf16.mxu1 %v4704_v47  ;;  %v4776_v46 = vld [vmem:[%s6243_s0 + $0x490] ss:$36 sps:$4 sm:$0xff]  }
 0x15b   :  { %2891 = vmatprep.mubr.bf16.mxu0 %v4706_v48  ;;  %v4777_v48 = vld [vmem:[%s6243_s0 + $0x458] ss:$36 sps:$4 sm:$0xff]  }
 0x161   :  { %2332 = vmatmul.mubr.bf16.gmra.mrb[44].mxu1 %v4708_v50 }
 0x162   :  { %2892 = vmatmul.mubr.bf16.gmra.mrb[92].mxu0 %v4709_v51  ;;  %2339 = vmatprep.mubr.bf16.mxu1 %v4710_v52 }
 0x163   :  { %2899 = vmatprep.mubr.bf16.mxu0 %v3663_v53  ;;  %v4780_v53 = vld [vmem:[%s6243_s0 + $0x4d8] ss:$36 sps:$4 sm:$0xff]  }
 0x169   :  { %2340 = vmatmul.mubr.bf16.gmra.mrb[48].mxu1 %v4713_v54 }
 0x16a   :  { %2900 = vmatmul.mubr.bf16.gmra.mrb[96].mxu0 %v3662_v55  ;;  %2347 = vmatprep.mubr.bf16.mxu1 %v4715_v56  ;;  %v4781_v55 = vld [vmem:[%s6243_s0 + $0x4a0] ss:$36 sps:$4 sm:$0xff]  }
 0x16b   :  { %3884 = vmatprep.mubr.msk.bf16.mxu0 %vm4828_vm0, %v4827_v38  ;;  %v4782_v56 = vld [vmem:[%s6243_s0 + $0x524] ss:$36 sps:$4 sm:$0xff]  }
 0x171   :  { %2348 = vmatmul.mubr.bf16.gmra.mrb[52].mxu1 %v4717_v57 }
 0x172   :  { %3885 = vmatmul.mubr.bf16.vlgmr.msra.gmra.mrb[0].mxu0 %v4718_v58  ;;  %2355 = vmatprep.mubr.bf16.mxu1 %v4719_v59 }
 0x173   :  { %3888 = vmatprep.mubr.msk.bf16.mxu0 %vm4828_vm0, %v4827_v38 }
 0x179   :  { %2356 = vmatmul.mubr.bf16.gmra.mrb[56].mxu1 %v4721_v60  ;;  %v4784_v60 = vld [vmem:[%s6243_s0 + $0x520] ss:$36 sps:$4 sm:$0xff]  }
 0x17a   :  { %3889 = vmatmul.mubr.bf16.gmra.mrb[4].mxu0 %v4722_v61  ;;  %2363 = vmatprep.mubr.bf16.mxu1 %v4723_v62  ;;  %v4785_v62 = vld [vmem:[%s6243_s0 + $0x4e8] ss:$36 sps:$4 sm:$0xff]  }
 0x17b   :  { %3892 = vmatprep.mubr.msk.bf16.mxu0 %vm4828_vm0, %v4827_v38 }
 0x181   :  { %2364 = vmatmul.mubr.bf16.gmra.mrb[60].mxu1 %v4725_v63  ;;  %v4786_v63 = vld [vmem:[%s6243_s0 + $0x56c] ss:$36 sps:$4 sm:$0xff]  }
 0x182   :  { %3893 = vmatmul.mubr.bf16.gmra.mrb[8].mxu0 %v4726_v1  ;;  %2371 = vmatprep.mubr.bf16.mxu1 %v4727_v2 }
 0x183   :  { %3896 = vmatprep.mubr.msk.bf16.mxu0 %vm4828_vm0, %v4827_v38 }
 0x189   :  { %2372 = vmatmul.mubr.bf16.gmra.mrb[64].mxu1 %v4729_v3 }
 0x18a   :  { %3897 = vmatmul.mubr.bf16.gmra.mrb[12].mxu0 %v4730_v4  ;;  %2379 = vmatprep.mubr.bf16.mxu1 %v4731_v5  ;;  %v4788_v4 = vld [vmem:[%s6243_s0 + $0x568] ss:$36 sps:$4 sm:$0xff]  }
 0x18b   :  { %3900 = vmatprep.mubr.msk.bf16.mxu0 %vm4828_vm0, %v4827_v38 }
 0x191   :  { %2380 = vmatmul.mubr.bf16.gmra.mrb[68].mxu1 %v4733_v6  ;;  %v4789_v6 = vld [vmem:[%s6243_s0 + $0x530] ss:$36 sps:$4 sm:$0xff]  }
 0x192   :  { %3901 = vmatmul.mubr.bf16.gmra.mrb[16].mxu0 %v4734_v7  ;;  %2387 = vmatprep.mubr.bf16.mxu1 %v4735_v8  ;;  %v4790_v7 = vld [vmem:[%s6243_s0 + $0x5b4] ss:$36 sps:$4 sm:$0xff]  }
 0x193   :  { %3904 = vmatprep.mubr.msk.bf16.mxu0 %vm4828_vm0, %v4827_v38 }
 0x199   :  { %2388 = vmatmul.mubr.bf16.gmra.mrb[72].mxu1 %v4737_v9 }
 0x19a   :  { %3905 = vmatmul.mubr.bf16.gmra.mrb[20].mxu0 %v4738_v10  ;;  %2395 = vmatprep.mubr.bf16.mxu1 %v4739_v11  ;;  %v4792_v11 = vld [vmem:[%s6243_s0 + $0x5b0] ss:$36 sps:$4 sm:$0xff]  }
 0x19b   :  { %3908 = vmatprep.mubr.msk.bf16.mxu0 %vm4828_vm0, %v4827_v38 }
 0x1a1   :  { %2396 = vmatmul.mubr.bf16.gmra.mrb[76].mxu1 %v4741_v12 }
 0x1a2   :  { %3909 = vmatmul.mubr.bf16.gmra.mrb[24].mxu0 %v4742_v13  ;;  %2403 = vmatprep.mubr.bf16.mxu1 %v4743_v14  ;;  %v4793_v13 = vld [vmem:[%s6243_s0 + $0x578] ss:$36 sps:$4 sm:$0xff]  }
 0x1a3   :  { %3912 = vmatprep.mubr.msk.bf16.mxu0 %vm4828_vm0, %v4827_v38  ;;  %v4794_v14 = vld [vmem:[%s6243_s0 + $0x5fc] ss:$36 sps:$4 sm:$0xff]  }
 0x1a9   :  { %2404 = vmatmul.mubr.bf16.gmra.mrb[80].mxu1 %v4745_v15 }
 0x1aa   :  { %3913 = vmatmul.mubr.bf16.gmra.mrb[28].mxu0 %v4746_v16  ;;  %2411 = vmatprep.mubr.bf16.mxu1 %v4747_v17 }
 0x1ab   :  { %3916 = vmatprep.mubr.msk.bf16.mxu0 %vm4828_vm0, %v4827_v38 }
 0x1b1   :  { %2412 = vmatmul.mubr.bf16.gmra.mrb[84].mxu1 %v4749_v18  ;;  %v4796_v18 = vld [vmem:[%s6243_s0 + $0x5f8] ss:$36 sps:$4 sm:$0xff]  }
 0x1b2   :  { %3917 = vmatmul.mubr.bf16.gmra.mrb[32].mxu0 %v4750_v19  ;;  %2419 = vmatprep.mubr.bf16.mxu1 %v4751_v20  ;;  %v4797_v20 = vld [vmem:[%s6243_s0 + $0x5c0] ss:$36 sps:$4 sm:$0xff]  }
 0x1b3   :  { %3920 = vmatprep.mubr.msk.bf16.mxu0 %vm4828_vm0, %v4827_v38 }
 0x1b9   :  { %2420 = vmatmul.mubr.bf16.gmra.mrb[88].mxu1 %v4753_v21  ;;  %v4798_v21 = vld [vmem:[%s6243_s0 + $0x644] ss:$36 sps:$4 sm:$0xff]  }
 0x1ba   :  { %3921 = vmatmul.mubr.bf16.gmra.mrb[36].mxu0 %v4754_v22  ;;  %2427 = vmatprep.mubr.bf16.mxu1 %v4755_v23 }
 0x1bb   :  { %3924 = vmatprep.mubr.msk.bf16.mxu0 %vm4828_vm0, %v4827_v38 }
 0x1c1   :  { %2428 = vmatmul.mubr.bf16.gmra.mrb[92].mxu1 %v4757_v25  ;;  %v4800_v25 = vld [vmem:[%s6243_s0 + $0x640] ss:$36 sps:$4 sm:$0xff]  }
 0x1c2   :  { %3925 = vmatmul.mubr.bf16.gmra.mrb[40].mxu0 %v4758_v26  ;;  %2435 = vmatprep.mubr.bf16.mxu1 %v3659_v27  ;;  %v4801_v27 = vld [vmem:[%s6243_s0 + $0x608] ss:$36 sps:$4 sm:$0xff]  }
 0x1c3   :  { %3928 = vmatprep.mubr.msk.bf16.mxu0 %vm4828_vm0, %v4827_v38 }
 0x1c9   :  { %2436 = vmatmul.mubr.bf16.gmra.mrb[96].mxu1 %v3658_v28  ;;  %v4802_v28 = vld [vmem:[%s6243_s0 + $0x68c] ss:$36 sps:$4 sm:$0xff]  }
 0x1ca   :  { %3929 = vmatmul.mubr.bf16.gmra.mrb[44].mxu0 %v4761_v29  ;;  %2579 = vmatprep.mubr.bf16.mxu1 %v4764_v30  ;;  %v257_v30 = vld [vmem:[%s6243_s0 + $0x6d0] sm:$0xff] }
 0x1cb   :  { %3932 = vmatprep.mubr.msk.bf16.mxu0 %vm4828_vm0, %v4827_v38 }
 0x1d1   :  { %2580 = vmatmul.mubr.bf16.vlgmr.msra.gmra.mrb[52].mxu1 %v4762_v31 }
 0x1d2   :  { %3933 = vmatmul.mubr.bf16.gmra.mrb[48].mxu0 %v4765_v32  ;;  %2587 = vmatprep.mubr.bf16.mxu1 %v4766_v33  ;;  %v4804_v33 = vld [vmem:[%s6243_s0 + $0x688] ss:$36 sps:$4 sm:$0xff]  }
 0x1d3   :  { %3936 = vmatprep.mubr.msk.bf16.mxu0 %vm4828_vm0, %v4827_v38 }
 0x1d9   :  { %2588 = vmatmul.mubr.bf16.gmra.mrb[56].mxu1 %v4768_v34 }
 0x1da   :  { %3937 = vmatmul.mubr.bf16.gmra.mrb[52].mxu0 %v4769_v35  ;;  %2595 = vmatprep.mubr.bf16.mxu1 %v4770_v36  ;;  %v4805_v35 = vld [vmem:[%s6243_s0 + $0x650] ss:$36 sps:$4 sm:$0xff]   ;;  %v3661_v36 = vcombine.high %v257_v30, %v257_v30 }
 0x1db   :  { %3940 = vmatprep.mubr.msk.bf16.mxu0 %vm4828_vm0, %v4827_v38 }
 0x1dc   :  { %v5807_v37 = vpop.f32.mrb[0].mxu1 }
 0x1dd   :  { %v2247_v39 = vpop.f32.mrb[1].mxu1 }
 0x1de   :  { %v5812_v0 = vpop.f32.mrb[2].mxu1 }
 0x1df   :  { %v2250_v43 = vpop.f32.mrb[3].mxu1 }
 0x1e1   :  { %2596 = vmatmul.mubr.bf16.gmra.mrb[60].mxu1 %v4772_v40 }
 0x1e2   :  { %3941 = vmatmul.mubr.bf16.gmra.mrb[56].mxu0 %v4773_v41  ;;  %2603 = vmatprep.mubr.bf16.mxu1 %v4774_v42  ;;  %v3660_v42 = vcombine.low %v257_v30, %v257_v30 }
 0x1e3   :  { %3944 = vmatprep.mubr.msk.bf16.mxu0 %vm4828_vm0, %v4827_v38 }
 0x1e4   :  { %v5822_v44 = vpop.f32.mrb[4].mxu1 }
 0x1e5   :  { %v2255_v45 = vpop.f32.mrb[5].mxu1 }
 0x1e6   :  { %v5827_v47 = vpop.f32.mrb[6].mxu1  ;;  %v4808_v45 = vld [vmem:[%s6243_s0 + $0x698] ss:$36 sps:$4 sm:$0xff]  }
 0x1e7   :  { %v2258_v50 = vpop.f32.mrb[7].mxu1 }
 0x1e9   :  { %2604 = vmatmul.mubr.bf16.gmra.mrb[64].mxu1 %v4776_v46 }
 0x1ea   :  { %3945 = vmatmul.mubr.bf16.gmra.mrb[60].mxu0 %v4777_v48  ;;  %2611 = vmatprep.mubr.bf16.mxu1 %v4778_v49 }
 0x1eb   :  { %3948 = vmatprep.mubr.msk.bf16.mxu0 %vm4828_vm0, %v4827_v38 }
 0x1ec   :  { %v5837_v51 = vpop.f32.mrb[8].mxu1 }
 0x1ed   :  { %v2263_v52 = vpop.f32.mrb[9].mxu1 }
 0x1ee   :  { %v5842_v54 = vpop.f32.mrb[10].mxu1  ;;  %v4809_v52 = vld [vmem:[%s6243_s0 + $0x6e0] ss:$0 sps:$4 sm:$0xff]  }
 0x1ef   :  { %v2266_v57 = vpop.f32.mrb[11].mxu1 }
 0x1f1   :  { %2612 = vmatmul.mubr.bf16.gmra.mrb[68].mxu1 %v4780_v53 }
 0x1f2   :  { %3949 = vmatmul.mubr.bf16.gmra.mrb[64].mxu0 %v4781_v55  ;;  %2619 = vmatprep.mubr.bf16.mxu1 %v4782_v56 }
 0x1f3   :  { %3952 = vmatprep.mubr.msk.bf16.mxu0 %vm4828_vm0, %v4827_v38 }
 0x1f4   :  { %v5852_v58 = vpop.f32.mrb[12].mxu1 }
 0x1f5   :  { %v2271_v59 = vpop.f32.mrb[13].mxu1 }
 0x1f6   :  { %v5857_v61 = vpop.f32.mrb[14].mxu1 }
 0x1f7   :  { %v2274_v1 = vpop.f32.mrb[15].mxu1 }
 0x1f8   :  { %v5969_v1 = vld [vmem:[%s6244_s2] ss:$0 sm:$0xff] }
 0x1f9   :  { %2620 = vmatmul.mubr.bf16.gmra.mrb[72].mxu1 %v4784_v60  ;;  %v4024_v30 = vadd.f32 %v5969_v1, %v5837_v51 }
 0x1fa   :  { %3953 = vmatmul.mubr.bf16.gmra.mrb[68].mxu0 %v4785_v62  ;;  %2627 = vmatprep.mubr.bf16.mxu1 %v4786_v63 }
 0x1fb   :  { %3956 = vmatprep.mubr.msk.bf16.mxu0 %vm4828_vm0, %v4827_v38 }
 0x1fc   :  { %v5867_v2 = vpop.f32.mrb[16].mxu1 }
 0x1fd   :  { %v2279_v3 = vpop.f32.mrb[17].mxu1 }
 0x1fe   :  { %v5872_v5 = vpop.f32.mrb[18].mxu1  ;;  %v4016_v3 = vadd.f32 %v5969_v1, %v5807_v37 }
 0x1ff   :  { %v2282_v8 = vpop.f32.mrb[19].mxu1 }
 0x201   :  { %2628 = vmatmul.mubr.bf16.gmra.mrb[76].mxu1 %v4788_v4 }
 0x202   :  { %3957 = vmatmul.mubr.bf16.gmra.mrb[72].mxu0 %v4789_v6  ;;  %2635 = vmatprep.mubr.bf16.mxu1 %v4790_v7  ;;  %v4018_v6 = vadd.f32 %v5969_v1, %v5812_v0  ;;  %v4022_v0 = vadd.f32 %v5969_v1, %v5827_v47 }
 0x203   :  { %3960 = vmatprep.mubr.msk.bf16.mxu0 %vm4828_vm0, %v4827_v38 }
 0x204   :  { %v5882_v9 = vpop.f32.mrb[20].mxu1 }
 0x205   :  { %v2287_v10 = vpop.f32.mrb[21].mxu1 }
 0x206   :  { %v5887_v12 = vpop.f32.mrb[22].mxu1 }
 0x207   :  { %v2290_v15 = vpop.f32.mrb[23].mxu1 }
 0x209   :  { %2636 = vmatmul.mubr.bf16.gmra.mrb[80].mxu1 %v4792_v11 }
 0x20a   :  { %3961 = vmatmul.mubr.bf16.gmra.mrb[76].mxu0 %v4793_v13  ;;  %2643 = vmatprep.mubr.bf16.mxu1 %v4794_v14 }
 0x20b   :  { %3964 = vmatprep.mubr.msk.bf16.mxu0 %vm4828_vm0, %v4827_v38 }
 0x20c   :  { %v5897_v16 = vpop.f32.mrb[24].mxu1 }
 0x20d   :  { %v2295_v17 = vpop.f32.mrb[25].mxu1 }
 0x20e   :  { %v5902_v19 = vpop.f32.mrb[26].mxu1 }
 0x20f   :  { %v2298_v22 = vpop.f32.mrb[27].mxu1 }
 0x211   :  { %2644 = vmatmul.mubr.bf16.gmra.mrb[84].mxu1 %v4796_v18  ;;  %v4020_v18 = vadd.f32 %v5969_v1, %v5822_v44 }
 0x212   :  { %3965 = vmatmul.mubr.bf16.gmra.mrb[80].mxu0 %v4797_v20  ;;  %2651 = vmatprep.mubr.bf16.mxu1 %v4798_v21 }
 0x213   :  { %3968 = vmatprep.mubr.msk.bf16.mxu0 %vm4828_vm0, %v4827_v38 }
 0x214   :  { %v5912_v23 = vpop.f32.mrb[28].mxu1 }
 0x215   :  { %v2303_v24 = vpop.f32.mrb[29].mxu1 }
 0x216   :  { %v5917_v26 = vpop.f32.mrb[30].mxu1 }
 0x217   :  { %v2306_v29 = vpop.f32.mrb[31].mxu1 }
 0x219   :  { %2652 = vmatmul.mubr.bf16.gmra.mrb[88].mxu1 %v4800_v25 }
 0x21a   :  { %3969 = vmatmul.mubr.bf16.gmra.mrb[84].mxu0 %v4801_v27  ;;  %2659 = vmatprep.mubr.bf16.mxu1 %v4802_v28 }
 0x21b   :  { %3972 = vmatprep.mubr.msk.bf16.mxu0 %vm4828_vm0, %v4827_v38 }
 0x21c   :  { %v5930_v31 = vpop.f32.mrb[32].mxu1 }
 0x21d   :  { %v2311_v32 = vpop.f32.mrb[33].mxu1 }
 0x21e   :  { %v5935_v34 = vpop.f32.mrb[34].mxu1 }
 0x21f   :  { %v2314_v39 = vpop.f32.mrb[35].mxu1 }
 0x221   :  { %2660 = vmatmul.mubr.bf16.gmra.mrb[92].mxu1 %v4804_v33  ;;  %v4026_v33 = vadd.f32 %v5969_v1, %v5842_v54 }
 0x222   :  { %3973 = vmatmul.mubr.bf16.gmra.mrb[88].mxu0 %v4805_v35  ;;  %2667 = vmatprep.mubr.bf16.mxu1 %v3661_v36 }
 0x223   :  { %3976 = vmatprep.mubr.msk.bf16.mxu0 %vm4828_vm0, %v4827_v38 }
 0x224   :  { %v5942_v40 = vpop.f32.mrb[36].mxu1 }
 0x225   :  { %v2319_v41 = vpop.f32.mrb[37].mxu1 }
 0x226   :  { %v5944_v43 = vpop.f32.mrb[38].mxu1 }
 0x227   :  { %v2322_v46 = vpop.f32.mrb[39].mxu1 }
 0x229   :  { %2668 = vmatmul.mubr.bf16.gmra.mrb[96].mxu1 %v3660_v42 }
 0x22a   :  { %3977 = vmatmul.mubr.bf16.gmra.mrb[92].mxu0 %v4808_v45 }
 0x22b   :  { %3980 = vmatprep.mubr.msk.bf16.mxu0 %vm4828_vm0, %v4827_v38 }
 0x22c   :  { %v5951_v48 = vpop.f32.mrb[40].mxu1 }
 0x22d   :  { %v2327_v49 = vpop.f32.mrb[41].mxu1 }
 0x22e   :  { %v5953_v50 = vpop.f32.mrb[42].mxu1  ;;  %v4028_v49 = vadd.f32 %v5969_v1, %v5852_v58 }
 0x22f   :  { %v2330_v53 = vpop.f32.mrb[43].mxu1 }
 0x230   :  { %v4030_v53 = vadd.f32 %v5969_v1, %v5857_v61 }
 0x232   :  { %3981 = vmatmul.mubr.bf16.gmra.mrb[96].mxu0 %v4809_v52 }
 0x234   :  { %v5958_v55 = vpop.f32.mrb[44].mxu1 }
 0x235   :  { %v2335_v56 = vpop.f32.mrb[45].mxu1 }
 0x236   :  { %v5960_v57 = vpop.f32.mrb[46].mxu1 }
 0x237   :  { %v2338_v59 = vpop.f32.mrb[47].mxu1 }
 0x23c   :  { %v5962_v60 = vpop.f32.mrb[48].mxu1 }
 0x23d   :  { %v2343_v38 = vpop.f32.mrb[49].mxu1 }
 0x23e   :  { %v5964_v62 = vpop.f32.mrb[50].mxu1 }
 0x23f   :  { %v2346_v63 = vpop.f32.mrb[51].mxu1 }
 0x245   :  { %v2941_v4 = vpop.f32.mrb[0].mxu0 }
 0x246   :  { %v4017_v7 = vadd.f32 %v4016_v3, %v2941_v4  ;;  %v3886_v8 = vpop.f32.mrb[1].mxu0 }
 0x247   :  { %v2944_v10 = vpop.f32.mrb[2].mxu0 }
 0x248   :  { %v3139_v11 = vmax.f32 %v4017_v7, 0.0  ;;  %v4019_v13 = vadd.f32 %v4018_v6, %v2944_v10  ;;  %v3887_v14 = vpop.f32.mrb[3].mxu0  ;;  %v4032_v7 = vadd.f32 %v5969_v1, %v5867_v2  ;;  %v4034_v10 = vadd.f32 %v5969_v1, %v5872_v5 }
 0x24a   :  { %v3786_v15 = vpack.c.bf16 %v3139_v11, %v3139_v11  ;;  %v3140_v17 = vmax.f32 %v4019_v13, 0.0 }
 0x24c   :  { %3386 = vst.msk [vmem:[%s6245_s3] sm:$0xf] %vm3385_vm1, %v3786_v15  ;;  %v3787_v37 = vpack.c.bf16 %v3140_v17, %v3140_v17 }
 0x24d   :  { %v2949_v20 = vpop.f32.mrb[4].mxu0 }
 0x24e   :  { %3387 = vst.msk [vmem:[%s6245_s3 + $0x4] sm:$0xf] %vm3385_vm1, %v3787_v37  ;;  %v4021_v21 = vadd.f32 %v4020_v18, %v2949_v20  ;;  %v3890_v22 = vpop.f32.mrb[5].mxu0  ;;  %v4036_v20 = vadd.f32 %v5969_v1, %v5882_v9 }
 0x24f   :  { %v2952_v24 = vpop.f32.mrb[6].mxu0 }
 0x250   :  { %v3141_v25 = vmax.f32 %v4021_v21, 0.0  ;;  %v4023_v44 = vadd.f32 %v4022_v0, %v2952_v24  ;;  %v3891_v27 = vpop.f32.mrb[7].mxu0  ;;  %v4038_v21 = vadd.f32 %v5969_v1, %v5887_v12 }
 0x252   :  { %v3788_v28 = vpack.c.bf16 %v3141_v25, %v3141_v25  ;;  %v3142_v29 = vmax.f32 %v4023_v44, 0.0 }
 0x254   :  { %3388 = vst.msk [vmem:[%s6245_s3 + $0x8] sm:$0xf] %vm3385_vm1, %v3788_v28  ;;  %v3789_v47 = vpack.c.bf16 %v3142_v29, %v3142_v29 }
 0x255   :  { %v2957_v32 = vpop.f32.mrb[8].mxu0 }
 0x256   :  { %3389 = vst.msk [vmem:[%s6245_s3 + $0xc] sm:$0xf] %vm3385_vm1, %v3789_v47  ;;  %v4025_v35 = vadd.f32 %v4024_v30, %v2957_v32  ;;  %v3894_v36 = vpop.f32.mrb[9].mxu0  ;;  %v4040_v30 = vadd.f32 %v5969_v1, %v5897_v16  ;;  %v4042_v32 = vadd.f32 %v5969_v1, %v5902_v19 }
 0x257   :  { %v2960_v39 = vpop.f32.mrb[10].mxu0 }
 0x258   :  { %v3143_v41 = vmax.f32 %v4025_v35, 0.0  ;;  %v4027_v51 = vadd.f32 %v4026_v33, %v2960_v39  ;;  %v3895_v42 = vpop.f32.mrb[11].mxu0 }
 0x25a   :  { %v3790_v45 = vpack.c.bf16 %v3143_v41, %v3143_v41  ;;  %v3144_v46 = vmax.f32 %v4027_v51, 0.0 }
 0x25c   :  { %3390 = vst.msk [vmem:[%s6245_s3 + $0x10] sm:$0xf] %vm3385_vm1, %v3790_v45  ;;  %v3791_v54 = vpack.c.bf16 %v3144_v46, %v3144_v46  ;;  %v4044_v45 = vadd.f32 %v5969_v1, %v5912_v23 }
 0x25d   :  { %v2965_v52 = vpop.f32.mrb[12].mxu0 }
 0x25e   :  { %3391 = vst.msk [vmem:[%s6245_s3 + $0x14] sm:$0xf] %vm3385_vm1, %v3791_v54  ;;  %v4029_v56 = vadd.f32 %v4028_v49, %v2965_v52  ;;  %v3898_v59 = vpop.f32.mrb[13].mxu0  ;;  %v4046_v49 = vadd.f32 %v5969_v1, %v5917_v26 }
 0x25f   :  { %v2968_v38 = vpop.f32.mrb[14].mxu0 }
 0x260   :  { %v3145_v63 = vmax.f32 %v4029_v56, 0.0  ;;  %v4031_v58 = vadd.f32 %v4030_v53, %v2968_v38  ;;  %v3899_v3 = vpop.f32.mrb[15].mxu0 }
 0x262   :  { %v3792_v4 = vpack.c.bf16 %v3145_v63, %v3145_v63  ;;  %v3146_v6 = vmax.f32 %v4031_v58, 0.0  ;;  %v4048_v58 = vadd.f32 %v5969_v1, %v5930_v31 }
 0x264   :  { %3392 = vst.msk [vmem:[%s6245_s3 + $0x18] sm:$0xf] %vm3385_vm1, %v3792_v4  ;;  %v3793_v61 = vpack.c.bf16 %v3146_v6, %v3146_v6  ;;  %v4050_v4 = vadd.f32 %v5969_v1, %v5935_v34 }
 0x265   :  { %v2973_v8 = vpop.f32.mrb[16].mxu0 }
 0x266   :  { %3393 = vst.msk [vmem:[%s6245_s3 + $0x1c] sm:$0xf] %vm3385_vm1, %v3793_v61  ;;  %v4033_v11 = vadd.f32 %v4032_v7, %v2973_v8  ;;  %v3902_v13 = vpop.f32.mrb[17].mxu0 }
 0x267   :  { %v2976_v14 = vpop.f32.mrb[18].mxu0 }
 0x268   :  { %v3147_v15 = vmax.f32 %v4033_v11, 0.0  ;;  %v4035_v2 = vadd.f32 %v4034_v10, %v2976_v14  ;;  %v3903_v17 = vpop.f32.mrb[19].mxu0  ;;  %v4052_v14 = vadd.f32 %v5969_v1, %v5942_v40 }
 0x26a   :  { %v3794_v18 = vpack.c.bf16 %v3147_v15, %v3147_v15  ;;  %v3148_v37 = vmax.f32 %v4035_v2, 0.0  ;;  %v4054_v2 = vadd.f32 %v5969_v1, %v5944_v43 }
 0x26c   :  { %3394 = vst.msk [vmem:[%s6245_s3 + $0x20] sm:$0xf] %vm3385_vm1, %v3794_v18  ;;  %v3795_v5 = vpack.c.bf16 %v3148_v37, %v3148_v37 }
 0x26d   :  { %v2981_v0 = vpop.f32.mrb[20].mxu0 }
 0x26e   :  { %3395 = vst.msk [vmem:[%s6245_s3 + $0x24] sm:$0xf] %vm3385_vm1, %v3795_v5  ;;  %v4037_v22 = vadd.f32 %v4036_v20, %v2981_v0  ;;  %v3906_v24 = vpop.f32.mrb[21].mxu0 }
 0x26f   :  { %v2984_v25 = vpop.f32.mrb[22].mxu0 }
 0x270   :  { %v3149_v44 = vmax.f32 %v4037_v22, 0.0  ;;  %v4039_v9 = vadd.f32 %v4038_v21, %v2984_v25  ;;  %v3907_v27 = vpop.f32.mrb[23].mxu0  ;;  %v4056_v22 = vadd.f32 %v5969_v1, %v5951_v48  ;;  %v4058_v25 = vadd.f32 %v5969_v1, %v5953_v50 }
 0x272   :  { %v3796_v28 = vpack.c.bf16 %v3149_v44, %v3149_v44  ;;  %v3150_v29 = vmax.f32 %v4039_v9, 0.0 }
 0x274   :  { %3396 = vst.msk [vmem:[%s6245_s3 + $0x28] sm:$0xf] %vm3385_vm1, %v3796_v28  ;;  %v3797_v12 = vpack.c.bf16 %v3150_v29, %v3150_v29 }
 0x275   :  { %v2989_v47 = vpop.f32.mrb[24].mxu0 }
 0x276   :  { %3397 = vst.msk [vmem:[%s6245_s3 + $0x2c] sm:$0xf] %vm3385_vm1, %v3797_v12  ;;  %v4041_v33 = vadd.f32 %v4040_v30, %v2989_v47  ;;  %v3910_v35 = vpop.f32.mrb[25].mxu0  ;;  %v4060_v47 = vadd.f32 %v5969_v1, %v5958_v55 }
 0x277   :  { %v2992_v36 = vpop.f32.mrb[26].mxu0 }
 0x278   :  { %v3151_v39 = vmax.f32 %v4041_v33, 0.0  ;;  %v4043_v16 = vadd.f32 %v4042_v32, %v2992_v36  ;;  %v3911_v41 = vpop.f32.mrb[27].mxu0  ;;  %v4062_v33 = vadd.f32 %v5969_v1, %v5960_v57 }
 0x27a   :  { %v3798_v51 = vpack.c.bf16 %v3151_v39, %v3151_v39  ;;  %v3152_v42 = vmax.f32 %v4043_v16, 0.0 }
 0x27c   :  { %3398 = vst.msk [vmem:[%s6245_s3 + $0x30] sm:$0xf] %vm3385_vm1, %v3798_v51  ;;  %v3799_v19 = vpack.c.bf16 %v3152_v42, %v3152_v42 }
 0x27d   :  { %v2997_v46 = vpop.f32.mrb[28].mxu0 }
 0x27e   :  { %3399 = vst.msk [vmem:[%s6245_s3 + $0x34] sm:$0xf] %vm3385_vm1, %v3799_v19  ;;  %v4045_v54 = vadd.f32 %v4044_v45, %v2997_v46  ;;  %v3914_v52 = vpop.f32.mrb[29].mxu0  ;;  %v4064_v45 = vadd.f32 %v5969_v1, %v5962_v60 }
 0x27f   :  { %v3000_v53 = vpop.f32.mrb[30].mxu0 }
 0x280   :  { %v3153_v56 = vmax.f32 %v4045_v54, 0.0  ;;  %v4047_v23 = vadd.f32 %v4046_v49, %v3000_v53  ;;  %v3915_v59 = vpop.f32.mrb[31].mxu0  ;;  %v4066_v54 = vadd.f32 %v5969_v1, %v5964_v62 }
 0x282   :  { %v3800_v38 = vpack.c.bf16 %v3153_v56, %v3153_v56  ;;  %v3154_v63 = vmax.f32 %v4047_v23, 0.0 }
 0x284   :  { %3400 = vst.msk [vmem:[%s6245_s3 + $0x38] sm:$0xf] %vm3385_vm1, %v3800_v38  ;;  %v3801_v26 = vpack.c.bf16 %v3154_v63, %v3154_v63 }
 0x285   :  { %v3005_v3 = vpop.f32.mrb[32].mxu0 }
 0x286   :  { %3401 = vst.msk [vmem:[%s6245_s3 + $0x3c] sm:$0xf] %vm3385_vm1, %v3801_v26  ;;  %v4049_v6 = vadd.f32 %v4048_v58, %v3005_v3  ;;  %v3918_v7 = vpop.f32.mrb[33].mxu0 }
 0x287   :  { %v3008_v61 = vpop.f32.mrb[34].mxu0 }
 0x288   :  { %v3155_v8 = vmax.f32 %v4049_v6, 0.0  ;;  %v4051_v31 = vadd.f32 %v4050_v4, %v3008_v61  ;;  %v3919_v10 = vpop.f32.mrb[35].mxu0 }
 0x28a   :  { %v3802_v11 = vpack.c.bf16 %v3155_v8, %v3155_v8  ;;  %v3156_v13 = vmax.f32 %v4051_v31, 0.0 }
 0x28c   :  { %3402 = vst.msk [vmem:[%s6245_s3 + $0x40] sm:$0xf] %vm3385_vm1, %v3802_v11  ;;  %v3803_v34 = vpack.c.bf16 %v3156_v13, %v3156_v13 }
 0x28d   :  { %v3013_v15 = vpop.f32.mrb[36].mxu0 }
 0x28e   :  { %3403 = vst.msk [vmem:[%s6245_s3 + $0x44] sm:$0xf] %vm3385_vm1, %v3803_v34  ;;  %v4053_v17 = vadd.f32 %v4052_v14, %v3013_v15  ;;  %v3922_v18 = vpop.f32.mrb[37].mxu0 }
 0x28f   :  { %v3016_v37 = vpop.f32.mrb[38].mxu0 }
 0x290   :  { %v3157_v20 = vmax.f32 %v4053_v17, 0.0  ;;  %v4055_v40 = vadd.f32 %v4054_v2, %v3016_v37  ;;  %v3923_v5 = vpop.f32.mrb[39].mxu0 }
 0x292   :  { %v3804_v0 = vpack.c.bf16 %v3157_v20, %v3157_v20  ;;  %v3158_v21 = vmax.f32 %v4055_v40, 0.0 }
 0x294   :  { %3404 = vst.msk [vmem:[%s6245_s3 + $0x48] sm:$0xf] %vm3385_vm1, %v3804_v0  ;;  %v3805_v43 = vpack.c.bf16 %v3158_v21, %v3158_v21 }
 0x295   :  { %v3021_v24 = vpop.f32.mrb[40].mxu0 }
 0x296   :  { %3405 = vst.msk [vmem:[%s6245_s3 + $0x4c] sm:$0xf] %vm3385_vm1, %v3805_v43  ;;  %v4057_v44 = vadd.f32 %v4056_v22, %v3021_v24  ;;  %v3926_v9 = vpop.f32.mrb[41].mxu0 }
 0x297   :  { %v3024_v27 = vpop.f32.mrb[42].mxu0 }
 0x298   :  { %v3159_v28 = vmax.f32 %v4057_v44, 0.0  ;;  %v4059_v48 = vadd.f32 %v4058_v25, %v3024_v27  ;;  %v3927_v29 = vpop.f32.mrb[43].mxu0 }
 0x29a   :  { %v3806_v30 = vpack.c.bf16 %v3159_v28, %v3159_v28  ;;  %v3160_v12 = vmax.f32 %v4059_v48, 0.0 }
 0x29c   :  { %3406 = vst.msk [vmem:[%s6245_s3 + $0x50] sm:$0xf] %vm3385_vm1, %v3806_v30  ;;  %v3807_v50 = vpack.c.bf16 %v3160_v12, %v3160_v12 }
 0x29d   :  { %v3029_v32 = vpop.f32.mrb[44].mxu0 }
 0x29e   :  { %3407 = vst.msk [vmem:[%s6245_s3 + $0x54] sm:$0xf] %vm3385_vm1, %v3807_v50  ;;  %v4061_v35 = vadd.f32 %v4060_v47, %v3029_v32  ;;  %v3930_v36 = vpop.f32.mrb[45].mxu0 }
 0x29f   :  { %v3032_v39 = vpop.f32.mrb[46].mxu0 }
 0x2a0   :  { %v3161_v16 = vmax.f32 %v4061_v35, 0.0  ;;  %v4063_v55 = vadd.f32 %v4062_v33, %v3032_v39  ;;  %v3931_v41 = vpop.f32.mrb[47].mxu0 }
 0x2a2   :  { %v3808_v51 = vpack.c.bf16 %v3161_v16, %v3161_v16  ;;  %v3162_v42 = vmax.f32 %v4063_v55, 0.0 }
 0x2a4   :  { %3408 = vst.msk [vmem:[%s6245_s3 + $0x58] sm:$0xf] %vm3385_vm1, %v3808_v51  ;;  %v3809_v57 = vpack.c.bf16 %v3162_v42, %v3162_v42  ;;  %v2581_v19 = vpop.f32.mrb[52].mxu1 }
 0x2a5   :  { %v3037_v46 = vpop.f32.mrb[48].mxu0  ;;  %v2583_v49 = vpop.f32.mrb[53].mxu1  ;;  %v4068_v3 = vadd.f32 %v5969_v1, %v2581_v19 }
 0x2a6   :  { %3409 = vst.msk [vmem:[%s6245_s3 + $0x5c] sm:$0xf] %vm3385_vm1, %v3809_v57  ;;  %v4065_v52 = vadd.f32 %v4064_v45, %v3037_v46  ;;  %v3934_v53 = vpop.f32.mrb[49].mxu0  ;;  %v2584_v60 = vpop.f32.mrb[54].mxu1 }
 0x2a7   :  { %v3040_v56 = vpop.f32.mrb[50].mxu0  ;;  %v2586_v23 = vpop.f32.mrb[55].mxu1  ;;  %v4070_v61 = vadd.f32 %v5969_v1, %v2584_v60 }
 0x2a8   :  { %v3163_v59 = vmax.f32 %v4065_v52, 0.0  ;;  %v4067_v38 = vadd.f32 %v4066_v54, %v3040_v56  ;;  %v3935_v63 = vpop.f32.mrb[51].mxu0 }
 0x2aa   :  { %v3810_v58 = vpack.c.bf16 %v3163_v59, %v3163_v59  ;;  %v3164_v26 = vmax.f32 %v4067_v38, 0.0 }
 0x2ac   :  { %3410 = vst.msk [vmem:[%s6245_s3 + $0x60] sm:$0xf] %vm3385_vm1, %v3810_v58  ;;  %v3811_v62 = vpack.c.bf16 %v3164_v26, %v3164_v26  ;;  %v2589_v4 = vpop.f32.mrb[56].mxu1 }
 0x2ad   :  { %v3045_v6 = vpop.f32.mrb[52].mxu0  ;;  %v2591_v7 = vpop.f32.mrb[57].mxu1  ;;  %v4072_v18 = vadd.f32 %v5969_v1, %v2589_v4 }
 0x2ae   :  { %3411 = vst.msk [vmem:[%s6245_s3 + $0x64] sm:$0xf] %vm3385_vm1, %v3811_v62  ;;  %v4069_v8 = vadd.f32 %v4068_v3, %v3045_v6  ;;  %v3938_v31 = vpop.f32.mrb[53].mxu0  ;;  %v2592_v10 = vpop.f32.mrb[58].mxu1 }
 0x2af   :  { %v3048_v11 = vpop.f32.mrb[54].mxu0  ;;  %v2594_v13 = vpop.f32.mrb[59].mxu1  ;;  %v4074_v0 = vadd.f32 %v5969_v1, %v2592_v10 }
 0x2b0   :  { %v3165_v14 = vmax.f32 %v4069_v8, 0.0  ;;  %v4071_v34 = vadd.f32 %v4070_v61, %v3048_v11  ;;  %v3939_v15 = vpop.f32.mrb[55].mxu0 }
 0x2b2   :  { %v3812_v2 = vpack.c.bf16 %v3165_v14, %v3165_v14  ;;  %v3166_v17 = vmax.f32 %v4071_v34, 0.0 }
 0x2b4   :  { %3412 = vst.msk [vmem:[%s6245_s3 + $0x68] sm:$0xf] %vm3385_vm1, %v3812_v2  ;;  %v3813_v37 = vpack.c.bf16 %v3166_v17, %v3166_v17  ;;  %v2597_v20 = vpop.f32.mrb[60].mxu1 }
 0x2b5   :  { %v3053_v40 = vpop.f32.mrb[56].mxu0  ;;  %v2599_v5 = vpop.f32.mrb[61].mxu1  ;;  %v4076_v29 = vadd.f32 %v5969_v1, %v2597_v20 }
 0x2b6   :  { %3413 = vst.msk [vmem:[%s6245_s3 + $0x6c] sm:$0xf] %vm3385_vm1, %v3813_v37  ;;  %v4073_v21 = vadd.f32 %v4072_v18, %v3053_v40  ;;  %v3942_v22 = vpop.f32.mrb[57].mxu0  ;;  %v2600_v43 = vpop.f32.mrb[62].mxu1 }
 0x2b7   :  { %v3056_v24 = vpop.f32.mrb[58].mxu0  ;;  %v2602_v25 = vpop.f32.mrb[63].mxu1  ;;  %v4078_v32 = vadd.f32 %v5969_v1, %v2600_v43 }
 0x2b8   :  { %v3167_v44 = vmax.f32 %v4073_v21, 0.0  ;;  %v4075_v9 = vadd.f32 %v4074_v0, %v3056_v24  ;;  %v3943_v27 = vpop.f32.mrb[59].mxu0 }
 0x2ba   :  { %v3814_v28 = vpack.c.bf16 %v3167_v44, %v3167_v44  ;;  %v3168_v48 = vmax.f32 %v4075_v9, 0.0 }
 0x2bc   :  { %3414 = vst.msk [vmem:[%s6245_s3 + $0x70] sm:$0xf] %vm3385_vm1, %v3814_v28  ;;  %v3815_v30 = vpack.c.bf16 %v3168_v48, %v3168_v48  ;;  %v2605_v12 = vpop.f32.mrb[64].mxu1 }
 0x2bd   :  { %v3061_v47 = vpop.f32.mrb[60].mxu0  ;;  %v2607_v50 = vpop.f32.mrb[65].mxu1  ;;  %v4080_v57 = vadd.f32 %v5969_v1, %v2605_v12 }
 0x2be   :  { %3415 = vst.msk [vmem:[%s6245_s3 + $0x74] sm:$0xf] %vm3385_vm1, %v3815_v30  ;;  %v4077_v33 = vadd.f32 %v4076_v29, %v3061_v47  ;;  %v3946_v35 = vpop.f32.mrb[61].mxu0  ;;  %v2608_v36 = vpop.f32.mrb[66].mxu1 }
 0x2bf   :  { %v3064_v39 = vpop.f32.mrb[62].mxu0  ;;  %v2610_v16 = vpop.f32.mrb[67].mxu1  ;;  %v4082_v52 = vadd.f32 %v5969_v1, %v2608_v36 }
 0x2c0   :  { %v3169_v55 = vmax.f32 %v4077_v33, 0.0  ;;  %v4079_v41 = vadd.f32 %v4078_v32, %v3064_v39  ;;  %v3947_v51 = vpop.f32.mrb[63].mxu0 }
 0x2c2   :  { %v3816_v42 = vpack.c.bf16 %v3169_v55, %v3169_v55  ;;  %v3170_v45 = vmax.f32 %v4079_v41, 0.0 }
 0x2c4   :  { %3416 = vst.msk [vmem:[%s6245_s3 + $0x78] sm:$0xf] %vm3385_vm1, %v3816_v42  ;;  %v3817_v19 = vpack.c.bf16 %v3170_v45, %v3170_v45  ;;  %v2613_v46 = vpop.f32.mrb[68].mxu1 }
 0x2c5   :  { %v3069_v49 = vpop.f32.mrb[64].mxu0  ;;  %v2615_v54 = vpop.f32.mrb[69].mxu1  ;;  %v4084_v62 = vadd.f32 %v5969_v1, %v2613_v46 }
 0x2c6   :  { %3417 = vst.msk [vmem:[%s6245_s3 + $0x7c] sm:$0xf] %vm3385_vm1, %v3817_v19  ;;  %v4081_v53 = vadd.f32 %v4080_v57, %v3069_v49  ;;  %v3950_v60 = vpop.f32.mrb[65].mxu0  ;;  %v2616_v56 = vpop.f32.mrb[70].mxu1 }
 0x2c7   :  { %v3072_v23 = vpop.f32.mrb[66].mxu0  ;;  %v2618_v59 = vpop.f32.mrb[71].mxu1  ;;  %v4086_v8 = vadd.f32 %v5969_v1, %v2616_v56 }
 0x2c8   :  { %v3171_v38 = vmax.f32 %v4081_v53, 0.0  ;;  %v4083_v63 = vadd.f32 %v4082_v52, %v3072_v23  ;;  %v3951_v58 = vpop.f32.mrb[67].mxu0 }
 0x2ca   :  { %v3818_v26 = vpack.c.bf16 %v3171_v38, %v3171_v38  ;;  %v3172_v3 = vmax.f32 %v4083_v63, 0.0 }
 0x2cc   :  { %3418 = vst.msk [vmem:[%s6245_s3 + $0x80] sm:$0xf] %vm3385_vm1, %v3818_v26  ;;  %v3819_v4 = vpack.c.bf16 %v3172_v3, %v3172_v3  ;;  %v2621_v6 = vpop.f32.mrb[72].mxu1 }
 0x2cd   :  { %v3077_v7 = vpop.f32.mrb[68].mxu0  ;;  %v2623_v61 = vpop.f32.mrb[73].mxu1  ;;  %v4088_v37 = vadd.f32 %v5969_v1, %v2621_v6 }
 0x2ce   :  { %3419 = vst.msk [vmem:[%s6245_s3 + $0x84] sm:$0xf] %vm3385_vm1, %v3819_v4  ;;  %v4085_v31 = vadd.f32 %v4084_v62, %v3077_v7  ;;  %v3954_v10 = vpop.f32.mrb[69].mxu0  ;;  %v2624_v11 = vpop.f32.mrb[74].mxu1 }
 0x2cf   :  { %v3080_v13 = vpop.f32.mrb[70].mxu0  ;;  %v2626_v14 = vpop.f32.mrb[75].mxu1  ;;  %v4090_v21 = vadd.f32 %v5969_v1, %v2624_v11 }
 0x2d0   :  { %v3173_v34 = vmax.f32 %v4085_v31, 0.0  ;;  %v4087_v15 = vadd.f32 %v4086_v8, %v3080_v13  ;;  %v3955_v2 = vpop.f32.mrb[71].mxu0 }
 0x2d2   :  { %v3820_v17 = vpack.c.bf16 %v3173_v34, %v3173_v34  ;;  %v3174_v18 = vmax.f32 %v4087_v15, 0.0 }
 0x2d4   :  { %3420 = vst.msk [vmem:[%s6245_s3 + $0x88] sm:$0xf] %vm3385_vm1, %v3820_v17  ;;  %v3821_v20 = vpack.c.bf16 %v3174_v18, %v3174_v18  ;;  %v2629_v40 = vpop.f32.mrb[76].mxu1 }
 0x2d5   :  { %v3085_v5 = vpop.f32.mrb[72].mxu0  ;;  %v2631_v0 = vpop.f32.mrb[77].mxu1  ;;  %v4092_v30 = vadd.f32 %v5969_v1, %v2629_v40 }
 0x2d6   :  { %3421 = vst.msk [vmem:[%s6245_s3 + $0x8c] sm:$0xf] %vm3385_vm1, %v3821_v20  ;;  %v4089_v22 = vadd.f32 %v4088_v37, %v3085_v5  ;;  %v3958_v43 = vpop.f32.mrb[73].mxu0  ;;  %v2632_v24 = vpop.f32.mrb[78].mxu1 }
 0x2d7   :  { %v3088_v25 = vpop.f32.mrb[74].mxu0  ;;  %v2634_v44 = vpop.f32.mrb[79].mxu1  ;;  %v4094_v33 = vadd.f32 %v5969_v1, %v2632_v24 }
 0x2d8   :  { %v3175_v9 = vmax.f32 %v4089_v22, 0.0  ;;  %v4091_v27 = vadd.f32 %v4090_v21, %v3088_v25  ;;  %v3959_v28 = vpop.f32.mrb[75].mxu0 }
 0x2da   :  { %v3822_v48 = vpack.c.bf16 %v3175_v9, %v3175_v9  ;;  %v3176_v29 = vmax.f32 %v4091_v27, 0.0 }
 0x2dc   :  { %3422 = vst.msk [vmem:[%s6245_s3 + $0x90] sm:$0xf] %vm3385_vm1, %v3822_v48  ;;  %v3823_v12 = vpack.c.bf16 %v3176_v29, %v3176_v29  ;;  %v2637_v47 = vpop.f32.mrb[80].mxu1 }
 0x2dd   :  { %v3093_v50 = vpop.f32.mrb[76].mxu0  ;;  %v2639_v32 = vpop.f32.mrb[81].mxu1  ;;  %v4096_v19 = vadd.f32 %v5969_v1, %v2637_v47 }
 0x2de   :  { %3423 = vst.msk [vmem:[%s6245_s3 + $0x94] sm:$0xf] %vm3385_vm1, %v3823_v12  ;;  %v4093_v35 = vadd.f32 %v4092_v30, %v3093_v50  ;;  %v3962_v36 = vpop.f32.mrb[77].mxu0  ;;  %v2640_v39 = vpop.f32.mrb[82].mxu1 }
 0x2df   :  { %v3096_v16 = vpop.f32.mrb[78].mxu0  ;;  %v2642_v55 = vpop.f32.mrb[83].mxu1  ;;  %v4098_v53 = vadd.f32 %v5969_v1, %v2640_v39 }
 0x2e0   :  { %v3177_v41 = vmax.f32 %v4093_v35, 0.0  ;;  %v4095_v51 = vadd.f32 %v4094_v33, %v3096_v16  ;;  %v3963_v42 = vpop.f32.mrb[79].mxu0 }
 0x2e2   :  { %v3824_v45 = vpack.c.bf16 %v3177_v41, %v3177_v41  ;;  %v3178_v57 = vmax.f32 %v4095_v51, 0.0 }
 0x2e4   :  { %3424 = vst.msk [vmem:[%s6245_s3 + $0x98] sm:$0xf] %vm3385_vm1, %v3824_v45  ;;  %v3825_v46 = vpack.c.bf16 %v3178_v57, %v3178_v57  ;;  %v2645_v49 = vpop.f32.mrb[84].mxu1 }
 0x2e5   :  { %v3101_v54 = vpop.f32.mrb[80].mxu0  ;;  %v2647_v52 = vpop.f32.mrb[85].mxu1  ;;  %v4100_v4 = vadd.f32 %v5969_v1, %v2645_v49 }
 0x2e6   :  { %3425 = vst.msk [vmem:[%s6245_s3 + $0x9c] sm:$0xf] %vm3385_vm1, %v3825_v46  ;;  %v4097_v60 = vadd.f32 %v4096_v19, %v3101_v54  ;;  %v3966_v56 = vpop.f32.mrb[81].mxu0  ;;  %v2648_v23 = vpop.f32.mrb[86].mxu1 }
 0x2e7   :  { %v3104_v59 = vpop.f32.mrb[82].mxu0  ;;  %v2650_v38 = vpop.f32.mrb[87].mxu1  ;;  %v4102_v31 = vadd.f32 %v5969_v1, %v2648_v23 }
 0x2e8   :  { %v3179_v63 = vmax.f32 %v4097_v60, 0.0  ;;  %v4099_v58 = vadd.f32 %v4098_v53, %v3104_v59  ;;  %v3967_v26 = vpop.f32.mrb[83].mxu0 }
 0x2ea   :  { %v3826_v3 = vpack.c.bf16 %v3179_v63, %v3179_v63  ;;  %v3180_v62 = vmax.f32 %v4099_v58, 0.0 }
 0x2ec   :  { %3426 = vst.msk [vmem:[%s6245_s3 + $0xa0] sm:$0xf] %vm3385_vm1, %v3826_v3  ;;  %v3827_v6 = vpack.c.bf16 %v3180_v62, %v3180_v62  ;;  %v2653_v7 = vpop.f32.mrb[88].mxu1 }
 0x2ed   :  { %v3109_v61 = vpop.f32.mrb[84].mxu0  ;;  %v2655_v8 = vpop.f32.mrb[89].mxu1  ;;  %v4104_v20 = vadd.f32 %v5969_v1, %v2653_v7 }
 0x2ee   :  { %3427 = vst.msk [vmem:[%s6245_s3 + $0xa4] sm:$0xf] %vm3385_vm1, %v3827_v6  ;;  %v4101_v10 = vadd.f32 %v4100_v4, %v3109_v61  ;;  %v3970_v11 = vpop.f32.mrb[85].mxu0  ;;  %v2656_v13 = vpop.f32.mrb[90].mxu1 }
 0x2ef   :  { %v3112_v14 = vpop.f32.mrb[86].mxu0  ;;  %v2658_v34 = vpop.f32.mrb[91].mxu1  ;;  %v4106_v22 = vadd.f32 %v5969_v1, %v2656_v13 }
 0x2f0   :  { %v3181_v15 = vmax.f32 %v4101_v10, 0.0  ;;  %v4103_v2 = vadd.f32 %v4102_v31, %v3112_v14  ;;  %v3971_v17 = vpop.f32.mrb[87].mxu0 }
 0x2f2   :  { %v3828_v18 = vpack.c.bf16 %v3181_v15, %v3181_v15  ;;  %v3182_v37 = vmax.f32 %v4103_v2, 0.0 }
 0x2f4   :  { %3428 = vst.msk [vmem:[%s6245_s3 + $0xa8] sm:$0xf] %vm3385_vm1, %v3828_v18  ;;  %v3829_v40 = vpack.c.bf16 %v3182_v37, %v3182_v37  ;;  %v2661_v5 = vpop.f32.mrb[92].mxu1 }
 0x2f5   :  { %v3117_v0 = vpop.f32.mrb[88].mxu0  ;;  %v2663_v21 = vpop.f32.mrb[93].mxu1  ;;  %v4108_v12 = vadd.f32 %v5969_v1, %v2661_v5 }
 0x2f6   :  { %3429 = vst.msk [vmem:[%s6245_s3 + $0xac] sm:$0xf] %vm3385_vm1, %v3829_v40  ;;  %v4105_v43 = vadd.f32 %v4104_v20, %v3117_v0  ;;  %v3974_v24 = vpop.f32.mrb[89].mxu0  ;;  %v2664_v25 = vpop.f32.mrb[94].mxu1 }
 0x2f7   :  { %v3120_v44 = vpop.f32.mrb[90].mxu0  ;;  %v2666_v9 = vpop.f32.mrb[95].mxu1  ;;  %v4110_v35 = vadd.f32 %v5969_v1, %v2664_v25 }
 0x2f8   :  { %v3183_v27 = vmax.f32 %v4105_v43, 0.0  ;;  %v4107_v28 = vadd.f32 %v4106_v22, %v3120_v44  ;;  %v3975_v48 = vpop.f32.mrb[91].mxu0 }
 0x2fa   :  { %v3830_v29 = vpack.c.bf16 %v3183_v27, %v3183_v27  ;;  %v3184_v30 = vmax.f32 %v4107_v28, 0.0 }
 0x2fc   :  { %3430 = vst.msk [vmem:[%s6245_s3 + $0xb0] sm:$0xf] %vm3385_vm1, %v3830_v29  ;;  %v3831_v47 = vpack.c.bf16 %v3184_v30, %v3184_v30  ;;  %v2669_v50 = vpop.f32.mrb[96].mxu1 }
 0x2fd   :  { %v3125_v32 = vpop.f32.mrb[92].mxu0  ;;  %v2671_v33 = vpop.f32.mrb[97].mxu1  ;;  %v4112_v46 = vadd.f32 %v5969_v1, %v2669_v50 }
 0x2fe   :  { %3431 = vst.msk [vmem:[%s6245_s3 + $0xb4] sm:$0xf] %vm3385_vm1, %v3831_v47  ;;  %v4109_v36 = vadd.f32 %v4108_v12, %v3125_v32  ;;  %v3978_v39 = vpop.f32.mrb[93].mxu0  ;;  %v2672_v16 = vpop.f32.mrb[98].mxu1 }
 0x2ff   :  { %v3128_v55 = vpop.f32.mrb[94].mxu0  ;;  %v2673_v41 = vpop.f32.mrb[99].mxu1 }
 0x300   :  { %v3185_v51 = vmax.f32 %v4109_v36, 0.0  ;;  %v4111_v42 = vadd.f32 %v4110_v35, %v3128_v55  ;;  %v3979_v45 = vpop.f32.mrb[95].mxu0 }
 0x302   :  { %v3832_v57 = vpack.c.bf16 %v3185_v51, %v3185_v51  ;;  %v3186_v19 = vmax.f32 %v4111_v42, 0.0 }
 0x304   :  { %3432 = vst.msk [vmem:[%s6245_s3 + $0xb8] sm:$0xf] %vm3385_vm1, %v3832_v57  ;;  %v3833_v49 = vpack.c.bf16 %v3186_v19, %v3186_v19 }
 0x305   :  { %v3133_v54 = vpop.f32.mrb[96].mxu0 }
 0x306   :  { %3433 = vst.msk [vmem:[%s6245_s3 + $0xbc] sm:$0xf] %vm3385_vm1, %v3833_v49  ;;  %v4113_v52 = vadd.f32 %v4112_v46, %v3133_v54  ;;  %v3982_v53 = vpop.f32.mrb[97].mxu0 }
 0x307   :  { %v3136_v60 = vpop.f32.mrb[98].mxu0 }
 0x308   :  { %v3187_v56 = vmax.f32 %v4113_v52, 0.0  ;;  %v3983_v23 = vpop.f32.mrb[99].mxu0 }
 0x30a   :  { %v3834_v59 = vpack.c.bf16 %v3187_v56, %v3187_v56 }
 0x30c   :  { %3434 = vst.msk [vmem:[%s6245_s3 + $0xc0] sm:$0xf] %vm3385_vm1, %v3834_v59 }

// kernel: vae_forward.13
= control target key start
LH: loop header
LB: loop body
LE: loop exit
PB: predicated region body
PF: predicated region fallthrough
CT: control target
= control target key end

     0   :  { %v5356_v22 = vmov 0   ;;  %v528_v37 = vlaneseq  ;;  %v5357_v38 = vmov 1966171168   ;;  %vm2952_vm0 = vcmask 523264   ;;  %s6912_s1 = inlined_call_operand.vmem [shape: bf16[576,1568], index: 1, kind: input, shape index: {}]   ;;  %s6913_s0 = inlined_call_operand.vmem [shape: bf16[1,576], index: 0, kind: input, shape index: {}]   ;;  %s6914_s2 = inlined_call_operand.<no memory space> [shape: f32[1,1], index: 2, kind: input, shape index: {}]   ;;  %s6915_s3 = inlined_call_operand.vmem [shape: f32[1,1568], index: 3, kind: output, shape index: {}]  }
   0x1   :  { %v4619_v0 = vld [vmem:[%s6912_s1 + $0x4] ss:$52 sps:$4 sm:$0xff]   ;;  %v4621_v1 = vld [vmem:[%s6912_s1 + $0xc] ss:$52 sps:$4 sm:$0xff]   ;;  %v4624_v3 = vld [vmem:[%s6912_s1 + $0x8] ss:$52 sps:$4 sm:$0xff]   ;;  %4618 = vset.pattern.permute.xlu0 %v5356_v22  ;;  %v535_v39 = vunpack.c.l.s4 %v5357_v38 }
   0x2   :  { %2956 = vmatprep.subr.bf16.mxu0 %v4619_v0  ;;  %v4623_v2 = vld [vmem:[%s6912_s1] ss:$52 sps:$4 sm:$0xff]   ;;  %3079 = vmatprep.subr.bf16.mxu1 %v4621_v1  ;;  %v4629_v6 = vld [vmem:[%s6912_s1 + $0x68] ss:$52 sps:$4 sm:$0xff]   ;;  %v4630_v7 = vld [vmem:[%s6912_s1 + $0x70] ss:$52 sps:$4 sm:$0xff]  }
   0x3   :  { %v4625_v4 = vld [vmem:[%s6912_s1 + $0x6c] ss:$52 sps:$4 sm:$0xff]   ;;  %2957 = vmatpush1.bf16.msra.mxu0 %v4623_v2  ;;  %3080 = vmatpush1.bf16.msra.mxu1 %v4624_v3  ;;  %v4627_v5 = vld [vmem:[%s6912_s1 + $0x74] ss:$52 sps:$4 sm:$0xff]   ;;  %v4633_v9 = vld [vmem:[%s6912_s1 + $0xdc] ss:$52 sps:$4 sm:$0xff]   ;;  %v536_v44 = vunpack.c.0.s8 %v535_v39 }
   0x4   :  { %2958 = vmatprep.subr.bf16.mxu0 %v4625_v4  ;;  %3081 = vmatprep.subr.bf16.mxu1 %v4627_v5  ;;  %v4631_v8 = vld [vmem:[%s6912_s1 + $0xd4] ss:$52 sps:$4 sm:$0xff]   ;;  %v4635_v10 = vld [vmem:[%s6912_s1 + $0xd0] ss:$52 sps:$4 sm:$0xff]   ;;  %v4636_v11 = vld [vmem:[%s6912_s1 + $0xd8] ss:$52 sps:$4 sm:$0xff]  }
   0x5   :  { %v4637_v12 = vld [vmem:[%s6912_s1 + $0x13c] ss:$52 sps:$4 sm:$0xff]   ;;  %v4639_v13 = vld [vmem:[%s6912_s1 + $0x144] ss:$52 sps:$4 sm:$0xff]   ;;  %v4642_v15 = vld [vmem:[%s6912_s1 + $0x140] ss:$52 sps:$4 sm:$0xff]  }
   0x6   :  { %v4641_v14 = vld [vmem:[%s6912_s1 + $0x138] ss:$52 sps:$4 sm:$0xff]   ;;  %v4647_v18 = vld [vmem:[%s6912_s1 + $0x1a0] ss:$52 sps:$4 sm:$0xff]   ;;  %v4648_v19 = vld [vmem:[%s6912_s1 + $0x1a8] ss:$52 sps:$4 sm:$0xff]  }
   0x7   :  { %2959 = vmatpush1.bf16.msra.mxu0 %v4629_v6  ;;  %3082 = vmatpush1.bf16.msra.mxu1 %v4630_v7  ;;  %v4643_v16 = vld [vmem:[%s6912_s1 + $0x1a4] ss:$52 sps:$4 sm:$0xff]   ;;  %v4645_v17 = vld [vmem:[%s6912_s1 + $0x1ac] ss:$52 sps:$4 sm:$0xff]   ;;  %v4651_v21 = vld [vmem:[%s6912_s1 + $0x214] ss:$52 sps:$4 sm:$0xff]  }
   0x8   :  { %2960 = vmatprep.subr.bf16.mxu0 %v4631_v8  ;;  %3083 = vmatprep.subr.bf16.mxu1 %v4633_v9  ;;  %v4649_v20 = vld [vmem:[%s6912_s1 + $0x20c] ss:$52 sps:$4 sm:$0xff]   ;;  %v4653_v23 = vld [vmem:[%s6912_s1 + $0x208] ss:$52 sps:$4 sm:$0xff]   ;;  %v4654_v24 = vld [vmem:[%s6912_s1 + $0x210] ss:$52 sps:$4 sm:$0xff]  }
   0x9   :  { %v4655_v25 = vld [vmem:[%s6912_s1 + $0x274] ss:$52 sps:$4 sm:$0xff]   ;;  %v4657_v26 = vld [vmem:[%s6912_s1 + $0x27c] ss:$52 sps:$4 sm:$0xff]   ;;  %v4660_v28 = vld [vmem:[%s6912_s1 + $0x278] ss:$52 sps:$4 sm:$0xff]  }
   0xa   :  { %v4659_v27 = vld [vmem:[%s6912_s1 + $0x270] ss:$52 sps:$4 sm:$0xff]   ;;  %v4665_v31 = vld [vmem:[%s6912_s1 + $0x2d8] ss:$52 sps:$4 sm:$0xff]   ;;  %v4666_v32 = vld [vmem:[%s6912_s1 + $0x2e0] ss:$52 sps:$4 sm:$0xff]  }
   0xb   :  { %2961 = vmatpush1.bf16.msra.mxu0 %v4635_v10  ;;  %3084 = vmatpush1.bf16.msra.mxu1 %v4636_v11  ;;  %v4661_v29 = vld [vmem:[%s6912_s1 + $0x2dc] ss:$52 sps:$4 sm:$0xff]   ;;  %v4663_v30 = vld [vmem:[%s6912_s1 + $0x2e4] ss:$52 sps:$4 sm:$0xff]   ;;  %v4669_v34 = vld [vmem:[%s6912_s1 + $0x34c] ss:$52 sps:$4 sm:$0xff]  }
   0xc   :  { %2962 = vmatprep.subr.bf16.mxu0 %v4637_v12  ;;  %3085 = vmatprep.subr.bf16.mxu1 %v4639_v13  ;;  %v4667_v33 = vld [vmem:[%s6912_s1 + $0x344] ss:$52 sps:$4 sm:$0xff]   ;;  %v4671_v35 = vld [vmem:[%s6912_s1 + $0x340] ss:$52 sps:$4 sm:$0xff]   ;;  %v4672_v36 = vld [vmem:[%s6912_s1 + $0x348] ss:$52 sps:$4 sm:$0xff]  }
   0xd   :  { %v4673_v40 = vld [vmem:[%s6912_s1 + $0x3ac] ss:$52 sps:$4 sm:$0xff]   ;;  %v4675_v41 = vld [vmem:[%s6912_s1 + $0x3b4] ss:$52 sps:$4 sm:$0xff]   ;;  %v5499_v43 = vshrl.u32 %v528_v37, 7  ;;  %vm5359_vm1 = vmmov 0  }
   0xe   :  { %v4677_v42 = vld [vmem:[%s6912_s1 + $0x3a8] ss:$52 sps:$4 sm:$0xff]   ;;  %v4678_v45 = vld [vmem:[%s6912_s1 + $0x3b0] ss:$52 sps:$4 sm:$0xff]   ;;  %v4684_v49 = vld [vmem:[%s6912_s1 + $0x418] ss:$52 sps:$4 sm:$0xff]  }
   0xf   :  { %2963 = vmatpush1.bf16.msra.mxu0 %v4641_v14  ;;  %3086 = vmatpush1.bf16.msra.mxu1 %v4642_v15  ;;  %v4679_v46 = vld [vmem:[%s6912_s1 + $0x414] ss:$52 sps:$4 sm:$0xff]   ;;  %v4681_v47 = vld [vmem:[%s6912_s1 + $0x41c] ss:$52 sps:$4 sm:$0xff]   ;;  %v5517_v50 = vsub.s32 %v536_v44, %v5499_v43  ;;  %v4687_v52 = vld [vmem:[%s6912_s1 + $0x484] ss:$52 sps:$4 sm:$0xff]  }
  0x10   :  { %2964 = vmatprep.subr.bf16.mxu0 %v4643_v16  ;;  %3087 = vmatprep.subr.bf16.mxu1 %v4645_v17  ;;  %v4683_v48 = vld [vmem:[%s6912_s1 + $0x410] ss:$52 sps:$4 sm:$0xff]   ;;  %v4689_v54 = vld [vmem:[%s6912_s1 + $0x478] ss:$52 sps:$4 sm:$0xff]   ;;  %v4690_v56 = vld [vmem:[%s6912_s1 + $0x480] ss:$52 sps:$4 sm:$0xff]  }
  0x11   :  { %v4685_v51 = vld [vmem:[%s6912_s1 + $0x47c] ss:$52 sps:$4 sm:$0xff]   ;;  %v5528_v53 = vld [vmem:[%s6913_s0] sm:$0x1f]  ;;  %v4699_v0 = vld [vmem:[%s6912_s1 + $0x554] ss:$52 sps:$4 sm:$0xff]  }
  0x12   :  { %v540_v55 = vrot.slane %v5528_v53, %v5517_v50  ;;  %v4691_v57 = vld [vmem:[%s6912_s1 + $0x4e4] ss:$52 sps:$4 sm:$0xff]   ;;  %v4693_v58 = vld [vmem:[%s6912_s1 + $0x4ec] ss:$52 sps:$4 sm:$0xff]   ;;  %v4696_v62 = vld [vmem:[%s6912_s1 + $0x4e8] ss:$52 sps:$4 sm:$0xff]  }
  0x13   :  { %2965 = vmatpush1.bf16.msra.mxu0 %v4647_v18  ;;  %3088 = vmatpush1.bf16.msra.mxu1 %v4648_v19  ;;  %v4695_v60 = vld [vmem:[%s6912_s1 + $0x4e0] ss:$52 sps:$4 sm:$0xff]   ;;  %v4701_v1 = vld [vmem:[%s6912_s1 + $0x548] ss:$52 sps:$4 sm:$0xff]   ;;  %v4702_v2 = vld [vmem:[%s6912_s1 + $0x550] ss:$52 sps:$4 sm:$0xff]  }
  0x14   :  { %2966 = vmatprep.subr.bf16.mxu0 %v4649_v20  ;;  %3089 = vmatprep.subr.bf16.mxu1 %v4651_v21  ;;  %v548_v59 = vcombine.high %v540_v55, %v540_v55  ;;  %v4697_v63 = vld [vmem:[%s6912_s1 + $0x54c] ss:$52 sps:$4 sm:$0xff]   ;;  %v4703_v3 = vld [vmem:[%s6912_s1 + $0x5b4] ss:$52 sps:$4 sm:$0xff]   ;;  %v4705_v4 = vld [vmem:[%s6912_s1 + $0x5bc] ss:$52 sps:$4 sm:$0xff]   ;;  %v5601_v14 = vrot.slane %v540_v55, %v5517_v50 }
  0x15   :  { %v4707_v5 = vld [vmem:[%s6912_s1 + $0x5b0] ss:$52 sps:$4 sm:$0xff]   ;;  %v4708_v6 = vld [vmem:[%s6912_s1 + $0x5b8] ss:$52 sps:$4 sm:$0xff]   ;;  %v4714_v10 = vld [vmem:[%s6912_s1 + $0x620] ss:$52 sps:$4 sm:$0xff]  }
  0x16   :  { %v5548_v61 = vrot.slane %v548_v59, %v5517_v50  ;;  %v4709_v7 = vld [vmem:[%s6912_s1 + $0x61c] ss:$52 sps:$4 sm:$0xff]   ;;  %v4711_v8 = vld [vmem:[%s6912_s1 + $0x624] ss:$52 sps:$4 sm:$0xff]   ;;  %v4720_v12 = vld [vmem:[%s6912_s1 + $0x68c] ss:$52 sps:$4 sm:$0xff]  }
  0x17   :  { %2967 = vmatpush1.bf16.msra.mxu0 %v4653_v23  ;;  %3090 = vmatpush1.bf16.msra.mxu1 %v4654_v24  ;;  %v4713_v9 = vld [vmem:[%s6912_s1 + $0x618] ss:$52 sps:$4 sm:$0xff]   ;;  %v4715_v13 = vld [vmem:[%s6912_s1 + $0x680] ss:$52 sps:$4 sm:$0xff]   ;;  %v4718_v15 = vld [vmem:[%s6912_s1 + $0x688] ss:$52 sps:$4 sm:$0xff]  }
  0x18   :  { %2968 = vmatprep.subr.bf16.mxu0 %v4655_v25  ;;  %3091 = vmatprep.subr.bf16.mxu1 %v4657_v26  ;;  %v4717_v11 = vld [vmem:[%s6912_s1 + $0x684] ss:$52 sps:$4 sm:$0xff]   ;;  %v4723_v16 = vld [vmem:[%s6912_s1 + $0x6ec] ss:$52 sps:$4 sm:$0xff]   ;;  %v4726_v17 = vld [vmem:[%s6912_s1 + $0x6f4] ss:$52 sps:$4 sm:$0xff]   ;;  %v5614_v18 = vcombine.high %v5548_v61, %v5548_v61 }
  0x19   :  { %2988 = vmatprep.mubr.bf16.mxu0 %v5548_v61  ;;  %3111 = vmatprep.mubr.bf16.mxu1 %v5548_v61  ;;  %v4721_v19 = vld [vmem:[%s6912_s1 + $0x6e8] ss:$52 sps:$4 sm:$0xff]   ;;  %v4724_v20 = vld [vmem:[%s6912_s1 + $0x6f0] ss:$52 sps:$4 sm:$0xff]   ;;  %v4730_v25 = vld [vmem:[%s6912_s1 + $0x758] ss:$52 sps:$4 sm:$0xff]  }
  0x1a   :  { %v4729_v21 = vld [vmem:[%s6912_s1 + $0x754] ss:$52 sps:$4 sm:$0xff]   ;;  %v4732_v23 = vld [vmem:[%s6912_s1 + $0x75c] ss:$52 sps:$4 sm:$0xff]   ;;  %v4771_v55 = vld [vmem:[%s6912_s1 + $0xa2c] ss:$52 sps:$4 sm:$0xff]  }
  0x1b   :  { %2969 = vmatpush1.bf16.msra.mxu0 %v4659_v27  ;;  %3092 = vmatpush1.bf16.msra.mxu1 %v4660_v28  ;;  %v4727_v24 = vld [vmem:[%s6912_s1 + $0x750] ss:$52 sps:$4 sm:$0xff]   ;;  %v4733_v28 = vld [vmem:[%s6912_s1 + $0x7b8] ss:$52 sps:$4 sm:$0xff]   ;;  %v4753_v39 = vld [vmem:[%s6912_s1 + $0x8f4] ss:$52 sps:$4 sm:$0xff]  }
  0x1c   :  { %2970 = vmatprep.subr.bf16.mxu0 %v4661_v29  ;;  %3093 = vmatprep.subr.bf16.mxu1 %v4663_v30  ;;  %v4735_v26 = vld [vmem:[%s6912_s1 + $0x7bc] ss:$52 sps:$4 sm:$0xff]   ;;  %v4738_v27 = vld [vmem:[%s6912_s1 + $0x7c4] ss:$52 sps:$4 sm:$0xff]   ;;  %v4736_v29 = vld [vmem:[%s6912_s1 + $0x7c0] ss:$52 sps:$4 sm:$0xff]  }
  0x1d   :  { %v4741_v30 = vld [vmem:[%s6912_s1 + $0x824] ss:$52 sps:$4 sm:$0xff]   ;;  %v4759_v44 = vld [vmem:[%s6912_s1 + $0x95c] ss:$52 sps:$4 sm:$0xff]   ;;  %v4777_v59 = vld [vmem:[%s6912_s1 + $0xa94] ss:$52 sps:$4 sm:$0xff]  }
  0x1e   :  { %v4748_v38 = vld [vmem:[%s6912_s1 + $0x890] ss:$52 sps:$4 sm:$0xff]   ;;  %vm3998_vm2 = vcmp.lt.s32.totalorder %v528_v37, 544 }
  0x1f   :  { %2971 = vmatpush1.bf16.msra.mxu0 %v4665_v31  ;;  %3094 = vmatpush1.bf16.msra.mxu1 %v4666_v32  ;;  %v4744_v31 = vld [vmem:[%s6912_s1 + $0x82c] ss:$52 sps:$4 sm:$0xff]  }
  0x20   :  { %2972 = vmatprep.subr.bf16.mxu0 %v4667_v33  ;;  %3095 = vmatprep.subr.bf16.mxu1 %v4669_v34  ;;  %v4739_v32 = vld [vmem:[%s6912_s1 + $0x820] ss:$52 sps:$4 sm:$0xff]   ;;  %v4742_v33 = vld [vmem:[%s6912_s1 + $0x828] ss:$52 sps:$4 sm:$0xff]  }
  0x21   :  { %v4747_v34 = vld [vmem:[%s6912_s1 + $0x88c] ss:$52 sps:$4 sm:$0xff]  }
  0x23   :  { %2973 = vmatpush1.bf16.msra.mxu0 %v4671_v35  ;;  %3096 = vmatpush1.bf16.msra.mxu1 %v4672_v36  ;;  %v4750_v35 = vld [vmem:[%s6912_s1 + $0x894] ss:$52 sps:$4 sm:$0xff]  }
  0x24   :  { %2974 = vmatprep.subr.bf16.mxu0 %v4673_v40  ;;  %3097 = vmatprep.subr.bf16.mxu1 %v4675_v41  ;;  %v4745_v36 = vld [vmem:[%s6912_s1 + $0x888] ss:$52 sps:$4 sm:$0xff]   ;;  %v4751_v41 = vld [vmem:[%s6912_s1 + $0x8f0] ss:$52 sps:$4 sm:$0xff]  }
  0x25   :  { %v4756_v40 = vld [vmem:[%s6912_s1 + $0x8fc] ss:$52 sps:$4 sm:$0xff]  }
  0x27   :  { %2975 = vmatpush1.bf16.msra.mxu0 %v4677_v42  ;;  %3098 = vmatpush1.bf16.msra.mxu1 %v4678_v45  ;;  %v4754_v42 = vld [vmem:[%s6912_s1 + $0x8f8] ss:$52 sps:$4 sm:$0xff]  }
  0x28   :  { %2976 = vmatprep.subr.bf16.mxu0 %v4679_v46  ;;  %3099 = vmatprep.subr.bf16.mxu1 %v4681_v47  ;;  %v4762_v45 = vld [vmem:[%s6912_s1 + $0x964] ss:$52 sps:$4 sm:$0xff]   ;;  %v4760_v47 = vld [vmem:[%s6912_s1 + $0x960] ss:$52 sps:$4 sm:$0xff]  }
  0x29   :  { %v4757_v46 = vld [vmem:[%s6912_s1 + $0x958] ss:$52 sps:$4 sm:$0xff]  }
  0x2b   :  { %2977 = vmatpush1.bf16.msra.mxu0 %v4683_v48  ;;  %3100 = vmatpush1.bf16.msra.mxu1 %v4684_v49  ;;  %v8_v48 = vstv %s6914_s2  ;;  %v4765_v49 = vld [vmem:[%s6912_s1 + $0x9c4] ss:$52 sps:$4 sm:$0xff]  }
  0x2c   :  { %2978 = vmatprep.subr.bf16.mxu0 %v4685_v51  ;;  %3101 = vmatprep.subr.bf16.mxu1 %v4687_v52  ;;  %v4768_v51 = vld [vmem:[%s6912_s1 + $0x9cc] ss:$52 sps:$4 sm:$0xff]   ;;  %9 = vst [vmem:[#allocation2] sm:$0x1] %v8_v48  ;;  %v4844_v48 = vld [vmem:[%s6912_s1 + $0x7c] ss:$52 sps:$4 sm:$0xff]  }
  0x2d   :  { %v4763_v52 = vld [vmem:[%s6912_s1 + $0x9c0] ss:$52 sps:$4 sm:$0xff]  }
  0x2f   :  { %2979 = vmatpush1.bf16.msra.mxu0 %v4689_v54  ;;  %3102 = vmatpush1.bf16.msra.mxu1 %v4690_v56  ;;  %v4766_v54 = vld [vmem:[%s6912_s1 + $0x9c8] ss:$52 sps:$4 sm:$0xff]  }
  0x30   :  { %2980 = vmatprep.subr.bf16.mxu0 %v4691_v57  ;;  %3103 = vmatprep.subr.bf16.mxu1 %v4693_v58  ;;  %v4774_v56 = vld [vmem:[%s6912_s1 + $0xa34] ss:$52 sps:$4 sm:$0xff]   ;;  %v4772_v58 = vld [vmem:[%s6912_s1 + $0xa30] ss:$52 sps:$4 sm:$0xff]  }
  0x31   :  { %v4769_v57 = vld [vmem:[%s6912_s1 + $0xa28] ss:$52 sps:$4 sm:$0xff]  }
  0x33   :  { %2981 = vmatpush1.bf16.msra.mxu0 %v4695_v60  ;;  %3104 = vmatpush1.bf16.msra.mxu1 %v4696_v62  ;;  %v4780_v60 = vld [vmem:[%s6912_s1 + $0xa9c] ss:$52 sps:$4 sm:$0xff]  }
  0x34   :  { %2982 = vmatprep.subr.bf16.mxu0 %v4697_v63  ;;  %3105 = vmatprep.subr.bf16.mxu1 %v4699_v0  ;;  %v4775_v62 = vld [vmem:[%s6912_s1 + $0xa90] ss:$52 sps:$4 sm:$0xff]   ;;  %v4778_v63 = vld [vmem:[%s6912_s1 + $0xa98] ss:$52 sps:$4 sm:$0xff]  }
  0x35   :  { %v4783_v0 = vld [vmem:[%s6912_s1 + $0xafc] ss:$52 sps:$4 sm:$0xff]  }
  0x37   :  { %2983 = vmatpush1.bf16.msra.mxu0 %v4701_v1  ;;  %3106 = vmatpush1.bf16.msra.mxu1 %v4702_v2  ;;  %v4786_v1 = vld [vmem:[%s6912_s1 + $0xb04] ss:$52 sps:$4 sm:$0xff]  }
  0x38   :  { %2984 = vmatprep.subr.bf16.mxu0 %v4703_v3  ;;  %3107 = vmatprep.subr.bf16.mxu1 %v4705_v4  ;;  %v4781_v2 = vld [vmem:[%s6912_s1 + $0xaf8] ss:$52 sps:$4 sm:$0xff]   ;;  %v4784_v3 = vld [vmem:[%s6912_s1 + $0xb00] ss:$52 sps:$4 sm:$0xff]  }
  0x39   :  { %v4789_v4 = vld [vmem:[%s6912_s1 + $0xb64] ss:$52 sps:$4 sm:$0xff]  }
  0x3b   :  { %2985 = vmatpush1.bf16.msra.mxu0 %v4707_v5  ;;  %3108 = vmatpush1.bf16.msra.mxu1 %v4708_v6  ;;  %v4792_v5 = vld [vmem:[%s6912_s1 + $0xb6c] ss:$52 sps:$4 sm:$0xff]  }
  0x3c   :  { %2986 = vmatprep.subr.bf16.mxu0 %v4709_v7  ;;  %3109 = vmatprep.subr.bf16.mxu1 %v4711_v8  ;;  %v4787_v6 = vld [vmem:[%s6912_s1 + $0xb60] ss:$52 sps:$4 sm:$0xff]   ;;  %v4790_v7 = vld [vmem:[%s6912_s1 + $0xb68] ss:$52 sps:$4 sm:$0xff]  }
  0x3d   :  { %v4795_v8 = vld [vmem:[%s6912_s1 + $0xbcc] ss:$52 sps:$4 sm:$0xff]  }
  0x3f   :  { %2987 = vmatpush1.bf16.msra.mxu0 %v4713_v9  ;;  %3110 = vmatpush1.bf16.msra.mxu1 %v4714_v10  ;;  %v4798_v9 = vld [vmem:[%s6912_s1 + $0xbd4] ss:$52 sps:$4 sm:$0xff]  }
  0x40   :  { %2997 = vmatprep.subr.bf16.mxu0 %v4717_v11  ;;  %3120 = vmatprep.subr.bf16.mxu1 %v4720_v12  ;;  %v4793_v10 = vld [vmem:[%s6912_s1 + $0xbc8] ss:$52 sps:$4 sm:$0xff]   ;;  %v4796_v11 = vld [vmem:[%s6912_s1 + $0xbd0] ss:$52 sps:$4 sm:$0xff]  }
  0x41   :  { %v4801_v12 = vld [vmem:[%s6912_s1 + $0xc34] ss:$52 sps:$4 sm:$0xff]  }
  0x42   :  { %2989 = vmatmul.mubr.bf16.vlgmr.msra.gmra.mrb[0].mxu0 %v5601_v14  ;;  %3112 = vmatmul.mubr.bf16.vlgmr.msra.gmra.mrb[0].mxu1 %v5601_v14 }
  0x43   :  { %2998 = vmatpush1.bf16.msra.mxu0 %v4715_v13  ;;  %3121 = vmatpush1.bf16.msra.mxu1 %v4718_v15  ;;  %v4804_v13 = vld [vmem:[%s6912_s1 + $0xc3c] ss:$52 sps:$4 sm:$0xff]  }
  0x44   :  { %2999 = vmatprep.subr.bf16.mxu0 %v4723_v16  ;;  %3122 = vmatprep.subr.bf16.mxu1 %v4726_v17  ;;  %v4799_v15 = vld [vmem:[%s6912_s1 + $0xc30] ss:$52 sps:$4 sm:$0xff]   ;;  %v4802_v16 = vld [vmem:[%s6912_s1 + $0xc38] ss:$52 sps:$4 sm:$0xff]  }
  0x45   :  { %3029 = vmatprep.mubr.bf16.mxu0 %v5614_v18  ;;  %3152 = vmatprep.mubr.bf16.mxu1 %v5614_v18  ;;  %v4807_v17 = vld [vmem:[%s6912_s1 + $0xc9c] ss:$52 sps:$4 sm:$0xff]  }
  0x47   :  { %3000 = vmatpush1.bf16.msra.mxu0 %v4721_v19  ;;  %3123 = vmatpush1.bf16.msra.mxu1 %v4724_v20  ;;  %v4810_v19 = vld [vmem:[%s6912_s1 + $0xca4] ss:$52 sps:$4 sm:$0xff]  }
  0x48   :  { %3001 = vmatprep.subr.bf16.mxu0 %v4729_v21  ;;  %3124 = vmatprep.subr.bf16.mxu1 %v4732_v23  ;;  %v4805_v20 = vld [vmem:[%s6912_s1 + $0xc98] ss:$52 sps:$4 sm:$0xff]   ;;  %v4808_v21 = vld [vmem:[%s6912_s1 + $0xca0] ss:$52 sps:$4 sm:$0xff]  }
  0x49   :  { %v4813_v23 = vld [vmem:[%s6912_s1 + $0xd04] ss:$52 sps:$4 sm:$0xff]  }
  0x4b   :  { %3002 = vmatpush1.bf16.msra.mxu0 %v4727_v24  ;;  %3125 = vmatpush1.bf16.msra.mxu1 %v4730_v25  ;;  %v4816_v24 = vld [vmem:[%s6912_s1 + $0xd0c] ss:$52 sps:$4 sm:$0xff]  }
  0x4c   :  { %3003 = vmatprep.subr.bf16.mxu0 %v4735_v26  ;;  %3126 = vmatprep.subr.bf16.mxu1 %v4738_v27  ;;  %v4811_v25 = vld [vmem:[%s6912_s1 + $0xd00] ss:$52 sps:$4 sm:$0xff]   ;;  %v5808_v26 = vcombine.high %v5601_v14, %v5601_v14  ;;  %v4814_v27 = vld [vmem:[%s6912_s1 + $0xd08] ss:$52 sps:$4 sm:$0xff]  }
  0x4f   :  { %3004 = vmatpush1.bf16.msra.mxu0 %v4733_v28  ;;  %3127 = vmatpush1.bf16.msra.mxu1 %v4736_v29  ;;  %v4819_v28 = vld [vmem:[%s6912_s1 + $0xd6c] ss:$52 sps:$4 sm:$0xff]   ;;  %v4822_v29 = vld [vmem:[%s6912_s1 + $0xd74] ss:$52 sps:$4 sm:$0xff]  }
  0x50   :  { %3005 = vmatprep.subr.bf16.mxu0 %v4741_v30  ;;  %3128 = vmatprep.subr.bf16.mxu1 %v4744_v31  ;;  %v4817_v30 = vld [vmem:[%s6912_s1 + $0xd68] ss:$52 sps:$4 sm:$0xff]   ;;  %v4820_v31 = vld [vmem:[%s6912_s1 + $0xd70] ss:$52 sps:$4 sm:$0xff]  }
  0x53   :  { %3006 = vmatpush1.bf16.msra.mxu0 %v4739_v32  ;;  %3129 = vmatpush1.bf16.msra.mxu1 %v4742_v33  ;;  %v4825_v32 = vld [vmem:[%s6912_s1 + $0xdd4] ss:$52 sps:$4 sm:$0xff]   ;;  %v4828_v33 = vld [vmem:[%s6912_s1 + $0xddc] ss:$52 sps:$4 sm:$0xff]  }
  0x54   :  { %3007 = vmatprep.subr.bf16.mxu0 %v4747_v34  ;;  %3130 = vmatprep.subr.bf16.mxu1 %v4750_v35  ;;  %v4823_v34 = vld [vmem:[%s6912_s1 + $0xdd0] ss:$52 sps:$4 sm:$0xff]   ;;  %v533_v35 = vcombine.high %v5528_v53, %v5528_v53  ;;  %v4829_v53 = vld [vmem:[%s6912_s1 + $0xe38] ss:$52 sps:$4 sm:$0xff]  }
  0x57   :  { %3008 = vmatpush1.bf16.msra.mxu0 %v4745_v36  ;;  %3131 = vmatpush1.bf16.msra.mxu1 %v4748_v38  ;;  %v4826_v36 = vld [vmem:[%s6912_s1 + $0xdd8] ss:$52 sps:$4 sm:$0xff]   ;;  %v4831_v38 = vld [vmem:[%s6912_s1 + $0xe3c] ss:$52 sps:$4 sm:$0xff]  }
  0x58   :  { %3009 = vmatprep.subr.bf16.mxu0 %v4753_v39  ;;  %3132 = vmatprep.subr.bf16.mxu1 %v4756_v40  ;;  %v4834_v39 = vld [vmem:[%s6912_s1 + $0xe44] ss:$52 sps:$4 sm:$0xff]   ;;  %v547_v40 = vrot.slane %v533_v35, %v5517_v50 }
  0x59   :  { %v4905_v35 = vld [vmem:[%s6912_s1 + $0x490] ss:$52 sps:$4 sm:$0xff]  }
  0x5b   :  { %3010 = vmatpush1.bf16.msra.mxu0 %v4751_v41  ;;  %3133 = vmatpush1.bf16.msra.mxu1 %v4754_v42  ;;  %v4832_v41 = vld [vmem:[%s6912_s1 + $0xe40] ss:$52 sps:$4 sm:$0xff]  }
  0x5c   :  { %3011 = vmatprep.subr.bf16.mxu0 %v4759_v44  ;;  %3134 = vmatprep.subr.bf16.mxu1 %v4762_v45  ;;  %v4838_v42 = vld [vmem:[%s6912_s1 + $0x14] ss:$52 sps:$4 sm:$0xff]   ;;  %v4841_v44 = vld [vmem:[%s6912_s1 + $0x1c] ss:$52 sps:$4 sm:$0xff]   ;;  %v5863_v45 = vrot.slane %v547_v40, %v5517_v50 }
  0x5d   :  { %v4916_v40 = vld [vmem:[%s6912_s1 + $0x55c] ss:$52 sps:$4 sm:$0xff]  }
  0x5f   :  { %3012 = vmatpush1.bf16.msra.mxu0 %v4757_v46  ;;  %3135 = vmatpush1.bf16.msra.mxu1 %v4760_v47  ;;  %v4836_v46 = vld [vmem:[%s6912_s1 + $0x10] ss:$52 sps:$4 sm:$0xff]   ;;  %v4839_v47 = vld [vmem:[%s6912_s1 + $0x18] ss:$52 sps:$4 sm:$0xff]  }
  0x60   :  { %3013 = vmatprep.subr.bf16.mxu0 %v4765_v49  ;;  %3136 = vmatprep.subr.bf16.mxu1 %v4768_v51  ;;  %v4847_v49 = vld [vmem:[%s6912_s1 + $0x84] ss:$52 sps:$4 sm:$0xff]  }
  0x61   :  { %v4842_v51 = vld [vmem:[%s6912_s1 + $0x78] ss:$52 sps:$4 sm:$0xff]  }
  0x63   :  { %3014 = vmatpush1.bf16.msra.mxu0 %v4763_v52  ;;  %3137 = vmatpush1.bf16.msra.mxu1 %v4766_v54  ;;  %v4845_v52 = vld [vmem:[%s6912_s1 + $0x80] ss:$52 sps:$4 sm:$0xff]   ;;  %v4850_v54 = vld [vmem:[%s6912_s1 + $0xe4] ss:$52 sps:$4 sm:$0xff]  }
  0x64   :  { %3015 = vmatprep.subr.bf16.mxu0 %v4771_v55  ;;  %3138 = vmatprep.subr.bf16.mxu1 %v4774_v56  ;;  %v4853_v55 = vld [vmem:[%s6912_s1 + $0xec] ss:$52 sps:$4 sm:$0xff]  }
  0x65   :  { %v4848_v56 = vld [vmem:[%s6912_s1 + $0xe0] ss:$52 sps:$4 sm:$0xff]  }
  0x67   :  { %3016 = vmatpush1.bf16.msra.mxu0 %v4769_v57  ;;  %3139 = vmatpush1.bf16.msra.mxu1 %v4772_v58  ;;  %v4851_v57 = vld [vmem:[%s6912_s1 + $0xe8] ss:$52 sps:$4 sm:$0xff]   ;;  %v522_v58 = vld [vmem:[#allocation2] sm:$0x1] }
  0x68   :  { %3017 = vmatprep.subr.bf16.mxu0 %v4777_v59  ;;  %3140 = vmatprep.subr.bf16.mxu1 %v4780_v60  ;;  %v4856_v59 = vld [vmem:[%s6912_s1 + $0x14c] ss:$52 sps:$4 sm:$0xff]   ;;  %v4859_v60 = vld [vmem:[%s6912_s1 + $0x154] ss:$52 sps:$4 sm:$0xff]  }
  0x69   :  { %525 = vperm.xlu0 %4618, %v522_v58   ;;  %v4932_v58 = vld [vmem:[%s6912_s1 + $0x690] ss:$52 sps:$4 sm:$0xff]  }
  0x6b   :  { %3018 = vmatpush1.bf16.msra.mxu0 %v4775_v62  ;;  %3141 = vmatpush1.bf16.msra.mxu1 %v4778_v63  ;;  %v4854_v62 = vld [vmem:[%s6912_s1 + $0x148] ss:$52 sps:$4 sm:$0xff]   ;;  %v4857_v63 = vld [vmem:[%s6912_s1 + $0x150] ss:$52 sps:$4 sm:$0xff]  }
  0x6c   :  { %3019 = vmatprep.subr.bf16.mxu0 %v4783_v0  ;;  %3142 = vmatprep.subr.bf16.mxu1 %v4786_v1  ;;  %v4862_v0 = vld [vmem:[%s6912_s1 + $0x1b4] ss:$52 sps:$4 sm:$0xff]   ;;  %v4865_v1 = vld [vmem:[%s6912_s1 + $0x1bc] ss:$52 sps:$4 sm:$0xff]  }
  0x6f   :  { %3020 = vmatpush1.bf16.msra.mxu0 %v4781_v2  ;;  %3143 = vmatpush1.bf16.msra.mxu1 %v4784_v3  ;;  %v4860_v2 = vld [vmem:[%s6912_s1 + $0x1b0] ss:$52 sps:$4 sm:$0xff]   ;;  %v4863_v3 = vld [vmem:[%s6912_s1 + $0x1b8] ss:$52 sps:$4 sm:$0xff]  }
  0x70   :  { %3021 = vmatprep.subr.bf16.mxu0 %v4789_v4  ;;  %3144 = vmatprep.subr.bf16.mxu1 %v4792_v5  ;;  %v4868_v4 = vld [vmem:[%s6912_s1 + $0x21c] ss:$52 sps:$4 sm:$0xff]   ;;  %v4871_v5 = vld [vmem:[%s6912_s1 + $0x224] ss:$52 sps:$4 sm:$0xff]  }
  0x73   :  { %3022 = vmatpush1.bf16.msra.mxu0 %v4787_v6  ;;  %3145 = vmatpush1.bf16.msra.mxu1 %v4790_v7  ;;  %v4866_v6 = vld [vmem:[%s6912_s1 + $0x218] ss:$52 sps:$4 sm:$0xff]   ;;  %v4869_v7 = vld [vmem:[%s6912_s1 + $0x220] ss:$52 sps:$4 sm:$0xff]  }
  0x74   :  { %3023 = vmatprep.subr.bf16.mxu0 %v4795_v8  ;;  %3146 = vmatprep.subr.bf16.mxu1 %v4798_v9  ;;  %v4874_v8 = vld [vmem:[%s6912_s1 + $0x284] ss:$52 sps:$4 sm:$0xff]   ;;  %v4877_v9 = vld [vmem:[%s6912_s1 + $0x28c] ss:$52 sps:$4 sm:$0xff]  }
  0x77   :  { %3024 = vmatpush1.bf16.msra.mxu0 %v4793_v10  ;;  %3147 = vmatpush1.bf16.msra.mxu1 %v4796_v11  ;;  %v4872_v10 = vld [vmem:[%s6912_s1 + $0x280] ss:$52 sps:$4 sm:$0xff]   ;;  %v4875_v11 = vld [vmem:[%s6912_s1 + $0x288] ss:$52 sps:$4 sm:$0xff]  }
  0x78   :  { %3025 = vmatprep.subr.bf16.mxu0 %v4801_v12  ;;  %3148 = vmatprep.subr.bf16.mxu1 %v4804_v13  ;;  %v4880_v12 = vld [vmem:[%s6912_s1 + $0x2ec] ss:$52 sps:$4 sm:$0xff]   ;;  %v4883_v13 = vld [vmem:[%s6912_s1 + $0x2f4] ss:$52 sps:$4 sm:$0xff]  }
  0x7b   :  { %3026 = vmatpush1.bf16.msra.mxu0 %v4799_v15  ;;  %3149 = vmatpush1.bf16.msra.mxu1 %v4802_v16  ;;  %v4878_v15 = vld [vmem:[%s6912_s1 + $0x2e8] ss:$52 sps:$4 sm:$0xff]   ;;  %v4881_v16 = vld [vmem:[%s6912_s1 + $0x2f0] ss:$52 sps:$4 sm:$0xff]  }
  0x7c   :  { %3027 = vmatprep.subr.bf16.mxu0 %v4807_v17  ;;  %3150 = vmatprep.subr.bf16.mxu1 %v4810_v19  ;;  %v4886_v17 = vld [vmem:[%s6912_s1 + $0x354] ss:$52 sps:$4 sm:$0xff]   ;;  %v4889_v19 = vld [vmem:[%s6912_s1 + $0x35c] ss:$52 sps:$4 sm:$0xff]  }
  0x7f   :  { %3028 = vmatpush1.bf16.msra.mxu0 %v4805_v20  ;;  %3151 = vmatpush1.bf16.msra.mxu1 %v4808_v21  ;;  %v4884_v20 = vld [vmem:[%s6912_s1 + $0x350] ss:$52 sps:$4 sm:$0xff]   ;;  %v4887_v21 = vld [vmem:[%s6912_s1 + $0x358] ss:$52 sps:$4 sm:$0xff]  }
  0x80   :  { %3038 = vmatprep.subr.bf16.mxu0 %v4813_v23  ;;  %3161 = vmatprep.subr.bf16.mxu1 %v4816_v24  ;;  %v4892_v23 = vld [vmem:[%s6912_s1 + $0x3bc] ss:$52 sps:$4 sm:$0xff]   ;;  %v4895_v24 = vld [vmem:[%s6912_s1 + $0x3c4] ss:$52 sps:$4 sm:$0xff]  }
  0x82   :  { %3030 = vmatmul.mubr.bf16.vlgmr.msra.gmra.mrb[0].mxu0 %v5808_v26  ;;  %3153 = vmatmul.mubr.bf16.vlgmr.msra.gmra.mrb[0].mxu1 %v5808_v26 }
  0x83   :  { %3039 = vmatpush1.bf16.msra.mxu0 %v4811_v25  ;;  %3162 = vmatpush1.bf16.msra.mxu1 %v4814_v27  ;;  %v4890_v25 = vld [vmem:[%s6912_s1 + $0x3b8] ss:$52 sps:$4 sm:$0xff]   ;;  %v4893_v27 = vld [vmem:[%s6912_s1 + $0x3c0] ss:$52 sps:$4 sm:$0xff]  }
  0x84   :  { %3040 = vmatprep.subr.bf16.mxu0 %v4819_v28  ;;  %3163 = vmatprep.subr.bf16.mxu1 %v4822_v29  ;;  %v4898_v28 = vld [vmem:[%s6912_s1 + $0x424] ss:$52 sps:$4 sm:$0xff]   ;;  %v4901_v29 = vld [vmem:[%s6912_s1 + $0x42c] ss:$52 sps:$4 sm:$0xff]  }
  0x85   :  { %3070 = vmatprep.mubr.bf16.mxu0 %v5356_v22  ;;  %3193 = vmatprep.mubr.bf16.mxu1 %v5356_v22 }
  0x87   :  { %3041 = vmatpush1.bf16.msra.mxu0 %v4817_v30  ;;  %3164 = vmatpush1.bf16.msra.mxu1 %v4820_v31  ;;  %v4896_v30 = vld [vmem:[%s6912_s1 + $0x420] ss:$52 sps:$4 sm:$0xff]   ;;  %v4899_v31 = vld [vmem:[%s6912_s1 + $0x428] ss:$52 sps:$4 sm:$0xff]  }
  0x88   :  { %3042 = vmatprep.subr.bf16.mxu0 %v4825_v32  ;;  %3165 = vmatprep.subr.bf16.mxu1 %v4828_v33  ;;  %v4904_v32 = vld [vmem:[%s6912_s1 + $0x48c] ss:$52 sps:$4 sm:$0xff]   ;;  %v4907_v33 = vld [vmem:[%s6912_s1 + $0x494] ss:$52 sps:$4 sm:$0xff]  }
  0x8b   :  { %3043 = vmatpush1.bf16.msra.mxu0 %v4823_v34  ;;  %3166 = vmatpush1.bf16.msra.mxu1 %v4826_v36  ;;  %v4902_v34 = vld [vmem:[%s6912_s1 + $0x488] ss:$52 sps:$4 sm:$0xff]  }
  0x8c   :  { %3044 = vmatprep.subr.bf16.mxu0 %v4831_v38  ;;  %3167 = vmatprep.subr.bf16.mxu1 %v4834_v39  ;;  %v4910_v36 = vld [vmem:[%s6912_s1 + $0x4f4] ss:$52 sps:$4 sm:$0xff]   ;;  %v4913_v38 = vld [vmem:[%s6912_s1 + $0x4fc] ss:$52 sps:$4 sm:$0xff]  }
  0x8d   :  { %v4908_v39 = vld [vmem:[%s6912_s1 + $0x4f0] ss:$52 sps:$4 sm:$0xff]  }
  0x8f   :  { %3045 = vmatpush1.bf16.msra.mxu0 %v4829_v53  ;;  %3168 = vmatpush1.bf16.msra.mxu1 %v4832_v41  ;;  %v4911_v53 = vld [vmem:[%s6912_s1 + $0x4f8] ss:$52 sps:$4 sm:$0xff]  }
  0x90   :  { %3202 = vmatprep.subr.bf16.mxu0 %v4838_v42  ;;  %3325 = vmatprep.subr.bf16.mxu1 %v4841_v44  ;;  %v4919_v41 = vld [vmem:[%s6912_s1 + $0x564] ss:$52 sps:$4 sm:$0xff]   ;;  %v4917_v44 = vld [vmem:[%s6912_s1 + $0x560] ss:$52 sps:$4 sm:$0xff]  }
  0x91   :  { %v4914_v42 = vld [vmem:[%s6912_s1 + $0x558] ss:$52 sps:$4 sm:$0xff]  }
  0x92   :  { %4473 = vmatmul.mubr.msk.bf16.vlgmr.msra.gmra.mrb[0].mxu0 %vm2952_vm0, %v5863_v45  ;;  %4474 = vmatmul.mubr.msk.bf16.vlgmr.msra.gmra.mrb[0].mxu1 %vm2952_vm0, %v5863_v45 }
  0x93   :  { %3203 = vmatpush1.bf16.msra.mxu0 %v4836_v46  ;;  %3326 = vmatpush1.bf16.msra.mxu1 %v4839_v47  ;;  %v4922_v46 = vld [vmem:[%s6912_s1 + $0x5c4] ss:$52 sps:$4 sm:$0xff]   ;;  %v4925_v47 = vld [vmem:[%s6912_s1 + $0x5cc] ss:$52 sps:$4 sm:$0xff]  }
  0x94   :  { %3204 = vmatprep.subr.bf16.mxu0 %v4844_v48  ;;  %3327 = vmatprep.subr.bf16.mxu1 %v4847_v49  ;;  %v4920_v48 = vld [vmem:[%s6912_s1 + $0x5c0] ss:$52 sps:$4 sm:$0xff]   ;;  %v4923_v49 = vld [vmem:[%s6912_s1 + $0x5c8] ss:$52 sps:$4 sm:$0xff]  }
  0x95   :  { %3234 = vmatprep.mubr.bf16.mxu0 %v5548_v61  ;;  %3357 = vmatprep.mubr.bf16.mxu1 %v5548_v61 }
  0x97   :  { %3205 = vmatpush1.bf16.msra.mxu0 %v4842_v51  ;;  %3328 = vmatpush1.bf16.msra.mxu1 %v4845_v52  ;;  %v4928_v51 = vld [vmem:[%s6912_s1 + $0x62c] ss:$52 sps:$4 sm:$0xff]   ;;  %v4931_v52 = vld [vmem:[%s6912_s1 + $0x634] ss:$52 sps:$4 sm:$0xff]  }
  0x98   :  { %3206 = vmatprep.subr.bf16.mxu0 %v4850_v54  ;;  %3329 = vmatprep.subr.bf16.mxu1 %v4853_v55  ;;  %v4926_v54 = vld [vmem:[%s6912_s1 + $0x628] ss:$52 sps:$4 sm:$0xff]   ;;  %v4929_v55 = vld [vmem:[%s6912_s1 + $0x630] ss:$52 sps:$4 sm:$0xff]  }
  0x9b   :  { %3207 = vmatpush1.bf16.msra.mxu0 %v4848_v56  ;;  %3330 = vmatpush1.bf16.msra.mxu1 %v4851_v57  ;;  %v4934_v56 = vld [vmem:[%s6912_s1 + $0x694] ss:$52 sps:$4 sm:$0xff]   ;;  %v4937_v57 = vld [vmem:[%s6912_s1 + $0x69c] ss:$52 sps:$4 sm:$0xff]  }
  0x9c   :  { %3208 = vmatprep.subr.bf16.mxu0 %v4856_v59  ;;  %3331 = vmatprep.subr.bf16.mxu1 %v4859_v60  ;;  %v4935_v59 = vld [vmem:[%s6912_s1 + $0x698] ss:$52 sps:$4 sm:$0xff]   ;;  %v4940_v60 = vld [vmem:[%s6912_s1 + $0x6fc] ss:$52 sps:$4 sm:$0xff]  }
  0x9f   :  { %3209 = vmatpush1.bf16.msra.mxu0 %v4854_v62  ;;  %3332 = vmatpush1.bf16.msra.mxu1 %v4857_v63  ;;  %v4943_v62 = vld [vmem:[%s6912_s1 + $0x704] ss:$52 sps:$4 sm:$0xff]  }
  0xa0   :  { %3210 = vmatprep.subr.bf16.mxu0 %v4862_v0  ;;  %3333 = vmatprep.subr.bf16.mxu1 %v4865_v1  ;;  %v4938_v63 = vld [vmem:[%s6912_s1 + $0x6f8] ss:$52 sps:$4 sm:$0xff]   ;;  %v4941_v0 = vld [vmem:[%s6912_s1 + $0x700] ss:$52 sps:$4 sm:$0xff]  }
  0xa1   :  { %v4946_v1 = vld [vmem:[%s6912_s1 + $0x764] ss:$52 sps:$4 sm:$0xff]  }
  0xa3   :  { %3211 = vmatpush1.bf16.msra.mxu0 %v4860_v2  ;;  %3334 = vmatpush1.bf16.msra.mxu1 %v4863_v3  ;;  %v4949_v2 = vld [vmem:[%s6912_s1 + $0x76c] ss:$52 sps:$4 sm:$0xff]  }
  0xa4   :  { %3212 = vmatprep.subr.bf16.mxu0 %v4868_v4  ;;  %3335 = vmatprep.subr.bf16.mxu1 %v4871_v5  ;;  %v4944_v3 = vld [vmem:[%s6912_s1 + $0x760] ss:$52 sps:$4 sm:$0xff]   ;;  %v4947_v4 = vld [vmem:[%s6912_s1 + $0x768] ss:$52 sps:$4 sm:$0xff]  }
  0xa5   :  { %v4952_v5 = vld [vmem:[%s6912_s1 + $0x7cc] ss:$52 sps:$4 sm:$0xff]  }
  0xa7   :  { %3213 = vmatpush1.bf16.msra.mxu0 %v4866_v6  ;;  %3336 = vmatpush1.bf16.msra.mxu1 %v4869_v7  ;;  %v4955_v6 = vld [vmem:[%s6912_s1 + $0x7d4] ss:$52 sps:$4 sm:$0xff]  }
  0xa8   :  { %3214 = vmatprep.subr.bf16.mxu0 %v4874_v8  ;;  %3337 = vmatprep.subr.bf16.mxu1 %v4877_v9  ;;  %v4950_v7 = vld [vmem:[%s6912_s1 + $0x7c8] ss:$52 sps:$4 sm:$0xff]   ;;  %v4953_v8 = vld [vmem:[%s6912_s1 + $0x7d0] ss:$52 sps:$4 sm:$0xff]  }
  0xa9   :  { %v4958_v9 = vld [vmem:[%s6912_s1 + $0x834] ss:$52 sps:$4 sm:$0xff]  }
  0xab   :  { %3215 = vmatpush1.bf16.msra.mxu0 %v4872_v10  ;;  %3338 = vmatpush1.bf16.msra.mxu1 %v4875_v11  ;;  %v4961_v10 = vld [vmem:[%s6912_s1 + $0x83c] ss:$52 sps:$4 sm:$0xff]  }
  0xac   :  { %3216 = vmatprep.subr.bf16.mxu0 %v4880_v12  ;;  %3339 = vmatprep.subr.bf16.mxu1 %v4883_v13  ;;  %v4956_v11 = vld [vmem:[%s6912_s1 + $0x830] ss:$52 sps:$4 sm:$0xff]   ;;  %v4959_v12 = vld [vmem:[%s6912_s1 + $0x838] ss:$52 sps:$4 sm:$0xff]  }
  0xad   :  { %v4964_v13 = vld [vmem:[%s6912_s1 + $0x89c] ss:$52 sps:$4 sm:$0xff]  }
  0xaf   :  { %3217 = vmatpush1.bf16.msra.mxu0 %v4878_v15  ;;  %3340 = vmatpush1.bf16.msra.mxu1 %v4881_v16  ;;  %v4967_v15 = vld [vmem:[%s6912_s1 + $0x8a4] ss:$52 sps:$4 sm:$0xff]  }
  0xb0   :  { %3218 = vmatprep.subr.bf16.mxu0 %v4886_v17  ;;  %3341 = vmatprep.subr.bf16.mxu1 %v4889_v19  ;;  %v4962_v16 = vld [vmem:[%s6912_s1 + $0x898] ss:$52 sps:$4 sm:$0xff]   ;;  %v4965_v17 = vld [vmem:[%s6912_s1 + $0x8a0] ss:$52 sps:$4 sm:$0xff]  }
  0xb1   :  { %v4970_v19 = vld [vmem:[%s6912_s1 + $0x904] ss:$52 sps:$4 sm:$0xff]  }
  0xb3   :  { %3219 = vmatpush1.bf16.msra.mxu0 %v4884_v20  ;;  %3342 = vmatpush1.bf16.msra.mxu1 %v4887_v21  ;;  %v4973_v20 = vld [vmem:[%s6912_s1 + $0x90c] ss:$52 sps:$4 sm:$0xff]  }
  0xb4   :  { %3220 = vmatprep.subr.bf16.mxu0 %v4892_v23  ;;  %3343 = vmatprep.subr.bf16.mxu1 %v4895_v24  ;;  %v4968_v21 = vld [vmem:[%s6912_s1 + $0x900] ss:$52 sps:$4 sm:$0xff]   ;;  %v4971_v23 = vld [vmem:[%s6912_s1 + $0x908] ss:$52 sps:$4 sm:$0xff]  }
  0xb5   :  { %v4976_v24 = vld [vmem:[%s6912_s1 + $0x96c] ss:$52 sps:$4 sm:$0xff]  }
  0xb7   :  { %3221 = vmatpush1.bf16.msra.mxu0 %v4890_v25  ;;  %3344 = vmatpush1.bf16.msra.mxu1 %v4893_v27  ;;  %v4979_v25 = vld [vmem:[%s6912_s1 + $0x974] ss:$52 sps:$4 sm:$0xff]  }
  0xb8   :  { %3222 = vmatprep.subr.bf16.mxu0 %v4898_v28  ;;  %3345 = vmatprep.subr.bf16.mxu1 %v4901_v29  ;;  %v4974_v27 = vld [vmem:[%s6912_s1 + $0x968] ss:$52 sps:$4 sm:$0xff]   ;;  %v4977_v28 = vld [vmem:[%s6912_s1 + $0x970] ss:$52 sps:$4 sm:$0xff]  }
  0xb9   :  { %v4982_v29 = vld [vmem:[%s6912_s1 + $0x9d4] ss:$52 sps:$4 sm:$0xff]  }
  0xbb   :  { %3223 = vmatpush1.bf16.msra.mxu0 %v4896_v30  ;;  %3346 = vmatpush1.bf16.msra.mxu1 %v4899_v31  ;;  %v4985_v30 = vld [vmem:[%s6912_s1 + $0x9dc] ss:$52 sps:$4 sm:$0xff]  }
  0xbc   :  { %3224 = vmatprep.subr.bf16.mxu0 %v4904_v32  ;;  %3347 = vmatprep.subr.bf16.mxu1 %v4907_v33  ;;  %v4980_v31 = vld [vmem:[%s6912_s1 + $0x9d0] ss:$52 sps:$4 sm:$0xff]   ;;  %v4983_v32 = vld [vmem:[%s6912_s1 + $0x9d8] ss:$52 sps:$4 sm:$0xff]  }
  0xbd   :  { %v4988_v33 = vld [vmem:[%s6912_s1 + $0xa3c] ss:$52 sps:$4 sm:$0xff]  }
  0xbf   :  { %3225 = vmatpush1.bf16.msra.mxu0 %v4902_v34  ;;  %3348 = vmatpush1.bf16.msra.mxu1 %v4905_v35  ;;  %v4991_v34 = vld [vmem:[%s6912_s1 + $0xa44] ss:$52 sps:$4 sm:$0xff]  }
  0xc0   :  { %3226 = vmatprep.subr.bf16.mxu0 %v4910_v36  ;;  %3349 = vmatprep.subr.bf16.mxu1 %v4913_v38  ;;  %v4986_v35 = vld [vmem:[%s6912_s1 + $0xa38] ss:$52 sps:$4 sm:$0xff]   ;;  %v4989_v36 = vld [vmem:[%s6912_s1 + $0xa40] ss:$52 sps:$4 sm:$0xff]  }
  0xc1   :  { %v4994_v38 = vld [vmem:[%s6912_s1 + $0xaa4] ss:$52 sps:$4 sm:$0xff]  }
  0xc3   :  { %3227 = vmatpush1.bf16.msra.mxu0 %v4908_v39  ;;  %3350 = vmatpush1.bf16.msra.mxu1 %v4911_v53  ;;  %v4997_v39 = vld [vmem:[%s6912_s1 + $0xaac] ss:$52 sps:$4 sm:$0xff]  }
  0xc4   :  { %3228 = vmatprep.subr.bf16.mxu0 %v4916_v40  ;;  %3351 = vmatprep.subr.bf16.mxu1 %v4919_v41  ;;  %v4992_v53 = vld [vmem:[%s6912_s1 + $0xaa0] ss:$52 sps:$4 sm:$0xff]   ;;  %v4995_v40 = vld [vmem:[%s6912_s1 + $0xaa8] ss:$52 sps:$4 sm:$0xff]  }
  0xc5   :  { %v5000_v41 = vld [vmem:[%s6912_s1 + $0xb0c] ss:$52 sps:$4 sm:$0xff]  }
  0xc7   :  { %3229 = vmatpush1.bf16.msra.mxu0 %v4914_v42  ;;  %3352 = vmatpush1.bf16.msra.mxu1 %v4917_v44  ;;  %v5003_v42 = vld [vmem:[%s6912_s1 + $0xb14] ss:$52 sps:$4 sm:$0xff]  }
  0xc8   :  { %3230 = vmatprep.subr.bf16.mxu0 %v4922_v46  ;;  %3353 = vmatprep.subr.bf16.mxu1 %v4925_v47  ;;  %v4998_v44 = vld [vmem:[%s6912_s1 + $0xb08] ss:$52 sps:$4 sm:$0xff]   ;;  %v5001_v46 = vld [vmem:[%s6912_s1 + $0xb10] ss:$52 sps:$4 sm:$0xff]  }
  0xc9   :  { %v5006_v47 = vld [vmem:[%s6912_s1 + $0xb74] ss:$52 sps:$4 sm:$0xff]  }
  0xcb   :  { %3231 = vmatpush1.bf16.msra.mxu0 %v4920_v48  ;;  %3354 = vmatpush1.bf16.msra.mxu1 %v4923_v49  ;;  %v5009_v48 = vld [vmem:[%s6912_s1 + $0xb7c] ss:$52 sps:$4 sm:$0xff]  }
  0xcc   :  { %3232 = vmatprep.subr.bf16.mxu0 %v4928_v51  ;;  %3355 = vmatprep.subr.bf16.mxu1 %v4931_v52  ;;  %v5004_v49 = vld [vmem:[%s6912_s1 + $0xb70] ss:$52 sps:$4 sm:$0xff]   ;;  %v5007_v51 = vld [vmem:[%s6912_s1 + $0xb78] ss:$52 sps:$4 sm:$0xff]  }
  0xcd   :  { %v5012_v52 = vld [vmem:[%s6912_s1 + $0xbdc] ss:$52 sps:$4 sm:$0xff]  }
  0xcf   :  { %3233 = vmatpush1.bf16.msra.mxu0 %v4926_v54  ;;  %3356 = vmatpush1.bf16.msra.mxu1 %v4929_v55  ;;  %v5015_v54 = vld [vmem:[%s6912_s1 + $0xbe4] ss:$52 sps:$4 sm:$0xff]  }
  0xd0   :  { %3243 = vmatprep.subr.bf16.mxu0 %v4934_v56  ;;  %3366 = vmatprep.subr.bf16.mxu1 %v4937_v57  ;;  %v5010_v55 = vld [vmem:[%s6912_s1 + $0xbd8] ss:$52 sps:$4 sm:$0xff]   ;;  %v5013_v56 = vld [vmem:[%s6912_s1 + $0xbe0] ss:$52 sps:$4 sm:$0xff]  }
  0xd1   :  { %v5018_v57 = vld [vmem:[%s6912_s1 + $0xc44] ss:$52 sps:$4 sm:$0xff]  }
  0xd2   :  { %3235 = vmatmul.mubr.bf16.vlgmr.msra.gmra.mrb[4].mxu0 %v5601_v14  ;;  %3358 = vmatmul.mubr.bf16.vlgmr.msra.gmra.mrb[4].mxu1 %v5601_v14 }
  0xd3   :  { %3244 = vmatpush1.bf16.msra.mxu0 %v4932_v58  ;;  %3367 = vmatpush1.bf16.msra.mxu1 %v4935_v59  ;;  %v5021_v58 = vld [vmem:[%s6912_s1 + $0xc4c] ss:$52 sps:$4 sm:$0xff]  }
  0xd4   :  { %3245 = vmatprep.subr.bf16.mxu0 %v4940_v60  ;;  %3368 = vmatprep.subr.bf16.mxu1 %v4943_v62  ;;  %v5016_v59 = vld [vmem:[%s6912_s1 + $0xc40] ss:$52 sps:$4 sm:$0xff]   ;;  %v5019_v60 = vld [vmem:[%s6912_s1 + $0xc48] ss:$52 sps:$4 sm:$0xff]  }
  0xd5   :  { %3275 = vmatprep.mubr.bf16.mxu0 %v5614_v18  ;;  %3398 = vmatprep.mubr.bf16.mxu1 %v5614_v18  ;;  %v5024_v62 = vld [vmem:[%s6912_s1 + $0xcac] ss:$52 sps:$4 sm:$0xff]  }
  0xd7   :  { %3246 = vmatpush1.bf16.msra.mxu0 %v4938_v63  ;;  %3369 = vmatpush1.bf16.msra.mxu1 %v4941_v0  ;;  %v5027_v63 = vld [vmem:[%s6912_s1 + $0xcb4] ss:$52 sps:$4 sm:$0xff]  }
  0xd8   :  { %3247 = vmatprep.subr.bf16.mxu0 %v4946_v1  ;;  %3370 = vmatprep.subr.bf16.mxu1 %v4949_v2  ;;  %v5022_v0 = vld [vmem:[%s6912_s1 + $0xca8] ss:$52 sps:$4 sm:$0xff]   ;;  %v5025_v1 = vld [vmem:[%s6912_s1 + $0xcb0] ss:$52 sps:$4 sm:$0xff]  }
  0xd9   :  { %v5030_v2 = vld [vmem:[%s6912_s1 + $0xd14] ss:$52 sps:$4 sm:$0xff]  }
  0xdb   :  { %3248 = vmatpush1.bf16.msra.mxu0 %v4944_v3  ;;  %3371 = vmatpush1.bf16.msra.mxu1 %v4947_v4  ;;  %v5033_v3 = vld [vmem:[%s6912_s1 + $0xd1c] ss:$52 sps:$4 sm:$0xff]  }
  0xdc   :  { %3249 = vmatprep.subr.bf16.mxu0 %v4952_v5  ;;  %3372 = vmatprep.subr.bf16.mxu1 %v4955_v6  ;;  %v5028_v4 = vld [vmem:[%s6912_s1 + $0xd10] ss:$52 sps:$4 sm:$0xff]   ;;  %v5031_v5 = vld [vmem:[%s6912_s1 + $0xd18] ss:$52 sps:$4 sm:$0xff]  }
  0xdd   :  { %v5036_v6 = vld [vmem:[%s6912_s1 + $0xd7c] ss:$52 sps:$4 sm:$0xff]  }
  0xdf   :  { %3250 = vmatpush1.bf16.msra.mxu0 %v4950_v7  ;;  %3373 = vmatpush1.bf16.msra.mxu1 %v4953_v8  ;;  %v5039_v7 = vld [vmem:[%s6912_s1 + $0xd84] ss:$52 sps:$4 sm:$0xff]  }
  0xe0   :  { %3251 = vmatprep.subr.bf16.mxu0 %v4958_v9  ;;  %3374 = vmatprep.subr.bf16.mxu1 %v4961_v10  ;;  %v5034_v8 = vld [vmem:[%s6912_s1 + $0xd78] ss:$52 sps:$4 sm:$0xff]   ;;  %v5037_v9 = vld [vmem:[%s6912_s1 + $0xd80] ss:$52 sps:$4 sm:$0xff]  }
  0xe1   :  { %v5042_v10 = vld [vmem:[%s6912_s1 + $0xde4] ss:$52 sps:$4 sm:$0xff]  }
  0xe3   :  { %3252 = vmatpush1.bf16.msra.mxu0 %v4956_v11  ;;  %3375 = vmatpush1.bf16.msra.mxu1 %v4959_v12  ;;  %v5045_v11 = vld [vmem:[%s6912_s1 + $0xdec] ss:$52 sps:$4 sm:$0xff]  }
  0xe4   :  { %3253 = vmatprep.subr.bf16.mxu0 %v4964_v13  ;;  %3376 = vmatprep.subr.bf16.mxu1 %v4967_v15  ;;  %v5040_v12 = vld [vmem:[%s6912_s1 + $0xde0] ss:$52 sps:$4 sm:$0xff]   ;;  %v5043_v13 = vld [vmem:[%s6912_s1 + $0xde8] ss:$52 sps:$4 sm:$0xff]  }
  0xe5   :  { %v5048_v15 = vld [vmem:[%s6912_s1 + $0xe4c] ss:$52 sps:$4 sm:$0xff]  }
  0xe7   :  { %3254 = vmatpush1.bf16.msra.mxu0 %v4962_v16  ;;  %3377 = vmatpush1.bf16.msra.mxu1 %v4965_v17  ;;  %v5051_v16 = vld [vmem:[%s6912_s1 + $0xe54] ss:$52 sps:$4 sm:$0xff]  }
  0xe8   :  { %3255 = vmatprep.subr.bf16.mxu0 %v4970_v19  ;;  %3378 = vmatprep.subr.bf16.mxu1 %v4973_v20  ;;  %v5046_v17 = vld [vmem:[%s6912_s1 + $0xe48] ss:$52 sps:$4 sm:$0xff]   ;;  %v5049_v19 = vld [vmem:[%s6912_s1 + $0xe50] ss:$52 sps:$4 sm:$0xff]  }
  0xe9   :  { %v5054_v20 = vld [vmem:[%s6912_s1 + $0x24] ss:$52 sps:$4 sm:$0xff]  }
  0xeb   :  { %3256 = vmatpush1.bf16.msra.mxu0 %v4968_v21  ;;  %3379 = vmatpush1.bf16.msra.mxu1 %v4971_v23  ;;  %v5057_v21 = vld [vmem:[%s6912_s1 + $0x2c] ss:$52 sps:$4 sm:$0xff]  }
  0xec   :  { %3257 = vmatprep.subr.bf16.mxu0 %v4976_v24  ;;  %3380 = vmatprep.subr.bf16.mxu1 %v4979_v25  ;;  %v5052_v23 = vld [vmem:[%s6912_s1 + $0x20] ss:$52 sps:$4 sm:$0xff]   ;;  %v5055_v24 = vld [vmem:[%s6912_s1 + $0x28] ss:$52 sps:$4 sm:$0xff]  }
  0xed   :  { %v5060_v25 = vld [vmem:[%s6912_s1 + $0x8c] ss:$52 sps:$4 sm:$0xff]  }
  0xef   :  { %3258 = vmatpush1.bf16.msra.mxu0 %v4974_v27  ;;  %3381 = vmatpush1.bf16.msra.mxu1 %v4977_v28  ;;  %v5063_v27 = vld [vmem:[%s6912_s1 + $0x94] ss:$52 sps:$4 sm:$0xff]  }
  0xf0   :  { %3259 = vmatprep.subr.bf16.mxu0 %v4982_v29  ;;  %3382 = vmatprep.subr.bf16.mxu1 %v4985_v30  ;;  %v5058_v28 = vld [vmem:[%s6912_s1 + $0x88] ss:$52 sps:$4 sm:$0xff]   ;;  %v5061_v29 = vld [vmem:[%s6912_s1 + $0x90] ss:$52 sps:$4 sm:$0xff]  }
  0xf1   :  { %v5066_v30 = vld [vmem:[%s6912_s1 + $0xf4] ss:$52 sps:$4 sm:$0xff]  }
  0xf3   :  { %3260 = vmatpush1.bf16.msra.mxu0 %v4980_v31  ;;  %3383 = vmatpush1.bf16.msra.mxu1 %v4983_v32  ;;  %v5069_v31 = vld [vmem:[%s6912_s1 + $0xfc] ss:$52 sps:$4 sm:$0xff]  }
  0xf4   :  { %3261 = vmatprep.subr.bf16.mxu0 %v4988_v33  ;;  %3384 = vmatprep.subr.bf16.mxu1 %v4991_v34  ;;  %v5064_v32 = vld [vmem:[%s6912_s1 + $0xf0] ss:$52 sps:$4 sm:$0xff]   ;;  %v5067_v33 = vld [vmem:[%s6912_s1 + $0xf8] ss:$52 sps:$4 sm:$0xff]  }
  0xf5   :  { %v5072_v34 = vld [vmem:[%s6912_s1 + $0x15c] ss:$52 sps:$4 sm:$0xff]  }
  0xf7   :  { %3262 = vmatpush1.bf16.msra.mxu0 %v4986_v35  ;;  %3385 = vmatpush1.bf16.msra.mxu1 %v4989_v36  ;;  %v5075_v35 = vld [vmem:[%s6912_s1 + $0x164] ss:$52 sps:$4 sm:$0xff]  }
  0xf8   :  { %3263 = vmatprep.subr.bf16.mxu0 %v4994_v38  ;;  %3386 = vmatprep.subr.bf16.mxu1 %v4997_v39  ;;  %v5070_v36 = vld [vmem:[%s6912_s1 + $0x158] ss:$52 sps:$4 sm:$0xff]   ;;  %v5073_v38 = vld [vmem:[%s6912_s1 + $0x160] ss:$52 sps:$4 sm:$0xff]  }
  0xf9   :  { %v5078_v39 = vld [vmem:[%s6912_s1 + $0x1c4] ss:$52 sps:$4 sm:$0xff]  }
  0xfb   :  { %3264 = vmatpush1.bf16.msra.mxu0 %v4992_v53  ;;  %3387 = vmatpush1.bf16.msra.mxu1 %v4995_v40  ;;  %v5081_v53 = vld [vmem:[%s6912_s1 + $0x1cc] ss:$52 sps:$4 sm:$0xff]  }
  0xfc   :  { %3265 = vmatprep.subr.bf16.mxu0 %v5000_v41  ;;  %3388 = vmatprep.subr.bf16.mxu1 %v5003_v42  ;;  %v5076_v40 = vld [vmem:[%s6912_s1 + $0x1c0] ss:$52 sps:$4 sm:$0xff]   ;;  %v5079_v41 = vld [vmem:[%s6912_s1 + $0x1c8] ss:$52 sps:$4 sm:$0xff]  }
  0xfd   :  { %v5084_v42 = vld [vmem:[%s6912_s1 + $0x22c] ss:$52 sps:$4 sm:$0xff]  }
  0xff   :  { %3266 = vmatpush1.bf16.msra.mxu0 %v4998_v44  ;;  %3389 = vmatpush1.bf16.msra.mxu1 %v5001_v46  ;;  %v5087_v44 = vld [vmem:[%s6912_s1 + $0x234] ss:$52 sps:$4 sm:$0xff]  }
 0x100   :  { %3267 = vmatprep.subr.bf16.mxu0 %v5006_v47  ;;  %3390 = vmatprep.subr.bf16.mxu1 %v5009_v48  ;;  %v5082_v46 = vld [vmem:[%s6912_s1 + $0x228] ss:$52 sps:$4 sm:$0xff]   ;;  %v5085_v47 = vld [vmem:[%s6912_s1 + $0x230] ss:$52 sps:$4 sm:$0xff]  }
 0x101   :  { %v5090_v48 = vld [vmem:[%s6912_s1 + $0x294] ss:$52 sps:$4 sm:$0xff]  }
 0x103   :  { %3268 = vmatpush1.bf16.msra.mxu0 %v5004_v49  ;;  %3391 = vmatpush1.bf16.msra.mxu1 %v5007_v51  ;;  %v5093_v49 = vld [vmem:[%s6912_s1 + $0x29c] ss:$52 sps:$4 sm:$0xff]  }
 0x104   :  { %3269 = vmatprep.subr.bf16.mxu0 %v5012_v52  ;;  %3392 = vmatprep.subr.bf16.mxu1 %v5015_v54  ;;  %v5088_v51 = vld [vmem:[%s6912_s1 + $0x290] ss:$52 sps:$4 sm:$0xff]   ;;  %v5091_v52 = vld [vmem:[%s6912_s1 + $0x298] ss:$52 sps:$4 sm:$0xff]  }
 0x105   :  { %v5096_v54 = vld [vmem:[%s6912_s1 + $0x2fc] ss:$52 sps:$4 sm:$0xff]  }
 0x107   :  { %3270 = vmatpush1.bf16.msra.mxu0 %v5010_v55  ;;  %3393 = vmatpush1.bf16.msra.mxu1 %v5013_v56  ;;  %v5099_v55 = vld [vmem:[%s6912_s1 + $0x304] ss:$52 sps:$4 sm:$0xff]  }
 0x108   :  { %3271 = vmatprep.subr.bf16.mxu0 %v5018_v57  ;;  %3394 = vmatprep.subr.bf16.mxu1 %v5021_v58  ;;  %v5094_v56 = vld [vmem:[%s6912_s1 + $0x2f8] ss:$52 sps:$4 sm:$0xff]   ;;  %v5097_v57 = vld [vmem:[%s6912_s1 + $0x300] ss:$52 sps:$4 sm:$0xff]  }
 0x109   :  { %v5102_v58 = vld [vmem:[%s6912_s1 + $0x364] ss:$52 sps:$4 sm:$0xff]  }
 0x10b   :  { %3272 = vmatpush1.bf16.msra.mxu0 %v5016_v59  ;;  %3395 = vmatpush1.bf16.msra.mxu1 %v5019_v60  ;;  %v5105_v59 = vld [vmem:[%s6912_s1 + $0x36c] ss:$52 sps:$4 sm:$0xff]  }
 0x10c   :  { %3273 = vmatprep.subr.bf16.mxu0 %v5024_v62  ;;  %3396 = vmatprep.subr.bf16.mxu1 %v5027_v63  ;;  %v5100_v60 = vld [vmem:[%s6912_s1 + $0x360] ss:$52 sps:$4 sm:$0xff]   ;;  %v5103_v62 = vld [vmem:[%s6912_s1 + $0x368] ss:$52 sps:$4 sm:$0xff]  }
 0x10d   :  { %v5108_v63 = vld [vmem:[%s6912_s1 + $0x3cc] ss:$52 sps:$4 sm:$0xff]  }
 0x10f   :  { %3274 = vmatpush1.bf16.msra.mxu0 %v5022_v0  ;;  %3397 = vmatpush1.bf16.msra.mxu1 %v5025_v1  ;;  %v5111_v0 = vld [vmem:[%s6912_s1 + $0x3d4] ss:$52 sps:$4 sm:$0xff]  }
 0x110   :  { %3284 = vmatprep.subr.bf16.mxu0 %v5030_v2  ;;  %3407 = vmatprep.subr.bf16.mxu1 %v5033_v3  ;;  %v5106_v1 = vld [vmem:[%s6912_s1 + $0x3c8] ss:$52 sps:$4 sm:$0xff]   ;;  %v5109_v2 = vld [vmem:[%s6912_s1 + $0x3d0] ss:$52 sps:$4 sm:$0xff]  }
 0x111   :  { %v5114_v3 = vld [vmem:[%s6912_s1 + $0x434] ss:$52 sps:$4 sm:$0xff]  }
 0x112   :  { %3276 = vmatmul.mubr.bf16.vlgmr.msra.gmra.mrb[4].mxu0 %v5808_v26  ;;  %3399 = vmatmul.mubr.bf16.vlgmr.msra.gmra.mrb[4].mxu1 %v5808_v26 }
 0x113   :  { %3285 = vmatpush1.bf16.msra.mxu0 %v5028_v4  ;;  %3408 = vmatpush1.bf16.msra.mxu1 %v5031_v5  ;;  %v5117_v4 = vld [vmem:[%s6912_s1 + $0x43c] ss:$52 sps:$4 sm:$0xff]  }
 0x114   :  { %3286 = vmatprep.subr.bf16.mxu0 %v5036_v6  ;;  %3409 = vmatprep.subr.bf16.mxu1 %v5039_v7  ;;  %v5112_v5 = vld [vmem:[%s6912_s1 + $0x430] ss:$52 sps:$4 sm:$0xff]   ;;  %v5115_v6 = vld [vmem:[%s6912_s1 + $0x438] ss:$52 sps:$4 sm:$0xff]  }
 0x115   :  { %3316 = vmatprep.mubr.bf16.mxu0 %v5356_v22  ;;  %3439 = vmatprep.mubr.bf16.mxu1 %v5356_v22  ;;  %v5120_v7 = vld [vmem:[%s6912_s1 + $0x49c] ss:$52 sps:$4 sm:$0xff]  }
 0x117   :  { %3287 = vmatpush1.bf16.msra.mxu0 %v5034_v8  ;;  %3410 = vmatpush1.bf16.msra.mxu1 %v5037_v9  ;;  %v5123_v8 = vld [vmem:[%s6912_s1 + $0x4a4] ss:$52 sps:$4 sm:$0xff]  }
 0x118   :  { %3288 = vmatprep.subr.bf16.mxu0 %v5042_v10  ;;  %3411 = vmatprep.subr.bf16.mxu1 %v5045_v11  ;;  %v5118_v9 = vld [vmem:[%s6912_s1 + $0x498] ss:$52 sps:$4 sm:$0xff]   ;;  %v5121_v10 = vld [vmem:[%s6912_s1 + $0x4a0] ss:$52 sps:$4 sm:$0xff]  }
 0x119   :  { %v5126_v11 = vld [vmem:[%s6912_s1 + $0x504] ss:$52 sps:$4 sm:$0xff]  }
 0x11b   :  { %3289 = vmatpush1.bf16.msra.mxu0 %v5040_v12  ;;  %3412 = vmatpush1.bf16.msra.mxu1 %v5043_v13  ;;  %v5129_v12 = vld [vmem:[%s6912_s1 + $0x50c] ss:$52 sps:$4 sm:$0xff]  }
 0x11c   :  { %3290 = vmatprep.subr.bf16.mxu0 %v5048_v15  ;;  %3413 = vmatprep.subr.bf16.mxu1 %v5051_v16  ;;  %v5124_v13 = vld [vmem:[%s6912_s1 + $0x500] ss:$52 sps:$4 sm:$0xff]   ;;  %v5127_v15 = vld [vmem:[%s6912_s1 + $0x508] ss:$52 sps:$4 sm:$0xff]  }
 0x11d   :  { %v5132_v16 = vld [vmem:[%s6912_s1 + $0x56c] ss:$52 sps:$4 sm:$0xff]  }
 0x11f   :  { %3291 = vmatpush1.bf16.msra.mxu0 %v5046_v17  ;;  %3414 = vmatpush1.bf16.msra.mxu1 %v5049_v19  ;;  %v5135_v17 = vld [vmem:[%s6912_s1 + $0x574] ss:$52 sps:$4 sm:$0xff]  }
 0x120   :  { %3448 = vmatprep.subr.bf16.mxu0 %v5054_v20  ;;  %3571 = vmatprep.subr.bf16.mxu1 %v5057_v21  ;;  %v5130_v19 = vld [vmem:[%s6912_s1 + $0x568] ss:$52 sps:$4 sm:$0xff]   ;;  %v5133_v20 = vld [vmem:[%s6912_s1 + $0x570] ss:$52 sps:$4 sm:$0xff]  }
 0x121   :  { %v5138_v21 = vld [vmem:[%s6912_s1 + $0x5d4] ss:$52 sps:$4 sm:$0xff]  }
 0x122   :  { %4475 = vmatmul.mubr.msk.bf16.vlgmr.msra.gmra.mrb[4].mxu0 %vm2952_vm0, %v5863_v45  ;;  %4476 = vmatmul.mubr.msk.bf16.vlgmr.msra.gmra.mrb[4].mxu1 %vm2952_vm0, %v5863_v45 }
 0x123   :  { %3449 = vmatpush1.bf16.msra.mxu0 %v5052_v23  ;;  %3572 = vmatpush1.bf16.msra.mxu1 %v5055_v24  ;;  %v5141_v23 = vld [vmem:[%s6912_s1 + $0x5dc] ss:$52 sps:$4 sm:$0xff]  }
 0x124   :  { %3450 = vmatprep.subr.bf16.mxu0 %v5060_v25  ;;  %3573 = vmatprep.subr.bf16.mxu1 %v5063_v27  ;;  %v5136_v24 = vld [vmem:[%s6912_s1 + $0x5d0] ss:$52 sps:$4 sm:$0xff]   ;;  %v5139_v25 = vld [vmem:[%s6912_s1 + $0x5d8] ss:$52 sps:$4 sm:$0xff]  }
 0x125   :  { %3480 = vmatprep.mubr.bf16.mxu0 %v5548_v61  ;;  %3603 = vmatprep.mubr.bf16.mxu1 %v5548_v61  ;;  %v5144_v27 = vld [vmem:[%s6912_s1 + $0x63c] ss:$52 sps:$4 sm:$0xff]  }
 0x127   :  { %3451 = vmatpush1.bf16.msra.mxu0 %v5058_v28  ;;  %3574 = vmatpush1.bf16.msra.mxu1 %v5061_v29  ;;  %v5147_v28 = vld [vmem:[%s6912_s1 + $0x644] ss:$52 sps:$4 sm:$0xff]  }
 0x128   :  { %3452 = vmatprep.subr.bf16.mxu0 %v5066_v30  ;;  %3575 = vmatprep.subr.bf16.mxu1 %v5069_v31  ;;  %v5142_v29 = vld [vmem:[%s6912_s1 + $0x638] ss:$52 sps:$4 sm:$0xff]   ;;  %v5145_v30 = vld [vmem:[%s6912_s1 + $0x640] ss:$52 sps:$4 sm:$0xff]  }
 0x129   :  { %v5150_v31 = vld [vmem:[%s6912_s1 + $0x6a4] ss:$52 sps:$4 sm:$0xff]  }
 0x12b   :  { %3453 = vmatpush1.bf16.msra.mxu0 %v5064_v32  ;;  %3576 = vmatpush1.bf16.msra.mxu1 %v5067_v33  ;;  %v5153_v32 = vld [vmem:[%s6912_s1 + $0x6ac] ss:$52 sps:$4 sm:$0xff]   ;;  %v530_v33 = vsub.s32 0, %v5499_v43  ;;  %v5159_v43 = vld [vmem:[%s6912_s1 + $0x714] ss:$52 sps:$4 sm:$0xff]  }
 0x12c   :  { %3454 = vmatprep.subr.bf16.mxu0 %v5072_v34  ;;  %3577 = vmatprep.subr.bf16.mxu1 %v5075_v35  ;;  %v5148_v34 = vld [vmem:[%s6912_s1 + $0x6a0] ss:$52 sps:$4 sm:$0xff]   ;;  %v5151_v35 = vld [vmem:[%s6912_s1 + $0x6a8] ss:$52 sps:$4 sm:$0xff]  }
 0x12f   :  { %3455 = vmatpush1.bf16.msra.mxu0 %v5070_v36  ;;  %3578 = vmatpush1.bf16.msra.mxu1 %v5073_v38  ;;  %v526_v36 = vpop.permute.xlu0 %525  ;;  %v5156_v38 = vld [vmem:[%s6912_s1 + $0x70c] ss:$52 sps:$4 sm:$0xff]  }
 0x130   :  { %3456 = vmatprep.subr.bf16.mxu0 %v5078_v39  ;;  %3579 = vmatprep.subr.bf16.mxu1 %v5081_v53  ;;  %v6522_v39 = vrot.slane %v526_v36, %v530_v33  ;;  %v5154_v53 = vld [vmem:[%s6912_s1 + $0x708] ss:$52 sps:$4 sm:$0xff]   ;;  %v5193_v33 = vld [vmem:[%s6912_s1 + $0x980] ss:$52 sps:$4 sm:$0xff]  }
 0x131   :  { %v5196_v36 = vld [vmem:[%s6912_s1 + $0x9e0] ss:$52 sps:$4 sm:$0xff]  }
 0x133   :  { %3457 = vmatpush1.bf16.msra.mxu0 %v5076_v40  ;;  %3580 = vmatpush1.bf16.msra.mxu1 %v5079_v41  ;;  %v5157_v40 = vld [vmem:[%s6912_s1 + $0x710] ss:$52 sps:$4 sm:$0xff]   ;;  %v5162_v41 = vld [vmem:[%s6912_s1 + $0x774] ss:$52 sps:$4 sm:$0xff]  }
 0x134   :  { %3458 = vmatprep.subr.bf16.mxu0 %v5084_v42  ;;  %3581 = vmatprep.subr.bf16.mxu1 %v5087_v44  ;;  %v5165_v42 = vld [vmem:[%s6912_s1 + $0x77c] ss:$52 sps:$4 sm:$0xff]  }
 0x137   :  { %3459 = vmatpush1.bf16.msra.mxu0 %v5082_v46  ;;  %3582 = vmatpush1.bf16.msra.mxu1 %v5085_v47 }
 0x138   :  { %3460 = vmatprep.subr.bf16.mxu0 %v5090_v48  ;;  %3583 = vmatprep.subr.bf16.mxu1 %v5093_v49 }
 0x13b   :  { %3461 = vmatpush1.bf16.msra.mxu0 %v5088_v51  ;;  %3584 = vmatpush1.bf16.msra.mxu1 %v5091_v52  ;;  %v5160_v52 = vld [vmem:[%s6912_s1 + $0x770] ss:$52 sps:$4 sm:$0xff]  }
 0x13c   :  { %3462 = vmatprep.subr.bf16.mxu0 %v5096_v54  ;;  %3585 = vmatprep.subr.bf16.mxu1 %v5099_v55  ;;  %v5163_v54 = vld [vmem:[%s6912_s1 + $0x778] ss:$52 sps:$4 sm:$0xff]  }
 0x13f   :  { %3463 = vmatpush1.bf16.msra.mxu0 %v5094_v56  ;;  %3586 = vmatpush1.bf16.msra.mxu1 %v5097_v57 }
 0x140   :  { %3464 = vmatprep.subr.bf16.mxu0 %v5102_v58  ;;  %3587 = vmatprep.subr.bf16.mxu1 %v5105_v59  ;;  %v5168_v59 = vld [vmem:[%s6912_s1 + $0x7dc] ss:$52 sps:$4 sm:$0xff]  }
 0x143   :  { %3465 = vmatpush1.bf16.msra.mxu0 %v5100_v60  ;;  %3588 = vmatpush1.bf16.msra.mxu1 %v5103_v62  ;;  %v5171_v60 = vld [vmem:[%s6912_s1 + $0x7e4] ss:$52 sps:$4 sm:$0xff]  }
 0x144   :  { %3466 = vmatprep.subr.bf16.mxu0 %v5108_v63  ;;  %3589 = vmatprep.subr.bf16.mxu1 %v5111_v0 }
 0x147   :  { %3467 = vmatpush1.bf16.msra.mxu0 %v5106_v1  ;;  %3590 = vmatpush1.bf16.msra.mxu1 %v5109_v2 }
 0x148   :  { %3468 = vmatprep.subr.bf16.mxu0 %v5114_v3  ;;  %3591 = vmatprep.subr.bf16.mxu1 %v5117_v4  ;;  %v5166_v4 = vld [vmem:[%s6912_s1 + $0x7d8] ss:$52 sps:$4 sm:$0xff]  }
 0x14b   :  { %3469 = vmatpush1.bf16.msra.mxu0 %v5112_v5  ;;  %3592 = vmatpush1.bf16.msra.mxu1 %v5115_v6  ;;  %v5169_v5 = vld [vmem:[%s6912_s1 + $0x7e0] ss:$52 sps:$4 sm:$0xff]   ;;  %v5174_v6 = vld [vmem:[%s6912_s1 + $0x844] ss:$52 sps:$4 sm:$0xff]  }
 0x14c   :  { %3470 = vmatprep.subr.bf16.mxu0 %v5120_v7  ;;  %3593 = vmatprep.subr.bf16.mxu1 %v5123_v8  ;;  %v5177_v7 = vld [vmem:[%s6912_s1 + $0x84c] ss:$52 sps:$4 sm:$0xff]  }
 0x14d   :  { %v5172_v8 = vld [vmem:[%s6912_s1 + $0x840] ss:$52 sps:$4 sm:$0xff]  }
 0x14f   :  { %3471 = vmatpush1.bf16.msra.mxu0 %v5118_v9  ;;  %3594 = vmatpush1.bf16.msra.mxu1 %v5121_v10  ;;  %v5175_v9 = vld [vmem:[%s6912_s1 + $0x848] ss:$52 sps:$4 sm:$0xff]   ;;  %v5180_v10 = vld [vmem:[%s6912_s1 + $0x8ac] ss:$52 sps:$4 sm:$0xff]  }
 0x150   :  { %3472 = vmatprep.subr.bf16.mxu0 %v5126_v11  ;;  %3595 = vmatprep.subr.bf16.mxu1 %v5129_v12  ;;  %v5183_v11 = vld [vmem:[%s6912_s1 + $0x8b4] ss:$52 sps:$4 sm:$0xff]  }
 0x151   :  { %v5178_v12 = vld [vmem:[%s6912_s1 + $0x8a8] ss:$52 sps:$4 sm:$0xff]  }
 0x153   :  { %3473 = vmatpush1.bf16.msra.mxu0 %v5124_v13  ;;  %3596 = vmatpush1.bf16.msra.mxu1 %v5127_v15  ;;  %v5181_v13 = vld [vmem:[%s6912_s1 + $0x8b0] ss:$52 sps:$4 sm:$0xff]  }
 0x154   :  { %3474 = vmatprep.subr.bf16.mxu0 %v5132_v16  ;;  %3597 = vmatprep.subr.bf16.mxu1 %v5135_v17  ;;  %v5186_v16 = vld [vmem:[%s6912_s1 + $0x914] ss:$52 sps:$4 sm:$0xff]   ;;  %v5189_v17 = vld [vmem:[%s6912_s1 + $0x91c] ss:$52 sps:$4 sm:$0xff]  }
 0x157   :  { %3475 = vmatpush1.bf16.msra.mxu0 %v5130_v19  ;;  %3598 = vmatpush1.bf16.msra.mxu1 %v5133_v20 }
 0x158   :  { %3476 = vmatprep.subr.bf16.mxu0 %v5138_v21  ;;  %3599 = vmatprep.subr.bf16.mxu1 %v5141_v23 }
 0x15b   :  { %3477 = vmatpush1.bf16.msra.mxu0 %v5136_v24  ;;  %3600 = vmatpush1.bf16.msra.mxu1 %v5139_v25 }
 0x15c   :  { %3478 = vmatprep.subr.bf16.mxu0 %v5144_v27  ;;  %3601 = vmatprep.subr.bf16.mxu1 %v5147_v28  ;;  %v5184_v27 = vld [vmem:[%s6912_s1 + $0x910] ss:$52 sps:$4 sm:$0xff]   ;;  %v5187_v28 = vld [vmem:[%s6912_s1 + $0x918] ss:$52 sps:$4 sm:$0xff]  }
 0x15f   :  { %3479 = vmatpush1.bf16.msra.mxu0 %v5142_v29  ;;  %3602 = vmatpush1.bf16.msra.mxu1 %v5145_v30  ;;  %v5192_v30 = vld [vmem:[%s6912_s1 + $0x97c] ss:$52 sps:$4 sm:$0xff]  }
 0x160   :  { %3489 = vmatprep.subr.bf16.mxu0 %v5150_v31  ;;  %3612 = vmatprep.subr.bf16.mxu1 %v5153_v32  ;;  %v5195_v31 = vld [vmem:[%s6912_s1 + $0x984] ss:$52 sps:$4 sm:$0xff]  }
 0x161   :  { %v5190_v32 = vld [vmem:[%s6912_s1 + $0x978] ss:$52 sps:$4 sm:$0xff]  }
 0x162   :  { %3481 = vmatmul.mubr.bf16.vlgmr.msra.gmra.mrb[8].mxu0 %v5601_v14  ;;  %3604 = vmatmul.mubr.bf16.vlgmr.msra.gmra.mrb[8].mxu1 %v5601_v14 }
 0x163   :  { %3490 = vmatpush1.bf16.msra.mxu0 %v5148_v34  ;;  %3613 = vmatpush1.bf16.msra.mxu1 %v5151_v35  ;;  %v5198_v34 = vld [vmem:[%s6912_s1 + $0x9e4] ss:$52 sps:$4 sm:$0xff]   ;;  %v5201_v35 = vld [vmem:[%s6912_s1 + $0x9ec] ss:$52 sps:$4 sm:$0xff]  }
 0x164   :  { %3491 = vmatprep.subr.bf16.mxu0 %v5156_v38  ;;  %3614 = vmatprep.subr.bf16.mxu1 %v5159_v43  ;;  %v5199_v38 = vld [vmem:[%s6912_s1 + $0x9e8] ss:$52 sps:$4 sm:$0xff]   ;;  %v5204_v43 = vld [vmem:[%s6912_s1 + $0xa4c] ss:$52 sps:$4 sm:$0xff]  }
 0x165   :  { %v3072_v44 = vpop.f32.mrb[0].mxu0  ;;  %v3195_v46 = vpop.f32.mrb[0].mxu1  ;;  %3521 = vmatprep.mubr.bf16.mxu0 %v5614_v18  ;;  %3644 = vmatprep.mubr.bf16.mxu1 %v5614_v18 }
 0x166   :  { %v4554_v47 = vadd.f32 %v3072_v44, %v6522_v39  ;;  %v4556_v48 = vadd.f32 %v3195_v46, %v6522_v39  ;;  %v3074_v49 = vpop.f32.mrb[1].mxu0  ;;  %v3197_v51 = vpop.f32.mrb[1].mxu1  ;;  %v5202_v44 = vld [vmem:[%s6912_s1 + $0xa48] ss:$52 sps:$4 sm:$0xff]   ;;  %v5205_v46 = vld [vmem:[%s6912_s1 + $0xa50] ss:$52 sps:$4 sm:$0xff]  }
 0x167   :  { %v4555_v55 = vadd.f32 %v3074_v49, %v6522_v39  ;;  %v4557_v56 = vadd.f32 %v3197_v51, %v6522_v39  ;;  %v3076_v57 = vpop.f32.mrb[2].mxu0  ;;  %v3199_v58 = vpop.f32.mrb[2].mxu1  ;;  %3492 = vmatpush1.bf16.msra.mxu0 %v5154_v53  ;;  %3615 = vmatpush1.bf16.msra.mxu1 %v5157_v40  ;;  %v5207_v53 = vld [vmem:[%s6912_s1 + $0xa54] ss:$52 sps:$4 sm:$0xff]   ;;  %v5213_v51 = vld [vmem:[%s6912_s1 + $0xabc] ss:$52 sps:$4 sm:$0xff]  }
 0x168   :  { %v4480_v62 = vmul.f32 -1.442695, %v4554_v47  ;;  %v4482_v63 = vmul.f32 -1.442695, %v4556_v48  ;;  %v3077_v0 = vpop.f32.mrb[3].mxu0  ;;  %v3200_v1 = vpop.f32.mrb[3].mxu1  ;;  %3493 = vmatprep.subr.bf16.mxu0 %v5162_v41  ;;  %3616 = vmatprep.subr.bf16.mxu1 %v5165_v42 }
 0x169   :  { %v4481_v2 = vmul.f32 -1.442695, %v4555_v55  ;;  %v4483_v3 = vmul.f32 -1.442695, %v4557_v56  ;;  %v5210_v49 = vld [vmem:[%s6912_s1 + $0xab4] ss:$52 sps:$4 sm:$0xff]  }
 0x16a   :  { %5304 = vpow2.f32 %v4480_v62  ;;  %v5208_v56 = vld [vmem:[%s6912_s1 + $0xab0] ss:$52 sps:$4 sm:$0xff]   ;;  %v5211_v57 = vld [vmem:[%s6912_s1 + $0xab8] ss:$52 sps:$4 sm:$0xff]  }
 0x16b   :  { %5306 = vpow2.f32 %v4482_v63  ;;  %3494 = vmatpush1.bf16.msra.mxu0 %v5160_v52  ;;  %3617 = vmatpush1.bf16.msra.mxu1 %v5163_v54  ;;  %v5216_v58 = vld [vmem:[%s6912_s1 + $0xb1c] ss:$52 sps:$4 sm:$0xff]   ;;  %v5214_v62 = vld [vmem:[%s6912_s1 + $0xb18] ss:$52 sps:$4 sm:$0xff]   ;;  %v5217_v63 = vld [vmem:[%s6912_s1 + $0xb20] ss:$52 sps:$4 sm:$0xff]  }
 0x16c   :  { %5308 = vpow2.f32 %v4481_v2  ;;  %3495 = vmatprep.subr.bf16.mxu0 %v5168_v59  ;;  %3618 = vmatprep.subr.bf16.mxu1 %v5171_v60  ;;  %v5219_v59 = vld [vmem:[%s6912_s1 + $0xb24] ss:$52 sps:$4 sm:$0xff]   ;;  %v5225_v1 = vld [vmem:[%s6912_s1 + $0xb8c] ss:$52 sps:$4 sm:$0xff]  }
 0x16d   :  { %5310 = vpow2.f32 %v4483_v3  ;;  %v5222_v0 = vld [vmem:[%s6912_s1 + $0xb84] ss:$52 sps:$4 sm:$0xff]   ;;  %v5220_v2 = vld [vmem:[%s6912_s1 + $0xb80] ss:$52 sps:$4 sm:$0xff]   ;;  %v5223_v3 = vld [vmem:[%s6912_s1 + $0xb88] ss:$52 sps:$4 sm:$0xff]  }
 0x16f   :  { %3496 = vmatpush1.bf16.msra.mxu0 %v5166_v4  ;;  %3619 = vmatpush1.bf16.msra.mxu1 %v5169_v5  ;;  %v5228_v4 = vld [vmem:[%s6912_s1 + $0xbec] ss:$52 sps:$4 sm:$0xff]   ;;  %v5231_v5 = vld [vmem:[%s6912_s1 + $0xbf4] ss:$52 sps:$4 sm:$0xff]  }
 0x170   :  { %3497 = vmatprep.subr.bf16.mxu0 %v5174_v6  ;;  %3620 = vmatprep.subr.bf16.mxu1 %v5177_v7  ;;  %v5226_v6 = vld [vmem:[%s6912_s1 + $0xbe8] ss:$52 sps:$4 sm:$0xff]   ;;  %v5229_v7 = vld [vmem:[%s6912_s1 + $0xbf0] ss:$52 sps:$4 sm:$0xff]  }
 0x173   :  { %3498 = vmatpush1.bf16.msra.mxu0 %v5172_v8  ;;  %3621 = vmatpush1.bf16.msra.mxu1 %v5175_v9  ;;  %v5234_v8 = vld [vmem:[%s6912_s1 + $0xc54] ss:$52 sps:$4 sm:$0xff]   ;;  %v5237_v9 = vld [vmem:[%s6912_s1 + $0xc5c] ss:$52 sps:$4 sm:$0xff]  }
 0x174   :  { %v5305_v15 = vpop.eup %5304  ;;  %3499 = vmatprep.subr.bf16.mxu0 %v5180_v10  ;;  %3622 = vmatprep.subr.bf16.mxu1 %v5183_v11  ;;  %v5232_v10 = vld [vmem:[%s6912_s1 + $0xc50] ss:$52 sps:$4 sm:$0xff]   ;;  %v5235_v11 = vld [vmem:[%s6912_s1 + $0xc58] ss:$52 sps:$4 sm:$0xff]  }
 0x175   :  { %v5307_v19 = vpop.eup %5306  ;;  %v3853_v20 = vadd.f32 1.0, %v5305_v15  ;;  %v5238_v15 = vld [vmem:[%s6912_s1 + $0xcb8] ss:$52 sps:$4 sm:$0xff]  }
 0x176   :  { %v5309_v21 = vpop.eup %5308  ;;  %v3855_v23 = vadd.f32 1.0, %v5307_v19  ;;  %v5249_v19 = vld [vmem:[%s6912_s1 + $0xd2c] ss:$52 sps:$4 sm:$0xff]  }
 0x177   :  { %v5311_v24 = vpop.eup %5310  ;;  %5312 = vrcp.f32 %v3853_v20  ;;  %v3854_v25 = vadd.f32 1.0, %v5309_v21  ;;  %3500 = vmatpush1.bf16.msra.mxu0 %v5178_v12  ;;  %3623 = vmatpush1.bf16.msra.mxu1 %v5181_v13  ;;  %v5240_v12 = vld [vmem:[%s6912_s1 + $0xcbc] ss:$52 sps:$4 sm:$0xff]   ;;  %v5243_v13 = vld [vmem:[%s6912_s1 + $0xcc4] ss:$52 sps:$4 sm:$0xff]  }
 0x178   :  { %5314 = vrcp.f32 %v3855_v23  ;;  %v3856_v29 = vadd.f32 1.0, %v5311_v24  ;;  %3501 = vmatprep.subr.bf16.mxu0 %v5186_v16  ;;  %3624 = vmatprep.subr.bf16.mxu1 %v5189_v17  ;;  %v5241_v16 = vld [vmem:[%s6912_s1 + $0xcc0] ss:$52 sps:$4 sm:$0xff]   ;;  %v5246_v17 = vld [vmem:[%s6912_s1 + $0xd24] ss:$52 sps:$4 sm:$0xff]  }
 0x179   :  { %5316 = vrcp.f32 %v3854_v25  ;;  %v5244_v20 = vld [vmem:[%s6912_s1 + $0xd20] ss:$52 sps:$4 sm:$0xff]   ;;  %v5247_v21 = vld [vmem:[%s6912_s1 + $0xd28] ss:$52 sps:$4 sm:$0xff]  }
 0x17a   :  { %5318 = vrcp.f32 %v3856_v29  ;;  %v5252_v23 = vld [vmem:[%s6912_s1 + $0xd8c] ss:$52 sps:$4 sm:$0xff]   ;;  %v5255_v24 = vld [vmem:[%s6912_s1 + $0xd94] ss:$52 sps:$4 sm:$0xff]   ;;  %v5261_v29 = vld [vmem:[%s6912_s1 + $0xdfc] ss:$52 sps:$4 sm:$0xff]  }
 0x17b   :  { %3502 = vmatpush1.bf16.msra.mxu0 %v5184_v27  ;;  %3625 = vmatpush1.bf16.msra.mxu1 %v5187_v28  ;;  %v5250_v25 = vld [vmem:[%s6912_s1 + $0xd88] ss:$52 sps:$4 sm:$0xff]   ;;  %v5253_v27 = vld [vmem:[%s6912_s1 + $0xd90] ss:$52 sps:$4 sm:$0xff]  }
 0x17c   :  { %3503 = vmatprep.subr.bf16.mxu0 %v5192_v30  ;;  %3626 = vmatprep.subr.bf16.mxu1 %v5195_v31  ;;  %v5258_v28 = vld [vmem:[%s6912_s1 + $0xdf4] ss:$52 sps:$4 sm:$0xff]   ;;  %v5256_v30 = vld [vmem:[%s6912_s1 + $0xdf0] ss:$52 sps:$4 sm:$0xff]   ;;  %v5259_v31 = vld [vmem:[%s6912_s1 + $0xdf8] ss:$52 sps:$4 sm:$0xff]  }
 0x17f   :  { %3504 = vmatpush1.bf16.msra.mxu0 %v5190_v32  ;;  %3627 = vmatpush1.bf16.msra.mxu1 %v5193_v33  ;;  %v5264_v32 = vld [vmem:[%s6912_s1 + $0xe5c] ss:$52 sps:$4 sm:$0xff]   ;;  %v5262_v33 = vld [vmem:[%s6912_s1 + $0xe58] ss:$52 sps:$4 sm:$0xff]  }
 0x180   :  { %3505 = vmatprep.subr.bf16.mxu0 %v5198_v34  ;;  %3628 = vmatprep.subr.bf16.mxu1 %v5201_v35  ;;  %v5265_v34 = vld [vmem:[%s6912_s1 + $0xe60] ss:$52 sps:$4 sm:$0xff]   ;;  %v5268_v35 = vld [vmem:[%s6912_s1 + $0x370] ss:$52 sps:$4 sm:$0xff]  }
 0x181   :  { %v5313_v40 = vpop.eup %5312 }
 0x182   :  { %v5315_v41 = vpop.eup %5314 }
 0x183   :  { %v5317_v42 = vpop.eup %5316  ;;  %3506 = vmatpush1.bf16.msra.mxu0 %v5196_v36  ;;  %3629 = vmatpush1.bf16.msra.mxu1 %v5199_v38  ;;  %v5270_v36 = vld [vmem:[%s6912_s1 + $0x9f0] ss:$52 sps:$4 sm:$0xff]  }
 0x184   :  { %v5319_v47 = vpop.eup %5318  ;;  %v3905_v48 = vcombine.low %v5313_v40, %v5317_v42  ;;  %3507 = vmatprep.subr.bf16.mxu0 %v5204_v43  ;;  %3630 = vmatprep.subr.bf16.mxu1 %v5207_v53  ;;  %v5269_v38 = vld [vmem:[%s6912_s1 + $0x30] ss:$52 sps:$4 sm:$0xff]   ;;  %v5272_v53 = vld [vmem:[%s6912_s1 + $0x3d8] ss:$52 sps:$4 sm:$0xff]  }
 0x185   :  { %v3906_v52 = vcombine.low %v5315_v41, %v5319_v47  ;;  %v5271_v43 = vld [vmem:[%s6912_s1 + $0x6b0] ss:$52 sps:$4 sm:$0xff]   ;;  %v5274_v40 = vld [vmem:[%s6912_s1 + $0xa58] ss:$52 sps:$4 sm:$0xff]   ;;  %v5277_v47 = vld [vmem:[%s6912_s1 + $0x100] ss:$52 sps:$4 sm:$0xff]  }
 0x186   :  { %v6641_v54 = vrot.slane %v3905_v48, %v5517_v50  ;;  %v5273_v41 = vld [vmem:[%s6912_s1 + $0x98] ss:$52 sps:$4 sm:$0xff]   ;;  %v5279_v48 = vld [vmem:[%s6912_s1 + $0x780] ss:$52 sps:$4 sm:$0xff]  }
 0x187   :  { %v6644_v55 = vrot.slane %v3906_v52, %v5517_v50  ;;  %3508 = vmatpush1.bf16.msra.mxu0 %v5202_v44  ;;  %3631 = vmatpush1.bf16.msra.mxu1 %v5205_v46  ;;  %v5275_v42 = vld [vmem:[%s6912_s1 + $0x718] ss:$52 sps:$4 sm:$0xff]   ;;  %v5276_v44 = vld [vmem:[%s6912_s1 + $0x440] ss:$52 sps:$4 sm:$0xff]   ;;  %v5284_v52 = vld [vmem:[%s6912_s1 + $0x510] ss:$52 sps:$4 sm:$0xff]  }
 0x188   :  { %3509 = vmatprep.subr.bf16.mxu0 %v5210_v49  ;;  %3632 = vmatprep.subr.bf16.mxu1 %v5213_v51  ;;  %v5278_v46 = vld [vmem:[%s6912_s1 + $0xac0] ss:$52 sps:$4 sm:$0xff]   ;;  %v5280_v49 = vld [vmem:[%s6912_s1 + $0x4a8] ss:$52 sps:$4 sm:$0xff]  }
 0x189   :  { %v3937_v60 = vcombine.low %v6641_v54, %v6644_v55  ;;  %v5283_v51 = vld [vmem:[%s6912_s1 + $0x7e8] ss:$52 sps:$4 sm:$0xff]  }
 0x18b   :  { %3510 = vmatpush1.bf16.msra.mxu0 %v5208_v56  ;;  %3633 = vmatpush1.bf16.msra.mxu1 %v5211_v57  ;;  %v5286_v56 = vld [vmem:[%s6912_s1 + $0xb90] ss:$52 sps:$4 sm:$0xff]  }
 0x18c   :  { %3511 = vmatprep.subr.bf16.mxu0 %v5216_v58  ;;  %3634 = vmatprep.subr.bf16.mxu1 %v5219_v59  ;;  %v5285_v57 = vld [vmem:[%s6912_s1 + $0x1d0] ss:$52 sps:$4 sm:$0xff]   ;;  %v5288_v59 = vld [vmem:[%s6912_s1 + $0x578] ss:$52 sps:$4 sm:$0xff]  }
 0x18d   :  { %v5287_v58 = vld [vmem:[%s6912_s1 + $0x850] ss:$52 sps:$4 sm:$0xff]  }
 0x18f   :  { %3512 = vmatpush1.bf16.msra.mxu0 %v5214_v62  ;;  %3635 = vmatpush1.bf16.msra.mxu1 %v5217_v63  ;;  %v5290_v62 = vld [vmem:[%s6912_s1 + $0xbf8] ss:$52 sps:$4 sm:$0xff]  }
 0x190   :  { %3513 = vmatprep.subr.bf16.mxu0 %v5222_v0  ;;  %3636 = vmatprep.subr.bf16.mxu1 %v5225_v1  ;;  %v5289_v63 = vld [vmem:[%s6912_s1 + $0x238] ss:$52 sps:$4 sm:$0xff]   ;;  %v5292_v1 = vld [vmem:[%s6912_s1 + $0x5e0] ss:$52 sps:$4 sm:$0xff]  }
 0x191   :  { %v5291_v0 = vld [vmem:[%s6912_s1 + $0x8b8] ss:$52 sps:$4 sm:$0xff]  }
 0x193   :  { %3514 = vmatpush1.bf16.msra.mxu0 %v5220_v2  ;;  %3637 = vmatpush1.bf16.msra.mxu1 %v5223_v3  ;;  %v5294_v2 = vld [vmem:[%s6912_s1 + $0xc60] ss:$52 sps:$4 sm:$0xff]  }
 0x194   :  { %3515 = vmatprep.subr.bf16.mxu0 %v5228_v4  ;;  %3638 = vmatprep.subr.bf16.mxu1 %v5231_v5  ;;  %v5293_v3 = vld [vmem:[%s6912_s1 + $0x2a0] ss:$52 sps:$4 sm:$0xff]   ;;  %v5296_v5 = vld [vmem:[%s6912_s1 + $0x648] ss:$52 sps:$4 sm:$0xff]  }
 0x195   :  { %v5295_v4 = vld [vmem:[%s6912_s1 + $0x920] ss:$52 sps:$4 sm:$0xff]  }
 0x197   :  { %3516 = vmatpush1.bf16.msra.mxu0 %v5226_v6  ;;  %3639 = vmatpush1.bf16.msra.mxu1 %v5229_v7  ;;  %v5298_v6 = vld [vmem:[%s6912_s1 + $0xcc8] ss:$52 sps:$4 sm:$0xff]  }
 0x198   :  { %3517 = vmatprep.subr.bf16.mxu0 %v5234_v8  ;;  %3640 = vmatprep.subr.bf16.mxu1 %v5237_v9  ;;  %v5297_v7 = vld [vmem:[%s6912_s1 + $0x308] ss:$52 sps:$4 sm:$0xff]   ;;  %v5300_v9 = vld [vmem:[%s6912_s1 + $0xd30] ss:$52 sps:$4 sm:$0xff]  }
 0x199   :  { %v5299_v8 = vld [vmem:[%s6912_s1 + $0x988] ss:$52 sps:$4 sm:$0xff]  }
 0x19b   :  { %3518 = vmatpush1.bf16.msra.mxu0 %v5232_v10  ;;  %3641 = vmatpush1.bf16.msra.mxu1 %v5235_v11  ;;  %v5358_v10 = vmov 0.0   ;;  %v5301_v11 = vld [vmem:[%s6912_s1 + $0xd98] ss:$52 sps:$4 sm:$0xff]  }
 0x19c   :  { %3519 = vmatprep.subr.bf16.mxu0 %v5240_v12  ;;  %3642 = vmatprep.subr.bf16.mxu1 %v5243_v13  ;;  %v5302_v12 = vld [vmem:[%s6912_s1 + $0xe00] ss:$52 sps:$4 sm:$0xff]  }
 0x19f   :  { %3520 = vmatpush1.bf16.msra.mxu0 %v5238_v15  ;;  %3643 = vmatpush1.bf16.msra.mxu1 %v5241_v16 }
 0x1a0   :  { %3530 = vmatprep.subr.bf16.mxu0 %v5246_v17  ;;  %3653 = vmatprep.subr.bf16.mxu1 %v5249_v19 }
 0x1a2   :  { %3522 = vmatmul.mubr.bf16.vlgmr.msra.gmra.mrb[8].mxu0 %v5808_v26  ;;  %3645 = vmatmul.mubr.bf16.vlgmr.msra.gmra.mrb[8].mxu1 %v5808_v26 }
 0x1a3   :  { %3531 = vmatpush1.bf16.msra.mxu0 %v5244_v20  ;;  %3654 = vmatpush1.bf16.msra.mxu1 %v5247_v21 }
 0x1a4   :  { %3532 = vmatprep.subr.bf16.mxu0 %v5252_v23  ;;  %3655 = vmatprep.subr.bf16.mxu1 %v5255_v24 }
 0x1a5   :  { %3562 = vmatprep.mubr.bf16.mxu0 %v5356_v22  ;;  %3685 = vmatprep.mubr.bf16.mxu1 %v5356_v22  ;;  %v5267_v22 = vld [vmem:[%s6912_s1 + $0xe64] ss:$52 sps:$4 sm:$0xff]  }
 0x1a7   :  { %3533 = vmatpush1.bf16.msra.mxu0 %v5250_v25  ;;  %3656 = vmatpush1.bf16.msra.mxu1 %v5253_v27 }
 0x1a8   :  { %3534 = vmatprep.subr.bf16.mxu0 %v5258_v28  ;;  %3657 = vmatprep.subr.bf16.mxu1 %v5261_v29 }
 0x1ab   :  { %3535 = vmatpush1.bf16.msra.mxu0 %v5256_v30  ;;  %3658 = vmatpush1.bf16.msra.mxu1 %v5259_v31 }
 0x1ac   :  { %3536 = vmatprep.subr.bf16.mxu0 %v5264_v32  ;;  %3659 = vmatprep.subr.bf16.mxu1 %v5267_v22 }
 0x1af   :  { %3537 = vmatpush1.bf16.msra.mxu0 %v5262_v33  ;;  %3660 = vmatpush1.bf16.msra.mxu1 %v5265_v34 }
 0x1b0   :  { %4493 = vmatprep.subr.bf16.mxu0 %v5268_v35  ;;  %4515 = vmatprep.subr.bf16.mxu1 %v5270_v36 }
 0x1b2   :  { %4477 = vmatmul.mubr.msk.bf16.vlgmr.msra.gmra.mrb[8].mxu0 %vm2952_vm0, %v5863_v45  ;;  %4478 = vmatmul.mubr.msk.bf16.vlgmr.msra.gmra.mrb[8].mxu1 %vm2952_vm0, %v5863_v45 }
 0x1b3   :  { %4494 = vmatpush3.bf16.msra.mxu0 %v5269_v38  ;;  %4516 = vmatpush3.bf16.msra.mxu1 %v5271_v43 }
 0x1b4   :  { %4495 = vmatprep.subr.bf16.mxu0 %v5272_v53  ;;  %4517 = vmatprep.subr.bf16.mxu1 %v5274_v40 }
 0x1b5   :  { %3726 = vmatprep.mubr.bf16.mxu0 %v5548_v61  ;;  %3766 = vmatprep.mubr.bf16.mxu1 %v5614_v18  ;;  %v5282_v61 = vld [vmem:[%s6912_s1 + $0xb28] ss:$52 sps:$4 sm:$0xff]  }
 0x1b6   :  { %v5281_v18 = vld [vmem:[%s6912_s1 + $0x168] ss:$52 sps:$4 sm:$0xff]  }
 0x1b7   :  { %4496 = vmatpush3.bf16.msra.mxu0 %v5273_v41  ;;  %4518 = vmatpush3.bf16.msra.mxu1 %v5275_v42 }
 0x1b8   :  { %4497 = vmatprep.subr.bf16.mxu0 %v5276_v44  ;;  %4519 = vmatprep.subr.bf16.mxu1 %v5278_v46 }
 0x1bb   :  { %4498 = vmatpush3.bf16.msra.mxu0 %v5277_v47  ;;  %4520 = vmatpush3.bf16.msra.mxu1 %v5279_v48 }
 0x1bc   :  { %4499 = vmatprep.subr.bf16.mxu0 %v5280_v49  ;;  %4521 = vmatprep.subr.bf16.mxu1 %v5282_v61  ;;  %v3945_v49 = vrot.slane %v3937_v60, %v5517_v50 }
 0x1bf   :  { %4500 = vmatpush3.bf16.msra.mxu0 %v5281_v18  ;;  %4522 = vmatpush3.bf16.msra.mxu1 %v5283_v51 }
 0x1c0   :  { %4501 = vmatprep.subr.bf16.mxu0 %v5284_v52  ;;  %4523 = vmatprep.subr.bf16.mxu1 %v5286_v56 }
 0x1c3   :  { %4502 = vmatpush3.bf16.msra.mxu0 %v5285_v57  ;;  %4524 = vmatpush3.bf16.msra.mxu1 %v5287_v58 }
 0x1c4   :  { %4503 = vmatprep.subr.bf16.mxu0 %v5288_v59  ;;  %4525 = vmatprep.subr.bf16.mxu1 %v5290_v62 }
 0x1c7   :  { %4504 = vmatpush3.bf16.msra.mxu0 %v5289_v63  ;;  %4526 = vmatpush3.bf16.msra.mxu1 %v5291_v0 }
 0x1c8   :  { %4505 = vmatprep.subr.bf16.mxu0 %v5292_v1  ;;  %4527 = vmatprep.subr.bf16.mxu1 %v5294_v2 }
 0x1cb   :  { %4506 = vmatpush3.bf16.msra.mxu0 %v5293_v3  ;;  %4528 = vmatpush3.bf16.msra.mxu1 %v5295_v4 }
 0x1cc   :  { %4507 = vmatprep.subr.bf16.mxu0 %v5296_v5  ;;  %4529 = vmatprep.subr.bf16.mxu1 %v5298_v6 }
 0x1cf   :  { %4508 = vmatpush3.bf16.msra.mxu0 %v5297_v7  ;;  %4530 = vmatpush3.bf16.msra.mxu1 %v5299_v8 }
 0x1d0   :  { %4542 = vmatprep.subr.bf16.mxu0 %v5358_v10 }
 0x1d2   :  { %3727 = vmatmul.mubr.bf16.vlgmr.msra.gmra.mrb[12].mxu0 %v5601_v14  ;;  %3767 = vmatmul.mubr.bf16.vlgmr.msra.gmra.mrb[12].mxu1 %v5808_v26  ;;  %v5303_v14 = vld [vmem:[%s6912_s1 + $0xe68] ss:$52 sps:$4 sm:$0xff]  }
 0x1d3   :  { %4543 = vmatpush3.bf16.msra.mxu0 %v5300_v9  ;;  %4550 = vmatprep.mubr.msk.bf16.mxu0 %vm5359_vm1, %v5358_v10 }
 0x1d4   :  { %4544 = vmatprep.subr.bf16.mxu0 %v5358_v10 }
 0x1d7   :  { %4545 = vmatpush3.bf16.msra.mxu0 %v5301_v11 }
 0x1d8   :  { %4546 = vmatprep.subr.bf16.mxu0 %v5358_v10 }
 0x1db   :  { %4547 = vmatpush3.bf16.msra.mxu0 %v5302_v12 }
 0x1dc   :  { %4548 = vmatprep.subr.bf16.mxu0 %v5358_v10 }
 0x1df   :  { %4549 = vmatpush3.bf16.msra.mxu0 %v5303_v14 }
 0x1e2   :  { %4551 = vmatmul.mubr.msk.bf16.vlgmr.msra.gmra.mrb[16].mxu0 %vm2952_vm0, %v5863_v45 }
 0x1f5   :  { %v3318_v26 = vpop.f32.mrb[4].mxu0  ;;  %v3441_v13 = vpop.f32.mrb[4].mxu1 }
 0x1f6   :  { %v4558_v15 = vadd.f32 %v3318_v26, %v6522_v39  ;;  %v4560_v16 = vadd.f32 %v3441_v13, %v6522_v39  ;;  %v3320_v17 = vpop.f32.mrb[5].mxu0  ;;  %v3443_v19 = vpop.f32.mrb[5].mxu1 }
 0x1f7   :  { %v4559_v20 = vadd.f32 %v3320_v17, %v6522_v39  ;;  %v4561_v21 = vadd.f32 %v3443_v19, %v6522_v39  ;;  %v3322_v23 = vpop.f32.mrb[6].mxu0  ;;  %v3445_v24 = vpop.f32.mrb[6].mxu1 }
 0x1f8   :  { %v4484_v25 = vmul.f32 -1.442695, %v4558_v15  ;;  %v4486_v27 = vmul.f32 -1.442695, %v4560_v16  ;;  %v3323_v28 = vpop.f32.mrb[7].mxu0  ;;  %v3446_v29 = vpop.f32.mrb[7].mxu1 }
 0x1f9   :  { %v4485_v30 = vmul.f32 -1.442695, %v4559_v20  ;;  %v4487_v45 = vmul.f32 -1.442695, %v4561_v21 }
 0x1fa   :  { %5320 = vpow2.f32 %v4484_v25 }
 0x1fb   :  { %5322 = vpow2.f32 %v4486_v27 }
 0x1fc   :  { %5324 = vpow2.f32 %v4485_v30 }
 0x1fd   :  { %5326 = vpow2.f32 %v4487_v45 }
 0x204   :  { %v5321_v31 = vpop.eup %5320 }
 0x205   :  { %v5323_v32 = vpop.eup %5322  ;;  %v3857_v22 = vadd.f32 1.0, %v5321_v31 }
 0x206   :  { %v5325_v33 = vpop.eup %5324  ;;  %v3859_v34 = vadd.f32 1.0, %v5323_v32 }
 0x207   :  { %v5327_v35 = vpop.eup %5326  ;;  %5328 = vrcp.f32 %v3857_v22  ;;  %v3858_v36 = vadd.f32 1.0, %v5325_v33 }
 0x208   :  { %5330 = vrcp.f32 %v3859_v34  ;;  %v3860_v38 = vadd.f32 1.0, %v5327_v35 }
 0x209   :  { %5332 = vrcp.f32 %v3858_v36 }
 0x20a   :  { %5334 = vrcp.f32 %v3860_v38 }
 0x211   :  { %v5329_v43 = vpop.eup %5328 }
 0x212   :  { %v5331_v53 = vpop.eup %5330 }
 0x213   :  { %v5333_v40 = vpop.eup %5332 }
 0x214   :  { %v5335_v41 = vpop.eup %5334  ;;  %v3907_v42 = vcombine.low %v5329_v43, %v5333_v40 }
 0x215   :  { %v3908_v44 = vcombine.low %v5331_v53, %v5335_v41 }
 0x216   :  { %v3929_v46 = vrot.slane %v3907_v42, %v5517_v50 }
 0x217   :  { %v3936_v47 = vrot.slane %v3908_v44, %v5517_v50 }
 0x219   :  { %v3938_v48 = vcombine.low %v3929_v46, %v3936_v47 }
 0x21b   :  { %v3952_v61 = vrot.slane %v3938_v48, %v5517_v50 }
 0x21d   :  { %v3953_v18 = vcombine.low %v3945_v49, %v3952_v61 }
 0x21f   :  { %3995 = vst [vmem:[%s6915_s3] sm:$0xff] %v3953_v18 }
 0x285   :  { %v3564_v51 = vpop.f32.mrb[8].mxu0  ;;  %v3687_v52 = vpop.f32.mrb[8].mxu1 }
 0x286   :  { %v4562_v56 = vadd.f32 %v3564_v51, %v6522_v39  ;;  %v4564_v57 = vadd.f32 %v3687_v52, %v6522_v39  ;;  %v3566_v58 = vpop.f32.mrb[9].mxu0  ;;  %v3689_v59 = vpop.f32.mrb[9].mxu1 }
 0x287   :  { %v4563_v62 = vadd.f32 %v3566_v58, %v6522_v39  ;;  %v4565_v54 = vadd.f32 %v3689_v59, %v6522_v39  ;;  %v3568_v55 = vpop.f32.mrb[10].mxu0  ;;  %v3691_v60 = vpop.f32.mrb[10].mxu1 }
 0x288   :  { %v4488_v63 = vmul.f32 -1.442695, %v4562_v56  ;;  %v4490_v0 = vmul.f32 -1.442695, %v4564_v57  ;;  %v3569_v1 = vpop.f32.mrb[11].mxu0  ;;  %v3692_v2 = vpop.f32.mrb[11].mxu1 }
 0x289   :  { %v4489_v3 = vmul.f32 -1.442695, %v4563_v62  ;;  %v4491_v4 = vmul.f32 -1.442695, %v4565_v54 }
 0x28a   :  { %5336 = vpow2.f32 %v4488_v63 }
 0x28b   :  { %5338 = vpow2.f32 %v4490_v0 }
 0x28c   :  { %5340 = vpow2.f32 %v4489_v3 }
 0x28d   :  { %5342 = vpow2.f32 %v4491_v4 }
 0x294   :  { %v5337_v5 = vpop.eup %5336 }
 0x295   :  { %v5339_v6 = vpop.eup %5338  ;;  %v3861_v7 = vadd.f32 1.0, %v5337_v5 }
 0x296   :  { %v5341_v8 = vpop.eup %5340  ;;  %v3863_v9 = vadd.f32 1.0, %v5339_v6 }
 0x297   :  { %v5343_v10 = vpop.eup %5342  ;;  %5344 = vrcp.f32 %v3861_v7  ;;  %v3862_v11 = vadd.f32 1.0, %v5341_v8 }
 0x298   :  { %5346 = vrcp.f32 %v3863_v9  ;;  %v3864_v12 = vadd.f32 1.0, %v5343_v10 }
 0x299   :  { %5348 = vrcp.f32 %v3862_v11 }
 0x29a   :  { %5350 = vrcp.f32 %v3864_v12 }
 0x2a1   :  { %v5345_v14 = vpop.eup %5344 }
 0x2a2   :  { %v5347_v26 = vpop.eup %5346 }
 0x2a3   :  { %v5349_v13 = vpop.eup %5348 }
 0x2a4   :  { %v5351_v15 = vpop.eup %5350  ;;  %v3954_v16 = vcombine.low %v5345_v14, %v5349_v13 }
 0x2a5   :  { %v3955_v17 = vcombine.low %v5347_v26, %v5351_v15  ;;  %v4509_v19 = vpop.f32.mrb[12].mxu0  ;;  %v4531_v20 = vpop.f32.mrb[12].mxu1 }
 0x2a6   :  { %v3962_v21 = vrot.slane %v3954_v16, %v5517_v50  ;;  %v4510_v23 = vpop.f32.mrb[13].mxu0  ;;  %v4532_v24 = vpop.f32.mrb[13].mxu1 }
 0x2a7   :  { %v3969_v25 = vrot.slane %v3955_v17, %v5517_v50  ;;  %v4511_v27 = vadd.f32 %v4510_v23, %v4509_v19  ;;  %v4512_v28 = vpop.f32.mrb[14].mxu0  ;;  %v4533_v29 = vadd.f32 %v4532_v24, %v4531_v20  ;;  %v4534_v30 = vpop.f32.mrb[14].mxu1 }
 0x2a8   :  { %v4513_v45 = vpop.f32.mrb[15].mxu0  ;;  %v4535_v31 = vpop.f32.mrb[15].mxu1 }
 0x2a9   :  { %v3977_v32 = vcombine.low %v3962_v21, %v3969_v25  ;;  %v3729_v22 = vadd.f32 %v4511_v27, %v6522_v39 }
 0x2ab   :  { %v3769_v33 = vadd.f32 %v4533_v29, %v3729_v22  ;;  %v3984_v46 = vrot.slane %v3977_v32, %v5517_v50 }
 0x2b5   :  { %v3808_v34 = vpop.f32.mrb[16].mxu0 }
 0x2b6   :  { %v3809_v35 = vadd.f32 %v3808_v34, %v3769_v33  ;;  %v4552_v36 = vpop.f32.mrb[17].mxu0 }
 0x2b7   :  { %v3811_v38 = vpop.f32.mrb[18].mxu0 }
 0x2b8   :  { %v4492_v43 = vmul.f32 -1.442695, %v3809_v35  ;;  %v4553_v53 = vpop.f32.mrb[19].mxu0 }
 0x2ba   :  { %5352 = vpow2.f32 %v4492_v43 }
 0x2c4   :  { %v5353_v40 = vpop.eup %5352 }
 0x2c5   :  { %v3865_v41 = vadd.f32 1.0, %v5353_v40 }
 0x2c7   :  { %5354 = vrcp.f32 %v3865_v41 }
 0x2d1   :  { %v5355_v42 = vpop.eup %5354 }
 0x2d2   :  { %v3976_v44 = vrot.slane %v5355_v42, %v5517_v50 }
 0x2d4   :  { %v3991_v47 = vrot.slane %v3976_v44, %v5517_v50 }
 0x2d6   :  { %v3992_v39 = vcombine.low %v3984_v46, %v3991_v47 }
 0x2d8   :  { %4000 = vst.msk [vmem:[%s6915_s3 + $0x8] sm:$0x1f] %vm3998_vm2, %v3992_v39 }

</bundles_post_ra>
